<compile_context>
chip_gen: v7x
topology: tpu7x:2x2x1
jax: 0.10.0
libtpu: 0.0.40
codegen_flags: <defaults>
</compile_context>

<pallas_src>
import math

import numpy as np
import jax
import jax.numpy as jnp
from jax.experimental import pallas as pl
from jax.experimental.pallas import tpu as pltpu  # noqa: F401  (TPU backend)

# ----------------------------------------------------------------------------
# Hyperparameters (small, consistent with the PyTorch module's forward pass).
# ----------------------------------------------------------------------------
EMBED_DIM = 64
N_HEADS = 8
HEAD_DIM = EMBED_DIM // N_HEADS
EXPANSION = 4
NUM_LAYERS = 2
INPUT_SIZE = 10            # encoder sequence length
DECODER_INPUT_SIZE = 9     # decoder sequence length
SEQ_LENGTH = 10            # max positional-embedding length
BATCH = 2
LN_EPS = 1e-5
NEG_INF = -1e30

R_ENC = BATCH * INPUT_SIZE            # 20 encoder rows (B*S)
R_DEC = BATCH * DECODER_INPUT_SIZE    # 18 decoder rows
HQ_ENC = N_HEADS * R_ENC              # 160 head-tiled encoder query rows
HQ_DEC = N_HEADS * R_DEC              # 144 head-tiled decoder query rows

# ---- HM slab (width 64): head lane masks + output-head params ----
HM_HENC = 0
HM_HDEC = HM_HENC + HQ_ENC            # 160
HM_FC1W = HM_HDEC + HQ_DEC            # 304
HM_FC1B = HM_FC1W + 1                 # 305
HM_FC2B = HM_FC1B + 1                 # 306
HM_ROWS = HM_FC2B + 1                 # 307

# ---- AC slab (width 160): head-sum matrices, batch masks, fc2 selector ----
AC_WIDTH = HQ_ENC                     # 160
AC_SUM_ENC = 0                        # (20, 160)
AC_SUM_DEC = AC_SUM_ENC + R_ENC       # (18, 144)
AC_BM_ENC = AC_SUM_DEC + R_DEC        # (160, 20)
AC_BM_DEC = AC_BM_ENC + HQ_ENC        # (144, 18)
AC_BM_X = AC_BM_DEC + HQ_DEC          # (144, 20)
AC_W2 = AC_BM_X + HQ_DEC              # (2, 18)
AC_ROWS = AC_W2 + BATCH               # 488


# ----------------------------------------------------------------------------
# The single fused Pallas kernel.
# ----------------------------------------------------------------------------
def fused_transformer_kernel(enc_ref, dec_ref, wsq_ref, fw1_ref, fw2_ref,
                             b64_ref, b256_ref, hm_ref, ac_ref, out_ref):

    def layernorm(x, g, b):
        mu = jnp.mean(x, axis=-1, keepdims=True)
        var = jnp.mean((x - mu) ** 2, axis=-1, keepdims=True)
        return (x - mu) * jax.lax.rsqrt(var + LN_EPS) * g + b

    def mha(query, key, value, wbase, bo, hmask_v, bmask_v, summat_v):
        """All-head attention with heads tiled along the query-row axis.

        The reference applies the SAME (Dh, Dh) Linear to every head, so the
        Q/K/V projections are single block-diagonal (E, E) matmuls
        (1/sqrt(Dh) is folded into Wq on the host).  `hmask` keeps only the
        lanes of the row's own head, `bmask` isolates batches (the reference
        forward never passes an attention mask), `summat` collapses the H
        head-row blocks back into the (Rq, E) concatenated head output.
        """
        wq = wsq_ref[wbase + 0]
        wk = wsq_ref[wbase + 1]
        wv = wsq_ref[wbase + 2]
        wo = wsq_ref[wbase + 3]
        hmask = hmask_v[...]                       # (H*Rq, E)
        bmask = bmask_v[...]                       # (H*Rq, Rk)
        summat = summat_v[...]                     # (Rq, H*Rq)

        q = jnp.dot(query, wq, preferred_element_type=jnp.float32)   # (Rq, E)
        k = jnp.dot(key, wk, preferred_element_type=jnp.float32)     # (Rk, E)
        v = jnp.dot(value, wv, preferred_element_type=jnp.float32)   # (Rk, E)

        # Head-tiled queries: row h*Rq+i holds q[i] restricted to head h lanes.
        qh = jnp.concatenate([q] * N_HEADS, axis=0) * hmask          # (H*Rq, E)
        logits = jax.lax.dot_general(
            qh, k, (((1,), (1,)), ((), ())),
            preferred_element_type=jnp.float32) + bmask               # (H*Rq, Rk)

        m = jnp.max(logits, axis=-1, keepdims=True)
        p = jnp.exp(logits - m)
        p = p * pl.reciprocal(jnp.sum(p, axis=-1, keepdims=True), approx=True)

        # Per-head context; lanes outside the row's head are garbage -> mask.
        ctx = jnp.dot(p, v, preferred_element_type=jnp.float32) * hmask   # (H*Rq, E)
        # Collapse head-row blocks -> concatenated heads (Rq, E).
        cat = jnp.dot(summat, ctx, preferred_element_type=jnp.float32)
        return jnp.dot(cat, wo, preferred_element_type=jnp.float32) + bo

    def transformer_block(key, query, value, wbase, brow, frow,
                          hmask_v, bmask_v, summat_v):
        bo = b64_ref[brow + 0:brow + 1, :]
        g1 = b64_ref[brow + 1:brow + 2, :]
        b1 = b64_ref[brow + 2:brow + 3, :]
        fb2 = b64_ref[brow + 3:brow + 4, :]
        g2 = b64_ref[brow + 4:brow + 5, :]
        b2 = b64_ref[brow + 5:brow + 6, :]
        fw1 = fw1_ref[frow]
        fw2 = fw2_ref[frow]
        fb1 = b256_ref[frow:frow + 1, :]

        attn = mha(query, key, value, wbase, bo, hmask_v, bmask_v, summat_v)
        # Faithful to the reference: norm1 is applied to the raw attention
        # output (the `attention_out + query` residual is computed but never
        # used); dropout layers are identity at inference.
        n1 = layernorm(attn, g1, b1)
        h = jnp.maximum(
            jnp.dot(n1, fw1, preferred_element_type=jnp.float32) + fb1, 0.0)
        ff = jnp.dot(h, fw2, preferred_element_type=jnp.float32) + fb2
        return layernorm(ff + n1, g2, b2)

    # Constant views (static slices of the packed slabs -> zero runtime cost;
    # the data is loaded next to its use inside each attention block).
    hmask_e = hm_ref.at[HM_HENC:HM_HENC + HQ_ENC, :]
    hmask_d = hm_ref.at[HM_HDEC:HM_HDEC + HQ_DEC, :]
    sum_e = ac_ref.at[AC_SUM_ENC:AC_SUM_ENC + R_ENC, 0:HQ_ENC]
    sum_d = ac_ref.at[AC_SUM_DEC:AC_SUM_DEC + R_DEC, 0:HQ_DEC]
    bm_e = ac_ref.at[AC_BM_ENC:AC_BM_ENC + HQ_ENC, 0:R_ENC]
    bm_d = ac_ref.at[AC_BM_DEC:AC_BM_DEC + HQ_DEC, 0:R_DEC]
    bm_x = ac_ref.at[AC_BM_X:AC_BM_X + HQ_DEC, 0:R_ENC]

    # ---- Encoder: 2 transformer blocks ----
    x = enc_ref[...]                               # (R_ENC, E)
    for l in range(NUM_LAYERS):
        x = transformer_block(x, x, x,
                              4 * l, 6 * l, l,
                              hmask_e, bm_e, sum_e)

    # ---- Decoder: 2 x (self-attn + cross transformer block) ----
    y = dec_ref[...]                               # (R_DEC, E)
    for l in range(NUM_LAYERS):
        sa_wbase = 4 * NUM_LAYERS + 4 * l
        sa_brow = 6 * NUM_LAYERS + 3 * l
        bo = b64_ref[sa_brow + 0:sa_brow + 1, :]
        g = b64_ref[sa_brow + 1:sa_brow + 2, :]
        b = b64_ref[sa_brow + 2:sa_brow + 3, :]
        sa = mha(y, y, y, sa_wbase, bo, hmask_d, bm_d, sum_d)  # reference: mask=None
        y = layernorm(sa + y, g, b)                            # residual + norm

        tb_wbase = 8 * NUM_LAYERS + 4 * l
        tb_brow = 9 * NUM_LAYERS + 6 * l
        tb_frow = NUM_LAYERS + l
        y = transformer_block(x, y, x,
                              tb_wbase, tb_brow, tb_frow,
                              hmask_d, bm_x, sum_d)

    # ---- Output head: Linear(E,1) -> squeeze -> Linear(Sd,1) per batch ----
    # fc1 becomes a VPU multiply + row reduction; fc2 is the tiny
    # batch-segmented reduction matmul (block-diagonal selector).
    fc1_w = hm_ref[HM_FC1W:HM_FC1W + 1, :]          # (1, E)
    fc1_b = hm_ref[HM_FC1B:HM_FC1B + 1, 0:1]        # (1, 1)
    fc2_b = hm_ref[HM_FC2B:HM_FC2B + 1, 0:1]        # (1, 1)
    w2sel = ac_ref[AC_W2:AC_W2 + BATCH, 0:R_DEC]    # (B, B*Sd)
    t = jnp.sum(y * fc1_w, axis=-1, keepdims=True) + fc1_b          # (R_DEC, 1)
    out_ref[...] = (jnp.dot(w2sel, t, preferred_element_type=jnp.float32)
                    + fc2_b)                                         # (B, 1)


# ----------------------------------------------------------------------------
# Host-side, one-time packing of parameters and constants into a few slabs.
# ----------------------------------------------------------------------------
def _block_diag_heads(w):
    # Same (Dh, Dh) weight applied to every head slice -> kron(I_H, w).
    return np.kron(np.eye(N_HEADS, dtype=np.float32), np.asarray(w, np.float32))


def _head_lane_mask(rq):
    m = np.zeros((N_HEADS * rq, EMBED_DIM), np.float32)
    for h in range(N_HEADS):
        m[h * rq:(h + 1) * rq, h * HEAD_DIM:(h + 1) * HEAD_DIM] = 1.0
    return m


def _summation_matrix(rq):
    m = np.zeros((rq, N_HEADS * rq), np.float32)
    eye = np.eye(rq, dtype=np.float32)
    for h in range(N_HEADS):
        m[:, h * rq:(h + 1) * rq] = eye
    return m


def _batch_block_mask(sq, sk):
    """Additive mask isolating batches inside head-tiled (H*B*sq, B*sk) logits."""
    rq, rk = BATCH * sq, BATCH * sk
    m = np.full((N_HEADS * rq, rk), NEG_INF, np.float32)
    for h in range(N_HEADS):
        for b in range(BATCH):
            m[h * rq + b * sq:h * rq + (b + 1) * sq, b * sk:(b + 1) * sk] = 0.0
    return m


def pack_params(params):
    """Runs ONCE (outside the jitted per-call path)."""
    scale = 1.0 / math.sqrt(HEAD_DIM)

    def mha_sq(p):
        return [_block_diag_heads(p['wq']) * scale,     # fold 1/sqrt(Dh) into Wq
                _block_diag_heads(p['wk']),
                _block_diag_heads(p['wv']),
                np.asarray(p['wo'], np.float32)]

    wsq, b64, b256, fw1, fw2 = [], [], [], [], []

    # Square (E,E) weights: encoder blocks, decoder self-attn, decoder t-blocks.
    for lp in params['encoder']:
        wsq.extend(mha_sq(lp))
    for lp in params['decoder']:
        wsq.extend(mha_sq(lp['self_attn']))
    for lp in params['decoder']:
        wsq.extend(mha_sq(lp['tblock']))

    # 64-wide biases/gains in the exact order the kernel indexes them.
    def tb_biases(p):
        return [p['bo'], p['g1'], p['b1'], p['fb2'], p['g2'], p['b2']]

    for lp in params['encoder']:
        b64.extend(tb_biases(lp))
    for lp in params['decoder']:
        b64.extend([lp['self_attn']['bo'], lp['g'], lp['b']])
    for lp in params['decoder']:
        b64.extend(tb_biases(lp['tblock']))

    # FFN weights / 256-wide biases: encoder blocks then decoder t-blocks.
    for lp in params['encoder']:
        fw1.append(lp['fw1']); fw2.append(lp['fw2']); b256.append(lp['fb1'])
    for lp in params['decoder']:
        tb = lp['tblock']
        fw1.append(tb['fw1']); fw2.append(tb['fw2']); b256.append(tb['fb1'])

    wsq = np.stack(wsq, axis=0)                                        # (24, 64, 64)
    fw1 = np.stack([np.asarray(w, np.float32) for w in fw1], axis=0)   # (4, 64, 256)
    fw2 = np.stack([np.asarray(w, np.float32) for w in fw2], axis=0)   # (4, 256, 64)
    b64 = np.concatenate(
        [np.asarray(b, np.float32).reshape(1, EMBED_DIM) for b in b64], axis=0)   # (30, 64)
    b256 = np.concatenate(
        [np.asarray(b, np.float32).reshape(1, EXPANSION * EMBED_DIM) for b in b256],
        axis=0)                                                        # (4, 256)

    # HM slab: head lane masks + output-head params.
    hm = np.zeros((HM_ROWS, EMBED_DIM), np.float32)
    hm[HM_HENC:HM_HENC + HQ_ENC] = _head_lane_mask(R_ENC)
    hm[HM_HDEC:HM_HDEC + HQ_DEC] = _head_lane_mask(R_DEC)
    hm[HM_FC1W] = np.asarray(params['fc1_w'], np.float32).reshape(-1)
    hm[HM_FC1B, 0] = float(np.asarray(params['fc1_b']).reshape(()))
    hm[HM_FC2B, 0] = float(np.asarray(params['fc2_b']).reshape(()))

    # AC slab: head-sum matrices, batch-block masks, fc2 selector.
    ac = np.zeros((AC_ROWS, AC_WIDTH), np.float32)
    ac[AC_SUM_ENC:AC_SUM_ENC + R_ENC, :HQ_ENC] = _summation_matrix(R_ENC)
    ac[AC_SUM_DEC:AC_SUM_DEC + R_DEC, :HQ_DEC] = _summation_matrix(R_DEC)
    ac[AC_BM_ENC:AC_BM_ENC + HQ_ENC, :R_ENC] = _batch_block_mask(INPUT_SIZE, INPUT_SIZE)
    ac[AC_BM_DEC:AC_BM_DEC + HQ_DEC, :R_DEC] = _batch_block_mask(
        DECODER_INPUT_SIZE, DECODER_INPUT_SIZE)
    ac[AC_BM_X:AC_BM_X + HQ_DEC, :R_ENC] = _batch_block_mask(
        DECODER_INPUT_SIZE, INPUT_SIZE)
    fc2_w = np.asarray(params['fc2_w'], np.float32).reshape(1, -1)     # (1, Sd)
    ac[AC_W2:AC_W2 + BATCH, :R_DEC] = np.kron(np.eye(BATCH, dtype=np.float32), fc2_w)

    return tuple(jnp.asarray(a) for a in (wsq, fw1, fw2, b64, b256, hm, ac))


# ----------------------------------------------------------------------------
# Parameters / embeddings (deterministic, in-script).
# ----------------------------------------------------------------------------
def init_params(rng):
    keys = iter(jax.random.split(rng, 256))

    def normal(shape, scale=0.05):
        return jax.random.normal(next(keys), shape, jnp.float32) * scale

    def mha():
        return dict(wq=normal((HEAD_DIM, HEAD_DIM)),
                    wk=normal((HEAD_DIM, HEAD_DIM)),
                    wv=normal((HEAD_DIM, HEAD_DIM)),
                    wo=normal((EMBED_DIM, EMBED_DIM)),
                    bo=normal((1, EMBED_DIM)))

    def tblock():
        p = mha()
        p.update(g1=jnp.ones((1, EMBED_DIM), jnp.float32),
                 b1=jnp.zeros((1, EMBED_DIM), jnp.float32),
                 fw1=normal((EMBED_DIM, EXPANSION * EMBED_DIM)),
                 fb1=normal((1, EXPANSION * EMBED_DIM)),
                 fw2=normal((EXPANSION * EMBED_DIM, EMBED_DIM)),
                 fb2=normal((1, EMBED_DIM)),
                 g2=jnp.ones((1, EMBED_DIM), jnp.float32),
                 b2=jnp.zeros((1, EMBED_DIM), jnp.float32))
        return p

    def dblock():
        return dict(self_attn=mha(),
                    g=jnp.ones((1, EMBED_DIM), jnp.float32),
                    b=jnp.zeros((1, EMBED_DIM), jnp.float32),
                    tblock=tblock())

    return dict(encoder=[tblock() for _ in range(NUM_LAYERS)],
                decoder=[dblock() for _ in range(NUM_LAYERS)],
                fc1_w=normal((EMBED_DIM, 1)),
                fc1_b=normal((1, 1)),
                fc2_w=normal((DECODER_INPUT_SIZE, 1)),
                fc2_b=normal((1, 1)))


def make_positional_embedding(max_seq_len, embed_dim):
    pe = np.zeros((max_seq_len, embed_dim), np.float32)
    for pos in range(max_seq_len):
        for i in range(0, embed_dim, 2):
            pe[pos, i] = math.sin(pos / 10000 ** (2 * i / embed_dim))
            pe[pos, i + 1] = math.cos(pos / 10000 ** (2 * (i + 1) / embed_dim))
    return jnp.asarray(pe)


# ----------------------------------------------------------------------------
# Full forward pass (matches Transformer.forward; dropout layers are identity
# at inference; trg_mask is computed in the reference but never reaches any
# attention call, so it is omitted).
# ----------------------------------------------------------------------------
@jax.jit
def transformer_forward(src, trg, packed, pe, enc_noise, dec_noise):
    wsq, fw1, fw2, b64, b256, hm, ac = packed
    # Embedding (reference scales a random tensor per position; the random
    # draw is supplied externally to keep it deterministic) + positional
    # embedding.  Tiny element-wise ops; all heavy work is in the fused kernel.
    enc_in = (enc_noise * src[:, :, None]) * math.sqrt(EMBED_DIM) \
        + pe[None, :src.shape[1], :]
    dec_in = (dec_noise * trg[:, :, None]) * math.sqrt(EMBED_DIM) \
        + pe[None, :trg.shape[1], :]
    enc_in2d = enc_in.reshape(-1, EMBED_DIM)      # (B*S_enc, E)
    dec_in2d = dec_in.reshape(-1, EMBED_DIM)      # (B*S_dec, E)

    # Single fused, grid-less pallas_call: every operand is a full VMEM block
    # (total footprint ~2 MB, far under the scoped VMEM limit everywhere).
    out = pl.pallas_call(
        fused_transformer_kernel,
        out_shape=jax.ShapeDtypeStruct((BATCH, 1), jnp.float32),
    )(enc_in2d, dec_in2d, wsq, fw1, fw2, b64, b256, hm, ac)
    return jnp.squeeze(out, axis=-1)              # (B,)


if __name__ == "__main__":
    rng = jax.random.PRNGKey(0)
    k_params, k_src, k_trg, k_enoise, k_dnoise = jax.random.split(rng, 5)

    params = init_params(k_params)
    packed = pack_params(params)          # one-time host-side packing
    pe = make_positional_embedding(SEQ_LENGTH, EMBED_DIM)

    src = jax.random.normal(k_src, (BATCH, INPUT_SIZE), jnp.float32)
    trg = jax.random.normal(k_trg, (BATCH, DECODER_INPUT_SIZE), jnp.float32)
    enc_noise = jax.random.normal(k_enoise, (BATCH, INPUT_SIZE, EMBED_DIM), jnp.float32)
    dec_noise = jax.random.normal(k_dnoise, (BATCH, DECODER_INPUT_SIZE, EMBED_DIM), jnp.float32)

    out = transformer_forward(src, trg, packed, pe, enc_noise, dec_noise)
    out = jax.block_until_ready(out)
    assert out.shape == (BATCH,), out.shape
    assert bool(jnp.all(jnp.isfinite(out)))
    print("KERNEL_OK")
</pallas_src>

<mosaic_0001>
module attributes {stable_mosaic.version = 11 : i64} {
  func.func @fused_transformer_kernel(%arg0: memref<20x64xf32, #tpu.memory_space<vmem>>, %arg1: memref<18x64xf32, #tpu.memory_space<vmem>>, %arg2: memref<24x64x64xf32, #tpu.memory_space<vmem>>, %arg3: memref<4x64x256xf32, #tpu.memory_space<vmem>>, %arg4: memref<4x256x64xf32, #tpu.memory_space<vmem>>, %arg5: memref<30x64xf32, #tpu.memory_space<vmem>>, %arg6: memref<4x256xf32, #tpu.memory_space<vmem>>, %arg7: memref<307x64xf32, #tpu.memory_space<vmem>>, %arg8: memref<488x160xf32, #tpu.memory_space<vmem>>, %arg9: memref<2x1xf32, #tpu.memory_space<vmem>>) attributes {dimension_semantics = [], scalar_prefetch = 0 : i64, scratch_operands = 0 : i64, tpu.core_type = #tpu.core_type<tc>} {
    %c0 = arith.constant 0 : index
    %c0_0 = arith.constant 0 : index
    %0 = vector.load %arg0[%c0, %c0_0] : memref<20x64xf32, #tpu.memory_space<vmem>>, vector<20x64xf32>
    %c0_1 = arith.constant 0 : index
    %c0_2 = arith.constant 0 : index
    %1 = vector.load %arg5[%c0_1, %c0_2] : memref<30x64xf32, #tpu.memory_space<vmem>>, vector<1x64xf32>
    %c1 = arith.constant 1 : index
    %c0_3 = arith.constant 0 : index
    %2 = vector.load %arg5[%c1, %c0_3] : memref<30x64xf32, #tpu.memory_space<vmem>>, vector<1x64xf32>
    %c2 = arith.constant 2 : index
    %c0_4 = arith.constant 0 : index
    %3 = vector.load %arg5[%c2, %c0_4] : memref<30x64xf32, #tpu.memory_space<vmem>>, vector<1x64xf32>
    %c3 = arith.constant 3 : index
    %c0_5 = arith.constant 0 : index
    %4 = vector.load %arg5[%c3, %c0_5] : memref<30x64xf32, #tpu.memory_space<vmem>>, vector<1x64xf32>
    %c4 = arith.constant 4 : index
    %c0_6 = arith.constant 0 : index
    %5 = vector.load %arg5[%c4, %c0_6] : memref<30x64xf32, #tpu.memory_space<vmem>>, vector<1x64xf32>
    %c5 = arith.constant 5 : index
    %c0_7 = arith.constant 0 : index
    %6 = vector.load %arg5[%c5, %c0_7] : memref<30x64xf32, #tpu.memory_space<vmem>>, vector<1x64xf32>
    %c0_8 = arith.constant 0 : index
    %c0_9 = arith.constant 0 : index
    %c0_10 = arith.constant 0 : index
    %7 = vector.load %arg3[%c0_8, %c0_9, %c0_10] : memref<4x64x256xf32, #tpu.memory_space<vmem>>, vector<1x64x256xf32>
    %8 = vector.shape_cast %7 : vector<1x64x256xf32> to vector<64x256xf32>
    %c0_11 = arith.constant 0 : index
    %c0_12 = arith.constant 0 : index
    %c0_13 = arith.constant 0 : index
    %9 = vector.load %arg4[%c0_11, %c0_12, %c0_13] : memref<4x256x64xf32, #tpu.memory_space<vmem>>, vector<1x256x64xf32>
    %10 = vector.shape_cast %9 : vector<1x256x64xf32> to vector<256x64xf32>
    %c0_14 = arith.constant 0 : index
    %c0_15 = arith.constant 0 : index
    %11 = vector.load %arg6[%c0_14, %c0_15] : memref<4x256xf32, #tpu.memory_space<vmem>>, vector<1x256xf32>
    %c0_16 = arith.constant 0 : index
    %c0_17 = arith.constant 0 : index
    %c0_18 = arith.constant 0 : index
    %12 = vector.load %arg2[%c0_16, %c0_17, %c0_18] : memref<24x64x64xf32, #tpu.memory_space<vmem>>, vector<1x64x64xf32>
    %13 = vector.shape_cast %12 : vector<1x64x64xf32> to vector<64x64xf32>
    %c1_19 = arith.constant 1 : index
    %c0_20 = arith.constant 0 : index
    %c0_21 = arith.constant 0 : index
    %14 = vector.load %arg2[%c1_19, %c0_20, %c0_21] : memref<24x64x64xf32, #tpu.memory_space<vmem>>, vector<1x64x64xf32>
    %15 = vector.shape_cast %14 : vector<1x64x64xf32> to vector<64x64xf32>
    %c2_22 = arith.constant 2 : index
    %c0_23 = arith.constant 0 : index
    %c0_24 = arith.constant 0 : index
    %16 = vector.load %arg2[%c2_22, %c0_23, %c0_24] : memref<24x64x64xf32, #tpu.memory_space<vmem>>, vector<1x64x64xf32>
    %17 = vector.shape_cast %16 : vector<1x64x64xf32> to vector<64x64xf32>
    %c3_25 = arith.constant 3 : index
    %c0_26 = arith.constant 0 : index
    %c0_27 = arith.constant 0 : index
    %18 = vector.load %arg2[%c3_25, %c0_26, %c0_27] : memref<24x64x64xf32, #tpu.memory_space<vmem>>, vector<1x64x64xf32>
    %19 = vector.shape_cast %18 : vector<1x64x64xf32> to vector<64x64xf32>
    %c0_28 = arith.constant 0 : index
    %c0_29 = arith.constant 0 : index
    %20 = vector.load %arg7[%c0_28, %c0_29] : memref<307x64xf32, #tpu.memory_space<vmem>>, vector<160x64xf32>
    %c38 = arith.constant 38 : index
    %c0_30 = arith.constant 0 : index
    %21 = vector.load %arg8[%c38, %c0_30] : memref<488x160xf32, #tpu.memory_space<vmem>>, vector<160x20xf32>
    %c0_31 = arith.constant 0 : index
    %c0_32 = arith.constant 0 : index
    %22 = vector.load %arg8[%c0_31, %c0_32] : memref<488x160xf32, #tpu.memory_space<vmem>>, vector<20x160xf32>
    %cst = arith.constant dense<0.000000e+00> : vector<20x64xf32>
    %23 = tpu.matmul %0, %13, %cst {dimension_numbers = #tpu.dot_dimension_numbers<[1], [0], [0], [1], [0, 0, 1, 1], [], []>} : vector<20x64xf32>, vector<64x64xf32>, vector<20x64xf32> -> vector<20x64xf32>
    %cst_33 = arith.constant dense<0.000000e+00> : vector<20x64xf32>
    %24 = tpu.matmul %0, %15, %cst_33 {dimension_numbers = #tpu.dot_dimension_numbers<[1], [0], [0], [1], [0, 0, 1, 1], [], []>} : vector<20x64xf32>, vector<64x64xf32>, vector<20x64xf32> -> vector<20x64xf32>
    %cst_34 = arith.constant dense<0.000000e+00> : vector<20x64xf32>
    %25 = tpu.matmul %0, %17, %cst_34 {dimension_numbers = #tpu.dot_dimension_numbers<[1], [0], [0], [1], [0, 0, 1, 1], [], []>} : vector<20x64xf32>, vector<64x64xf32>, vector<20x64xf32> -> vector<20x64xf32>
    %26 = tpu.concatenate %23, %23, %23, %23, %23, %23, %23, %23 in 0 : vector<20x64xf32>, vector<20x64xf32>, vector<20x64xf32>, vector<20x64xf32>, vector<20x64xf32>, vector<20x64xf32>, vector<20x64xf32>, vector<20x64xf32> -> vector<160x64xf32>
    %27 = arith.mulf %26, %20 : vector<160x64xf32>
    %cst_35 = arith.constant dense<0.000000e+00> : vector<160x20xf32>
    %28 = tpu.matmul %27, %24, %cst_35 {dimension_numbers = #tpu.dot_dimension_numbers<[1], [1], [0], [0], [0, 0, 1, 0], [], []>} : vector<160x64xf32>, vector<20x64xf32>, vector<160x20xf32> -> vector<160x20xf32>
    %29 = arith.addf %28, %21 : vector<160x20xf32>
    %cst_36 = arith.constant dense<0xFF800000> : vector<160xf32>
    %30 = vector.multi_reduction <maximumf>, %29, %cst_36 [1] : vector<160x20xf32> to vector<160xf32>
    %31 = vector.shape_cast %30 : vector<160xf32> to vector<160x1xf32>
    %32 = vector.broadcast %31 : vector<160x1xf32> to vector<160x20xf32>
    %33 = arith.subf %29, %32 : vector<160x20xf32>
    %34 = math.exp %33 : vector<160x20xf32>
    %cst_37 = arith.constant dense<0.000000e+00> : vector<160xf32>
    %35 = vector.multi_reduction <add>, %34, %cst_37 [1] : vector<160x20xf32> to vector<160xf32>
    %36 = vector.shape_cast %35 : vector<160xf32> to vector<160x1xf32>
    %37 = tpu.reciprocal %36 {approx = true} : vector<160x1xf32> -> vector<160x1xf32>
    %38 = vector.broadcast %37 : vector<160x1xf32> to vector<160x20xf32>
    %39 = arith.mulf %34, %38 : vector<160x20xf32>
    %cst_38 = arith.constant dense<0.000000e+00> : vector<160x64xf32>
    %40 = tpu.matmul %39, %25, %cst_38 {dimension_numbers = #tpu.dot_dimension_numbers<[1], [0], [0], [1], [0, 0, 1, 1], [], []>} : vector<160x20xf32>, vector<20x64xf32>, vector<160x64xf32> -> vector<160x64xf32>
    %41 = arith.mulf %40, %20 : vector<160x64xf32>
    %cst_39 = arith.constant dense<0.000000e+00> : vector<20x64xf32>
    %42 = tpu.matmul %22, %41, %cst_39 {dimension_numbers = #tpu.dot_dimension_numbers<[1], [0], [0], [1], [0, 0, 1, 1], [], []>} : vector<20x160xf32>, vector<160x64xf32>, vector<20x64xf32> -> vector<20x64xf32>
    %cst_40 = arith.constant dense<0.000000e+00> : vector<20x64xf32>
    %43 = tpu.matmul %42, %19, %cst_40 {dimension_numbers = #tpu.dot_dimension_numbers<[1], [0], [0], [1], [0, 0, 1, 1], [], []>} : vector<20x64xf32>, vector<64x64xf32>, vector<20x64xf32> -> vector<20x64xf32>
    %44 = vector.broadcast %1 : vector<1x64xf32> to vector<20x64xf32>
    %45 = arith.addf %43, %44 : vector<20x64xf32>
    %cst_41 = arith.constant dense<0.000000e+00> : vector<20xf32>
    %46 = vector.multi_reduction <add>, %45, %cst_41 [1] : vector<20x64xf32> to vector<20xf32>
    %47 = vector.shape_cast %46 : vector<20xf32> to vector<20x1xf32>
    %cst_42 = arith.constant 6.400000e+01 : f32
    %48 = vector.broadcast %cst_42 : f32 to vector<20x1xf32>
    %49 = arith.divf %47, %48 : vector<20x1xf32>
    %50 = vector.broadcast %49 : vector<20x1xf32> to vector<20x64xf32>
    %51 = arith.subf %45, %50 : vector<20x64xf32>
    %52 = arith.mulf %51, %51 : vector<20x64xf32>
    %cst_43 = arith.constant dense<0.000000e+00> : vector<20xf32>
    %53 = vector.multi_reduction <add>, %52, %cst_43 [1] : vector<20x64xf32> to vector<20xf32>
    %54 = vector.shape_cast %53 : vector<20xf32> to vector<20x1xf32>
    %cst_44 = arith.constant 6.400000e+01 : f32
    %55 = vector.broadcast %cst_44 : f32 to vector<20x1xf32>
    %56 = arith.divf %54, %55 : vector<20x1xf32>
    %57 = vector.broadcast %49 : vector<20x1xf32> to vector<20x64xf32>
    %58 = arith.subf %45, %57 : vector<20x64xf32>
    %cst_45 = arith.constant 9.99999974E-6 : f32
    %59 = vector.broadcast %cst_45 : f32 to vector<20x1xf32>
    %60 = arith.addf %56, %59 : vector<20x1xf32>
    %61 = math.rsqrt %60 : vector<20x1xf32>
    %62 = vector.broadcast %61 : vector<20x1xf32> to vector<20x64xf32>
    %63 = arith.mulf %58, %62 : vector<20x64xf32>
    %64 = vector.broadcast %2 : vector<1x64xf32> to vector<20x64xf32>
    %65 = arith.mulf %63, %64 : vector<20x64xf32>
    %66 = vector.broadcast %3 : vector<1x64xf32> to vector<20x64xf32>
    %67 = arith.addf %65, %66 : vector<20x64xf32>
    %cst_46 = arith.constant dense<0.000000e+00> : vector<20x256xf32>
    %68 = tpu.matmul %67, %8, %cst_46 {dimension_numbers = #tpu.dot_dimension_numbers<[1], [0], [0], [1], [0, 0, 1, 1], [], []>} : vector<20x64xf32>, vector<64x256xf32>, vector<20x256xf32> -> vector<20x256xf32>
    %69 = vector.broadcast %11 : vector<1x256xf32> to vector<20x256xf32>
    %70 = arith.addf %68, %69 : vector<20x256xf32>
    %cst_47 = arith.constant 0.000000e+00 : f32
    %71 = vector.broadcast %cst_47 : f32 to vector<20x256xf32>
    %72 = arith.maximumf %70, %71 : vector<20x256xf32>
    %cst_48 = arith.constant dense<0.000000e+00> : vector<20x64xf32>
    %73 = tpu.matmul %72, %10, %cst_48 {dimension_numbers = #tpu.dot_dimension_numbers<[1], [0], [0], [1], [0, 0, 1, 1], [], []>} : vector<20x256xf32>, vector<256x64xf32>, vector<20x64xf32> -> vector<20x64xf32>
    %74 = vector.broadcast %4 : vector<1x64xf32> to vector<20x64xf32>
    %75 = arith.addf %73, %74 : vector<20x64xf32>
    %76 = arith.addf %75, %67 : vector<20x64xf32>
    %cst_49 = arith.constant dense<0.000000e+00> : vector<20xf32>
    %77 = vector.multi_reduction <add>, %76, %cst_49 [1] : vector<20x64xf32> to vector<20xf32>
    %78 = vector.shape_cast %77 : vector<20xf32> to vector<20x1xf32>
    %cst_50 = arith.constant 6.400000e+01 : f32
    %79 = vector.broadcast %cst_50 : f32 to vector<20x1xf32>
    %80 = arith.divf %78, %79 : vector<20x1xf32>
    %81 = vector.broadcast %80 : vector<20x1xf32> to vector<20x64xf32>
    %82 = arith.subf %76, %81 : vector<20x64xf32>
    %83 = arith.mulf %82, %82 : vector<20x64xf32>
    %cst_51 = arith.constant dense<0.000000e+00> : vector<20xf32>
    %84 = vector.multi_reduction <add>, %83, %cst_51 [1] : vector<20x64xf32> to vector<20xf32>
    %85 = vector.shape_cast %84 : vector<20xf32> to vector<20x1xf32>
    %cst_52 = arith.constant 6.400000e+01 : f32
    %86 = vector.broadcast %cst_52 : f32 to vector<20x1xf32>
    %87 = arith.divf %85, %86 : vector<20x1xf32>
    %88 = vector.broadcast %80 : vector<20x1xf32> to vector<20x64xf32>
    %89 = arith.subf %76, %88 : vector<20x64xf32>
    %cst_53 = arith.constant 9.99999974E-6 : f32
    %90 = vector.broadcast %cst_53 : f32 to vector<20x1xf32>
    %91 = arith.addf %87, %90 : vector<20x1xf32>
    %92 = math.rsqrt %91 : vector<20x1xf32>
    %93 = vector.broadcast %92 : vector<20x1xf32> to vector<20x64xf32>
    %94 = arith.mulf %89, %93 : vector<20x64xf32>
    %95 = vector.broadcast %5 : vector<1x64xf32> to vector<20x64xf32>
    %96 = arith.mulf %94, %95 : vector<20x64xf32>
    %97 = vector.broadcast %6 : vector<1x64xf32> to vector<20x64xf32>
    %98 = arith.addf %96, %97 : vector<20x64xf32>
    %c6 = arith.constant 6 : index
    %c0_54 = arith.constant 0 : index
    %99 = vector.load %arg5[%c6, %c0_54] : memref<30x64xf32, #tpu.memory_space<vmem>>, vector<1x64xf32>
    %c7 = arith.constant 7 : index
    %c0_55 = arith.constant 0 : index
    %100 = vector.load %arg5[%c7, %c0_55] : memref<30x64xf32, #tpu.memory_space<vmem>>, vector<1x64xf32>
    %c8 = arith.constant 8 : index
    %c0_56 = arith.constant 0 : index
    %101 = vector.load %arg5[%c8, %c0_56] : memref<30x64xf32, #tpu.memory_space<vmem>>, vector<1x64xf32>
    %c9 = arith.constant 9 : index
    %c0_57 = arith.constant 0 : index
    %102 = vector.load %arg5[%c9, %c0_57] : memref<30x64xf32, #tpu.memory_space<vmem>>, vector<1x64xf32>
    %c10 = arith.constant 10 : index
    %c0_58 = arith.constant 0 : index
    %103 = vector.load %arg5[%c10, %c0_58] : memref<30x64xf32, #tpu.memory_space<vmem>>, vector<1x64xf32>
    %c11 = arith.constant 11 : index
    %c0_59 = arith.constant 0 : index
    %104 = vector.load %arg5[%c11, %c0_59] : memref<30x64xf32, #tpu.memory_space<vmem>>, vector<1x64xf32>
    %c1_60 = arith.constant 1 : index
    %c0_61 = arith.constant 0 : index
    %c0_62 = arith.constant 0 : index
    %105 = vector.load %arg3[%c1_60, %c0_61, %c0_62] : memref<4x64x256xf32, #tpu.memory_space<vmem>>, vector<1x64x256xf32>
    %106 = vector.shape_cast %105 : vector<1x64x256xf32> to vector<64x256xf32>
    %c1_63 = arith.constant 1 : index
    %c0_64 = arith.constant 0 : index
    %c0_65 = arith.constant 0 : index
    %107 = vector.load %arg4[%c1_63, %c0_64, %c0_65] : memref<4x256x64xf32, #tpu.memory_space<vmem>>, vector<1x256x64xf32>
    %108 = vector.shape_cast %107 : vector<1x256x64xf32> to vector<256x64xf32>
    %c1_66 = arith.constant 1 : index
    %c0_67 = arith.constant 0 : index
    %109 = vector.load %arg6[%c1_66, %c0_67] : memref<4x256xf32, #tpu.memory_space<vmem>>, vector<1x256xf32>
    %c4_68 = arith.constant 4 : index
    %c0_69 = arith.constant 0 : index
    %c0_70 = arith.constant 0 : index
    %110 = vector.load %arg2[%c4_68, %c0_69, %c0_70] : memref<24x64x64xf32, #tpu.memory_space<vmem>>, vector<1x64x64xf32>
    %111 = vector.shape_cast %110 : vector<1x64x64xf32> to vector<64x64xf32>
    %c5_71 = arith.constant 5 : index
    %c0_72 = arith.constant 0 : index
    %c0_73 = arith.constant 0 : index
    %112 = vector.load %arg2[%c5_71, %c0_72, %c0_73] : memref<24x64x64xf32, #tpu.memory_space<vmem>>, vector<1x64x64xf32>
    %113 = vector.shape_cast %112 : vector<1x64x64xf32> to vector<64x64xf32>
    %c6_74 = arith.constant 6 : index
    %c0_75 = arith.constant 0 : index
    %c0_76 = arith.constant 0 : index
    %114 = vector.load %arg2[%c6_74, %c0_75, %c0_76] : memref<24x64x64xf32, #tpu.memory_space<vmem>>, vector<1x64x64xf32>
    %115 = vector.shape_cast %114 : vector<1x64x64xf32> to vector<64x64xf32>
    %c7_77 = arith.constant 7 : index
    %c0_78 = arith.constant 0 : index
    %c0_79 = arith.constant 0 : index
    %116 = vector.load %arg2[%c7_77, %c0_78, %c0_79] : memref<24x64x64xf32, #tpu.memory_space<vmem>>, vector<1x64x64xf32>
    %117 = vector.shape_cast %116 : vector<1x64x64xf32> to vector<64x64xf32>
    %c0_80 = arith.constant 0 : index
    %c0_81 = arith.constant 0 : index
    %118 = vector.load %arg7[%c0_80, %c0_81] : memref<307x64xf32, #tpu.memory_space<vmem>>, vector<160x64xf32>
    %c38_82 = arith.constant 38 : index
    %c0_83 = arith.constant 0 : index
    %119 = vector.load %arg8[%c38_82, %c0_83] : memref<488x160xf32, #tpu.memory_space<vmem>>, vector<160x20xf32>
    %c0_84 = arith.constant 0 : index
    %c0_85 = arith.constant 0 : index
    %120 = vector.load %arg8[%c0_84, %c0_85] : memref<488x160xf32, #tpu.memory_space<vmem>>, vector<20x160xf32>
    %cst_86 = arith.constant dense<0.000000e+00> : vector<20x64xf32>
    %121 = tpu.matmul %98, %111, %cst_86 {dimension_numbers = #tpu.dot_dimension_numbers<[1], [0], [0], [1], [0, 0, 1, 1], [], []>} : vector<20x64xf32>, vector<64x64xf32>, vector<20x64xf32> -> vector<20x64xf32>
    %cst_87 = arith.constant dense<0.000000e+00> : vector<20x64xf32>
    %122 = tpu.matmul %98, %113, %cst_87 {dimension_numbers = #tpu.dot_dimension_numbers<[1], [0], [0], [1], [0, 0, 1, 1], [], []>} : vector<20x64xf32>, vector<64x64xf32>, vector<20x64xf32> -> vector<20x64xf32>
    %cst_88 = arith.constant dense<0.000000e+00> : vector<20x64xf32>
    %123 = tpu.matmul %98, %115, %cst_88 {dimension_numbers = #tpu.dot_dimension_numbers<[1], [0], [0], [1], [0, 0, 1, 1], [], []>} : vector<20x64xf32>, vector<64x64xf32>, vector<20x64xf32> -> vector<20x64xf32>
    %124 = tpu.concatenate %121, %121, %121, %121, %121, %121, %121, %121 in 0 : vector<20x64xf32>, vector<20x64xf32>, vector<20x64xf32>, vector<20x64xf32>, vector<20x64xf32>, vector<20x64xf32>, vector<20x64xf32>, vector<20x64xf32> -> vector<160x64xf32>
    %125 = arith.mulf %124, %118 : vector<160x64xf32>
    %cst_89 = arith.constant dense<0.000000e+00> : vector<160x20xf32>
    %126 = tpu.matmul %125, %122, %cst_89 {dimension_numbers = #tpu.dot_dimension_numbers<[1], [1], [0], [0], [0, 0, 1, 0], [], []>} : vector<160x64xf32>, vector<20x64xf32>, vector<160x20xf32> -> vector<160x20xf32>
    %127 = arith.addf %126, %119 : vector<160x20xf32>
    %cst_90 = arith.constant dense<0xFF800000> : vector<160xf32>
    %128 = vector.multi_reduction <maximumf>, %127, %cst_90 [1] : vector<160x20xf32> to vector<160xf32>
    %129 = vector.shape_cast %128 : vector<160xf32> to vector<160x1xf32>
    %130 = vector.broadcast %129 : vector<160x1xf32> to vector<160x20xf32>
    %131 = arith.subf %127, %130 : vector<160x20xf32>
    %132 = math.exp %131 : vector<160x20xf32>
    %cst_91 = arith.constant dense<0.000000e+00> : vector<160xf32>
    %133 = vector.multi_reduction <add>, %132, %cst_91 [1] : vector<160x20xf32> to vector<160xf32>
    %134 = vector.shape_cast %133 : vector<160xf32> to vector<160x1xf32>
    %135 = tpu.reciprocal %134 {approx = true} : vector<160x1xf32> -> vector<160x1xf32>
    %136 = vector.broadcast %135 : vector<160x1xf32> to vector<160x20xf32>
    %137 = arith.mulf %132, %136 : vector<160x20xf32>
    %cst_92 = arith.constant dense<0.000000e+00> : vector<160x64xf32>
    %138 = tpu.matmul %137, %123, %cst_92 {dimension_numbers = #tpu.dot_dimension_numbers<[1], [0], [0], [1], [0, 0, 1, 1], [], []>} : vector<160x20xf32>, vector<20x64xf32>, vector<160x64xf32> -> vector<160x64xf32>
    %139 = arith.mulf %138, %118 : vector<160x64xf32>
    %cst_93 = arith.constant dense<0.000000e+00> : vector<20x64xf32>
    %140 = tpu.matmul %120, %139, %cst_93 {dimension_numbers = #tpu.dot_dimension_numbers<[1], [0], [0], [1], [0, 0, 1, 1], [], []>} : vector<20x160xf32>, vector<160x64xf32>, vector<20x64xf32> -> vector<20x64xf32>
    %cst_94 = arith.constant dense<0.000000e+00> : vector<20x64xf32>
    %141 = tpu.matmul %140, %117, %cst_94 {dimension_numbers = #tpu.dot_dimension_numbers<[1], [0], [0], [1], [0, 0, 1, 1], [], []>} : vector<20x64xf32>, vector<64x64xf32>, vector<20x64xf32> -> vector<20x64xf32>
    %142 = vector.broadcast %99 : vector<1x64xf32> to vector<20x64xf32>
    %143 = arith.addf %141, %142 : vector<20x64xf32>
    %cst_95 = arith.constant dense<0.000000e+00> : vector<20xf32>
    %144 = vector.multi_reduction <add>, %143, %cst_95 [1] : vector<20x64xf32> to vector<20xf32>
    %145 = vector.shape_cast %144 : vector<20xf32> to vector<20x1xf32>
    %cst_96 = arith.constant 6.400000e+01 : f32
    %146 = vector.broadcast %cst_96 : f32 to vector<20x1xf32>
    %147 = arith.divf %145, %146 : vector<20x1xf32>
    %148 = vector.broadcast %147 : vector<20x1xf32> to vector<20x64xf32>
    %149 = arith.subf %143, %148 : vector<20x64xf32>
    %150 = arith.mulf %149, %149 : vector<20x64xf32>
    %cst_97 = arith.constant dense<0.000000e+00> : vector<20xf32>
    %151 = vector.multi_reduction <add>, %150, %cst_97 [1] : vector<20x64xf32> to vector<20xf32>
    %152 = vector.shape_cast %151 : vector<20xf32> to vector<20x1xf32>
    %cst_98 = arith.constant 6.400000e+01 : f32
    %153 = vector.broadcast %cst_98 : f32 to vector<20x1xf32>
    %154 = arith.divf %152, %153 : vector<20x1xf32>
    %155 = vector.broadcast %147 : vector<20x1xf32> to vector<20x64xf32>
    %156 = arith.subf %143, %155 : vector<20x64xf32>
    %cst_99 = arith.constant 9.99999974E-6 : f32
    %157 = vector.broadcast %cst_99 : f32 to vector<20x1xf32>
    %158 = arith.addf %154, %157 : vector<20x1xf32>
    %159 = math.rsqrt %158 : vector<20x1xf32>
    %160 = vector.broadcast %159 : vector<20x1xf32> to vector<20x64xf32>
    %161 = arith.mulf %156, %160 : vector<20x64xf32>
    %162 = vector.broadcast %100 : vector<1x64xf32> to vector<20x64xf32>
    %163 = arith.mulf %161, %162 : vector<20x64xf32>
    %164 = vector.broadcast %101 : vector<1x64xf32> to vector<20x64xf32>
    %165 = arith.addf %163, %164 : vector<20x64xf32>
    %cst_100 = arith.constant dense<0.000000e+00> : vector<20x256xf32>
    %166 = tpu.matmul %165, %106, %cst_100 {dimension_numbers = #tpu.dot_dimension_numbers<[1], [0], [0], [1], [0, 0, 1, 1], [], []>} : vector<20x64xf32>, vector<64x256xf32>, vector<20x256xf32> -> vector<20x256xf32>
    %167 = vector.broadcast %109 : vector<1x256xf32> to vector<20x256xf32>
    %168 = arith.addf %166, %167 : vector<20x256xf32>
    %cst_101 = arith.constant 0.000000e+00 : f32
    %169 = vector.broadcast %cst_101 : f32 to vector<20x256xf32>
    %170 = arith.maximumf %168, %169 : vector<20x256xf32>
    %cst_102 = arith.constant dense<0.000000e+00> : vector<20x64xf32>
    %171 = tpu.matmul %170, %108, %cst_102 {dimension_numbers = #tpu.dot_dimension_numbers<[1], [0], [0], [1], [0, 0, 1, 1], [], []>} : vector<20x256xf32>, vector<256x64xf32>, vector<20x64xf32> -> vector<20x64xf32>
    %172 = vector.broadcast %102 : vector<1x64xf32> to vector<20x64xf32>
    %173 = arith.addf %171, %172 : vector<20x64xf32>
    %174 = arith.addf %173, %165 : vector<20x64xf32>
    %cst_103 = arith.constant dense<0.000000e+00> : vector<20xf32>
    %175 = vector.multi_reduction <add>, %174, %cst_103 [1] : vector<20x64xf32> to vector<20xf32>
    %176 = vector.shape_cast %175 : vector<20xf32> to vector<20x1xf32>
    %cst_104 = arith.constant 6.400000e+01 : f32
    %177 = vector.broadcast %cst_104 : f32 to vector<20x1xf32>
    %178 = arith.divf %176, %177 : vector<20x1xf32>
    %179 = vector.broadcast %178 : vector<20x1xf32> to vector<20x64xf32>
    %180 = arith.subf %174, %179 : vector<20x64xf32>
    %181 = arith.mulf %180, %180 : vector<20x64xf32>
    %cst_105 = arith.constant dense<0.000000e+00> : vector<20xf32>
    %182 = vector.multi_reduction <add>, %181, %cst_105 [1] : vector<20x64xf32> to vector<20xf32>
    %183 = vector.shape_cast %182 : vector<20xf32> to vector<20x1xf32>
    %cst_106 = arith.constant 6.400000e+01 : f32
    %184 = vector.broadcast %cst_106 : f32 to vector<20x1xf32>
    %185 = arith.divf %183, %184 : vector<20x1xf32>
    %186 = vector.broadcast %178 : vector<20x1xf32> to vector<20x64xf32>
    %187 = arith.subf %174, %186 : vector<20x64xf32>
    %cst_107 = arith.constant 9.99999974E-6 : f32
    %188 = vector.broadcast %cst_107 : f32 to vector<20x1xf32>
    %189 = arith.addf %185, %188 : vector<20x1xf32>
    %190 = math.rsqrt %189 : vector<20x1xf32>
    %191 = vector.broadcast %190 : vector<20x1xf32> to vector<20x64xf32>
    %192 = arith.mulf %187, %191 : vector<20x64xf32>
    %193 = vector.broadcast %103 : vector<1x64xf32> to vector<20x64xf32>
    %194 = arith.mulf %192, %193 : vector<20x64xf32>
    %195 = vector.broadcast %104 : vector<1x64xf32> to vector<20x64xf32>
    %196 = arith.addf %194, %195 : vector<20x64xf32>
    %c0_108 = arith.constant 0 : index
    %c0_109 = arith.constant 0 : index
    %197 = vector.load %arg1[%c0_108, %c0_109] : memref<18x64xf32, #tpu.memory_space<vmem>>, vector<18x64xf32>
    %c12 = arith.constant 12 : index
    %c0_110 = arith.constant 0 : index
    %198 = vector.load %arg5[%c12, %c0_110] : memref<30x64xf32, #tpu.memory_space<vmem>>, vector<1x64xf32>
    %c13 = arith.constant 13 : index
    %c0_111 = arith.constant 0 : index
    %199 = vector.load %arg5[%c13, %c0_111] : memref<30x64xf32, #tpu.memory_space<vmem>>, vector<1x64xf32>
    %c14 = arith.constant 14 : index
    %c0_112 = arith.constant 0 : index
    %200 = vector.load %arg5[%c14, %c0_112] : memref<30x64xf32, #tpu.memory_space<vmem>>, vector<1x64xf32>
    %c8_113 = arith.constant 8 : index
    %c0_114 = arith.constant 0 : index
    %c0_115 = arith.constant 0 : index
    %201 = vector.load %arg2[%c8_113, %c0_114, %c0_115] : memref<24x64x64xf32, #tpu.memory_space<vmem>>, vector<1x64x64xf32>
    %202 = vector.shape_cast %201 : vector<1x64x64xf32> to vector<64x64xf32>
    %c9_116 = arith.constant 9 : index
    %c0_117 = arith.constant 0 : index
    %c0_118 = arith.constant 0 : index
    %203 = vector.load %arg2[%c9_116, %c0_117, %c0_118] : memref<24x64x64xf32, #tpu.memory_space<vmem>>, vector<1x64x64xf32>
    %204 = vector.shape_cast %203 : vector<1x64x64xf32> to vector<64x64xf32>
    %c10_119 = arith.constant 10 : index
    %c0_120 = arith.constant 0 : index
    %c0_121 = arith.constant 0 : index
    %205 = vector.load %arg2[%c10_119, %c0_120, %c0_121] : memref<24x64x64xf32, #tpu.memory_space<vmem>>, vector<1x64x64xf32>
    %206 = vector.shape_cast %205 : vector<1x64x64xf32> to vector<64x64xf32>
    %c11_122 = arith.constant 11 : index
    %c0_123 = arith.constant 0 : index
    %c0_124 = arith.constant 0 : index
    %207 = vector.load %arg2[%c11_122, %c0_123, %c0_124] : memref<24x64x64xf32, #tpu.memory_space<vmem>>, vector<1x64x64xf32>
    %208 = vector.shape_cast %207 : vector<1x64x64xf32> to vector<64x64xf32>
    %c160 = arith.constant 160 : index
    %c0_125 = arith.constant 0 : index
    %209 = vector.load %arg7[%c160, %c0_125] : memref<307x64xf32, #tpu.memory_space<vmem>>, vector<144x64xf32>
    %c198 = arith.constant 198 : index
    %c0_126 = arith.constant 0 : index
    %210 = vector.load %arg8[%c198, %c0_126] : memref<488x160xf32, #tpu.memory_space<vmem>>, vector<144x18xf32>
    %c20 = arith.constant 20 : index
    %c0_127 = arith.constant 0 : index
    %211 = vector.load %arg8[%c20, %c0_127] : memref<488x160xf32, #tpu.memory_space<vmem>>, vector<18x144xf32>
    %cst_128 = arith.constant dense<0.000000e+00> : vector<18x64xf32>
    %212 = tpu.matmul %197, %202, %cst_128 {dimension_numbers = #tpu.dot_dimension_numbers<[1], [0], [0], [1], [0, 0, 1, 1], [], []>} : vector<18x64xf32>, vector<64x64xf32>, vector<18x64xf32> -> vector<18x64xf32>
    %cst_129 = arith.constant dense<0.000000e+00> : vector<18x64xf32>
    %213 = tpu.matmul %197, %204, %cst_129 {dimension_numbers = #tpu.dot_dimension_numbers<[1], [0], [0], [1], [0, 0, 1, 1], [], []>} : vector<18x64xf32>, vector<64x64xf32>, vector<18x64xf32> -> vector<18x64xf32>
    %cst_130 = arith.constant dense<0.000000e+00> : vector<18x64xf32>
    %214 = tpu.matmul %197, %206, %cst_130 {dimension_numbers = #tpu.dot_dimension_numbers<[1], [0], [0], [1], [0, 0, 1, 1], [], []>} : vector<18x64xf32>, vector<64x64xf32>, vector<18x64xf32> -> vector<18x64xf32>
    %215 = tpu.concatenate %212, %212, %212, %212, %212, %212, %212, %212 in 0 : vector<18x64xf32>, vector<18x64xf32>, vector<18x64xf32>, vector<18x64xf32>, vector<18x64xf32>, vector<18x64xf32>, vector<18x64xf32>, vector<18x64xf32> -> vector<144x64xf32>
    %216 = arith.mulf %215, %209 : vector<144x64xf32>
    %cst_131 = arith.constant dense<0.000000e+00> : vector<144x18xf32>
    %217 = tpu.matmul %216, %213, %cst_131 {dimension_numbers = #tpu.dot_dimension_numbers<[1], [1], [0], [0], [0, 0, 1, 0], [], []>} : vector<144x64xf32>, vector<18x64xf32>, vector<144x18xf32> -> vector<144x18xf32>
    %218 = arith.addf %217, %210 : vector<144x18xf32>
    %cst_132 = arith.constant dense<0xFF800000> : vector<144xf32>
    %219 = vector.multi_reduction <maximumf>, %218, %cst_132 [1] : vector<144x18xf32> to vector<144xf32>
    %220 = vector.shape_cast %219 : vector<144xf32> to vector<144x1xf32>
    %221 = vector.broadcast %220 : vector<144x1xf32> to vector<144x18xf32>
    %222 = arith.subf %218, %221 : vector<144x18xf32>
    %223 = math.exp %222 : vector<144x18xf32>
    %cst_133 = arith.constant dense<0.000000e+00> : vector<144xf32>
    %224 = vector.multi_reduction <add>, %223, %cst_133 [1] : vector<144x18xf32> to vector<144xf32>
    %225 = vector.shape_cast %224 : vector<144xf32> to vector<144x1xf32>
    %226 = tpu.reciprocal %225 {approx = true} : vector<144x1xf32> -> vector<144x1xf32>
    %227 = vector.broadcast %226 : vector<144x1xf32> to vector<144x18xf32>
    %228 = arith.mulf %223, %227 : vector<144x18xf32>
    %cst_134 = arith.constant dense<0.000000e+00> : vector<144x64xf32>
    %229 = tpu.matmul %228, %214, %cst_134 {dimension_numbers = #tpu.dot_dimension_numbers<[1], [0], [0], [1], [0, 0, 1, 1], [], []>} : vector<144x18xf32>, vector<18x64xf32>, vector<144x64xf32> -> vector<144x64xf32>
    %230 = arith.mulf %229, %209 : vector<144x64xf32>
    %cst_135 = arith.constant dense<0.000000e+00> : vector<18x64xf32>
    %231 = tpu.matmul %211, %230, %cst_135 {dimension_numbers = #tpu.dot_dimension_numbers<[1], [0], [0], [1], [0, 0, 1, 1], [], []>} : vector<18x144xf32>, vector<144x64xf32>, vector<18x64xf32> -> vector<18x64xf32>
    %cst_136 = arith.constant dense<0.000000e+00> : vector<18x64xf32>
    %232 = tpu.matmul %231, %208, %cst_136 {dimension_numbers = #tpu.dot_dimension_numbers<[1], [0], [0], [1], [0, 0, 1, 1], [], []>} : vector<18x64xf32>, vector<64x64xf32>, vector<18x64xf32> -> vector<18x64xf32>
    %233 = vector.broadcast %198 : vector<1x64xf32> to vector<18x64xf32>
    %234 = arith.addf %232, %233 : vector<18x64xf32>
    %235 = arith.addf %234, %197 : vector<18x64xf32>
    %cst_137 = arith.constant dense<0.000000e+00> : vector<18xf32>
    %236 = vector.multi_reduction <add>, %235, %cst_137 [1] : vector<18x64xf32> to vector<18xf32>
    %237 = vector.shape_cast %236 : vector<18xf32> to vector<18x1xf32>
    %cst_138 = arith.constant 6.400000e+01 : f32
    %238 = vector.broadcast %cst_138 : f32 to vector<18x1xf32>
    %239 = arith.divf %237, %238 : vector<18x1xf32>
    %240 = vector.broadcast %239 : vector<18x1xf32> to vector<18x64xf32>
    %241 = arith.subf %235, %240 : vector<18x64xf32>
    %242 = arith.mulf %241, %241 : vector<18x64xf32>
    %cst_139 = arith.constant dense<0.000000e+00> : vector<18xf32>
    %243 = vector.multi_reduction <add>, %242, %cst_139 [1] : vector<18x64xf32> to vector<18xf32>
    %244 = vector.shape_cast %243 : vector<18xf32> to vector<18x1xf32>
    %cst_140 = arith.constant 6.400000e+01 : f32
    %245 = vector.broadcast %cst_140 : f32 to vector<18x1xf32>
    %246 = arith.divf %244, %245 : vector<18x1xf32>
    %247 = vector.broadcast %239 : vector<18x1xf32> to vector<18x64xf32>
    %248 = arith.subf %235, %247 : vector<18x64xf32>
    %cst_141 = arith.constant 9.99999974E-6 : f32
    %249 = vector.broadcast %cst_141 : f32 to vector<18x1xf32>
    %250 = arith.addf %246, %249 : vector<18x1xf32>
    %251 = math.rsqrt %250 : vector<18x1xf32>
    %252 = vector.broadcast %251 : vector<18x1xf32> to vector<18x64xf32>
    %253 = arith.mulf %248, %252 : vector<18x64xf32>
    %254 = vector.broadcast %199 : vector<1x64xf32> to vector<18x64xf32>
    %255 = arith.mulf %253, %254 : vector<18x64xf32>
    %256 = vector.broadcast %200 : vector<1x64xf32> to vector<18x64xf32>
    %257 = arith.addf %255, %256 : vector<18x64xf32>
    %c18 = arith.constant 18 : index
    %c0_142 = arith.constant 0 : index
    %258 = vector.load %arg5[%c18, %c0_142] : memref<30x64xf32, #tpu.memory_space<vmem>>, vector<1x64xf32>
    %c19 = arith.constant 19 : index
    %c0_143 = arith.constant 0 : index
    %259 = vector.load %arg5[%c19, %c0_143] : memref<30x64xf32, #tpu.memory_space<vmem>>, vector<1x64xf32>
    %c20_144 = arith.constant 20 : index
    %c0_145 = arith.constant 0 : index
    %260 = vector.load %arg5[%c20_144, %c0_145] : memref<30x64xf32, #tpu.memory_space<vmem>>, vector<1x64xf32>
    %c21 = arith.constant 21 : index
    %c0_146 = arith.constant 0 : index
    %261 = vector.load %arg5[%c21, %c0_146] : memref<30x64xf32, #tpu.memory_space<vmem>>, vector<1x64xf32>
    %c22 = arith.constant 22 : index
    %c0_147 = arith.constant 0 : index
    %262 = vector.load %arg5[%c22, %c0_147] : memref<30x64xf32, #tpu.memory_space<vmem>>, vector<1x64xf32>
    %c23 = arith.constant 23 : index
    %c0_148 = arith.constant 0 : index
    %263 = vector.load %arg5[%c23, %c0_148] : memref<30x64xf32, #tpu.memory_space<vmem>>, vector<1x64xf32>
    %c2_149 = arith.constant 2 : index
    %c0_150 = arith.constant 0 : index
    %c0_151 = arith.constant 0 : index
    %264 = vector.load %arg3[%c2_149, %c0_150, %c0_151] : memref<4x64x256xf32, #tpu.memory_space<vmem>>, vector<1x64x256xf32>
    %265 = vector.shape_cast %264 : vector<1x64x256xf32> to vector<64x256xf32>
    %c2_152 = arith.constant 2 : index
    %c0_153 = arith.constant 0 : index
    %c0_154 = arith.constant 0 : index
    %266 = vector.load %arg4[%c2_152, %c0_153, %c0_154] : memref<4x256x64xf32, #tpu.memory_space<vmem>>, vector<1x256x64xf32>
    %267 = vector.shape_cast %266 : vector<1x256x64xf32> to vector<256x64xf32>
    %c2_155 = arith.constant 2 : index
    %c0_156 = arith.constant 0 : index
    %268 = vector.load %arg6[%c2_155, %c0_156] : memref<4x256xf32, #tpu.memory_space<vmem>>, vector<1x256xf32>
    %c16 = arith.constant 16 : index
    %c0_157 = arith.constant 0 : index
    %c0_158 = arith.constant 0 : index
    %269 = vector.load %arg2[%c16, %c0_157, %c0_158] : memref<24x64x64xf32, #tpu.memory_space<vmem>>, vector<1x64x64xf32>
    %270 = vector.shape_cast %269 : vector<1x64x64xf32> to vector<64x64xf32>
    %c17 = arith.constant 17 : index
    %c0_159 = arith.constant 0 : index
    %c0_160 = arith.constant 0 : index
    %271 = vector.load %arg2[%c17, %c0_159, %c0_160] : memref<24x64x64xf32, #tpu.memory_space<vmem>>, vector<1x64x64xf32>
    %272 = vector.shape_cast %271 : vector<1x64x64xf32> to vector<64x64xf32>
    %c18_161 = arith.constant 18 : index
    %c0_162 = arith.constant 0 : index
    %c0_163 = arith.constant 0 : index
    %273 = vector.load %arg2[%c18_161, %c0_162, %c0_163] : memref<24x64x64xf32, #tpu.memory_space<vmem>>, vector<1x64x64xf32>
    %274 = vector.shape_cast %273 : vector<1x64x64xf32> to vector<64x64xf32>
    %c19_164 = arith.constant 19 : index
    %c0_165 = arith.constant 0 : index
    %c0_166 = arith.constant 0 : index
    %275 = vector.load %arg2[%c19_164, %c0_165, %c0_166] : memref<24x64x64xf32, #tpu.memory_space<vmem>>, vector<1x64x64xf32>
    %276 = vector.shape_cast %275 : vector<1x64x64xf32> to vector<64x64xf32>
    %c160_167 = arith.constant 160 : index
    %c0_168 = arith.constant 0 : index
    %277 = vector.load %arg7[%c160_167, %c0_168] : memref<307x64xf32, #tpu.memory_space<vmem>>, vector<144x64xf32>
    %c342 = arith.constant 342 : index
    %c0_169 = arith.constant 0 : index
    %278 = vector.load %arg8[%c342, %c0_169] : memref<488x160xf32, #tpu.memory_space<vmem>>, vector<144x20xf32>
    %c20_170 = arith.constant 20 : index
    %c0_171 = arith.constant 0 : index
    %279 = vector.load %arg8[%c20_170, %c0_171] : memref<488x160xf32, #tpu.memory_space<vmem>>, vector<18x144xf32>
    %cst_172 = arith.constant dense<0.000000e+00> : vector<18x64xf32>
    %280 = tpu.matmul %257, %270, %cst_172 {dimension_numbers = #tpu.dot_dimension_numbers<[1], [0], [0], [1], [0, 0, 1, 1], [], []>} : vector<18x64xf32>, vector<64x64xf32>, vector<18x64xf32> -> vector<18x64xf32>
    %cst_173 = arith.constant dense<0.000000e+00> : vector<20x64xf32>
    %281 = tpu.matmul %196, %272, %cst_173 {dimension_numbers = #tpu.dot_dimension_numbers<[1], [0], [0], [1], [0, 0, 1, 1], [], []>} : vector<20x64xf32>, vector<64x64xf32>, vector<20x64xf32> -> vector<20x64xf32>
    %cst_174 = arith.constant dense<0.000000e+00> : vector<20x64xf32>
    %282 = tpu.matmul %196, %274, %cst_174 {dimension_numbers = #tpu.dot_dimension_numbers<[1], [0], [0], [1], [0, 0, 1, 1], [], []>} : vector<20x64xf32>, vector<64x64xf32>, vector<20x64xf32> -> vector<20x64xf32>
    %283 = tpu.concatenate %280, %280, %280, %280, %280, %280, %280, %280 in 0 : vector<18x64xf32>, vector<18x64xf32>, vector<18x64xf32>, vector<18x64xf32>, vector<18x64xf32>, vector<18x64xf32>, vector<18x64xf32>, vector<18x64xf32> -> vector<144x64xf32>
    %284 = arith.mulf %283, %277 : vector<144x64xf32>
    %cst_175 = arith.constant dense<0.000000e+00> : vector<144x20xf32>
    %285 = tpu.matmul %284, %281, %cst_175 {dimension_numbers = #tpu.dot_dimension_numbers<[1], [1], [0], [0], [0, 0, 1, 0], [], []>} : vector<144x64xf32>, vector<20x64xf32>, vector<144x20xf32> -> vector<144x20xf32>
    %286 = arith.addf %285, %278 : vector<144x20xf32>
    %cst_176 = arith.constant dense<0xFF800000> : vector<144xf32>
    %287 = vector.multi_reduction <maximumf>, %286, %cst_176 [1] : vector<144x20xf32> to vector<144xf32>
    %288 = vector.shape_cast %287 : vector<144xf32> to vector<144x1xf32>
    %289 = vector.broadcast %288 : vector<144x1xf32> to vector<144x20xf32>
    %290 = arith.subf %286, %289 : vector<144x20xf32>
    %291 = math.exp %290 : vector<144x20xf32>
    %cst_177 = arith.constant dense<0.000000e+00> : vector<144xf32>
    %292 = vector.multi_reduction <add>, %291, %cst_177 [1] : vector<144x20xf32> to vector<144xf32>
    %293 = vector.shape_cast %292 : vector<144xf32> to vector<144x1xf32>
    %294 = tpu.reciprocal %293 {approx = true} : vector<144x1xf32> -> vector<144x1xf32>
    %295 = vector.broadcast %294 : vector<144x1xf32> to vector<144x20xf32>
    %296 = arith.mulf %291, %295 : vector<144x20xf32>
    %cst_178 = arith.constant dense<0.000000e+00> : vector<144x64xf32>
    %297 = tpu.matmul %296, %282, %cst_178 {dimension_numbers = #tpu.dot_dimension_numbers<[1], [0], [0], [1], [0, 0, 1, 1], [], []>} : vector<144x20xf32>, vector<20x64xf32>, vector<144x64xf32> -> vector<144x64xf32>
    %298 = arith.mulf %297, %277 : vector<144x64xf32>
    %cst_179 = arith.constant dense<0.000000e+00> : vector<18x64xf32>
    %299 = tpu.matmul %279, %298, %cst_179 {dimension_numbers = #tpu.dot_dimension_numbers<[1], [0], [0], [1], [0, 0, 1, 1], [], []>} : vector<18x144xf32>, vector<144x64xf32>, vector<18x64xf32> -> vector<18x64xf32>
    %cst_180 = arith.constant dense<0.000000e+00> : vector<18x64xf32>
    %300 = tpu.matmul %299, %276, %cst_180 {dimension_numbers = #tpu.dot_dimension_numbers<[1], [0], [0], [1], [0, 0, 1, 1], [], []>} : vector<18x64xf32>, vector<64x64xf32>, vector<18x64xf32> -> vector<18x64xf32>
    %301 = vector.broadcast %258 : vector<1x64xf32> to vector<18x64xf32>
    %302 = arith.addf %300, %301 : vector<18x64xf32>
    %cst_181 = arith.constant dense<0.000000e+00> : vector<18xf32>
    %303 = vector.multi_reduction <add>, %302, %cst_181 [1] : vector<18x64xf32> to vector<18xf32>
    %304 = vector.shape_cast %303 : vector<18xf32> to vector<18x1xf32>
    %cst_182 = arith.constant 6.400000e+01 : f32
    %305 = vector.broadcast %cst_182 : f32 to vector<18x1xf32>
    %306 = arith.divf %304, %305 : vector<18x1xf32>
    %307 = vector.broadcast %306 : vector<18x1xf32> to vector<18x64xf32>
    %308 = arith.subf %302, %307 : vector<18x64xf32>
    %309 = arith.mulf %308, %308 : vector<18x64xf32>
    %cst_183 = arith.constant dense<0.000000e+00> : vector<18xf32>
    %310 = vector.multi_reduction <add>, %309, %cst_183 [1] : vector<18x64xf32> to vector<18xf32>
    %311 = vector.shape_cast %310 : vector<18xf32> to vector<18x1xf32>
    %cst_184 = arith.constant 6.400000e+01 : f32
    %312 = vector.broadcast %cst_184 : f32 to vector<18x1xf32>
    %313 = arith.divf %311, %312 : vector<18x1xf32>
    %314 = vector.broadcast %306 : vector<18x1xf32> to vector<18x64xf32>
    %315 = arith.subf %302, %314 : vector<18x64xf32>
    %cst_185 = arith.constant 9.99999974E-6 : f32
    %316 = vector.broadcast %cst_185 : f32 to vector<18x1xf32>
    %317 = arith.addf %313, %316 : vector<18x1xf32>
    %318 = math.rsqrt %317 : vector<18x1xf32>
    %319 = vector.broadcast %318 : vector<18x1xf32> to vector<18x64xf32>
    %320 = arith.mulf %315, %319 : vector<18x64xf32>
    %321 = vector.broadcast %259 : vector<1x64xf32> to vector<18x64xf32>
    %322 = arith.mulf %320, %321 : vector<18x64xf32>
    %323 = vector.broadcast %260 : vector<1x64xf32> to vector<18x64xf32>
    %324 = arith.addf %322, %323 : vector<18x64xf32>
    %cst_186 = arith.constant dense<0.000000e+00> : vector<18x256xf32>
    %325 = tpu.matmul %324, %265, %cst_186 {dimension_numbers = #tpu.dot_dimension_numbers<[1], [0], [0], [1], [0, 0, 1, 1], [], []>} : vector<18x64xf32>, vector<64x256xf32>, vector<18x256xf32> -> vector<18x256xf32>
    %326 = vector.broadcast %268 : vector<1x256xf32> to vector<18x256xf32>
    %327 = arith.addf %325, %326 : vector<18x256xf32>
    %cst_187 = arith.constant 0.000000e+00 : f32
    %328 = vector.broadcast %cst_187 : f32 to vector<18x256xf32>
    %329 = arith.maximumf %327, %328 : vector<18x256xf32>
    %cst_188 = arith.constant dense<0.000000e+00> : vector<18x64xf32>
    %330 = tpu.matmul %329, %267, %cst_188 {dimension_numbers = #tpu.dot_dimension_numbers<[1], [0], [0], [1], [0, 0, 1, 1], [], []>} : vector<18x256xf32>, vector<256x64xf32>, vector<18x64xf32> -> vector<18x64xf32>
    %331 = vector.broadcast %261 : vector<1x64xf32> to vector<18x64xf32>
    %332 = arith.addf %330, %331 : vector<18x64xf32>
    %333 = arith.addf %332, %324 : vector<18x64xf32>
    %cst_189 = arith.constant dense<0.000000e+00> : vector<18xf32>
    %334 = vector.multi_reduction <add>, %333, %cst_189 [1] : vector<18x64xf32> to vector<18xf32>
    %335 = vector.shape_cast %334 : vector<18xf32> to vector<18x1xf32>
    %cst_190 = arith.constant 6.400000e+01 : f32
    %336 = vector.broadcast %cst_190 : f32 to vector<18x1xf32>
    %337 = arith.divf %335, %336 : vector<18x1xf32>
    %338 = vector.broadcast %337 : vector<18x1xf32> to vector<18x64xf32>
    %339 = arith.subf %333, %338 : vector<18x64xf32>
    %340 = arith.mulf %339, %339 : vector<18x64xf32>
    %cst_191 = arith.constant dense<0.000000e+00> : vector<18xf32>
    %341 = vector.multi_reduction <add>, %340, %cst_191 [1] : vector<18x64xf32> to vector<18xf32>
    %342 = vector.shape_cast %341 : vector<18xf32> to vector<18x1xf32>
    %cst_192 = arith.constant 6.400000e+01 : f32
    %343 = vector.broadcast %cst_192 : f32 to vector<18x1xf32>
    %344 = arith.divf %342, %343 : vector<18x1xf32>
    %345 = vector.broadcast %337 : vector<18x1xf32> to vector<18x64xf32>
    %346 = arith.subf %333, %345 : vector<18x64xf32>
    %cst_193 = arith.constant 9.99999974E-6 : f32
    %347 = vector.broadcast %cst_193 : f32 to vector<18x1xf32>
    %348 = arith.addf %344, %347 : vector<18x1xf32>
    %349 = math.rsqrt %348 : vector<18x1xf32>
    %350 = vector.broadcast %349 : vector<18x1xf32> to vector<18x64xf32>
    %351 = arith.mulf %346, %350 : vector<18x64xf32>
    %352 = vector.broadcast %262 : vector<1x64xf32> to vector<18x64xf32>
    %353 = arith.mulf %351, %352 : vector<18x64xf32>
    %354 = vector.broadcast %263 : vector<1x64xf32> to vector<18x64xf32>
    %355 = arith.addf %353, %354 : vector<18x64xf32>
    %c15 = arith.constant 15 : index
    %c0_194 = arith.constant 0 : index
    %356 = vector.load %arg5[%c15, %c0_194] : memref<30x64xf32, #tpu.memory_space<vmem>>, vector<1x64xf32>
    %c16_195 = arith.constant 16 : index
    %c0_196 = arith.constant 0 : index
    %357 = vector.load %arg5[%c16_195, %c0_196] : memref<30x64xf32, #tpu.memory_space<vmem>>, vector<1x64xf32>
    %c17_197 = arith.constant 17 : index
    %c0_198 = arith.constant 0 : index
    %358 = vector.load %arg5[%c17_197, %c0_198] : memref<30x64xf32, #tpu.memory_space<vmem>>, vector<1x64xf32>
    %c12_199 = arith.constant 12 : index
    %c0_200 = arith.constant 0 : index
    %c0_201 = arith.constant 0 : index
    %359 = vector.load %arg2[%c12_199, %c0_200, %c0_201] : memref<24x64x64xf32, #tpu.memory_space<vmem>>, vector<1x64x64xf32>
    %360 = vector.shape_cast %359 : vector<1x64x64xf32> to vector<64x64xf32>
    %c13_202 = arith.constant 13 : index
    %c0_203 = arith.constant 0 : index
    %c0_204 = arith.constant 0 : index
    %361 = vector.load %arg2[%c13_202, %c0_203, %c0_204] : memref<24x64x64xf32, #tpu.memory_space<vmem>>, vector<1x64x64xf32>
    %362 = vector.shape_cast %361 : vector<1x64x64xf32> to vector<64x64xf32>
    %c14_205 = arith.constant 14 : index
    %c0_206 = arith.constant 0 : index
    %c0_207 = arith.constant 0 : index
    %363 = vector.load %arg2[%c14_205, %c0_206, %c0_207] : memref<24x64x64xf32, #tpu.memory_space<vmem>>, vector<1x64x64xf32>
    %364 = vector.shape_cast %363 : vector<1x64x64xf32> to vector<64x64xf32>
    %c15_208 = arith.constant 15 : index
    %c0_209 = arith.constant 0 : index
    %c0_210 = arith.constant 0 : index
    %365 = vector.load %arg2[%c15_208, %c0_209, %c0_210] : memref<24x64x64xf32, #tpu.memory_space<vmem>>, vector<1x64x64xf32>
    %366 = vector.shape_cast %365 : vector<1x64x64xf32> to vector<64x64xf32>
    %c160_211 = arith.constant 160 : index
    %c0_212 = arith.constant 0 : index
    %367 = vector.load %arg7[%c160_211, %c0_212] : memref<307x64xf32, #tpu.memory_space<vmem>>, vector<144x64xf32>
    %c198_213 = arith.constant 198 : index
    %c0_214 = arith.constant 0 : index
    %368 = vector.load %arg8[%c198_213, %c0_214] : memref<488x160xf32, #tpu.memory_space<vmem>>, vector<144x18xf32>
    %c20_215 = arith.constant 20 : index
    %c0_216 = arith.constant 0 : index
    %369 = vector.load %arg8[%c20_215, %c0_216] : memref<488x160xf32, #tpu.memory_space<vmem>>, vector<18x144xf32>
    %cst_217 = arith.constant dense<0.000000e+00> : vector<18x64xf32>
    %370 = tpu.matmul %355, %360, %cst_217 {dimension_numbers = #tpu.dot_dimension_numbers<[1], [0], [0], [1], [0, 0, 1, 1], [], []>} : vector<18x64xf32>, vector<64x64xf32>, vector<18x64xf32> -> vector<18x64xf32>
    %cst_218 = arith.constant dense<0.000000e+00> : vector<18x64xf32>
    %371 = tpu.matmul %355, %362, %cst_218 {dimension_numbers = #tpu.dot_dimension_numbers<[1], [0], [0], [1], [0, 0, 1, 1], [], []>} : vector<18x64xf32>, vector<64x64xf32>, vector<18x64xf32> -> vector<18x64xf32>
    %cst_219 = arith.constant dense<0.000000e+00> : vector<18x64xf32>
    %372 = tpu.matmul %355, %364, %cst_219 {dimension_numbers = #tpu.dot_dimension_numbers<[1], [0], [0], [1], [0, 0, 1, 1], [], []>} : vector<18x64xf32>, vector<64x64xf32>, vector<18x64xf32> -> vector<18x64xf32>
    %373 = tpu.concatenate %370, %370, %370, %370, %370, %370, %370, %370 in 0 : vector<18x64xf32>, vector<18x64xf32>, vector<18x64xf32>, vector<18x64xf32>, vector<18x64xf32>, vector<18x64xf32>, vector<18x64xf32>, vector<18x64xf32> -> vector<144x64xf32>
    %374 = arith.mulf %373, %367 : vector<144x64xf32>
    %cst_220 = arith.constant dense<0.000000e+00> : vector<144x18xf32>
    %375 = tpu.matmul %374, %371, %cst_220 {dimension_numbers = #tpu.dot_dimension_numbers<[1], [1], [0], [0], [0, 0, 1, 0], [], []>} : vector<144x64xf32>, vector<18x64xf32>, vector<144x18xf32> -> vector<144x18xf32>
    %376 = arith.addf %375, %368 : vector<144x18xf32>
    %cst_221 = arith.constant dense<0xFF800000> : vector<144xf32>
    %377 = vector.multi_reduction <maximumf>, %376, %cst_221 [1] : vector<144x18xf32> to vector<144xf32>
    %378 = vector.shape_cast %377 : vector<144xf32> to vector<144x1xf32>
    %379 = vector.broadcast %378 : vector<144x1xf32> to vector<144x18xf32>
    %380 = arith.subf %376, %379 : vector<144x18xf32>
    %381 = math.exp %380 : vector<144x18xf32>
    %cst_222 = arith.constant dense<0.000000e+00> : vector<144xf32>
    %382 = vector.multi_reduction <add>, %381, %cst_222 [1] : vector<144x18xf32> to vector<144xf32>
    %383 = vector.shape_cast %382 : vector<144xf32> to vector<144x1xf32>
    %384 = tpu.reciprocal %383 {approx = true} : vector<144x1xf32> -> vector<144x1xf32>
    %385 = vector.broadcast %384 : vector<144x1xf32> to vector<144x18xf32>
    %386 = arith.mulf %381, %385 : vector<144x18xf32>
    %cst_223 = arith.constant dense<0.000000e+00> : vector<144x64xf32>
    %387 = tpu.matmul %386, %372, %cst_223 {dimension_numbers = #tpu.dot_dimension_numbers<[1], [0], [0], [1], [0, 0, 1, 1], [], []>} : vector<144x18xf32>, vector<18x64xf32>, vector<144x64xf32> -> vector<144x64xf32>
    %388 = arith.mulf %387, %367 : vector<144x64xf32>
    %cst_224 = arith.constant dense<0.000000e+00> : vector<18x64xf32>
    %389 = tpu.matmul %369, %388, %cst_224 {dimension_numbers = #tpu.dot_dimension_numbers<[1], [0], [0], [1], [0, 0, 1, 1], [], []>} : vector<18x144xf32>, vector<144x64xf32>, vector<18x64xf32> -> vector<18x64xf32>
    %cst_225 = arith.constant dense<0.000000e+00> : vector<18x64xf32>
    %390 = tpu.matmul %389, %366, %cst_225 {dimension_numbers = #tpu.dot_dimension_numbers<[1], [0], [0], [1], [0, 0, 1, 1], [], []>} : vector<18x64xf32>, vector<64x64xf32>, vector<18x64xf32> -> vector<18x64xf32>
    %391 = vector.broadcast %356 : vector<1x64xf32> to vector<18x64xf32>
    %392 = arith.addf %390, %391 : vector<18x64xf32>
    %393 = arith.addf %392, %355 : vector<18x64xf32>
    %cst_226 = arith.constant dense<0.000000e+00> : vector<18xf32>
    %394 = vector.multi_reduction <add>, %393, %cst_226 [1] : vector<18x64xf32> to vector<18xf32>
    %395 = vector.shape_cast %394 : vector<18xf32> to vector<18x1xf32>
    %cst_227 = arith.constant 6.400000e+01 : f32
    %396 = vector.broadcast %cst_227 : f32 to vector<18x1xf32>
    %397 = arith.divf %395, %396 : vector<18x1xf32>
    %398 = vector.broadcast %397 : vector<18x1xf32> to vector<18x64xf32>
    %399 = arith.subf %393, %398 : vector<18x64xf32>
    %400 = arith.mulf %399, %399 : vector<18x64xf32>
    %cst_228 = arith.constant dense<0.000000e+00> : vector<18xf32>
    %401 = vector.multi_reduction <add>, %400, %cst_228 [1] : vector<18x64xf32> to vector<18xf32>
    %402 = vector.shape_cast %401 : vector<18xf32> to vector<18x1xf32>
    %cst_229 = arith.constant 6.400000e+01 : f32
    %403 = vector.broadcast %cst_229 : f32 to vector<18x1xf32>
    %404 = arith.divf %402, %403 : vector<18x1xf32>
    %405 = vector.broadcast %397 : vector<18x1xf32> to vector<18x64xf32>
    %406 = arith.subf %393, %405 : vector<18x64xf32>
    %cst_230 = arith.constant 9.99999974E-6 : f32
    %407 = vector.broadcast %cst_230 : f32 to vector<18x1xf32>
    %408 = arith.addf %404, %407 : vector<18x1xf32>
    %409 = math.rsqrt %408 : vector<18x1xf32>
    %410 = vector.broadcast %409 : vector<18x1xf32> to vector<18x64xf32>
    %411 = arith.mulf %406, %410 : vector<18x64xf32>
    %412 = vector.broadcast %357 : vector<1x64xf32> to vector<18x64xf32>
    %413 = arith.mulf %411, %412 : vector<18x64xf32>
    %414 = vector.broadcast %358 : vector<1x64xf32> to vector<18x64xf32>
    %415 = arith.addf %413, %414 : vector<18x64xf32>
    %c24 = arith.constant 24 : index
    %c0_231 = arith.constant 0 : index
    %416 = vector.load %arg5[%c24, %c0_231] : memref<30x64xf32, #tpu.memory_space<vmem>>, vector<1x64xf32>
    %c25 = arith.constant 25 : index
    %c0_232 = arith.constant 0 : index
    %417 = vector.load %arg5[%c25, %c0_232] : memref<30x64xf32, #tpu.memory_space<vmem>>, vector<1x64xf32>
    %c26 = arith.constant 26 : index
    %c0_233 = arith.constant 0 : index
    %418 = vector.load %arg5[%c26, %c0_233] : memref<30x64xf32, #tpu.memory_space<vmem>>, vector<1x64xf32>
    %c27 = arith.constant 27 : index
    %c0_234 = arith.constant 0 : index
    %419 = vector.load %arg5[%c27, %c0_234] : memref<30x64xf32, #tpu.memory_space<vmem>>, vector<1x64xf32>
    %c28 = arith.constant 28 : index
    %c0_235 = arith.constant 0 : index
    %420 = vector.load %arg5[%c28, %c0_235] : memref<30x64xf32, #tpu.memory_space<vmem>>, vector<1x64xf32>
    %c29 = arith.constant 29 : index
    %c0_236 = arith.constant 0 : index
    %421 = vector.load %arg5[%c29, %c0_236] : memref<30x64xf32, #tpu.memory_space<vmem>>, vector<1x64xf32>
    %c3_237 = arith.constant 3 : index
    %c0_238 = arith.constant 0 : index
    %c0_239 = arith.constant 0 : index
    %422 = vector.load %arg3[%c3_237, %c0_238, %c0_239] : memref<4x64x256xf32, #tpu.memory_space<vmem>>, vector<1x64x256xf32>
    %423 = vector.shape_cast %422 : vector<1x64x256xf32> to vector<64x256xf32>
    %c3_240 = arith.constant 3 : index
    %c0_241 = arith.constant 0 : index
    %c0_242 = arith.constant 0 : index
    %424 = vector.load %arg4[%c3_240, %c0_241, %c0_242] : memref<4x256x64xf32, #tpu.memory_space<vmem>>, vector<1x256x64xf32>
    %425 = vector.shape_cast %424 : vector<1x256x64xf32> to vector<256x64xf32>
    %c3_243 = arith.constant 3 : index
    %c0_244 = arith.constant 0 : index
    %426 = vector.load %arg6[%c3_243, %c0_244] : memref<4x256xf32, #tpu.memory_space<vmem>>, vector<1x256xf32>
    %c20_245 = arith.constant 20 : index
    %c0_246 = arith.constant 0 : index
    %c0_247 = arith.constant 0 : index
    %427 = vector.load %arg2[%c20_245, %c0_246, %c0_247] : memref<24x64x64xf32, #tpu.memory_space<vmem>>, vector<1x64x64xf32>
    %428 = vector.shape_cast %427 : vector<1x64x64xf32> to vector<64x64xf32>
    %c21_248 = arith.constant 21 : index
    %c0_249 = arith.constant 0 : index
    %c0_250 = arith.constant 0 : index
    %429 = vector.load %arg2[%c21_248, %c0_249, %c0_250] : memref<24x64x64xf32, #tpu.memory_space<vmem>>, vector<1x64x64xf32>
    %430 = vector.shape_cast %429 : vector<1x64x64xf32> to vector<64x64xf32>
    %c22_251 = arith.constant 22 : index
    %c0_252 = arith.constant 0 : index
    %c0_253 = arith.constant 0 : index
    %431 = vector.load %arg2[%c22_251, %c0_252, %c0_253] : memref<24x64x64xf32, #tpu.memory_space<vmem>>, vector<1x64x64xf32>
    %432 = vector.shape_cast %431 : vector<1x64x64xf32> to vector<64x64xf32>
    %c23_254 = arith.constant 23 : index
    %c0_255 = arith.constant 0 : index
    %c0_256 = arith.constant 0 : index
    %433 = vector.load %arg2[%c23_254, %c0_255, %c0_256] : memref<24x64x64xf32, #tpu.memory_space<vmem>>, vector<1x64x64xf32>
    %434 = vector.shape_cast %433 : vector<1x64x64xf32> to vector<64x64xf32>
    %c160_257 = arith.constant 160 : index
    %c0_258 = arith.constant 0 : index
    %435 = vector.load %arg7[%c160_257, %c0_258] : memref<307x64xf32, #tpu.memory_space<vmem>>, vector<144x64xf32>
    %c342_259 = arith.constant 342 : index
    %c0_260 = arith.constant 0 : index
    %436 = vector.load %arg8[%c342_259, %c0_260] : memref<488x160xf32, #tpu.memory_space<vmem>>, vector<144x20xf32>
    %c20_261 = arith.constant 20 : index
    %c0_262 = arith.constant 0 : index
    %437 = vector.load %arg8[%c20_261, %c0_262] : memref<488x160xf32, #tpu.memory_space<vmem>>, vector<18x144xf32>
    %cst_263 = arith.constant dense<0.000000e+00> : vector<18x64xf32>
    %438 = tpu.matmul %415, %428, %cst_263 {dimension_numbers = #tpu.dot_dimension_numbers<[1], [0], [0], [1], [0, 0, 1, 1], [], []>} : vector<18x64xf32>, vector<64x64xf32>, vector<18x64xf32> -> vector<18x64xf32>
    %cst_264 = arith.constant dense<0.000000e+00> : vector<20x64xf32>
    %439 = tpu.matmul %196, %430, %cst_264 {dimension_numbers = #tpu.dot_dimension_numbers<[1], [0], [0], [1], [0, 0, 1, 1], [], []>} : vector<20x64xf32>, vector<64x64xf32>, vector<20x64xf32> -> vector<20x64xf32>
    %cst_265 = arith.constant dense<0.000000e+00> : vector<20x64xf32>
    %440 = tpu.matmul %196, %432, %cst_265 {dimension_numbers = #tpu.dot_dimension_numbers<[1], [0], [0], [1], [0, 0, 1, 1], [], []>} : vector<20x64xf32>, vector<64x64xf32>, vector<20x64xf32> -> vector<20x64xf32>
    %441 = tpu.concatenate %438, %438, %438, %438, %438, %438, %438, %438 in 0 : vector<18x64xf32>, vector<18x64xf32>, vector<18x64xf32>, vector<18x64xf32>, vector<18x64xf32>, vector<18x64xf32>, vector<18x64xf32>, vector<18x64xf32> -> vector<144x64xf32>
    %442 = arith.mulf %441, %435 : vector<144x64xf32>
    %cst_266 = arith.constant dense<0.000000e+00> : vector<144x20xf32>
    %443 = tpu.matmul %442, %439, %cst_266 {dimension_numbers = #tpu.dot_dimension_numbers<[1], [1], [0], [0], [0, 0, 1, 0], [], []>} : vector<144x64xf32>, vector<20x64xf32>, vector<144x20xf32> -> vector<144x20xf32>
    %444 = arith.addf %443, %436 : vector<144x20xf32>
    %cst_267 = arith.constant dense<0xFF800000> : vector<144xf32>
    %445 = vector.multi_reduction <maximumf>, %444, %cst_267 [1] : vector<144x20xf32> to vector<144xf32>
    %446 = vector.shape_cast %445 : vector<144xf32> to vector<144x1xf32>
    %447 = vector.broadcast %446 : vector<144x1xf32> to vector<144x20xf32>
    %448 = arith.subf %444, %447 : vector<144x20xf32>
    %449 = math.exp %448 : vector<144x20xf32>
    %cst_268 = arith.constant dense<0.000000e+00> : vector<144xf32>
    %450 = vector.multi_reduction <add>, %449, %cst_268 [1] : vector<144x20xf32> to vector<144xf32>
    %451 = vector.shape_cast %450 : vector<144xf32> to vector<144x1xf32>
    %452 = tpu.reciprocal %451 {approx = true} : vector<144x1xf32> -> vector<144x1xf32>
    %453 = vector.broadcast %452 : vector<144x1xf32> to vector<144x20xf32>
    %454 = arith.mulf %449, %453 : vector<144x20xf32>
    %cst_269 = arith.constant dense<0.000000e+00> : vector<144x64xf32>
    %455 = tpu.matmul %454, %440, %cst_269 {dimension_numbers = #tpu.dot_dimension_numbers<[1], [0], [0], [1], [0, 0, 1, 1], [], []>} : vector<144x20xf32>, vector<20x64xf32>, vector<144x64xf32> -> vector<144x64xf32>
    %456 = arith.mulf %455, %435 : vector<144x64xf32>
    %cst_270 = arith.constant dense<0.000000e+00> : vector<18x64xf32>
    %457 = tpu.matmul %437, %456, %cst_270 {dimension_numbers = #tpu.dot_dimension_numbers<[1], [0], [0], [1], [0, 0, 1, 1], [], []>} : vector<18x144xf32>, vector<144x64xf32>, vector<18x64xf32> -> vector<18x64xf32>
    %cst_271 = arith.constant dense<0.000000e+00> : vector<18x64xf32>
    %458 = tpu.matmul %457, %434, %cst_271 {dimension_numbers = #tpu.dot_dimension_numbers<[1], [0], [0], [1], [0, 0, 1, 1], [], []>} : vector<18x64xf32>, vector<64x64xf32>, vector<18x64xf32> -> vector<18x64xf32>
    %459 = vector.broadcast %416 : vector<1x64xf32> to vector<18x64xf32>
    %460 = arith.addf %458, %459 : vector<18x64xf32>
    %cst_272 = arith.constant dense<0.000000e+00> : vector<18xf32>
    %461 = vector.multi_reduction <add>, %460, %cst_272 [1] : vector<18x64xf32> to vector<18xf32>
    %462 = vector.shape_cast %461 : vector<18xf32> to vector<18x1xf32>
    %cst_273 = arith.constant 6.400000e+01 : f32
    %463 = vector.broadcast %cst_273 : f32 to vector<18x1xf32>
    %464 = arith.divf %462, %463 : vector<18x1xf32>
    %465 = vector.broadcast %464 : vector<18x1xf32> to vector<18x64xf32>
    %466 = arith.subf %460, %465 : vector<18x64xf32>
    %467 = arith.mulf %466, %466 : vector<18x64xf32>
    %cst_274 = arith.constant dense<0.000000e+00> : vector<18xf32>
    %468 = vector.multi_reduction <add>, %467, %cst_274 [1] : vector<18x64xf32> to vector<18xf32>
    %469 = vector.shape_cast %468 : vector<18xf32> to vector<18x1xf32>
    %cst_275 = arith.constant 6.400000e+01 : f32
    %470 = vector.broadcast %cst_275 : f32 to vector<18x1xf32>
    %471 = arith.divf %469, %470 : vector<18x1xf32>
    %472 = vector.broadcast %464 : vector<18x1xf32> to vector<18x64xf32>
    %473 = arith.subf %460, %472 : vector<18x64xf32>
    %cst_276 = arith.constant 9.99999974E-6 : f32
    %474 = vector.broadcast %cst_276 : f32 to vector<18x1xf32>
    %475 = arith.addf %471, %474 : vector<18x1xf32>
    %476 = math.rsqrt %475 : vector<18x1xf32>
    %477 = vector.broadcast %476 : vector<18x1xf32> to vector<18x64xf32>
    %478 = arith.mulf %473, %477 : vector<18x64xf32>
    %479 = vector.broadcast %417 : vector<1x64xf32> to vector<18x64xf32>
    %480 = arith.mulf %478, %479 : vector<18x64xf32>
    %481 = vector.broadcast %418 : vector<1x64xf32> to vector<18x64xf32>
    %482 = arith.addf %480, %481 : vector<18x64xf32>
    %cst_277 = arith.constant dense<0.000000e+00> : vector<18x256xf32>
    %483 = tpu.matmul %482, %423, %cst_277 {dimension_numbers = #tpu.dot_dimension_numbers<[1], [0], [0], [1], [0, 0, 1, 1], [], []>} : vector<18x64xf32>, vector<64x256xf32>, vector<18x256xf32> -> vector<18x256xf32>
    %484 = vector.broadcast %426 : vector<1x256xf32> to vector<18x256xf32>
    %485 = arith.addf %483, %484 : vector<18x256xf32>
    %cst_278 = arith.constant 0.000000e+00 : f32
    %486 = vector.broadcast %cst_278 : f32 to vector<18x256xf32>
    %487 = arith.maximumf %485, %486 : vector<18x256xf32>
    %cst_279 = arith.constant dense<0.000000e+00> : vector<18x64xf32>
    %488 = tpu.matmul %487, %425, %cst_279 {dimension_numbers = #tpu.dot_dimension_numbers<[1], [0], [0], [1], [0, 0, 1, 1], [], []>} : vector<18x256xf32>, vector<256x64xf32>, vector<18x64xf32> -> vector<18x64xf32>
    %489 = vector.broadcast %419 : vector<1x64xf32> to vector<18x64xf32>
    %490 = arith.addf %488, %489 : vector<18x64xf32>
    %491 = arith.addf %490, %482 : vector<18x64xf32>
    %cst_280 = arith.constant dense<0.000000e+00> : vector<18xf32>
    %492 = vector.multi_reduction <add>, %491, %cst_280 [1] : vector<18x64xf32> to vector<18xf32>
    %493 = vector.shape_cast %492 : vector<18xf32> to vector<18x1xf32>
    %cst_281 = arith.constant 6.400000e+01 : f32
    %494 = vector.broadcast %cst_281 : f32 to vector<18x1xf32>
    %495 = arith.divf %493, %494 : vector<18x1xf32>
    %496 = vector.broadcast %495 : vector<18x1xf32> to vector<18x64xf32>
    %497 = arith.subf %491, %496 : vector<18x64xf32>
    %498 = arith.mulf %497, %497 : vector<18x64xf32>
    %cst_282 = arith.constant dense<0.000000e+00> : vector<18xf32>
    %499 = vector.multi_reduction <add>, %498, %cst_282 [1] : vector<18x64xf32> to vector<18xf32>
    %500 = vector.shape_cast %499 : vector<18xf32> to vector<18x1xf32>
    %cst_283 = arith.constant 6.400000e+01 : f32
    %501 = vector.broadcast %cst_283 : f32 to vector<18x1xf32>
    %502 = arith.divf %500, %501 : vector<18x1xf32>
    %503 = vector.broadcast %495 : vector<18x1xf32> to vector<18x64xf32>
    %504 = arith.subf %491, %503 : vector<18x64xf32>
    %cst_284 = arith.constant 9.99999974E-6 : f32
    %505 = vector.broadcast %cst_284 : f32 to vector<18x1xf32>
    %506 = arith.addf %502, %505 : vector<18x1xf32>
    %507 = math.rsqrt %506 : vector<18x1xf32>
    %508 = vector.broadcast %507 : vector<18x1xf32> to vector<18x64xf32>
    %509 = arith.mulf %504, %508 : vector<18x64xf32>
    %510 = vector.broadcast %420 : vector<1x64xf32> to vector<18x64xf32>
    %511 = arith.mulf %509, %510 : vector<18x64xf32>
    %512 = vector.broadcast %421 : vector<1x64xf32> to vector<18x64xf32>
    %513 = arith.addf %511, %512 : vector<18x64xf32>
    %c304 = arith.constant 304 : index
    %c0_285 = arith.constant 0 : index
    %514 = vector.load %arg7[%c304, %c0_285] : memref<307x64xf32, #tpu.memory_space<vmem>>, vector<1x64xf32>
    %c305 = arith.constant 305 : index
    %c0_286 = arith.constant 0 : index
    %515 = vector.load %arg7[%c305, %c0_286] : memref<307x64xf32, #tpu.memory_space<vmem>>, vector<1x1xf32>
    %c306 = arith.constant 306 : index
    %c0_287 = arith.constant 0 : index
    %516 = vector.load %arg7[%c306, %c0_287] : memref<307x64xf32, #tpu.memory_space<vmem>>, vector<1x1xf32>
    %c486 = arith.constant 486 : index
    %c0_288 = arith.constant 0 : index
    %517 = vector.load %arg8[%c486, %c0_288] : memref<488x160xf32, #tpu.memory_space<vmem>>, vector<2x18xf32>
    %518 = vector.broadcast %514 : vector<1x64xf32> to vector<18x64xf32>
    %519 = arith.mulf %513, %518 : vector<18x64xf32>
    %cst_289 = arith.constant dense<0.000000e+00> : vector<18xf32>
    %520 = vector.multi_reduction <add>, %519, %cst_289 [1] : vector<18x64xf32> to vector<18xf32>
    %521 = vector.shape_cast %520 : vector<18xf32> to vector<18x1xf32>
    %522 = vector.broadcast %515 : vector<1x1xf32> to vector<18x1xf32>
    %523 = arith.addf %521, %522 : vector<18x1xf32>
    %cst_290 = arith.constant dense<0.000000e+00> : vector<2x1xf32>
    %524 = tpu.matmul %517, %523, %cst_290 {dimension_numbers = #tpu.dot_dimension_numbers<[1], [0], [0], [1], [0, 0, 1, 1], [], []>} : vector<2x18xf32>, vector<18x1xf32>, vector<2x1xf32> -> vector<2x1xf32>
    %525 = vector.broadcast %516 : vector<1x1xf32> to vector<2x1xf32>
    %526 = arith.addf %524, %525 : vector<2x1xf32>
    %c0_291 = arith.constant 0 : index
    %c0_292 = arith.constant 0 : index
    %527 = vector.load %arg9[%c0_291, %c0_292] : memref<2x1xf32, #tpu.memory_space<vmem>>, vector<2x1xf32>
    tpu.vector_store %arg9[%c0_291, %c0_292], %526 {strides = array<i32>} : memref<2x1xf32, #tpu.memory_space<vmem>>, vector<2x1xf32>,
    return
  }
}

</mosaic_0001>

<bundles_post_ra>
// kernel: transformer_forward.1
= control target key start
LH: loop header
LB: loop body
LE: loop exit
PB: predicated region body
PF: predicated region fallthrough
CT: control target
= control target key end

     0   :  { %v17821_v0 = vmov 0.0|0.0   ;;  %vm12830_vm0 = vmmov 0   ;;  %v17819_v4 = vmov 0.0   ;;  %vm172_vm1 = vcmask 523264   ;;  %s17809_s2 = inlined_call_operand.vmem [shape: f32[24,64,64], index: 2, kind: input, shape index: {}]   ;;  %s17810_s0 = inlined_call_operand.vmem [shape: f32[20,64], index: 0, kind: input, shape index: {}]   ;;  %s17811_s7 = inlined_call_operand.vmem [shape: f32[307,64], index: 7, kind: input, shape index: {}]   ;;  %s17812_s8 = inlined_call_operand.vmem [shape: f32[488,160], index: 8, kind: input, shape index: {}]   ;;  %s17813_s5 = inlined_call_operand.vmem [shape: f32[30,64], index: 5, kind: input, shape index: {}]   ;;  %s17814_s3 = inlined_call_operand.vmem [shape: f32[4,64,256], index: 3, kind: input, shape index: {}]   ;;  %s17815_s4 = inlined_call_operand.vmem [shape: f32[4,256,64], index: 4, kind: input, shape index: {}]   ;;  %s17816_s6 = inlined_call_operand.vmem [shape: f32[4,256], index: 6, kind: input, shape index: {}]   ;;  %s17817_s1 = inlined_call_operand.vmem [shape: f32[18,64], index: 1, kind: input, shape index: {}]   ;;  %s17818_s9 = inlined_call_operand.vmem [shape: f32[2,1], index: 9, kind: output, shape index: {}]  }
   0x1   :  { %11516 = vmatprep.subr.bf16.mxu1 %v17821_v0  ;;  %v90_v1 = vld [vmem:[%s17809_s2] sm:$0xff]  ;;  %v91_v2 = vld [vmem:[%s17809_s2 + $0x8] sm:$0xff]  ;;  %v92_v3 = vld [vmem:[%s17809_s2 + $0x10] sm:$0xff]  ;;  %10515 = vmatprep.mubr.msk.f32.mxu1 %vm12830_vm0, %v17819_v4  ;;  %vm425_vm2 = vcmask 1043456   ;;  %vm476_vm4 = vcmask 1041408   ;;  %vm772_vm5 = vcmask 162816  }
   0x2   :  { %v11517_v5 = vpack.c.bf16 %v91_v2, %v90_v1  ;;  %v93_v6 = vld [vmem:[%s17809_s2 + $0x18] sm:$0xff]  ;;  %11540 = vmatprep.subr.bf16.mxu0 %v17821_v0  ;;  %10565 = vmatprep.mubr.msk.f32.mxu0 %vm12830_vm0, %v17819_v4  ;;  %v94_v8 = vld [vmem:[%s17809_s2 + $0x20] sm:$0xff]  ;;  %v95_v9 = vld [vmem:[%s17809_s2 + $0x28] sm:$0xff]  ;;  %vm1241_vm6 = vcmask 261120   ;;  %vm1430_vm7 = vcmask 519168   ;;  %vm3633_vm8 = vcmask 1045504  }
   0x3   :  { %v11520_v7 = vpack.c.bf16 %v93_v6, %v92_v3  ;;  %v11523_v10 = vpack.c.bf16 %v95_v9, %v94_v8  ;;  %v96_v11 = vld [vmem:[%s17809_s2 + $0x30] sm:$0xff]  ;;  %v97_v12 = vld [vmem:[%s17809_s2 + $0x38] sm:$0xff]  ;;  %v9091_v14 = vld [vmem:[%s17809_s2 + $0x40] sm:$0xff]  ;;  %vm3955_vm9 = vcmask 146432   ;;  %vm4403_vm10 = vcmask 130048  }
   0x4   :  { %11518 = vmatpush3.bf16.msra.mxu1 %v11517_v5  ;;  %v11526_v13 = vpack.c.bf16 %v97_v12, %v96_v11  ;;  %v9092_v15 = vld [vmem:[%s17809_s2 + $0x48] sm:$0xff]  ;;  %v12924_v16 = vld [vmem:[%s17810_s0] sm:$0xff]  ;;  %v9093_v18 = vld [vmem:[%s17809_s2 + $0x50] sm:$0xff]  ;;  %vm4592_vm11 = vcmask 517120   ;;  %vm9085_vm12 = vcmask 1024  }
   0x5   :  { %11519 = vmatprep.subr.bf16.mxu1 %v17821_v0  ;;  %v11529_v17 = vpack.c.bf16 %v9092_v15, %v9091_v14  ;;  %v9094_v19 = vld [vmem:[%s17809_s2 + $0x58] sm:$0xff]  ;;  %v12940_v20 = vld [vmem:[%s17810_s0 + $0x8] sm:$0xff]  ;;  %v9095_v22 = vld [vmem:[%s17809_s2 + $0x60] sm:$0xff] }
   0x6   :  { %v11532_v21 = vpack.c.bf16 %v9094_v19, %v9093_v18  ;;  %v9096_v23 = vld [vmem:[%s17809_s2 + $0x68] sm:$0xff]  ;;  %v12956_v24 = vld [vmem:[%s17810_s0 + $0x10] sm:$0xf]  ;;  %v9098_v27 = vld [vmem:[%s17809_s2 + $0x78] sm:$0xff] }
   0x7   :  { %v11535_v25 = vpack.c.bf16 %v9096_v23, %v9095_v22  ;;  %v9097_v26 = vld [vmem:[%s17809_s2 + $0x70] sm:$0xff]  ;;  %v125_v29 = vld [vmem:[%s17811_s7] sm:$0xff]  ;;  %vm13002_vm3 = vmpackc.low %vm172_vm1, %vm172_vm1 }
   0x8   :  { %11521 = vmatpush3.bf16.msra.mxu1 %v11520_v7  ;;  %v11538_v28 = vpack.c.bf16 %v9098_v27, %v9097_v26  ;;  %v13014_v51 = vld [vmem:[%s17811_s7 + $0x8] sm:$0xff]  ;;  %v13019_v52 = vld [vmem:[%s17811_s7 + $0x10] sm:$0xff]  ;;  %v13030_v55 = vld [vmem:[%s17811_s7 + $0x18] sm:$0xff] }
   0x9   :  { %11522 = vmatprep.subr.bf16.mxu1 %v17821_v0  ;;  %v13036_v56 = vld [vmem:[%s17811_s7 + $0x20] sm:$0xff]  ;;  %v13046_v59 = vld [vmem:[%s17811_s7 + $0x28] sm:$0xff]  ;;  %v13052_v60 = vld [vmem:[%s17811_s7 + $0x30] sm:$0xff] }
   0xa   :  { %v13060_v62 = vld [vmem:[%s17811_s7 + $0x38] sm:$0xff]  ;;  %v133_v1 = vld [vmem:[%s17811_s7 + $0x40] sm:$0xff]  ;;  %v13075_v5 = vld [vmem:[%s17811_s7 + $0x48] sm:$0xff] }
   0xb   :  { %v135_v6 = vld [vmem:[%s17811_s7 + $0x50] sm:$0xff]  ;;  %v13088_v9 = vld [vmem:[%s17811_s7 + $0x58] sm:$0xff]  ;;  %v141_v19 = vld [vmem:[%s17811_s7 + $0x80] sm:$0xff] }
   0xc   :  { %11524 = vmatpush3.bf16.msra.mxu1 %v11523_v10  ;;  %v137_v10 = vld [vmem:[%s17811_s7 + $0x60] sm:$0xff]  ;;  %v139_v14 = vld [vmem:[%s17811_s7 + $0x70] sm:$0xff]  ;;  %v13114_v18 = vld [vmem:[%s17811_s7 + $0x78] sm:$0xff] }
   0xd   :  { %11525 = vmatprep.subr.bf16.mxu1 %v17821_v0  ;;  %v13126_v22 = vld [vmem:[%s17811_s7 + $0x88] sm:$0xff] }
  0x10   :  { %11527 = vmatpush3.bf16.msra.mxu1 %v11526_v13  ;;  %v13101_v13 = vld [vmem:[%s17811_s7 + $0x68] sm:$0xff] }
  0x11   :  { %11528 = vmatprep.subr.bf16.mxu1 %v17821_v0 }
  0x13   :  { %10516 = vmatmul.mubr.msk.f32.vlgmr.msra.gmra.mrb[0].mxu1 %vm172_vm1, %v12924_v16 }
  0x14   :  { %11530 = vmatpush3.bf16.msra.mxu1 %v11529_v17  ;;  %10518 = vmatprep.mubr.msk.f32.mxu1 %vm12830_vm0, %v17819_v4 }
  0x15   :  { %11531 = vmatprep.subr.bf16.mxu1 %v17821_v0 }
  0x17   :  { %10519 = vmatmul.mubr.msk.f32.gmra.mrb[2].mxu1 %vm172_vm1, %v12940_v20 }
  0x18   :  { %11533 = vmatpush3.bf16.msra.mxu1 %v11532_v21  ;;  %10521 = vmatprep.mubr.msk.f32.mxu1 %vm12830_vm0, %v17819_v4 }
  0x19   :  { %11534 = vmatprep.subr.bf16.mxu1 %v17821_v0 }
  0x1b   :  { %10522 = vmatmul.mubr.msk.f32.gmra.mrb[4].mxu1 %vm172_vm1, %v12956_v24 }
  0x1c   :  { %11536 = vmatpush3.bf16.msra.mxu1 %v11535_v25  ;;  %10540 = vmatprep.mubr.msk.f32.mxu1 %vm12830_vm0, %v17819_v4  ;;  %v143_v25 = vld [vmem:[%s17811_s7 + $0x90] sm:$0xff] }
  0x1d   :  { %11537 = vmatprep.subr.bf16.mxu1 %v17821_v0 }
  0x20   :  { %11539 = vmatpush3.bf16.msra.mxu1 %v11538_v28  ;;  %v13140_v28 = vld [vmem:[%s17811_s7 + $0x98] sm:$0xff] }
  0x23   :  { %10541 = vmatmul.mubr.msk.f32.vlgmr.msra.gmra.mrb[6].mxu1 %vm172_vm1, %v12924_v16 }
  0x24   :  { %10543 = vmatprep.mubr.msk.f32.mxu1 %vm12830_vm0, %v17819_v4 }
  0x27   :  { %10544 = vmatmul.mubr.msk.f32.gmra.mrb[8].mxu1 %vm172_vm1, %v12940_v20 }
  0x28   :  { %10546 = vmatprep.mubr.msk.f32.mxu1 %vm12830_vm0, %v17819_v4 }
  0x2b   :  { %10547 = vmatmul.mubr.msk.f32.gmra.mrb[10].mxu1 %vm172_vm1, %v12956_v24 }
  0xe6   :  { %v12983_v30 = vpop.f32.mrb[0].mxu1 }
  0xe7   :  { %v10517_v31 = vpop.f32.mrb[1].mxu1  ;;  %v435_v32 = vmul.f32 %v12983_v30, %v125_v29  ;;  %v426_v36 = vrot.slane %v12983_v30, 4  ;;  %v440_v61 = vmul.f32 %v12983_v30, %v13046_v59  ;;  %v445_v8 = vmul.f32 %v12983_v30, %v135_v6 }
  0xe8   :  { %v450_v21 = vmul.f32 %v12983_v30, %v13114_v18  ;;  %v9099_v30 = vld [vmem:[%s17809_s2 + $0x80] sm:$0xff]  ;;  %v9100_v31 = vld [vmem:[%s17809_s2 + $0x88] sm:$0xff] }
  0xe9   :  { %10580 = vmatprep.mubr.msk.f32.mxu1 %vm172_vm1, %v435_v32  ;;  %v9101_v32 = vld [vmem:[%s17809_s2 + $0x90] sm:$0xff] }
  0xea   :  { %v12987_v33 = vpop.f32.mrb[2].mxu1 }
  0xeb   :  { %v427_v34 = vrot.slane %v12987_v33, 4  ;;  %v10520_v35 = vpop.f32.mrb[3].mxu1  ;;  %v436_v53 = vmul.f32 %v12987_v33, %v13014_v51  ;;  %v441_v63 = vmul.f32 %v12987_v33, %v13052_v60  ;;  %v446_v11 = vmul.f32 %v12987_v33, %v13088_v9 }
  0xec   :  { %v451_v23 = vmul.f32 %v12987_v33, %v141_v19  ;;  %v11541_v33 = vpack.c.bf16 %v9100_v31, %v9099_v30 }
  0xed   :  { %v12992_v37 = vsel %vm425_vm2, %v426_v36, %v427_v34 }
  0xee   :  { %v258_v38 = vpop.f32.mrb[4].mxu1  ;;  %v438_v57 = vmul.f32 %v12992_v37, %v13030_v55  ;;  %v443_v3 = vmul.f32 %v12992_v37, %v133_v1  ;;  %v448_v15 = vmul.f32 %v12992_v37, %v13101_v13  ;;  %v453_v27 = vmul.f32 %v12992_v37, %v143_v25  ;;  %11542 = vmatpush3.bf16.msra.mxu0 %v11541_v33  ;;  %v9104_v37 = vld [vmem:[%s17809_s2 + $0xa8] sm:$0xff]  ;;  %v155_v33 = vld [vmem:[%s17812_s8 + $0xe0] sm:$0xff] }
  0xef   :  { %v429_v39 = vrot.slane %v258_v38, 4  ;;  %v12995_v40 = vsel %vm425_vm2, %v258_v38, %v426_v36  ;;  %v10523_v41 = vpop.f32.mrb[5].mxu1  ;;  %11543 = vmatprep.subr.bf16.mxu0 %v17821_v0  ;;  %v9103_v36 = vld [vmem:[%s17809_s2 + $0xa0] sm:$0xff] }
  0xf0   :  { %v437_v54 = vmul.f32 %v12995_v40, %v13019_v52  ;;  %v442_v2 = vmul.f32 %v12995_v40, %v13060_v62  ;;  %v447_v12 = vmul.f32 %v12995_v40, %v137_v10  ;;  %v452_v26 = vmul.f32 %v12995_v40, %v13126_v22  ;;  %v9106_v40 = vld [vmem:[%s17809_s2 + $0xb8] sm:$0xff] }
  0xf1   :  { %v12998_v42 = vsel %vm425_vm2, %v427_v34, %v429_v39  ;;  %v9102_v34 = vld [vmem:[%s17809_s2 + $0x98] sm:$0xff]  ;;  %v11547_v38 = vpack.c.bf16 %v9104_v37, %v9103_v36  ;;  %v9105_v39 = vld [vmem:[%s17809_s2 + $0xb0] sm:$0xff] }
  0xf2   :  { %v439_v58 = vmul.f32 %v12998_v42, %v13036_v56  ;;  %v444_v7 = vmul.f32 %v12998_v42, %v13075_v5  ;;  %v449_v17 = vmul.f32 %v12998_v42, %v139_v14  ;;  %v454_v29 = vmul.f32 %v12998_v42, %v13140_v28  ;;  %v146_v42 = vld [vmem:[%s17812_s8 + $0x50] sm:$0xff] }
  0xf3   :  { %v11544_v35 = vpack.c.bf16 %v9102_v34, %v9101_v32  ;;  %v11550_v41 = vpack.c.bf16 %v9106_v40, %v9105_v39  ;;  %v156_v40 = vld [vmem:[%s17812_s8 + $0xf0] sm:$0xff] }
  0xf5   :  { %11545 = vmatpush3.bf16.msra.mxu0 %v11544_v35 }
  0xf6   :  { %v328_v43 = vpop.f32.mrb[6].mxu1  ;;  %11546 = vmatprep.subr.bf16.mxu0 %v17821_v0 }
  0xf7   :  { %v10542_v44 = vpop.f32.mrb[7].mxu1 }
  0xf8   :  { %v478_v44 = vrot.slane %v146_v42, 6 }
  0xf9   :  { %11548 = vmatpush3.bf16.msra.mxu0 %v11547_v38 }
  0xfa   :  { %v333_v45 = vpop.f32.mrb[8].mxu1  ;;  %11549 = vmatprep.subr.bf16.mxu0 %v17821_v0 }
  0xfb   :  { %v11552_v47 = vpack.c.bf16 %v333_v45, %v328_v43  ;;  %v10545_v48 = vpop.f32.mrb[9].mxu1  ;;  %v147_v43 = vld [vmem:[%s17812_s8 + $0x60] sm:$0xff]  ;;  %v148_v45 = vld [vmem:[%s17812_s8 + $0x70] sm:$0xff] }
  0xfd   :  { %11554 = vmatprep.subr.msk.bf16.mxu1 %vm13002_vm3, %v11552_v47  ;;  %11551 = vmatpush3.bf16.msra.mxu0 %v11550_v41 }
  0xfe   :  { %11557 = vmatpush3.bf16.xpose.msk.msra.mxu1 %vm13002_vm3, %v11552_v47  ;;  %v338_v49 = vpop.f32.mrb[10].mxu1  ;;  %v149_v47 = vld [vmem:[%s17812_s8 + $0x80] sm:$0xff] }
  0xff   :  { %v10548_v50 = vpop.f32.mrb[11].mxu1  ;;  %10578 = vmatprep.subr.msk.mxu1 %vm172_vm1, %v338_v49 }
 0x100   :  { %10566 = vmatmul.mubr.msk.f32.vlgmr.msra.gmra.mrb[0].mxu0 %vm172_vm1, %v12924_v16  ;;  %v145_v16 = vld [vmem:[%s17812_s8 + $0x40] sm:$0xc0] }
 0x101   :  { %10568 = vmatprep.mubr.msk.f32.mxu0 %vm12830_vm0, %v17819_v4 }
 0x104   :  { %10569 = vmatmul.mubr.msk.f32.gmra.mrb[2].mxu0 %vm172_vm1, %v12940_v20  ;;  %v477_v20 = vrot.slane %v145_v16, 6  ;;  %v496_v16 = vrot.slane %v155_v33, 6 }
 0x105   :  { %10571 = vmatprep.mubr.msk.f32.mxu0 %vm12830_vm0, %v17819_v4 }
 0x106   :  { %10579 = vmatpush3.xpose.msk.msra.mxu1 %vm172_vm1, %v338_v49  ;;  %v13200_v48 = vsel %vm476_vm4, %v477_v20, %v478_v44  ;;  %v482_v49 = vrot.slane %v148_v45, 6  ;;  %v498_v45 = vrot.slane %v156_v40, 6 }
 0x107   :  { %11562 = vmatprep.subr.bf16.mxu1 %v17821_v0 }
 0x108   :  { %10572 = vmatmul.mubr.msk.f32.gmra.mrb[4].mxu0 %vm172_vm1, %v12956_v24  ;;  %v480_v24 = vrot.slane %v147_v43, 6 }
 0x109   :  { %10581 = vmatmul.mubr.msk.f32.vlgmr.msra.gmra.mrb[12].mxu1 %vm172_vm1, %v436_v53  ;;  %v150_v53 = vld [vmem:[%s17812_s8 + $0x90] sm:$0xff] }
 0x10a   :  { %10583 = vmatprep.mubr.msk.f32.mxu1 %vm172_vm1, %v437_v54  ;;  %v13206_v54 = vsel %vm476_vm4, %v478_v44, %v480_v24  ;;  %v13215_v1 = vsel %vm476_vm4, %v480_v24, %v482_v49  ;;  %v157_v44 = vld [vmem:[%s17812_s8 + $0x100] sm:$0xff] }
 0x10d   :  { %10584 = vmatmul.mubr.msk.f32.gmra.mrb[14].mxu1 %vm172_vm1, %v438_v57 }
 0x10e   :  { %10586 = vmatprep.mubr.msk.f32.mxu1 %vm172_vm1, %v439_v58  ;;  %v484_v58 = vrot.slane %v149_v47, 6 }
 0x110   :  { %v13226_v10 = vsel %vm476_vm4, %v482_v49, %v484_v58 }
 0x111   :  { %10587 = vmatmul.mubr.msk.f32.gmra.mrb[16].mxu1 %vm172_vm1, %v440_v61 }
 0x112   :  { %10589 = vmatprep.mubr.msk.f32.mxu1 %vm172_vm1, %v441_v63  ;;  %v151_v63 = vld [vmem:[%s17812_s8 + $0xa0] sm:$0xff] }
 0x115   :  { %10590 = vmatmul.mubr.msk.f32.gmra.mrb[18].mxu1 %vm172_vm1, %v442_v2  ;;  %v486_v2 = vrot.slane %v150_v53, 6  ;;  %v158_v53 = vld [vmem:[%s17812_s8 + $0x110] sm:$0xff] }
 0x116   :  { %10592 = vmatprep.mubr.msk.f32.mxu1 %vm172_vm1, %v443_v3 }
 0x119   :  { %10593 = vmatmul.mubr.msk.f32.gmra.mrb[20].mxu1 %vm172_vm1, %v444_v7 }
 0x11a   :  { %10595 = vmatprep.mubr.msk.f32.mxu1 %vm172_vm1, %v445_v8  ;;  %v152_v8 = vld [vmem:[%s17812_s8 + $0xb0] sm:$0xff] }
 0x11b   :  { %v490_v19 = vrot.slane %v152_v8, 6  ;;  %v502_v8 = vrot.slane %v158_v53, 6 }
 0x11d   :  { %10596 = vmatmul.mubr.msk.f32.gmra.mrb[22].mxu1 %vm172_vm1, %v446_v11 }
 0x11e   :  { %10598 = vmatprep.mubr.msk.f32.mxu1 %vm172_vm1, %v447_v12  ;;  %v488_v12 = vrot.slane %v151_v63, 6  ;;  %v500_v63 = vrot.slane %v157_v44, 6 }
 0x120   :  { %v13257_v34 = vsel %vm476_vm4, %v488_v12, %v490_v19  ;;  %v13323_v33 = vsel %vm476_vm4, %v500_v63, %v502_v8 }
 0x121   :  { %10599 = vmatmul.mubr.msk.f32.gmra.mrb[24].mxu1 %vm172_vm1, %v448_v15  ;;  %v153_v15 = vld [vmem:[%s17812_s8 + $0xc0] sm:$0xff] }
 0x122   :  { %10601 = vmatprep.mubr.msk.f32.mxu1 %vm172_vm1, %v449_v17  ;;  %v13235_v17 = vsel %vm476_vm4, %v484_v58, %v486_v2  ;;  %v492_v31 = vrot.slane %v153_v15, 6 }
 0x124   :  { %v13270_v41 = vsel %vm476_vm4, %v490_v19, %v492_v31 }
 0x125   :  { %10602 = vmatmul.mubr.msk.f32.gmra.mrb[26].mxu1 %vm172_vm1, %v450_v21 }
 0x126   :  { %10604 = vmatprep.mubr.msk.f32.mxu1 %vm172_vm1, %v451_v23 }
 0x129   :  { %10605 = vmatmul.mubr.msk.f32.gmra.mrb[28].mxu1 %vm172_vm1, %v452_v26 }
 0x12a   :  { %10607 = vmatprep.mubr.msk.f32.mxu1 %vm172_vm1, %v453_v27  ;;  %v154_v27 = vld [vmem:[%s17812_s8 + $0xd0] sm:$0xff] }
 0x12b   :  { %v494_v35 = vrot.slane %v154_v27, 6 }
 0x12d   :  { %10608 = vmatmul.mubr.msk.f32.gmra.mrb[30].mxu1 %vm172_vm1, %v454_v29  ;;  %v13248_v29 = vsel %vm476_vm4, %v486_v2, %v488_v12  ;;  %v13279_v20 = vsel %vm476_vm4, %v492_v31, %v494_v35  ;;  %v161_v31 = vld [vmem:[%s17812_s8 + $0x140] sm:$0xff] }
 0x1dc   :  { %v10582_v50 = vpop.f32.mrb[12].mxu1 }
 0x1dd   :  { %v673_v57 = vpop.f32.mrb[13].mxu1  ;;  %v13218_v3 = vadd.f32 %v10582_v50, %v13206_v54 }
 0x1de   :  { %v13209_v61 = vadd.f32 %v673_v57, %v13200_v48  ;;  %v13292_v57 = vsel %vm476_vm4, %v494_v35, %v496_v16 }
 0x1df   :  { %v776_v26 = vsel %vm772_vm5, %v13218_v3, -inf }
 0x1e0   :  { %v10585_v6 = vpop.f32.mrb[14].mxu1  ;;  %v773_v7 = vsel %vm772_vm5, %v13209_v61, -inf }
 0x1e1   :  { %v683_v11 = vpop.f32.mrb[15].mxu1  ;;  %774 = vmax.xlane.f32.xlu0 %v773_v7  ;;  %v13238_v21 = vadd.f32 %v10585_v6, %v13226_v10  ;;  %v159_v6 = vld [vmem:[%s17812_s8 + $0x120] sm:$0xff]  ;;  %v13301_v7 = vsel %vm476_vm4, %v496_v16, %v498_v45 }
 0x1e2   :  { %v13229_v14 = vadd.f32 %v683_v11, %v13215_v1  ;;  %v504_v27 = vrot.slane %v159_v6, 6 }
 0x1e3   :  { %v782_v38 = vsel %vm772_vm5, %v13238_v21, -inf }
 0x1e4   :  { %v10588_v23 = vpop.f32.mrb[16].mxu1  ;;  %v779_v25 = vsel %vm772_vm5, %v13229_v14, -inf  ;;  %v13336_v16 = vsel %vm476_vm4, %v502_v8, %v504_v27 }
 0x1e5   :  { %v693_v30 = vpop.f32.mrb[17].mxu1  ;;  %780 = vmax.xlane.f32.xlu1 %v779_v25  ;;  %777 = vmax.xlane.f32.xlu0 %v776_v26  ;;  %v13260_v36 = vadd.f32 %v10588_v23, %v13248_v29  ;;  %v160_v23 = vld [vmem:[%s17812_s8 + $0x130] sm:$0xff]  ;;  %v13314_v25 = vsel %vm476_vm4, %v498_v45, %v500_v63  ;;  %v508_v45 = vrot.slane %v161_v31, 6 }
 0x1e6   :  { %v13251_v32 = vadd.f32 %v693_v30, %v13235_v17  ;;  %v506_v35 = vrot.slane %v160_v23, 6 }
 0x1e7   :  { %v788_v49 = vsel %vm772_vm5, %v13260_v36, -inf }
 0x1e8   :  { %v10591_v37 = vpop.f32.mrb[18].mxu1  ;;  %v785_v39 = vsel %vm772_vm5, %v13251_v32, -inf }
 0x1e9   :  { %v703_v42 = vpop.f32.mrb[19].mxu1  ;;  %783 = vmax.xlane.f32.xlu1 %v782_v38  ;;  %786 = vmax.xlane.f32.xlu0 %v785_v39  ;;  %v13282_v24 = vadd.f32 %v10591_v37, %v13270_v41 }
 0x1ea   :  { %v13273_v43 = vadd.f32 %v703_v42, %v13257_v34  ;;  %v162_v42 = vld [vmem:[%s17812_s8 + $0x150] sm:$0xff] }
 0x1eb   :  { %v794_v15 = vsel %vm772_vm5, %v13282_v24, -inf  ;;  %v510_v53 = vrot.slane %v162_v42, 6 }
 0x1ec   :  { %v10594_v47 = vpop.f32.mrb[20].mxu1  ;;  %v791_v50 = vsel %vm772_vm5, %v13273_v43, -inf }
 0x1ed   :  { %v713_v58 = vpop.f32.mrb[21].mxu1  ;;  %789 = vmax.xlane.f32.xlu1 %v788_v49  ;;  %792 = vmax.xlane.f32.xlu0 %v791_v50  ;;  %v13304_v11 = vadd.f32 %v10594_v47, %v13292_v57  ;;  %v163_v49 = vld [vmem:[%s17812_s8 + $0x160] sm:$0xff]  ;;  %v13345_v50 = vsel %vm476_vm4, %v504_v27, %v506_v35  ;;  %v13367_v31 = vsel %vm476_vm4, %v508_v45, %v510_v53 }
 0x1ee   :  { %v13295_v2 = vadd.f32 %v713_v58, %v13279_v20  ;;  %v512_v23 = vrot.slane %v163_v49, 6  ;;  %v165_v27 = vld [vmem:[%s17812_s8 + $0x180] sm:$0x3f]  ;;  %17867 = vst [vmem:[#allocation2_spill] sm:$0xff] %v13367_v31 }
 0x1ef   :  { %v800_v39 = vsel %vm772_vm5, %v13304_v11, -inf }
 0x1f0   :  { %v10597_v12 = vpop.f32.mrb[22].mxu1  ;;  %v797_v19 = vsel %vm772_vm5, %v13295_v2, -inf }
 0x1f1   :  { %v723_v26 = vpop.f32.mrb[23].mxu1  ;;  %795 = vmax.xlane.f32.xlu1 %v794_v15  ;;  %798 = vmax.xlane.f32.xlu0 %v797_v19  ;;  %v13326_v37 = vadd.f32 %v10597_v12, %v13314_v25  ;;  %v164_v12 = vld [vmem:[%s17812_s8 + $0x170] sm:$0xff]  ;;  %v13358_v15 = vsel %vm476_vm4, %v506_v35, %v508_v45 }
 0x1f2   :  { %v13317_v30 = vadd.f32 %v723_v26, %v13301_v7 }
 0x1f3   :  { %v806_v6 = vsel %vm772_vm5, %v13326_v37, -inf }
 0x1f4   :  { %v10600_v38 = vpop.f32.mrb[24].mxu1  ;;  %v803_v40 = vsel %vm772_vm5, %v13317_v30, -inf }
 0x1f5   :  { %v733_v44 = vpop.f32.mrb[25].mxu1  ;;  %801 = vmax.xlane.f32.xlu1 %v800_v39  ;;  %804 = vmax.xlane.f32.xlu0 %v803_v40  ;;  %v13348_v58 = vadd.f32 %v10600_v38, %v13336_v16  ;;  %v514_v38 = vrot.slane %v164_v12, 6 }
 0x1f6   :  { %v13339_v47 = vadd.f32 %v733_v44, %v13323_v33  ;;  %v13377_v44 = vsel %vm476_vm4, %v510_v53, %v512_v23 }
 0x1f7   :  { %v812_v40 = vsel %vm772_vm5, %v13348_v58, -inf  ;;  %17868 = vst [vmem:[#allocation3_spill] sm:$0xff] %v13377_v44 }
 0x1f8   :  { %v10603_v63 = vpop.f32.mrb[26].mxu1  ;;  %v809_v8 = vsel %vm772_vm5, %v13339_v47, -inf }
 0x1f9   :  { %v743_v19 = vpop.f32.mrb[27].mxu1  ;;  %807 = vmax.xlane.f32.xlu1 %v806_v6  ;;  %810 = vmax.xlane.f32.xlu0 %v809_v8  ;;  %v13370_v39 = vadd.f32 %v10603_v63, %v13358_v15  ;;  %v516_v6 = vrot.slane %v165_v27, 6  ;;  %v13383_v63 = vsel %vm476_vm4, %v512_v23, %v514_v38 }
 0x1fa   :  { %v13361_v26 = vadd.f32 %v743_v19, %v13345_v50  ;;  %17869 = vst [vmem:[#allocation4_spill] sm:$0xff] %v13383_v63 }
 0x1fb   :  { %v818_v19 = vsel %vm772_vm5, %v13370_v39, -inf }
 0x1fc   :  { %v10606_v35 = vpop.f32.mrb[28].mxu1  ;;  %v815_v42 = vsel %vm772_vm5, %v13361_v26, -inf }
 0x1fd   :  { %v753_v49 = vpop.f32.mrb[29].mxu1  ;;  %813 = vmax.xlane.f32.xlu1 %v812_v40  ;;  %816 = vmax.xlane.f32.xlu0 %v815_v42  ;;  %v13386_v8 = vadd.f32 %v10606_v35, %v13377_v44  ;;  %v13393_v40 = vsel %vm476_vm4, %v514_v38, %v516_v6 }
 0x1fe   :  { %v13380_v45 = vadd.f32 %v753_v49, %v13367_v31  ;;  %17870 = vst [vmem:[#allocation5_spill] sm:$0xff] %v13393_v40 }
 0x1ff   :  { %v824_v35 = vsel %vm772_vm5, %v13386_v8, -inf }
 0x200   :  { %v10609_v12 = vpop.f32.mrb[30].mxu1  ;;  %v821_v53 = vsel %vm772_vm5, %v13380_v45, -inf }
 0x201   :  { %v763_v27 = vpop.f32.mrb[31].mxu1  ;;  %819 = vmax.xlane.f32.xlu1 %v818_v19  ;;  %822 = vmax.xlane.f32.xlu0 %v821_v53  ;;  %v13399_v23 = vadd.f32 %v10609_v12, %v13393_v40 }
 0x202   :  { %v13396_v42 = vadd.f32 %v763_v27, %v13383_v63 }
 0x203   :  { %v830_v38 = vsel %vm772_vm5, %v13399_v23, -inf }
 0x204   :  { %v827_v49 = vsel %vm772_vm5, %v13396_v42, -inf }
 0x205   :  { %825 = vmax.xlane.f32.xlu1 %v824_v35  ;;  %828 = vmax.xlane.f32.xlu0 %v827_v49 }
 0x209   :  { %831 = vmax.xlane.f32.xlu1 %v830_v38 }
 0x26e   :  { %v775_v6 = vpop.xlane.xlu0 %774 }
 0x26f   :  { %v833_v19 = vsub.f32 %v13209_v61, %v775_v6 }
 0x271   :  { %v853_v53 = vmul.f32 1.442695, %v833_v19 }
 0x272   :  { %v781_v27 = vpop.xlane.xlu1 %780  ;;  %v778_v4 = vpop.xlane.xlu0 %777 }
 0x273   :  { %12230 = vpow2.f32 %v853_v53  ;;  %v835_v12 = vsub.f32 %v13229_v14, %v781_v27  ;;  %v834_v0 = vsub.f32 %v13218_v3, %v778_v4 }
 0x275   :  { %v857_v63 = vmul.f32 1.442695, %v835_v12  ;;  %v855_v40 = vmul.f32 1.442695, %v834_v0 }
 0x276   :  { %v784_v31 = vpop.xlane.xlu1 %783  ;;  %v787_v35 = vpop.xlane.xlu0 %786 }
 0x277   :  { %12232 = vpow2.f32 %v857_v63  ;;  %v836_v49 = vsub.f32 %v13238_v21, %v784_v31  ;;  %v837_v38 = vsub.f32 %v13251_v32, %v787_v35 }
 0x278   :  { %12234 = vpow2.f32 %v855_v40 }
 0x279   :  { %v859_v44 = vmul.f32 1.442695, %v836_v49  ;;  %v861_v61 = vmul.f32 1.442695, %v837_v38 }
 0x27a   :  { %v790_v6 = vpop.xlane.xlu1 %789  ;;  %v793_v19 = vpop.xlane.xlu0 %792 }
 0x27b   :  { %12236 = vpow2.f32 %v859_v44  ;;  %v838_v53 = vsub.f32 %v13260_v36, %v790_v6  ;;  %v839_v14 = vsub.f32 %v13273_v43, %v793_v19 }
 0x27c   :  { %12238 = vpow2.f32 %v861_v61 }
 0x27d   :  { %v13414_v4 = vpop.eup %12230  ;;  %v863_v0 = vmul.f32 1.442695, %v838_v53  ;;  %v865_v3 = vmul.f32 1.442695, %v839_v14 }
 0x27e   :  { %v796_v63 = vpop.xlane.xlu1 %795  ;;  %v799_v27 = vpop.xlane.xlu0 %798  ;;  %v893_v21 = vsel %vm772_vm5, %v13414_v4, 0.0 }
 0x27f   :  { %12240 = vpow2.f32 %v863_v0  ;;  %v840_v32 = vsub.f32 %v13282_v24, %v796_v63  ;;  %v841_v31 = vsub.f32 %v13295_v2, %v799_v27  ;;  %894 = vadd.xlane.f32.xlu0 %v893_v21 }
 0x280   :  { %12242 = vpow2.f32 %v865_v3 }
 0x281   :  { %v13420_v36 = vpop.eup %12232  ;;  %v867_v43 = vmul.f32 1.442695, %v840_v32  ;;  %v869_v44 = vmul.f32 1.442695, %v841_v31 }
 0x282   :  { %v13422_v40 = vpop.eup %12234  ;;  %v802_v12 = vpop.xlane.xlu1 %801  ;;  %v899_v49 = vsel %vm772_vm5, %v13420_v36, 0.0 }
 0x283   :  { %v805_v35 = vpop.xlane.xlu0 %804  ;;  %12244 = vpow2.f32 %v867_v43  ;;  %v842_v38 = vsub.f32 %v13304_v11, %v802_v12  ;;  %900 = vadd.xlane.f32.xlu0 %v899_v49  ;;  %v896_v2 = vsel %vm772_vm5, %v13422_v40, 0.0 }
 0x284   :  { %v843_v24 = vsub.f32 %v13317_v30, %v805_v35  ;;  %12246 = vpow2.f32 %v869_v44  ;;  %897 = vadd.xlane.f32.xlu1 %v896_v2  ;;  %v408_v2 = vpop.f32.mrb[0].mxu0 }
 0x285   :  { %v13430_v61 = vpop.eup %12236  ;;  %v871_v6 = vmul.f32 1.442695, %v842_v38 }
 0x286   :  { %v873_v19 = vmul.f32 1.442695, %v843_v24  ;;  %v13432_v53 = vpop.eup %12238  ;;  %v808_v14 = vpop.xlane.xlu1 %807  ;;  %v902_v3 = vsel %vm772_vm5, %v13430_v61, 0.0 }
 0x287   :  { %v811_v0 = vpop.xlane.xlu0 %810  ;;  %12248 = vpow2.f32 %v871_v6  ;;  %v844_v11 = vsub.f32 %v13326_v37, %v808_v14  ;;  %v905_v63 = vsel %vm772_vm5, %v13432_v53, 0.0 }
 0x288   :  { %v845_v30 = vsub.f32 %v13339_v47, %v811_v0  ;;  %12250 = vpow2.f32 %v873_v19  ;;  %903 = vadd.xlane.f32.xlu1 %v902_v3  ;;  %906 = vadd.xlane.f32.xlu0 %v905_v63 }
 0x289   :  { %v13440_v27 = vpop.eup %12240  ;;  %v875_v21 = vmul.f32 1.442695, %v844_v11  ;;  %v10567_v11 = vpop.f32.mrb[1].mxu0 }
 0x28a   :  { %v877_v32 = vmul.f32 1.442695, %v845_v30  ;;  %v13442_v31 = vpop.eup %12242  ;;  %v814_v43 = vpop.xlane.xlu1 %813  ;;  %v908_v12 = vsel %vm772_vm5, %v13440_v27, 0.0 }
 0x28b   :  { %v817_v44 = vpop.xlane.xlu0 %816  ;;  %12252 = vpow2.f32 %v875_v21  ;;  %v846_v37 = vsub.f32 %v13348_v58, %v814_v43  ;;  %v911_v35 = vsel %vm772_vm5, %v13442_v31, 0.0  ;;  %v413_v30 = vpop.f32.mrb[2].mxu0 }
 0x28c   :  { %v847_v47 = vsub.f32 %v13361_v26, %v817_v44  ;;  %12254 = vpow2.f32 %v877_v32  ;;  %909 = vadd.xlane.f32.xlu1 %v908_v12  ;;  %912 = vadd.xlane.f32.xlu0 %v911_v35  ;;  %v11558_v43 = vpack.c.bf16 %v413_v30, %v408_v2  ;;  %v10570_v44 = vpop.f32.mrb[3].mxu0 }
 0x28d   :  { %v13450_v49 = vpop.eup %12244  ;;  %v879_v38 = vmul.f32 1.442695, %v846_v37 }
 0x28e   :  { %v881_v24 = vmul.f32 1.442695, %v847_v47  ;;  %v13452_v6 = vpop.eup %12246  ;;  %v820_v19 = vpop.xlane.xlu1 %819  ;;  %v914_v58 = vsel %vm772_vm5, %v13450_v49, 0.0  ;;  %11559 = vmatprep.subr.bf16.mxu0 %v11558_v43 }
 0x28f   :  { %v823_v14 = vpop.xlane.xlu0 %822  ;;  %12256 = vpow2.f32 %v879_v38  ;;  %v848_v26 = vsub.f32 %v13370_v39, %v820_v19  ;;  %v917_v3 = vsel %vm772_vm5, %v13452_v6, 0.0  ;;  %11561 = vmatpush3.bf16.msra.mxu0 %v11558_v43 }
 0x290   :  { %v849_v0 = vsub.f32 %v13380_v45, %v823_v14  ;;  %12258 = vpow2.f32 %v881_v24  ;;  %915 = vadd.xlane.f32.xlu1 %v914_v58  ;;  %918 = vadd.xlane.f32.xlu0 %v917_v3 }
 0x291   :  { %v13460_v63 = vpop.eup %12248  ;;  %v883_v21 = vmul.f32 1.442695, %v848_v26 }
 0x292   :  { %v885_v32 = vmul.f32 1.442695, %v849_v0  ;;  %v13462_v12 = vpop.eup %12250  ;;  %v826_v37 = vpop.xlane.xlu1 %825  ;;  %v920_v45 = vsel %vm772_vm5, %v13460_v63, 0.0 }
 0x293   :  { %v829_v39 = vpop.xlane.xlu0 %828  ;;  %12260 = vpow2.f32 %v883_v21  ;;  %v850_v47 = vsub.f32 %v13386_v8, %v826_v37  ;;  %v923_v38 = vsel %vm772_vm5, %v13462_v12, 0.0 }
 0x294   :  { %v851_v35 = vsub.f32 %v13396_v42, %v829_v39  ;;  %12262 = vpow2.f32 %v885_v32  ;;  %921 = vadd.xlane.f32.xlu1 %v920_v45  ;;  %924 = vadd.xlane.f32.xlu0 %v923_v38  ;;  %v17871_v45 = vmov 0.0|0.0  }
 0x295   :  { %v13470_v24 = vpop.eup %12252  ;;  %v887_v2 = vmul.f32 1.442695, %v850_v47 }
 0x296   :  { %v889_v19 = vmul.f32 1.442695, %v851_v35  ;;  %v13472_v14 = vpop.eup %12254  ;;  %v832_v58 = vpop.xlane.xlu1 %831  ;;  %v926_v8 = vsel %vm772_vm5, %v13470_v24, 0.0 }
 0x297   :  { %12264 = vpow2.f32 %v887_v2  ;;  %v852_v42 = vsub.f32 %v13399_v23, %v832_v58  ;;  %v929_v26 = vsel %vm772_vm5, %v13472_v14, 0.0  ;;  %v418_v23 = vpop.f32.mrb[4].mxu0 }
 0x298   :  { %12266 = vpow2.f32 %v889_v19  ;;  %927 = vadd.xlane.f32.xlu1 %v926_v8  ;;  %930 = vadd.xlane.f32.xlu0 %v929_v26  ;;  %v10573_v43 = vpop.f32.mrb[5].mxu0 }
 0x299   :  { %v13479_v0 = vpop.eup %12256  ;;  %v891_v3 = vmul.f32 1.442695, %v852_v42  ;;  %10614 = vmatprep.subr.msk.mxu0 %vm425_vm2, %v418_v23 }
 0x29a   :  { %v13481_v11 = vpop.eup %12258  ;;  %v932_v30 = vsel %vm772_vm5, %v13479_v0, 0.0  ;;  %10615 = vmatpush3.msk.msra.mxu0 %vm425_vm2, %v418_v23 }
 0x29b   :  { %12268 = vpow2.f32 %v891_v3  ;;  %v935_v21 = vsel %vm772_vm5, %v13481_v11, 0.0  ;;  %11592 = vmatprep.subr.bf16.mxu0 %v17871_v45 }
 0x29c   :  { %933 = vadd.xlane.f32.xlu1 %v932_v30  ;;  %936 = vadd.xlane.f32.xlu0 %v935_v21 }
 0x29d   :  { %v13487_v32 = vpop.eup %12260 }
 0x29e   :  { %v13490_v44 = vpop.eup %12262  ;;  %v938_v37 = vsel %vm772_vm5, %v13487_v32, 0.0 }
 0x29f   :  { %v941_v39 = vsel %vm772_vm5, %v13490_v44, 0.0 }
 0x2a0   :  { %939 = vadd.xlane.f32.xlu1 %v938_v37  ;;  %942 = vadd.xlane.f32.xlu0 %v941_v39 }
 0x2a1   :  { %v13498_v47 = vpop.eup %12264 }
 0x2a2   :  { %v13500_v35 = vpop.eup %12266  ;;  %v944_v38 = vsel %vm772_vm5, %v13498_v47, 0.0 }
 0x2a3   :  { %v947_v2 = vsel %vm772_vm5, %v13500_v35, 0.0 }
 0x2a4   :  { %945 = vadd.xlane.f32.xlu1 %v944_v38  ;;  %948 = vadd.xlane.f32.xlu0 %v947_v2 }
 0x2a5   :  { %v13506_v19 = vpop.eup %12268 }
 0x2a6   :  { %v950_v58 = vsel %vm772_vm5, %v13506_v19, 0.0 }
 0x2a8   :  { %951 = vadd.xlane.f32.xlu1 %v950_v58 }
 0x30c   :  { %v895_v8 = vpop.xlane.xlu0 %894 }
 0x30d   :  { %12270 = vrcp.f32 %v895_v8 }
 0x310   :  { %v901_v42 = vpop.xlane.xlu0 %900 }
 0x311   :  { %v898_v26 = vpop.xlane.xlu1 %897  ;;  %12272 = vrcp.f32 %v901_v42 }
 0x312   :  { %12274 = vrcp.f32 %v898_v26 }
 0x315   :  { %v904_v3 = vpop.xlane.xlu1 %903  ;;  %v907_v30 = vpop.xlane.xlu0 %906 }
 0x316   :  { %12276 = vrcp.f32 %v904_v3 }
 0x317   :  { %v12271_v21 = vpop.eup %12270  ;;  %12278 = vrcp.f32 %v907_v30 }
 0x318   :  { %v973_v23 = vmul.f32 %v12271_v21, %v13414_v4 }
 0x319   :  { %v910_v43 = vpop.xlane.xlu1 %909  ;;  %v913_v37 = vpop.xlane.xlu0 %912 }
 0x31a   :  { %12280 = vrcp.f32 %v910_v43  ;;  %10616 = vmatprep.mubr.msk.f32.mxu0 %vm772_vm5, %v973_v23 }
 0x31b   :  { %v12273_v39 = vpop.eup %12272  ;;  %12282 = vrcp.f32 %v913_v37 }
 0x31c   :  { %v12275_v38 = vpop.eup %12274  ;;  %v975_v2 = vmul.f32 %v12273_v39, %v13420_v36 }
 0x31d   :  { %v974_v58 = vmul.f32 %v12275_v38, %v13422_v40  ;;  %v916_v8 = vpop.xlane.xlu1 %915  ;;  %v919_v42 = vpop.xlane.xlu0 %918 }
 0x31e   :  { %12284 = vrcp.f32 %v916_v8 }
 0x31f   :  { %12286 = vrcp.f32 %v919_v42  ;;  %10617 = vmatmul.mubr.msk.f32.vlgmr.msra.gmra.mrb[6].mxu0 %vm772_vm5, %v974_v58 }
 0x320   :  { %v12277_v26 = vpop.eup %12276  ;;  %10619 = vmatprep.mubr.msk.f32.mxu0 %vm772_vm5, %v975_v2 }
 0x321   :  { %v12279_v4 = vpop.eup %12278  ;;  %v922_v3 = vpop.xlane.xlu1 %921  ;;  %v976_v21 = vmul.f32 %v12277_v26, %v13430_v61 }
 0x322   :  { %v925_v30 = vpop.xlane.xlu0 %924  ;;  %12288 = vrcp.f32 %v922_v3  ;;  %v977_v23 = vmul.f32 %v12279_v4, %v13432_v53 }
 0x323   :  { %12290 = vrcp.f32 %v925_v30  ;;  %10620 = vmatmul.mubr.msk.f32.gmra.mrb[8].mxu0 %vm772_vm5, %v976_v21 }
 0x324   :  { %v12281_v36 = vpop.eup %12280  ;;  %10622 = vmatprep.mubr.msk.f32.mxu0 %vm772_vm5, %v977_v23 }
 0x325   :  { %v12283_v40 = vpop.eup %12282  ;;  %v928_v43 = vpop.xlane.xlu1 %927  ;;  %v978_v39 = vmul.f32 %v12281_v36, %v13440_v27 }
 0x326   :  { %v931_v37 = vpop.xlane.xlu0 %930  ;;  %12292 = vrcp.f32 %v928_v43  ;;  %v979_v38 = vmul.f32 %v12283_v40, %v13442_v31 }
 0x327   :  { %12294 = vrcp.f32 %v931_v37  ;;  %10623 = vmatmul.mubr.msk.f32.gmra.mrb[10].mxu0 %vm772_vm5, %v978_v39 }
 0x328   :  { %v12285_v61 = vpop.eup %12284  ;;  %10625 = vmatprep.mubr.msk.f32.mxu0 %vm772_vm5, %v979_v38 }
 0x329   :  { %v12287_v53 = vpop.eup %12286  ;;  %v934_v2 = vpop.xlane.xlu1 %933  ;;  %v980_v8 = vmul.f32 %v12285_v61, %v13450_v49 }
 0x32a   :  { %v937_v58 = vpop.xlane.xlu0 %936  ;;  %12296 = vrcp.f32 %v934_v2  ;;  %v981_v42 = vmul.f32 %v12287_v53, %v13452_v6 }
 0x32b   :  { %12298 = vrcp.f32 %v937_v58  ;;  %10626 = vmatmul.mubr.msk.f32.gmra.mrb[12].mxu0 %vm772_vm5, %v980_v8 }
 0x32c   :  { %v12289_v27 = vpop.eup %12288  ;;  %10628 = vmatprep.mubr.msk.f32.mxu0 %vm772_vm5, %v981_v42 }
 0x32d   :  { %v12291_v31 = vpop.eup %12290  ;;  %v940_v26 = vpop.xlane.xlu1 %939  ;;  %v982_v3 = vmul.f32 %v12289_v27, %v13460_v63  ;;  %v9110_v27 = vld [vmem:[%s17809_s2 + $0xd8] sm:$0xff] }
 0x32e   :  { %v943_v4 = vpop.xlane.xlu0 %942  ;;  %12300 = vrcp.f32 %v940_v26  ;;  %v983_v30 = vmul.f32 %v12291_v31, %v13462_v12  ;;  %v9111_v26 = vld [vmem:[%s17809_s2 + $0xe0] sm:$0xff] }
 0x32f   :  { %12302 = vrcp.f32 %v943_v4  ;;  %10629 = vmatmul.mubr.msk.f32.gmra.mrb[14].mxu0 %vm772_vm5, %v982_v3  ;;  %v9112_v4 = vld [vmem:[%s17809_s2 + $0xe8] sm:$0xff] }
 0x330   :  { %v12293_v49 = vpop.eup %12292  ;;  %10631 = vmatprep.mubr.msk.f32.mxu0 %vm772_vm5, %v983_v30  ;;  %v11599_v3 = vpack.c.bf16 %v9112_v4, %v9111_v26  ;;  %v9113_v30 = vld [vmem:[%s17809_s2 + $0xf0] sm:$0xff] }
 0x331   :  { %v12295_v6 = vpop.eup %12294  ;;  %v946_v21 = vpop.xlane.xlu1 %945  ;;  %v984_v36 = vmul.f32 %v12293_v49, %v13470_v24  ;;  %v9114_v49 = vld [vmem:[%s17809_s2 + $0xf8] sm:$0xff] }
 0x332   :  { %v949_v23 = vpop.xlane.xlu0 %948  ;;  %12304 = vrcp.f32 %v946_v21  ;;  %v985_v40 = vmul.f32 %v12295_v6, %v13472_v14  ;;  %v11602_v6 = vpack.c.bf16 %v9114_v49, %v9113_v30 }
 0x333   :  { %12306 = vrcp.f32 %v949_v23  ;;  %10632 = vmatmul.mubr.msk.f32.gmra.mrb[16].mxu0 %vm772_vm5, %v984_v36 }
 0x334   :  { %v12297_v63 = vpop.eup %12296  ;;  %10634 = vmatprep.mubr.msk.f32.mxu0 %vm772_vm5, %v985_v40  ;;  %v13587_v40 = vld [vmem:[%s17811_s7] sm:$0xff] }
 0x335   :  { %v12299_v12 = vpop.eup %12298  ;;  %v952_v43 = vpop.xlane.xlu1 %951  ;;  %v986_v37 = vmul.f32 %v12297_v63, %v13479_v0 }
 0x336   :  { %12308 = vrcp.f32 %v952_v43  ;;  %v987_v39 = vmul.f32 %v12299_v12, %v13481_v11 }
 0x337   :  { %10635 = vmatmul.mubr.msk.f32.gmra.mrb[18].mxu0 %vm772_vm5, %v986_v37 }
 0x338   :  { %v12301_v38 = vpop.eup %12300  ;;  %10637 = vmatprep.mubr.msk.f32.mxu0 %vm772_vm5, %v987_v39 }
 0x339   :  { %v12303_v24 = vpop.eup %12302  ;;  %v988_v14 = vmul.f32 %v12301_v38, %v13487_v32  ;;  %v17872_v32 = vmov 0.0  }
 0x33a   :  { %v989_v61 = vmul.f32 %v12303_v24, %v13490_v44  ;;  %v167_v44 = vld [vmem:[%s17812_s8 + $0x8] sm:$0xff] }
 0x33b   :  { %10638 = vmatmul.mubr.msk.f32.gmra.mrb[20].mxu0 %vm772_vm5, %v988_v14  ;;  %9168 = vmatprep.mubr.msk.f32.mxu1 %vm1241_vm6, %v167_v44 }
 0x33c   :  { %v12305_v53 = vpop.eup %12304  ;;  %10640 = vmatprep.mubr.msk.f32.mxu0 %vm772_vm5, %v989_v61 }
 0x33d   :  { %v12307_v2 = vpop.eup %12306  ;;  %v990_v0 = vmul.f32 %v12305_v53, %v13498_v47  ;;  %v9107_v47 = vld [vmem:[%s17809_s2 + $0xc0] sm:$0xff] }
 0x33e   :  { %v991_v11 = vmul.f32 %v12307_v2, %v13500_v35  ;;  %v9108_v35 = vld [vmem:[%s17809_s2 + $0xc8] sm:$0xff] }
 0x33f   :  { %10641 = vmatmul.mubr.msk.f32.gmra.mrb[22].mxu0 %vm772_vm5, %v990_v0  ;;  %v11593_v42 = vpack.c.bf16 %v9108_v35, %v9107_v47 }
 0x340   :  { %v12309_v58 = vpop.eup %12308  ;;  %10643 = vmatprep.mubr.msk.f32.mxu0 %vm772_vm5, %v991_v11 }
 0x341   :  { %v992_v8 = vmul.f32 %v12309_v58, %v13506_v19  ;;  %v9109_v19 = vld [vmem:[%s17809_s2 + $0xd0] sm:$0xff]  ;;  %11594 = vmatpush3.bf16.msra.mxu0 %v11593_v42 }
 0x342   :  { %v11596_v31 = vpack.c.bf16 %v9110_v27, %v9109_v19  ;;  %11595 = vmatprep.subr.bf16.mxu0 %v17871_v45 }
 0x343   :  { %10644 = vmatmul.mubr.msk.f32.gmra.mrb[24].mxu0 %vm772_vm5, %v992_v8 }
 0x344   :  { %10662 = vmatprep.mubr.msk.f32.mxu0 %vm12830_vm0, %v17872_v32 }
 0x345   :  { %11597 = vmatpush3.bf16.msra.mxu0 %v11596_v31 }
 0x346   :  { %11598 = vmatprep.subr.bf16.mxu0 %v17871_v45 }
 0x349   :  { %11600 = vmatpush3.bf16.msra.mxu0 %v11599_v3 }
 0x34a   :  { %11601 = vmatprep.subr.bf16.mxu0 %v17871_v45 }
 0x34d   :  { %11603 = vmatpush3.bf16.msra.mxu0 %v11602_v6 }
 0x3f2   :  { %v10618_v21 = vpop.f32.mrb[6].mxu0 }
 0x3f3   :  { %v1222_v23 = vmul.f32 %v10618_v21, %v13014_v51  ;;  %v1122_v36 = vpop.f32.mrb[7].mxu0 }
 0x3f4   :  { %v1221_v63 = vmul.f32 %v13587_v40, %v1122_v36 }
 0x3f6   :  { %v11563_v12 = vpack.c.bf16 %v1222_v23, %v1221_v63  ;;  %v10621_v43 = vpop.f32.mrb[8].mxu0 }
 0x3f7   :  { %v1224_v37 = vmul.f32 %v10621_v43, %v13030_v55  ;;  %v1132_v39 = vpop.f32.mrb[9].mxu0 }
 0x3f8   :  { %v1223_v38 = vmul.f32 %v1132_v39, %v13019_v52  ;;  %11564 = vmatpush1.bf16.msra.mxu1 %v11563_v12 }
 0x3f9   :  { %11565 = vmatprep.subr.bf16.mxu1 %v17871_v45 }
 0x3fa   :  { %v11566_v24 = vpack.c.bf16 %v1224_v37, %v1223_v38  ;;  %v10624_v51 = vpop.f32.mrb[10].mxu0 }
 0x3fb   :  { %v1226_v14 = vmul.f32 %v10624_v51, %v13046_v59  ;;  %v1142_v61 = vpop.f32.mrb[11].mxu0 }
 0x3fc   :  { %v1225_v53 = vmul.f32 %v1142_v61, %v13036_v56  ;;  %11567 = vmatpush1.bf16.msra.mxu1 %v11566_v24  ;;  %v13603_v56 = vld [vmem:[%s17811_s7 + $0x40] sm:$0xff] }
 0x3fd   :  { %11568 = vmatprep.subr.bf16.mxu1 %v17871_v45 }
 0x3fe   :  { %v11569_v2 = vpack.c.bf16 %v1226_v14, %v1225_v53  ;;  %v10627_v0 = vpop.f32.mrb[12].mxu0  ;;  %v166_v53 = vld [vmem:[%s17812_s8] sm:$0xff] }
 0x3ff   :  { %v1228_v55 = vmul.f32 %v10627_v0, %v13060_v62  ;;  %v1152_v11 = vpop.f32.mrb[13].mxu0  ;;  %v171_v0 = vld [vmem:[%s17812_s8 + $0x28] sm:$0xf] }
 0x400   :  { %v1227_v52 = vmul.f32 %v1152_v11, %v13052_v60  ;;  %11570 = vmatpush1.bf16.msra.mxu1 %v11569_v2  ;;  %v168_v2 = vld [vmem:[%s17812_s8 + $0x10] sm:$0xff] }
 0x401   :  { %11571 = vmatprep.subr.bf16.mxu1 %v17871_v45 }
 0x402   :  { %v11572_v58 = vpack.c.bf16 %v1228_v55, %v1227_v52  ;;  %v10630_v8 = vpop.f32.mrb[14].mxu0  ;;  %v170_v55 = vld [vmem:[%s17812_s8 + $0x20] sm:$0xf] }
 0x403   :  { %v1230_v59 = vmul.f32 %v10630_v8, %v13075_v5  ;;  %v1162_v44 = vpop.f32.mrb[15].mxu0  ;;  %v13611_v5 = vld [vmem:[%s17811_s7 + $0x50] sm:$0xff] }
 0x404   :  { %v1229_v47 = vmul.f32 %v13603_v56, %v1162_v44  ;;  %11573 = vmatpush1.bf16.msra.mxu1 %v11572_v58 }
 0x405   :  { %11574 = vmatprep.subr.bf16.mxu1 %v17871_v45 }
 0x406   :  { %v11575_v62 = vpack.c.bf16 %v1230_v59, %v1229_v47  ;;  %v10633_v60 = vpop.f32.mrb[16].mxu0  ;;  %v9171_v47 = vld [vmem:[%s17813_s5] ss:$0 sm:$0xff] }
 0x407   :  { %v1232_v35 = vmul.f32 %v10633_v60, %v13088_v9  ;;  %v1172_v19 = vpop.f32.mrb[17].mxu0  ;;  %v13619_v9 = vld [vmem:[%s17811_s7 + $0x60] sm:$0xff] }
 0x408   :  { %v1231_v42 = vmul.f32 %v13611_v5, %v1172_v19  ;;  %11576 = vmatpush1.bf16.msra.mxu1 %v11575_v62 }
 0x409   :  { %11577 = vmatprep.subr.bf16.mxu1 %v17871_v45 }
 0x40a   :  { %v11578_v27 = vpack.c.bf16 %v1232_v35, %v1231_v42  ;;  %v10636_v31 = vpop.f32.mrb[18].mxu0 }
 0x40b   :  { %v1234_v26 = vmul.f32 %v10636_v31, %v13101_v13  ;;  %v1182_v4 = vpop.f32.mrb[19].mxu0  ;;  %v13627_v13 = vld [vmem:[%s17811_s7 + $0x70] sm:$0xff] }
 0x40c   :  { %v1233_v3 = vmul.f32 %v13619_v9, %v1182_v4  ;;  %11579 = vmatpush1.bf16.msra.mxu1 %v11578_v27 }
 0x40d   :  { %11580 = vmatprep.subr.bf16.mxu1 %v17871_v45 }
 0x40e   :  { %v11581_v30 = vpack.c.bf16 %v1234_v26, %v1233_v3  ;;  %v10639_v49 = vpop.f32.mrb[20].mxu0 }
 0x40f   :  { %v1236_v6 = vmul.f32 %v10639_v49, %v13114_v18  ;;  %v1192_v21 = vpop.f32.mrb[21].mxu0  ;;  %v13635_v18 = vld [vmem:[%s17811_s7 + $0x80] sm:$0xff] }
 0x410   :  { %v1235_v23 = vmul.f32 %v13627_v13, %v1192_v21  ;;  %11582 = vmatpush1.bf16.msra.mxu1 %v11581_v30 }
 0x411   :  { %11583 = vmatprep.subr.bf16.mxu1 %v17871_v45 }
 0x412   :  { %v11584_v36 = vpack.c.bf16 %v1236_v6, %v1235_v23  ;;  %v10642_v63 = vpop.f32.mrb[22].mxu0 }
 0x413   :  { %v1238_v12 = vmul.f32 %v10642_v63, %v13126_v22  ;;  %v1202_v43 = vpop.f32.mrb[23].mxu0  ;;  %v13643_v22 = vld [vmem:[%s17811_s7 + $0x90] sm:$0xff] }
 0x414   :  { %v1237_v37 = vmul.f32 %v13635_v18, %v1202_v43  ;;  %11585 = vmatpush1.bf16.msra.mxu1 %v11584_v36 }
 0x415   :  { %11586 = vmatprep.subr.bf16.mxu1 %v17871_v45 }
 0x416   :  { %v11587_v39 = vpack.c.bf16 %v1238_v12, %v1237_v37  ;;  %v10645_v38 = vpop.f32.mrb[24].mxu0 }
 0x417   :  { %v1240_v24 = vmul.f32 %v10645_v38, %v13140_v28  ;;  %v1212_v51 = vpop.f32.mrb[25].mxu0  ;;  %v169_v28 = vld [vmem:[%s17812_s8 + $0x18] sm:$0xff] }
 0x418   :  { %v1239_v14 = vmul.f32 %v13643_v22, %v1212_v51  ;;  %11588 = vmatpush1.bf16.msra.mxu1 %v11587_v39 }
 0x419   :  { %11589 = vmatprep.subr.bf16.mxu1 %v17871_v45 }
 0x41a   :  { %v11590_v61 = vpack.c.bf16 %v1240_v24, %v1239_v14 }
 0x41c   :  { %11591 = vmatpush1.bf16.msra.mxu1 %v11590_v61 }
 0x41f   :  { %1316 = vmatmul.mubr.f32.vlgmr.msra.gmra.mrb[32].mxu1 %v166_v53 }
 0x420   :  { %9169 = vmatprep.mubr.msk.f32.mxu1 %vm1241_vm6, %v169_v28  ;;  %v42_v28 = vld [vmem:[%s17814_s3 + $0x8] sm:$0xff] }
 0x423   :  { %1321 = vmatmul.mubr.f32.gmra.mrb[34].mxu1 %v168_v2  ;;  %v44_v2 = vld [vmem:[%s17814_s3 + $0x18] sm:$0xff] }
 0x424   :  { %9170 = vmatprep.mubr.msk.f32.mxu1 %vm1241_vm6, %v171_v0  ;;  %v11604_v0 = vpack.c.bf16 %v44_v2, %v42_v28  ;;  %v77_v28 = vld [vmem:[%s17815_s4 + $0xa0] sm:$0xff]  ;;  %v78_v2 = vld [vmem:[%s17815_s4 + $0xa8] sm:$0xff] }
 0x426   :  { %11605 = vmatprep.subr.bf16.mxu1 %v11604_v0 }
 0x427   :  { %1326 = vmatmul.mubr.f32.gmra.mrb[36].mxu1 %v170_v55  ;;  %v41_v55 = vld [vmem:[%s17814_s3] sm:$0xff] }
 0x428   :  { %1563 = vmatprep.mubr.f32.mxu1 %v17872_v32 }
 0x4f2   :  { %v1317_v11 = vpop.f32.mrb[32].mxu1 }
 0x4f3   :  { %v1319_v52 = vpop.f32.mrb[33].mxu1  ;;  %10663 = vmatmul.mubr.msk.f32.vlgmr.msra.gmra.mrb[26].mxu0 %vm172_vm1, %v1317_v11  ;;  %v43_v11 = vld [vmem:[%s17814_s3 + $0x10] sm:$0xff] }
 0x4f4   :  { %10665 = vmatprep.mubr.msk.f32.mxu0 %vm12830_vm0, %v17872_v32  ;;  %v11606_v52 = vpack.c.bf16 %v43_v11, %v41_v55  ;;  %v11628_v55 = vpack.c.bf16 %v78_v2, %v77_v28  ;;  %v61_v11 = vld [vmem:[%s17815_s4 + $0x20] sm:$0xff] }
 0x4f6   :  { %v1322_v58 = vpop.f32.mrb[34].mxu1  ;;  %11607 = vmatpush1.bf16.msra.mxu1 %v11606_v52  ;;  %v62_v52 = vld [vmem:[%s17815_s4 + $0x28] sm:$0xff] }
 0x4f7   :  { %10666 = vmatmul.mubr.msk.f32.gmra.mrb[28].mxu0 %vm172_vm1, %v1322_v58  ;;  %v1324_v8 = vpop.f32.mrb[35].mxu1  ;;  %v46_v58 = vld [vmem:[%s17814_s3 + $0x28] sm:$0xff] }
 0x4f8   :  { %10668 = vmatprep.mubr.msk.f32.mxu0 %vm12830_vm0, %v17872_v32  ;;  %v48_v8 = vld [vmem:[%s17814_s3 + $0x38] sm:$0xff] }
 0x4fa   :  { %v1327_v59 = vpop.f32.mrb[36].mxu1 }
 0x4fb   :  { %10669 = vmatmul.mubr.msk.f32.gmra.mrb[30].mxu0 %vm172_vm1, %v1327_v59  ;;  %v1329_v44 = vpop.f32.mrb[37].mxu1  ;;  %v11608_v59 = vpack.c.bf16 %v48_v8, %v46_v58  ;;  %v79_v58 = vld [vmem:[%s17815_s4 + $0xb0] sm:$0xff]  ;;  %v80_v8 = vld [vmem:[%s17815_s4 + $0xb8] sm:$0xff] }
 0x4fc   :  { %v45_v44 = vld [vmem:[%s17814_s3 + $0x20] sm:$0xff] }
 0x4fd   :  { %11609 = vmatprep.subr.bf16.mxu1 %v11608_v59  ;;  %v11630_v59 = vpack.c.bf16 %v62_v52, %v61_v11  ;;  %v9176_v52 = vld [vmem:[%s17813_s5 + $0x2] ss:$0 sm:$0xff] }
 0x5c6   :  { %v1410_v62 = vpop.f32.mrb[26].mxu0 }
 0x5c7   :  { %v1411_v60 = vadd.f32 %v9171_v47, %v1410_v62  ;;  %v10664_v35 = vpop.f32.mrb[27].mxu0 }
 0x5c8   :  { %v52_v35 = vld [vmem:[%s17814_s3 + $0x58] sm:$0xff] }
 0x5c9   :  { %v1424_v19 = vsel %vm172_vm1, %v1411_v60, 0.0 }
 0x5ca   :  { %1425 = vadd.xlane.f32.xlu0 %v1424_v19  ;;  %v1415_v42 = vpop.f32.mrb[28].mxu0 }
 0x5cb   :  { %v1416_v27 = vadd.f32 %v9171_v47, %v1415_v42  ;;  %v10667_v31 = vpop.f32.mrb[29].mxu0  ;;  %v49_v42 = vld [vmem:[%s17814_s3 + $0x40] sm:$0xff] }
 0x5cd   :  { %v1427_v26 = vsel %vm172_vm1, %v1416_v27, 0.0 }
 0x5ce   :  { %1428 = vadd.xlane.f32.xlu1 %v1427_v26  ;;  %v1420_v4 = vpop.f32.mrb[30].mxu0  ;;  %v54_v26 = vld [vmem:[%s17814_s3 + $0x68] sm:$0xff] }
 0x5cf   :  { %v1421_v3 = vadd.f32 %v9171_v47, %v1420_v4  ;;  %v10670_v30 = vpop.f32.mrb[31].mxu0  ;;  %v47_v47 = vld [vmem:[%s17814_s3 + $0x30] sm:$0xff]  ;;  %v56_v4 = vld [vmem:[%s17814_s3 + $0x78] sm:$0xff] }
 0x5d0   :  { %v11610_v62 = vpack.c.bf16 %v47_v47, %v45_v44  ;;  %v53_v30 = vld [vmem:[%s17814_s3 + $0x60] sm:$0xff]  ;;  %v11632_v44 = vpack.c.bf16 %v80_v8, %v79_v58  ;;  %v63_v47 = vld [vmem:[%s17815_s4 + $0x30] sm:$0xff] }
 0x5d1   :  { %v1431_v49 = vsel %vm1430_vm7, %v1421_v3, 0.0 }
 0x5d2   :  { %1432 = vadd.xlane.f32.xlu0 %v1431_v49  ;;  %11611 = vmatpush1.bf16.msra.mxu1 %v11610_v62  ;;  %v55_v49 = vld [vmem:[%s17814_s3 + $0x70] sm:$0xff]  ;;  %v64_v62 = vld [vmem:[%s17815_s4 + $0x38] sm:$0xff] }
 0x657   :  { %v1426_v6 = vpop.xlane.xlu0 %1425 }
 0x658   :  { %v1435_v21 = vmul.f32 0.015625, %v1426_v6  ;;  %v11618_v6 = vpack.c.bf16 %v55_v49, %v53_v30  ;;  %v67_v49 = vld [vmem:[%s17815_s4 + $0x50] sm:$0xff] }
 0x65a   :  { %v13678_v23 = vsub.f32 %v1411_v60, %v1435_v21  ;;  %v50_v60 = vld [vmem:[%s17814_s3 + $0x48] sm:$0xff]  ;;  %v73_v21 = vld [vmem:[%s17815_s4 + $0x80] sm:$0xff] }
 0x65b   :  { %v1429_v36 = vpop.xlane.xlu1 %1428  ;;  %v11612_v19 = vpack.c.bf16 %v52_v35, %v50_v60  ;;  %v81_v60 = vld [vmem:[%s17815_s4 + $0xc0] sm:$0xff]  ;;  %v82_v35 = vld [vmem:[%s17815_s4 + $0xc8] sm:$0xff] }
 0x65c   :  { %v1436_v63 = vmul.f32 0.015625, %v1429_v36  ;;  %v1441_v12 = vmul.f32 %v13678_v23, %v13678_v23  ;;  %v74_v36 = vld [vmem:[%s17815_s4 + $0x88] sm:$0xff] }
 0x65d   :  { %11613 = vmatprep.subr.bf16.mxu1 %v11612_v19  ;;  %v11634_v19 = vpack.c.bf16 %v64_v62, %v63_v47 }
 0x65e   :  { %v13682_v43 = vsub.f32 %v1416_v27, %v1436_v63  ;;  %v1444_v37 = vsel %vm172_vm1, %v1441_v12, 0.0  ;;  %v51_v27 = vld [vmem:[%s17814_s3 + $0x50] sm:$0xff]  ;;  %v57_v63 = vld [vmem:[%s17815_s4] sm:$0xff]  ;;  %v11620_v12 = vpack.c.bf16 %v74_v36, %v73_v21  ;;  %v86_v36 = vld [vmem:[%s17815_s4 + $0xe8] sm:$0xff] }
 0x65f   :  { %1445 = vadd.xlane.f32.xlu1 %v1444_v37  ;;  %v1433_v39 = vpop.xlane.xlu0 %1432  ;;  %v11614_v31 = vpack.c.bf16 %v51_v27, %v49_v42  ;;  %v58_v37 = vld [vmem:[%s17815_s4 + $0x8] sm:$0xff]  ;;  %v11636_v42 = vpack.c.bf16 %v82_v35, %v81_v60  ;;  %v65_v27 = vld [vmem:[%s17815_s4 + $0x40] sm:$0xff] }
 0x660   :  { %v1437_v38 = vmul.f32 0.015625, %v1433_v39  ;;  %v1442_v24 = vmul.f32 %v13682_v43, %v13682_v43  ;;  %v75_v39 = vld [vmem:[%s17815_s4 + $0x90] sm:$0xff]  ;;  %11621 = vmatprep.subr.bf16.mxu0 %v11620_v12  ;;  %v85_v21 = vld [vmem:[%s17815_s4 + $0xe0] sm:$0xff] }
 0x661   :  { %11615 = vmatpush1.bf16.msra.mxu1 %v11614_v31  ;;  %v66_v31 = vld [vmem:[%s17815_s4 + $0x48] sm:$0xff]  ;;  %v11644_v12 = vpack.c.bf16 %v86_v36, %v85_v21  ;;  %v89_v36 = vld [vmem:[%s17816_s6] ss:$4 sm:$0x3] }
 0x662   :  { %v13687_v51 = vsub.f32 %v1421_v3, %v1437_v38  ;;  %v1447_v14 = vsel %vm172_vm1, %v1442_v24, 0.0  ;;  %v11616_v3 = vpack.c.bf16 %v56_v4, %v54_v26  ;;  %v76_v38 = vld [vmem:[%s17815_s4 + $0x98] sm:$0xff]  ;;  %v11622_v24 = vpack.c.bf16 %v58_v37, %v57_v63  ;;  %v83_v26 = vld [vmem:[%s17815_s4 + $0xd0] sm:$0xff] }
 0x663   :  { %1448 = vadd.xlane.f32.xlu0 %v1447_v14  ;;  %v11624_v14 = vpack.c.bf16 %v76_v38, %v75_v39  ;;  %v84_v4 = vld [vmem:[%s17815_s4 + $0xd8] sm:$0xff] }
 0x664   :  { %v1443_v61 = vmul.f32 %v13687_v51, %v13687_v51  ;;  %11617 = vmatprep.subr.bf16.mxu1 %v11616_v3  ;;  %11623 = vmatpush3.bf16.msra.mxu0 %v11622_v24  ;;  %v11638_v3 = vpack.c.bf16 %v66_v31, %v65_v27  ;;  %v11640_v30 = vpack.c.bf16 %v84_v4, %v83_v26  ;;  %v87_v27 = vld [vmem:[%s17815_s4 + $0xf0] sm:$0xff]  ;;  %v88_v31 = vld [vmem:[%s17815_s4 + $0xf8] sm:$0xff] }
 0x665   :  { %11619 = vmatpush1.bf16.msra.mxu1 %v11618_v6  ;;  %11625 = vmatprep.subr.bf16.mxu0 %v11624_v14  ;;  %v68_v6 = vld [vmem:[%s17815_s4 + $0x58] sm:$0xff]  ;;  %v11648_v26 = vpack.c.bf16 %v88_v31, %v87_v27  ;;  %v71_v4 = vld [vmem:[%s17815_s4 + $0x70] sm:$0xff] }
 0x666   :  { %v1450_v53 = vsel %vm1430_vm7, %v1443_v61, 0.0  ;;  %11652 = vmatprep.subr.bf16.mxu1 %v17871_v45  ;;  %v59_v61 = vld [vmem:[%s17815_s4 + $0x10] sm:$0xff]  ;;  %v11642_v63 = vpack.c.bf16 %v68_v6, %v67_v49  ;;  %v1480_v49 = vlaneseq }
 0x667   :  { %1451 = vadd.xlane.f32.xlu1 %v1450_v53  ;;  %v60_v53 = vld [vmem:[%s17815_s4 + $0x18] sm:$0xff] }
 0x668   :  { %v11626_v0 = vpack.c.bf16 %v60_v53, %v59_v61  ;;  %v1481_v6 = vshrl.u32 %v1480_v49, 7 }
 0x66a   :  { %11627 = vmatpush3.bf16.msra.mxu0 %v11626_v0  ;;  %v13864_v21 = vsub.s32 0, %v1481_v6 }
 0x66b   :  { %11629 = vmatprep.subr.bf16.mxu0 %v11628_v55  ;;  %v9175_v55 = vld [vmem:[%s17813_s5 + $0x1] ss:$0 sm:$0xff] }
 0x66e   :  { %11631 = vmatpush3.bf16.msra.mxu0 %v11630_v59 }
 0x66f   :  { %11633 = vmatprep.subr.bf16.mxu0 %v11632_v44 }
 0x672   :  { %11635 = vmatpush3.bf16.msra.mxu0 %v11634_v19 }
 0x673   :  { %11637 = vmatprep.subr.bf16.mxu0 %v11636_v42 }
 0x676   :  { %11639 = vmatpush3.bf16.msra.mxu0 %v11638_v3  ;;  %v72_v3 = vld [vmem:[%s17815_s4 + $0x78] sm:$0xff] }
 0x677   :  { %11641 = vmatprep.subr.bf16.mxu0 %v11640_v30  ;;  %v11650_v30 = vpack.c.bf16 %v72_v3, %v71_v4 }
 0x67a   :  { %11643 = vmatpush3.bf16.msra.mxu0 %v11642_v63  ;;  %v13869_v63 = vsub.s32 1, %v1481_v6 }
 0x67b   :  { %11645 = vmatprep.subr.bf16.mxu0 %v11644_v12  ;;  %v1483_v12 = vrot.slane %v89_v36, %v13864_v21 }
 0x6ec   :  { %v1446_v37 = vpop.xlane.xlu1 %1445 }
 0x6ed   :  { %v1453_v39 = vmul.f32 0.015625, %v1446_v37  ;;  %v1487_v37 = vrot.slane %v89_v36, %v13869_v63 }
 0x6ef   :  { %v1456_v38 = vadd.f32 1e-05, %v1453_v39 }
 0x6f0   :  { %v1449_v24 = vpop.xlane.xlu0 %1448 }
 0x6f1   :  { %12310 = vrsqrt.f32 %v1456_v38  ;;  %v1454_v14 = vmul.f32 0.015625, %v1449_v24 }
 0x6f3   :  { %v1457_v61 = vadd.f32 1e-05, %v1454_v14 }
 0x6f4   :  { %v1452_v53 = vpop.xlane.xlu1 %1451 }
 0x6f5   :  { %12312 = vrsqrt.f32 %v1457_v61  ;;  %v1455_v28 = vmul.f32 0.015625, %v1452_v53 }
 0x6f7   :  { %v1458_v2 = vadd.f32 1e-05, %v1455_v28 }
 0x6f9   :  { %12314 = vrsqrt.f32 %v1458_v2 }
 0x6fb   :  { %v12311_v0 = vpop.eup %12310 }
 0x6fc   :  { %v1462_v11 = vmul.f32 %v12311_v0, %v13678_v23 }
 0x6fe   :  { %v1469_v58 = vmul.f32 %v9175_v55, %v1462_v11 }
 0x6ff   :  { %v12313_v8 = vpop.eup %12312 }
 0x700   :  { %v13827_v59 = vadd.f32 %v9176_v52, %v1469_v58  ;;  %v1463_v44 = vmul.f32 %v12313_v8, %v13682_v43  ;;  %v69_v43 = vld [vmem:[%s17815_s4 + $0x60] sm:$0xff] }
 0x702   :  { %9177 = vmatmul.mubr.msk.f32.vlgmr.msra.gmra.mrb[38].mxu1 %vm172_vm1, %v13827_v59  ;;  %v1470_v47 = vmul.f32 %v9175_v55, %v1463_v44 }
 0x703   :  { %v12315_v62 = vpop.eup %12314  ;;  %1569 = vmatprep.mubr.f32.mxu1 %v17872_v32 }
 0x704   :  { %v13833_v60 = vadd.f32 %v9176_v52, %v1470_v47  ;;  %v1464_v23 = vmul.f32 %v12315_v62, %v13687_v51  ;;  %v70_v51 = vld [vmem:[%s17815_s4 + $0x68] sm:$0xff] }
 0x705   :  { %v11646_v42 = vpack.c.bf16 %v70_v51, %v69_v43  ;;  %v9180_v43 = vld [vmem:[%s17813_s5 + $0x3] ss:$0 sm:$0xff] }
 0x706   :  { %9178 = vmatmul.mubr.msk.f32.gmra.mrb[40].mxu1 %vm172_vm1, %v13833_v60  ;;  %v1471_v35 = vmul.f32 %v9175_v55, %v1464_v23 }
 0x707   :  { %1575 = vmatprep.mubr.f32.mxu1 %v17872_v32  ;;  %11647 = vmatpush3.bf16.msra.mxu0 %v11646_v42 }
 0x708   :  { %v13839_v19 = vadd.f32 %v9176_v52, %v1471_v35  ;;  %11649 = vmatprep.subr.bf16.mxu0 %v11648_v26 }
 0x70a   :  { %9179 = vmatmul.mubr.msk.f32.gmra.mrb[42].mxu1 %vm172_vm1, %v13839_v19 }
 0x70b   :  { %10687 = vmatprep.mubr.msk.f32.mxu1 %vm12830_vm0, %v17872_v32  ;;  %11651 = vmatpush3.bf16.msra.mxu0 %v11650_v30 }
 0x70c   :  { %11676 = vmatprep.subr.bf16.mxu0 %v17871_v45 }
 0x7d5   :  { %v1565_v39 = vpop.f32.mrb[38].mxu1 }
 0x7d6   :  { %v1566_v38 = vadd.f32 %v1565_v39, %v1483_v12  ;;  %v1567_v24 = vpop.f32.mrb[39].mxu1 }
 0x7d7   :  { %v1568_v14 = vadd.f32 %v1567_v24, %v1487_v37 }
 0x7d8   :  { %v1582_v28 = vmax.f32 %v1566_v38, 0.0 }
 0x7d9   :  { %v1583_v61 = vmax.f32 %v1568_v14, 0.0  ;;  %v1571_v53 = vpop.f32.mrb[40].mxu1 }
 0x7da   :  { %v1572_v2 = vadd.f32 %v1571_v53, %v1483_v12  ;;  %v1573_v0 = vpop.f32.mrb[41].mxu1 }
 0x7db   :  { %v1574_v55 = vadd.f32 %v1573_v0, %v1487_v37  ;;  %1656 = vmatprep.mubr.f32.mxu0 %v1583_v61 }
 0x7dc   :  { %1657 = vmatmul.mubr.f32.vlgmr.msra.gmra.mrb[32].mxu0 %v1582_v28  ;;  %v1584_v58 = vmax.f32 %v1572_v2, 0.0 }
 0x7dd   :  { %v1585_v11 = vmax.f32 %v1574_v55, 0.0  ;;  %v1577_v52 = vpop.f32.mrb[42].mxu1 }
 0x7de   :  { %v1578_v8 = vadd.f32 %v1577_v52, %v1483_v12  ;;  %v1579_v44 = vpop.f32.mrb[43].mxu1 }
 0x7df   :  { %v1580_v47 = vadd.f32 %v1579_v44, %v1487_v37  ;;  %1661 = vmatprep.mubr.f32.mxu0 %v1585_v11 }
 0x7e0   :  { %1662 = vmatmul.mubr.f32.gmra.mrb[34].mxu0 %v1584_v58  ;;  %v1586_v23 = vmax.f32 %v1578_v8, 0.0 }
 0x7e1   :  { %v1587_v62 = vmax.f32 %v1580_v47, 0.0 }
 0x7e3   :  { %1666 = vmatprep.mubr.f32.mxu0 %v1587_v62  ;;  %v9232_v62 = vld [vmem:[%s17809_s2 + $0x100] sm:$0xff] }
 0x7e4   :  { %1667 = vmatmul.mubr.f32.gmra.mrb[36].mxu0 %v1586_v23  ;;  %v9233_v23 = vld [vmem:[%s17809_s2 + $0x108] sm:$0xff] }
 0x7e5   :  { %10737 = vmatprep.mubr.msk.f32.mxu0 %vm12830_vm0, %v17872_v32 }
 0x8af   :  { %v9929_v35 = vpop.f32.mrb[32].mxu0 }
 0x8b0   :  { %v9930_v51 = vpop.f32.mrb[33].mxu0 }
 0x8b1   :  { %v9931_v42 = vadd.f32 %v9930_v51, %v9929_v35  ;;  %v11653_v35 = vpack.c.bf16 %v9233_v23, %v9232_v62  ;;  %v9249_v51 = vld [vmem:[%s17809_s2 + $0x188] sm:$0xff]  ;;  %v9181_v23 = vld [vmem:[%s17813_s5 + $0x4] ss:$0 sm:$0xff] }
 0x8b3   :  { %v1659_v27 = vadd.f32 %v9931_v42, %v9180_v43  ;;  %v9932_v31 = vpop.f32.mrb[34].mxu0  ;;  %11654 = vmatpush3.bf16.msra.mxu1 %v11653_v35 }
 0x8b4   :  { %v9933_v26 = vpop.f32.mrb[35].mxu0  ;;  %11655 = vmatprep.subr.bf16.mxu1 %v17871_v45 }
 0x8b5   :  { %v9934_v4 = vadd.f32 %v9933_v26, %v9932_v31  ;;  %v1672_v3 = vadd.f32 %v1659_v27, %v13827_v59  ;;  %v9234_v27 = vld [vmem:[%s17809_s2 + $0x110] sm:$0xff]  ;;  %v9235_v31 = vld [vmem:[%s17809_s2 + $0x118] sm:$0xff] }
 0x8b6   :  { %v11656_v26 = vpack.c.bf16 %v9235_v31, %v9234_v27 }
 0x8b7   :  { %v1664_v30 = vadd.f32 %v9934_v4, %v9180_v43  ;;  %v9935_v49 = vpop.f32.mrb[36].mxu0  ;;  %v1675_v6 = vsel %vm172_vm1, %v1672_v3, 0.0  ;;  %v9250_v4 = vld [vmem:[%s17809_s2 + $0x190] sm:$0xff] }
 0x8b8   :  { %v9936_v36 = vpop.f32.mrb[37].mxu0  ;;  %1676 = vadd.xlane.f32.xlu0 %v1675_v6  ;;  %11657 = vmatpush3.bf16.msra.mxu1 %v11656_v26  ;;  %v9237_v6 = vld [vmem:[%s17809_s2 + $0x128] sm:$0xff] }
 0x8b9   :  { %v9937_v12 = vadd.f32 %v9936_v36, %v9935_v49  ;;  %v1673_v37 = vadd.f32 %v1664_v30, %v13833_v60  ;;  %11658 = vmatprep.subr.bf16.mxu1 %v17871_v45  ;;  %v9236_v49 = vld [vmem:[%s17809_s2 + $0x120] sm:$0xff] }
 0x8ba   :  { %v11659_v36 = vpack.c.bf16 %v9237_v6, %v9236_v49 }
 0x8bb   :  { %v1669_v39 = vadd.f32 %v9937_v12, %v9180_v43  ;;  %v1678_v38 = vsel %vm172_vm1, %v1673_v37, 0.0  ;;  %v9248_v43 = vld [vmem:[%s17809_s2 + $0x180] sm:$0xff] }
 0x8bc   :  { %1679 = vadd.xlane.f32.xlu1 %v1678_v38  ;;  %v11677_v42 = vpack.c.bf16 %v9249_v51, %v9248_v43  ;;  %v9252_v12 = vld [vmem:[%s17809_s2 + $0x1a0] sm:$0xff]  ;;  %11660 = vmatpush3.bf16.msra.mxu1 %v11659_v36  ;;  %v9238_v38 = vld [vmem:[%s17809_s2 + $0x130] sm:$0xff]  ;;  %v9241_v51 = vld [vmem:[%s17809_s2 + $0x148] sm:$0xff] }
 0x8bd   :  { %v1674_v24 = vadd.f32 %v1669_v39, %v13839_v19  ;;  %11661 = vmatprep.subr.bf16.mxu1 %v17871_v45  ;;  %v9240_v43 = vld [vmem:[%s17809_s2 + $0x140] sm:$0xff] }
 0x8be   :  { %11678 = vmatpush3.bf16.msra.mxu0 %v11677_v42  ;;  %v9182_v42 = vld [vmem:[%s17813_s5 + $0x5] ss:$0 sm:$0xff]  ;;  %v11665_v26 = vpack.c.bf16 %v9241_v51, %v9240_v43 }
 0x8bf   :  { %v1681_v14 = vsel %vm1430_vm7, %v1674_v24, 0.0  ;;  %11679 = vmatprep.subr.bf16.mxu0 %v17871_v45 }
 0x8c0   :  { %1682 = vadd.xlane.f32.xlu0 %v1681_v14 }
 0x945   :  { %v1677_v61 = vpop.xlane.xlu0 %1676 }
 0x946   :  { %v1684_v59 = vmul.f32 0.015625, %v1677_v61  ;;  %v9254_v61 = vld [vmem:[%s17809_s2 + $0x1b0] sm:$0xff] }
 0x948   :  { %v13884_v53 = vsub.f32 %v1672_v3, %v1684_v59  ;;  %v9251_v3 = vld [vmem:[%s17809_s2 + $0x198] sm:$0xff] }
 0x949   :  { %v1680_v28 = vpop.xlane.xlu1 %1679  ;;  %v11680_v30 = vpack.c.bf16 %v9251_v3, %v9250_v4  ;;  %v9255_v59 = vld [vmem:[%s17809_s2 + $0x1b8] sm:$0xff] }
 0x94a   :  { %v1685_v2 = vmul.f32 0.015625, %v1680_v28  ;;  %v1690_v0 = vmul.f32 %v13884_v53, %v13884_v53  ;;  %v11686_v28 = vpack.c.bf16 %v9255_v59, %v9254_v61  ;;  %v9247_v61 = vld [vmem:[%s17809_s2 + $0x178] sm:$0xff] }
 0x94b   :  { %11681 = vmatpush3.bf16.msra.mxu0 %v11680_v30  ;;  %v9243_v30 = vld [vmem:[%s17809_s2 + $0x158] sm:$0xff] }
 0x94c   :  { %v13888_v55 = vsub.f32 %v1673_v37, %v1685_v2  ;;  %v1693_v60 = vsel %vm172_vm1, %v1690_v0, 0.0  ;;  %11682 = vmatprep.subr.bf16.mxu0 %v17871_v45  ;;  %v9253_v37 = vld [vmem:[%s17809_s2 + $0x1a8] sm:$0xff] }
 0x94d   :  { %1694 = vadd.xlane.f32.xlu1 %v1693_v60  ;;  %v1683_v11 = vpop.xlane.xlu0 %1682  ;;  %v11683_v39 = vpack.c.bf16 %v9253_v37, %v9252_v12  ;;  %v9244_v37 = vld [vmem:[%s17809_s2 + $0x160] sm:$0xff] }
 0x94e   :  { %v1686_v52 = vmul.f32 0.015625, %v1683_v11  ;;  %v1691_v19 = vmul.f32 %v13888_v55, %v13888_v55 }
 0x94f   :  { %11684 = vmatpush3.bf16.msra.mxu0 %v11683_v39  ;;  %v9245_v39 = vld [vmem:[%s17809_s2 + $0x168] sm:$0xff] }
 0x950   :  { %v13893_v58 = vsub.f32 %v1674_v24, %v1686_v52  ;;  %v1696_v8 = vsel %vm172_vm1, %v1691_v19, 0.0  ;;  %v9239_v24 = vld [vmem:[%s17809_s2 + $0x138] sm:$0xff]  ;;  %11685 = vmatprep.subr.bf16.mxu0 %v17871_v45 }
 0x951   :  { %1697 = vadd.xlane.f32.xlu0 %v1696_v8  ;;  %v11662_v14 = vpack.c.bf16 %v9239_v24, %v9238_v38  ;;  %v11671_v24 = vpack.c.bf16 %v9245_v39, %v9244_v37  ;;  %v14051_v37 = vld [vmem:[%s17811_s7 + $0x10] sm:$0xff] }
 0x952   :  { %v1692_v44 = vmul.f32 %v13893_v58, %v13893_v58 }
 0x953   :  { %11663 = vmatpush3.bf16.msra.mxu1 %v11662_v14  ;;  %11687 = vmatpush3.bf16.msra.mxu0 %v11686_v28  ;;  %v9246_v14 = vld [vmem:[%s17809_s2 + $0x170] sm:$0xff] }
 0x954   :  { %v1699_v47 = vsel %vm1430_vm7, %v1692_v44, 0.0  ;;  %11664 = vmatprep.subr.bf16.mxu1 %v17871_v45  ;;  %v11674_v59 = vpack.c.bf16 %v9247_v61, %v9246_v14  ;;  %v14076_v61 = vld [vmem:[%s17811_s7 + $0x28] sm:$0xff] }
 0x955   :  { %1700 = vadd.xlane.f32.xlu1 %v1699_v47 }
 0x9da   :  { %v1695_v2 = vpop.xlane.xlu1 %1694 }
 0x9db   :  { %v1702_v0 = vmul.f32 0.015625, %v1695_v2 }
 0x9dd   :  { %v1705_v60 = vadd.f32 1e-05, %v1702_v0 }
 0x9de   :  { %v1698_v11 = vpop.xlane.xlu0 %1697 }
 0x9df   :  { %12316 = vrsqrt.f32 %v1705_v60  ;;  %v1703_v52 = vmul.f32 0.015625, %v1698_v11 }
 0x9e1   :  { %v1706_v19 = vadd.f32 1e-05, %v1703_v52 }
 0x9e2   :  { %v1701_v8 = vpop.xlane.xlu1 %1700 }
 0x9e3   :  { %12318 = vrsqrt.f32 %v1706_v19  ;;  %v1704_v44 = vmul.f32 0.015625, %v1701_v8 }
 0x9e5   :  { %v1707_v47 = vadd.f32 1e-05, %v1704_v44 }
 0x9e7   :  { %12320 = vrsqrt.f32 %v1707_v47 }
 0x9e9   :  { %v12317_v62 = vpop.eup %12316 }
 0x9ea   :  { %v1711_v35 = vmul.f32 %v12317_v62, %v13884_v53  ;;  %v9242_v53 = vld [vmem:[%s17809_s2 + $0x150] sm:$0xff] }
 0x9eb   :  { %v11668_v36 = vpack.c.bf16 %v9243_v30, %v9242_v53 }
 0x9ec   :  { %v1718_v27 = vmul.f32 %v9181_v23, %v1711_v35 }
 0x9ed   :  { %v12319_v31 = vpop.eup %12318 }
 0x9ee   :  { %v1725_v4 = vadd.f32 %v9182_v42, %v1718_v27  ;;  %v1712_v3 = vmul.f32 %v12319_v31, %v13888_v55 }
 0x9f0   :  { %10688 = vmatmul.mubr.msk.f32.vlgmr.msra.gmra.mrb[44].mxu1 %vm172_vm1, %v1725_v4  ;;  %10738 = vmatmul.mubr.msk.f32.vlgmr.msra.gmra.mrb[38].mxu0 %vm172_vm1, %v1725_v4  ;;  %v1719_v49 = vmul.f32 %v9181_v23, %v1712_v3 }
 0x9f1   :  { %v12321_v6 = vpop.eup %12320  ;;  %11666 = vmatpush3.bf16.msra.mxu1 %v11665_v26  ;;  %10690 = vmatprep.mubr.msk.f32.mxu1 %vm12830_vm0, %v17872_v32 }
 0x9f2   :  { %11667 = vmatprep.subr.bf16.mxu1 %v17871_v45  ;;  %10740 = vmatprep.mubr.msk.f32.mxu0 %vm12830_vm0, %v17872_v32  ;;  %v1726_v55 = vadd.f32 %v9182_v42, %v1719_v49  ;;  %v1713_v12 = vmul.f32 %v12321_v6, %v13893_v58 }
 0x9f4   :  { %10691 = vmatmul.mubr.msk.f32.gmra.mrb[46].mxu1 %vm172_vm1, %v1726_v55  ;;  %10741 = vmatmul.mubr.msk.f32.gmra.mrb[40].mxu0 %vm172_vm1, %v1726_v55  ;;  %v1720_v38 = vmul.f32 %v9181_v23, %v1713_v12 }
 0x9f5   :  { %11669 = vmatpush3.bf16.msra.mxu1 %v11668_v36  ;;  %10693 = vmatprep.mubr.msk.f32.mxu1 %vm12830_vm0, %v17872_v32 }
 0x9f6   :  { %11670 = vmatprep.subr.bf16.mxu1 %v17871_v45  ;;  %10743 = vmatprep.mubr.msk.f32.mxu0 %vm12830_vm0, %v17872_v32  ;;  %v1727_v58 = vadd.f32 %v9182_v42, %v1720_v38  ;;  %v14060_v38 = vld [vmem:[%s17811_s7 + $0x18] sm:$0xff] }
 0x9f8   :  { %10694 = vmatmul.mubr.msk.f32.gmra.mrb[48].mxu1 %vm172_vm1, %v1727_v58  ;;  %10744 = vmatmul.mubr.msk.f32.gmra.mrb[42].mxu0 %vm172_vm1, %v1727_v58 }
 0x9f9   :  { %11672 = vmatpush3.bf16.msra.mxu1 %v11671_v24  ;;  %10712 = vmatprep.mubr.msk.f32.mxu1 %vm12830_vm0, %v17872_v32 }
 0x9fa   :  { %11673 = vmatprep.subr.bf16.mxu1 %v17871_v45 }
 0x9fd   :  { %11675 = vmatpush3.bf16.msra.mxu1 %v11674_v59 }
 0xa00   :  { %10713 = vmatmul.mubr.msk.f32.vlgmr.msra.gmra.mrb[50].mxu1 %vm172_vm1, %v1725_v4 }
 0xa01   :  { %10715 = vmatprep.mubr.msk.f32.mxu1 %vm12830_vm0, %v17872_v32 }
 0xa04   :  { %10716 = vmatmul.mubr.msk.f32.gmra.mrb[52].mxu1 %vm172_vm1, %v1726_v55  ;;  %v14043_v55 = vld [vmem:[%s17811_s7 + $0x8] sm:$0xff] }
 0xa05   :  { %10718 = vmatprep.mubr.msk.f32.mxu1 %vm12830_vm0, %v17872_v32 }
 0xa08   :  { %10719 = vmatmul.mubr.msk.f32.gmra.mrb[54].mxu1 %vm172_vm1, %v1727_v58  ;;  %v14067_v58 = vld [vmem:[%s17811_s7 + $0x20] sm:$0xff] }
 0xac3   :  { %v14013_v28 = vpop.f32.mrb[44].mxu1  ;;  %v2057_v2 = vpop.f32.mrb[38].mxu0 }
 0xac4   :  { %v10689_v0 = vpop.f32.mrb[45].mxu1  ;;  %v10739_v60 = vpop.f32.mrb[39].mxu0  ;;  %v2083_v11 = vmul.f32 %v13587_v40, %v14013_v28  ;;  %v2074_v23 = vrot.slane %v14013_v28, 4  ;;  %v2088_v59 = vmul.f32 %v14076_v61, %v14013_v28 }
 0xac5   :  { %v14092_v60 = vld [vmem:[%s17811_s7 + $0x38] sm:$0xff] }
 0xac6   :  { %10752 = vmatprep.mubr.msk.f32.mxu1 %vm172_vm1, %v2083_v11 }
 0xac7   :  { %v14018_v52 = vpop.f32.mrb[46].mxu1  ;;  %v2062_v19 = vpop.f32.mrb[40].mxu0 }
 0xac8   :  { %v2075_v8 = vrot.slane %v14018_v52, 4  ;;  %v11694_v44 = vpack.c.bf16 %v2062_v19, %v2057_v2  ;;  %v10692_v47 = vpop.f32.mrb[47].mxu1  ;;  %v10742_v62 = vpop.f32.mrb[41].mxu0  ;;  %v2084_v12 = vmul.f32 %v14043_v55, %v14018_v52  ;;  %v14083_v2 = vld [vmem:[%s17811_s7 + $0x30] sm:$0xff] }
 0xac9   :  { %v2089_v0 = vmul.f32 %v14083_v2, %v14018_v52  ;;  %v2093_v47 = vmul.f32 %v13611_v5, %v14013_v28  ;;  %v14125_v5 = vld [vmem:[%s17811_s7 + $0x68] sm:$0xff] }
 0xaca   :  { %11695 = vmatprep.subr.bf16.mxu0 %v11694_v44  ;;  %v14023_v35 = vsel %vm425_vm2, %v2074_v23, %v2075_v8 }
 0xacb   :  { %v1907_v43 = vpop.f32.mrb[48].mxu1  ;;  %v2067_v51 = vpop.f32.mrb[42].mxu0  ;;  %11697 = vmatpush3.bf16.msra.mxu0 %v11694_v44  ;;  %v2086_v24 = vmul.f32 %v14060_v38, %v14023_v35  ;;  %v2091_v19 = vmul.f32 %v13603_v56, %v14023_v35  ;;  %v14114_v56 = vld [vmem:[%s17811_s7 + $0x58] sm:$0xff] }
 0xacc   :  { %v2077_v40 = vrot.slane %v1907_v43, 4  ;;  %v14026_v42 = vsel %vm425_vm2, %v1907_v43, %v2074_v23  ;;  %v10695_v27 = vpop.f32.mrb[49].mxu1  ;;  %v10745_v31 = vpop.f32.mrb[43].mxu0  ;;  %10786 = vmatprep.subr.msk.mxu0 %vm425_vm2, %v2067_v51  ;;  %v2094_v62 = vmul.f32 %v14114_v56, %v14018_v52  ;;  %v2096_v43 = vmul.f32 %v14125_v5, %v14023_v35 }
 0xacd   :  { %v2085_v39 = vmul.f32 %v14051_v37, %v14026_v42  ;;  %v2090_v11 = vmul.f32 %v14092_v60, %v14026_v42  ;;  %v2095_v23 = vmul.f32 %v13619_v9, %v14026_v42  ;;  %v14136_v9 = vld [vmem:[%s17811_s7 + $0x78] sm:$0xff]  ;;  %v2099_v27 = vmul.f32 %v13635_v18, %v14018_v52  ;;  %v12758_v52 = vld [vmem:[%s17812_s8 + $0x8] sm:$0xff] }
 0xace   :  { %v14030_v26 = vsel %vm425_vm2, %v2075_v8, %v2077_v40  ;;  %v14103_v8 = vld [vmem:[%s17811_s7 + $0x48] sm:$0xff]  ;;  %v2098_v40 = vmul.f32 %v14136_v9, %v14013_v28  ;;  %v14158_v18 = vld [vmem:[%s17811_s7 + $0x98] sm:$0xff] }
 0xacf   :  { %10787 = vmatpush3.msk.msra.mxu0 %vm425_vm2, %v2067_v51  ;;  %v2087_v14 = vmul.f32 %v14067_v58, %v14030_v26  ;;  %v2092_v44 = vmul.f32 %v14103_v8, %v14030_v26  ;;  %v2097_v51 = vmul.f32 %v13627_v13, %v14030_v26  ;;  %v14147_v13 = vld [vmem:[%s17811_s7 + $0x88] sm:$0xff]  ;;  %v2102_v28 = vmul.f32 %v14158_v18, %v14030_v26 }
 0xad0   :  { %11728 = vmatprep.subr.bf16.mxu0 %v17871_v45  ;;  %v2100_v31 = vmul.f32 %v14147_v13, %v14026_v42 }
 0xad3   :  { %v1977_v4 = vpop.f32.mrb[50].mxu1 }
 0xad4   :  { %v10714_v3 = vpop.f32.mrb[51].mxu1 }
 0xad7   :  { %v1982_v53 = vpop.f32.mrb[52].mxu1 }
 0xad8   :  { %v11688_v30 = vpack.c.bf16 %v1982_v53, %v1977_v4  ;;  %v10717_v49 = vpop.f32.mrb[53].mxu1  ;;  %v2101_v4 = vmul.f32 %v13643_v22, %v14023_v35 }
 0xada   :  { %11690 = vmatprep.subr.msk.bf16.mxu1 %vm13002_vm3, %v11688_v30 }
 0xadb   :  { %v1987_v6 = vpop.f32.mrb[54].mxu1  ;;  %11693 = vmatpush3.bf16.xpose.msk.msra.mxu1 %vm13002_vm3, %v11688_v30 }
 0xadc   :  { %v10720_v36 = vpop.f32.mrb[55].mxu1  ;;  %10750 = vmatprep.subr.msk.mxu1 %vm172_vm1, %v1987_v6 }
 0xae3   :  { %10751 = vmatpush3.xpose.msk.msra.mxu1 %vm172_vm1, %v1987_v6 }
 0xae4   :  { %11698 = vmatprep.subr.bf16.mxu1 %v17871_v45 }
 0xae6   :  { %10753 = vmatmul.mubr.msk.f32.vlgmr.msra.gmra.mrb[56].mxu1 %vm172_vm1, %v2084_v12 }
 0xae7   :  { %10755 = vmatprep.mubr.msk.f32.mxu1 %vm172_vm1, %v2085_v39 }
 0xaea   :  { %10756 = vmatmul.mubr.msk.f32.gmra.mrb[58].mxu1 %vm172_vm1, %v2086_v24 }
 0xaeb   :  { %10758 = vmatprep.mubr.msk.f32.mxu1 %vm172_vm1, %v2087_v14 }
 0xaee   :  { %10759 = vmatmul.mubr.msk.f32.gmra.mrb[60].mxu1 %vm172_vm1, %v2088_v59 }
 0xaef   :  { %10761 = vmatprep.mubr.msk.f32.mxu1 %vm172_vm1, %v2089_v0 }
 0xaf2   :  { %10762 = vmatmul.mubr.msk.f32.gmra.mrb[62].mxu1 %vm172_vm1, %v2090_v11 }
 0xaf3   :  { %10764 = vmatprep.mubr.msk.f32.mxu1 %vm172_vm1, %v2091_v19 }
 0xaf6   :  { %10765 = vmatmul.mubr.msk.f32.gmra.mrb[64].mxu1 %vm172_vm1, %v2092_v44 }
 0xaf7   :  { %10767 = vmatprep.mubr.msk.f32.mxu1 %vm172_vm1, %v2093_v47 }
 0xafa   :  { %10768 = vmatmul.mubr.msk.f32.gmra.mrb[66].mxu1 %vm172_vm1, %v2094_v62 }
 0xafb   :  { %10770 = vmatprep.mubr.msk.f32.mxu1 %vm172_vm1, %v2095_v23 }
 0xafe   :  { %10771 = vmatmul.mubr.msk.f32.gmra.mrb[68].mxu1 %vm172_vm1, %v2096_v43 }
 0xaff   :  { %10773 = vmatprep.mubr.msk.f32.mxu1 %vm172_vm1, %v2097_v51 }
 0xb02   :  { %10774 = vmatmul.mubr.msk.f32.gmra.mrb[70].mxu1 %vm172_vm1, %v2098_v40 }
 0xb03   :  { %10776 = vmatprep.mubr.msk.f32.mxu1 %vm172_vm1, %v2099_v27 }
 0xb06   :  { %10777 = vmatmul.mubr.msk.f32.gmra.mrb[72].mxu1 %vm172_vm1, %v2100_v31 }
 0xb07   :  { %10779 = vmatprep.mubr.msk.f32.mxu1 %vm172_vm1, %v2101_v4 }
 0xb0a   :  { %10780 = vmatmul.mubr.msk.f32.gmra.mrb[74].mxu1 %vm172_vm1, %v2102_v28 }
 0xb0b   :  { %9317 = vmatprep.mubr.msk.f32.mxu1 %vm1241_vm6, %v12758_v52 }
 0xbb9   :  { %v10754_v22 = vpop.f32.mrb[56].mxu1 }
 0xbba   :  { %v14168_v35 = vadd.f32 %v10754_v22, %v13206_v54  ;;  %v2238_v42 = vpop.f32.mrb[57].mxu1 }
 0xbbb   :  { %v14171_v3 = vadd.f32 %v2238_v42, %v13200_v48 }
 0xbbc   :  { %v2340_v53 = vsel %vm772_vm5, %v14168_v35, -inf }
 0xbbd   :  { %2341 = vmax.xlane.f32.xlu1 %v2340_v53  ;;  %v10757_v26 = vpop.f32.mrb[58].mxu1  ;;  %v2337_v30 = vsel %vm772_vm5, %v14171_v3, -inf }
 0xbbe   :  { %v14178_v49 = vadd.f32 %v10757_v26, %v13226_v10  ;;  %v2248_v6 = vpop.f32.mrb[59].mxu1  ;;  %2338 = vmax.xlane.f32.xlu0 %v2337_v30 }
 0xbbf   :  { %v14181_v54 = vadd.f32 %v2248_v6, %v13215_v1  ;;  %v17873_v6 = vld [vmem:[#allocation3_spill] sm:$0xff] }
 0xbc0   :  { %v2346_v48 = vsel %vm772_vm5, %v14178_v49, -inf }
 0xbc1   :  { %2347 = vmax.xlane.f32.xlu1 %v2346_v48  ;;  %v10760_v36 = vpop.f32.mrb[60].mxu1  ;;  %v2343_v12 = vsel %vm772_vm5, %v14181_v54, -inf }
 0xbc2   :  { %v14188_v39 = vadd.f32 %v10760_v36, %v13248_v29  ;;  %v2258_v24 = vpop.f32.mrb[61].mxu1  ;;  %2344 = vmax.xlane.f32.xlu0 %v2343_v12 }
 0xbc3   :  { %v14191_v10 = vadd.f32 %v2258_v24, %v13235_v17 }
 0xbc4   :  { %v2352_v1 = vsel %vm772_vm5, %v14188_v39, -inf }
 0xbc5   :  { %2353 = vmax.xlane.f32.xlu1 %v2352_v1  ;;  %v10763_v14 = vpop.f32.mrb[62].mxu1  ;;  %v2349_v59 = vsel %vm772_vm5, %v14191_v10, -inf }
 0xbc6   :  { %v14198_v0 = vadd.f32 %v10763_v14, %v13270_v41  ;;  %v2268_v11 = vpop.f32.mrb[63].mxu1  ;;  %2350 = vmax.xlane.f32.xlu0 %v2349_v59  ;;  %v17875_v14 = vld [vmem:[#allocation5_spill] sm:$0xff] }
 0xbc7   :  { %v14201_v29 = vadd.f32 %v2268_v11, %v13257_v34 }
 0xbc8   :  { %v2358_v17 = vsel %vm772_vm5, %v14198_v0, -inf }
 0xbc9   :  { %2359 = vmax.xlane.f32.xlu1 %v2358_v17  ;;  %v10766_v19 = vpop.f32.mrb[64].mxu1  ;;  %v2355_v44 = vsel %vm772_vm5, %v14201_v29, -inf  ;;  %v17876_v17 = vld [vmem:[#allocation4_spill] sm:$0xff] }
 0xbca   :  { %v14208_v47 = vadd.f32 %v10766_v19, %v13292_v57  ;;  %v2278_v62 = vpop.f32.mrb[65].mxu1  ;;  %2356 = vmax.xlane.f32.xlu0 %v2355_v44 }
 0xbcb   :  { %v14211_v41 = vadd.f32 %v2278_v62, %v13279_v20 }
 0xbcc   :  { %v2364_v34 = vsel %vm772_vm5, %v14208_v47, -inf }
 0xbcd   :  { %2365 = vmax.xlane.f32.xlu1 %v2364_v34  ;;  %v10769_v23 = vpop.f32.mrb[66].mxu1  ;;  %v2361_v43 = vsel %vm772_vm5, %v14211_v41, -inf }
 0xbce   :  { %v14218_v51 = vadd.f32 %v10769_v23, %v13314_v25  ;;  %v2288_v40 = vpop.f32.mrb[67].mxu1  ;;  %2362 = vmax.xlane.f32.xlu0 %v2361_v43 }
 0xbcf   :  { %v14221_v57 = vadd.f32 %v2288_v40, %v13301_v7 }
 0xbd0   :  { %v2370_v20 = vsel %vm772_vm5, %v14218_v51, -inf }
 0xbd1   :  { %2371 = vmax.xlane.f32.xlu1 %v2370_v20  ;;  %v10772_v27 = vpop.f32.mrb[68].mxu1  ;;  %v2367_v31 = vsel %vm772_vm5, %v14221_v57, -inf }
 0xbd2   :  { %v14228_v4 = vadd.f32 %v10772_v27, %v13336_v16  ;;  %v2298_v28 = vpop.f32.mrb[69].mxu1  ;;  %2368 = vmax.xlane.f32.xlu0 %v2367_v31 }
 0xbd3   :  { %v14231_v25 = vadd.f32 %v2298_v28, %v13323_v33 }
 0xbd4   :  { %v2376_v7 = vsel %vm772_vm5, %v14228_v4, -inf }
 0xbd5   :  { %2377 = vmax.xlane.f32.xlu1 %v2376_v7  ;;  %v10775_v52 = vpop.f32.mrb[70].mxu1  ;;  %v2373_v22 = vsel %vm772_vm5, %v14231_v25, -inf }
 0xbd6   :  { %v14238_v42 = vadd.f32 %v10775_v52, %v13358_v15  ;;  %v2308_v53 = vpop.f32.mrb[71].mxu1  ;;  %2374 = vmax.xlane.f32.xlu0 %v2373_v22  ;;  %v17874_v15 = vld [vmem:[#allocation2_spill] sm:$0xff] }
 0xbd7   :  { %v14241_v16 = vadd.f32 %v2308_v53, %v13345_v50 }
 0xbd8   :  { %v2382_v33 = vsel %vm772_vm5, %v14238_v42, -inf }
 0xbd9   :  { %2383 = vmax.xlane.f32.xlu1 %v2382_v33  ;;  %v10778_v26 = vpop.f32.mrb[72].mxu1  ;;  %v2379_v30 = vsel %vm772_vm5, %v14241_v16, -inf }
 0xbda   :  { %v14248_v48 = vadd.f32 %v10778_v26, %v17873_v6  ;;  %v2318_v36 = vpop.f32.mrb[73].mxu1  ;;  %2380 = vmax.xlane.f32.xlu0 %v2379_v30 }
 0xbdb   :  { %v14251_v12 = vadd.f32 %v2318_v36, %v17874_v15 }
 0xbdc   :  { %v2388_v50 = vsel %vm772_vm5, %v14248_v48, -inf }
 0xbdd   :  { %2389 = vmax.xlane.f32.xlu1 %v2388_v50  ;;  %v10781_v24 = vpop.f32.mrb[74].mxu1  ;;  %v2385_v1 = vsel %vm772_vm5, %v14251_v12, -inf }
 0xbde   :  { %v14258_v59 = vadd.f32 %v10781_v24, %v17875_v14  ;;  %v2328_v11 = vpop.f32.mrb[75].mxu1  ;;  %2386 = vmax.xlane.f32.xlu0 %v2385_v1 }
 0xbdf   :  { %v14261_v19 = vadd.f32 %v2328_v11, %v17876_v17 }
 0xbe0   :  { %v2394_v44 = vsel %vm772_vm5, %v14258_v59, -inf }
 0xbe1   :  { %2395 = vmax.xlane.f32.xlu1 %v2394_v44  ;;  %v2391_v62 = vsel %vm772_vm5, %v14261_v19, -inf }
 0xbe2   :  { %2392 = vmax.xlane.f32.xlu0 %v2391_v62 }
 0xc4a   :  { %v2342_v34 = vpop.xlane.xlu1 %2341 }
 0xc4b   :  { %v2398_v23 = vsub.f32 %v14168_v35, %v2342_v34  ;;  %v2339_v43 = vpop.xlane.xlu0 %2338 }
 0xc4c   :  { %v2397_v40 = vsub.f32 %v14171_v3, %v2339_v43 }
 0xc4d   :  { %v2419_v20 = vmul.f32 1.442695, %v2398_v23 }
 0xc4e   :  { %v2417_v27 = vmul.f32 1.442695, %v2397_v40  ;;  %v2348_v31 = vpop.xlane.xlu1 %2347 }
 0xc4f   :  { %12322 = vpow2.f32 %v2419_v20  ;;  %v2400_v28 = vsub.f32 %v14178_v49, %v2348_v31  ;;  %v2345_v7 = vpop.xlane.xlu0 %2344 }
 0xc50   :  { %12324 = vpow2.f32 %v2417_v27  ;;  %v2399_v52 = vsub.f32 %v14181_v54, %v2345_v7 }
 0xc51   :  { %v2423_v22 = vmul.f32 1.442695, %v2400_v28 }
 0xc52   :  { %v2421_v53 = vmul.f32 1.442695, %v2399_v52  ;;  %v2354_v33 = vpop.xlane.xlu1 %2353 }
 0xc53   :  { %12326 = vpow2.f32 %v2423_v22  ;;  %v2402_v26 = vsub.f32 %v14188_v39, %v2354_v33  ;;  %v2351_v35 = vpop.xlane.xlu0 %2350 }
 0xc54   :  { %12328 = vpow2.f32 %v2421_v53  ;;  %v2401_v3 = vsub.f32 %v14191_v10, %v2351_v35 }
 0xc55   :  { %v2427_v30 = vmul.f32 1.442695, %v2402_v26 }
 0xc56   :  { %v2425_v6 = vmul.f32 1.442695, %v2401_v3  ;;  %v2360_v36 = vpop.xlane.xlu1 %2359 }
 0xc57   :  { %12330 = vpow2.f32 %v2427_v30  ;;  %v2404_v49 = vsub.f32 %v14198_v0, %v2360_v36  ;;  %v2357_v15 = vpop.xlane.xlu0 %2356 }
 0xc58   :  { %12332 = vpow2.f32 %v2425_v6  ;;  %v2403_v54 = vsub.f32 %v14201_v29, %v2357_v15 }
 0xc59   :  { %v14275_v50 = vpop.eup %12322  ;;  %v2431_v24 = vmul.f32 1.442695, %v2404_v49 }
 0xc5a   :  { %v14277_v1 = vpop.eup %12324  ;;  %v2429_v39 = vmul.f32 1.442695, %v2403_v54  ;;  %v2366_v14 = vpop.xlane.xlu1 %2365  ;;  %v2460_v10 = vsel %vm772_vm5, %v14275_v50, 0.0 }
 0xc5b   :  { %12334 = vpow2.f32 %v2431_v24  ;;  %v2406_v11 = vsub.f32 %v14208_v47, %v2366_v14  ;;  %2461 = vadd.xlane.f32.xlu1 %v2460_v10  ;;  %v2363_v17 = vpop.xlane.xlu0 %2362  ;;  %v2457_v0 = vsel %vm772_vm5, %v14277_v1, 0.0 }
 0xc5c   :  { %12336 = vpow2.f32 %v2429_v39  ;;  %v2405_v29 = vsub.f32 %v14211_v41, %v2363_v17  ;;  %2458 = vadd.xlane.f32.xlu0 %v2457_v0 }
 0xc5d   :  { %v14285_v44 = vpop.eup %12326  ;;  %v2435_v62 = vmul.f32 1.442695, %v2406_v11 }
 0xc5e   :  { %v14287_v34 = vpop.eup %12328  ;;  %v2433_v23 = vmul.f32 1.442695, %v2405_v29  ;;  %v2372_v43 = vpop.xlane.xlu1 %2371  ;;  %v2466_v40 = vsel %vm772_vm5, %v14285_v44, 0.0 }
 0xc5f   :  { %12338 = vpow2.f32 %v2435_v62  ;;  %v2408_v47 = vsub.f32 %v14218_v51, %v2372_v43  ;;  %2467 = vadd.xlane.f32.xlu1 %v2466_v40  ;;  %v2369_v20 = vpop.xlane.xlu0 %2368  ;;  %v2463_v27 = vsel %vm772_vm5, %v14287_v34, 0.0 }
 0xc60   :  { %12340 = vpow2.f32 %v2433_v23  ;;  %v2407_v41 = vsub.f32 %v14221_v57, %v2369_v20  ;;  %2464 = vadd.xlane.f32.xlu0 %v2463_v27 }
 0xc61   :  { %v14295_v31 = vpop.eup %12330  ;;  %v2439_v28 = vmul.f32 1.442695, %v2408_v47 }
 0xc62   :  { %v14297_v7 = vpop.eup %12332  ;;  %v2437_v52 = vmul.f32 1.442695, %v2407_v41  ;;  %v2378_v22 = vpop.xlane.xlu1 %2377  ;;  %v2472_v53 = vsel %vm772_vm5, %v14295_v31, 0.0 }
 0xc63   :  { %12342 = vpow2.f32 %v2439_v28  ;;  %v2410_v51 = vsub.f32 %v14228_v4, %v2378_v22  ;;  %2473 = vadd.xlane.f32.xlu1 %v2472_v53  ;;  %v2375_v33 = vpop.xlane.xlu0 %2374  ;;  %v2469_v26 = vsel %vm772_vm5, %v14297_v7, 0.0 }
 0xc64   :  { %12344 = vpow2.f32 %v2437_v52  ;;  %v2409_v57 = vsub.f32 %v14231_v25, %v2375_v33  ;;  %2470 = vadd.xlane.f32.xlu0 %v2469_v26 }
 0xc65   :  { %v14305_v35 = vpop.eup %12334  ;;  %v2443_v3 = vmul.f32 1.442695, %v2410_v51 }
 0xc66   :  { %v14307_v30 = vpop.eup %12336  ;;  %v2441_v6 = vmul.f32 1.442695, %v2409_v57  ;;  %v2384_v36 = vpop.xlane.xlu1 %2383  ;;  %v2478_v49 = vsel %vm772_vm5, %v14305_v35, 0.0 }
 0xc67   :  { %12346 = vpow2.f32 %v2443_v3  ;;  %v2412_v4 = vsub.f32 %v14238_v42, %v2384_v36  ;;  %2479 = vadd.xlane.f32.xlu1 %v2478_v49  ;;  %v2381_v15 = vpop.xlane.xlu0 %2380  ;;  %v2475_v54 = vsel %vm772_vm5, %v14307_v30, 0.0 }
 0xc68   :  { %12348 = vpow2.f32 %v2441_v6  ;;  %v2411_v25 = vsub.f32 %v14241_v16, %v2381_v15  ;;  %2476 = vadd.xlane.f32.xlu0 %v2475_v54 }
 0xc69   :  { %v14315_v24 = vpop.eup %12338  ;;  %v2447_v39 = vmul.f32 1.442695, %v2412_v4 }
 0xc6a   :  { %v14317_v14 = vpop.eup %12340  ;;  %v2445_v10 = vmul.f32 1.442695, %v2411_v25  ;;  %v2390_v11 = vpop.xlane.xlu1 %2389  ;;  %v2484_v17 = vsel %vm772_vm5, %v14315_v24, 0.0 }
 0xc6b   :  { %12350 = vpow2.f32 %v2447_v39  ;;  %v2414_v42 = vsub.f32 %v14248_v48, %v2390_v11  ;;  %2485 = vadd.xlane.f32.xlu1 %v2484_v17  ;;  %v2387_v0 = vpop.xlane.xlu0 %2386  ;;  %v2481_v29 = vsel %vm772_vm5, %v14317_v14, 0.0 }
 0xc6c   :  { %12352 = vpow2.f32 %v2445_v10  ;;  %v2413_v16 = vsub.f32 %v14251_v12, %v2387_v0  ;;  %2482 = vadd.xlane.f32.xlu0 %v2481_v29 }
 0xc6d   :  { %v14325_v62 = vpop.eup %12342  ;;  %v2451_v23 = vmul.f32 1.442695, %v2414_v42 }
 0xc6e   :  { %v14327_v43 = vpop.eup %12344  ;;  %v2449_v40 = vmul.f32 1.442695, %v2413_v16  ;;  %v2396_v47 = vpop.xlane.xlu1 %2395  ;;  %v2490_v20 = vsel %vm772_vm5, %v14325_v62, 0.0 }
 0xc6f   :  { %12354 = vpow2.f32 %v2451_v23  ;;  %v2416_v48 = vsub.f32 %v14258_v59, %v2396_v47  ;;  %2491 = vadd.xlane.f32.xlu1 %v2490_v20  ;;  %v2393_v27 = vpop.xlane.xlu0 %2392  ;;  %v2487_v41 = vsel %vm772_vm5, %v14327_v43, 0.0 }
 0xc70   :  { %12356 = vpow2.f32 %v2449_v40  ;;  %v2415_v12 = vsub.f32 %v14261_v19, %v2393_v27  ;;  %2488 = vadd.xlane.f32.xlu0 %v2487_v41 }
 0xc71   :  { %v14335_v28 = vpop.eup %12346  ;;  %v2455_v52 = vmul.f32 1.442695, %v2416_v48 }
 0xc72   :  { %v14337_v22 = vpop.eup %12348  ;;  %v2453_v53 = vmul.f32 1.442695, %v2415_v12  ;;  %v2496_v51 = vsel %vm772_vm5, %v14335_v28, 0.0 }
 0xc73   :  { %12358 = vpow2.f32 %v2455_v52  ;;  %2497 = vadd.xlane.f32.xlu1 %v2496_v51  ;;  %v2493_v59 = vsel %vm772_vm5, %v14337_v22, 0.0 }
 0xc74   :  { %12360 = vpow2.f32 %v2453_v53  ;;  %2494 = vadd.xlane.f32.xlu0 %v2493_v59 }
 0xc75   :  { %v14343_v33 = vpop.eup %12350 }
 0xc76   :  { %v14345_v19 = vpop.eup %12352  ;;  %v2502_v26 = vsel %vm772_vm5, %v14343_v33, 0.0 }
 0xc77   :  { %2503 = vadd.xlane.f32.xlu1 %v2502_v26  ;;  %v2499_v57 = vsel %vm772_vm5, %v14345_v19, 0.0 }
 0xc78   :  { %2500 = vadd.xlane.f32.xlu0 %v2499_v57 }
 0xc79   :  { %v14351_v3 = vpop.eup %12354 }
 0xc7a   :  { %v14353_v6 = vpop.eup %12356  ;;  %v2508_v36 = vsel %vm772_vm5, %v14351_v3, 0.0 }
 0xc7b   :  { %2509 = vadd.xlane.f32.xlu1 %v2508_v36  ;;  %v2505_v49 = vsel %vm772_vm5, %v14353_v6, 0.0 }
 0xc7c   :  { %2506 = vadd.xlane.f32.xlu0 %v2505_v49 }
 0xc7d   :  { %v14359_v4 = vpop.eup %12358 }
 0xc7e   :  { %v14361_v15 = vpop.eup %12360  ;;  %v2514_v54 = vsel %vm772_vm5, %v14359_v4, 0.0 }
 0xc7f   :  { %2515 = vadd.xlane.f32.xlu1 %v2514_v54  ;;  %v2511_v25 = vsel %vm772_vm5, %v14361_v15, 0.0 }
 0xc80   :  { %2512 = vadd.xlane.f32.xlu0 %v2511_v25 }
 0xce8   :  { %v2462_v39 = vpop.xlane.xlu1 %2461 }
 0xce9   :  { %12362 = vrcp.f32 %v2462_v39  ;;  %v2459_v10 = vpop.xlane.xlu0 %2458 }
 0xcea   :  { %12364 = vrcp.f32 %v2459_v10 }
 0xcec   :  { %v2468_v11 = vpop.xlane.xlu1 %2467 }
 0xced   :  { %12366 = vrcp.f32 %v2468_v11  ;;  %v2465_v17 = vpop.xlane.xlu0 %2464 }
 0xcee   :  { %12368 = vrcp.f32 %v2465_v17 }
 0xcf0   :  { %v2474_v42 = vpop.xlane.xlu1 %2473 }
 0xcf1   :  { %12370 = vrcp.f32 %v2474_v42  ;;  %v2471_v0 = vpop.xlane.xlu0 %2470 }
 0xcf2   :  { %12372 = vrcp.f32 %v2471_v0 }
 0xcf3   :  { %v12363_v29 = vpop.eup %12362 }
 0xcf4   :  { %v12365_v16 = vpop.eup %12364  ;;  %v2480_v23 = vpop.xlane.xlu1 %2479  ;;  %v2538_v20 = vmul.f32 %v12363_v29, %v14275_v50 }
 0xcf5   :  { %12374 = vrcp.f32 %v2480_v23  ;;  %v2477_v40 = vpop.xlane.xlu0 %2476  ;;  %v2537_v47 = vmul.f32 %v12365_v16, %v14277_v1 }
 0xcf6   :  { %12376 = vrcp.f32 %v2477_v40 }
 0xcf7   :  { %v12367_v48 = vpop.eup %12366  ;;  %10788 = vmatprep.mubr.msk.f32.mxu0 %vm772_vm5, %v2537_v47 }
 0xcf8   :  { %v12369_v27 = vpop.eup %12368  ;;  %v2486_v41 = vpop.xlane.xlu1 %2485  ;;  %10789 = vmatmul.mubr.msk.f32.vlgmr.msra.gmra.mrb[44].mxu0 %vm772_vm5, %v2538_v20  ;;  %v2540_v53 = vmul.f32 %v12367_v48, %v14285_v44 }
 0xcf9   :  { %12378 = vrcp.f32 %v2486_v41  ;;  %v2483_v12 = vpop.xlane.xlu0 %2482  ;;  %v2539_v52 = vmul.f32 %v12369_v27, %v14287_v34 }
 0xcfa   :  { %12380 = vrcp.f32 %v2483_v12 }
 0xcfb   :  { %v12371_v51 = vpop.eup %12370  ;;  %10791 = vmatprep.mubr.msk.f32.mxu0 %vm772_vm5, %v2539_v52 }
 0xcfc   :  { %v12373_v1 = vpop.eup %12372  ;;  %v2492_v50 = vpop.xlane.xlu1 %2491  ;;  %10792 = vmatmul.mubr.msk.f32.gmra.mrb[46].mxu0 %vm772_vm5, %v2540_v53  ;;  %v2542_v57 = vmul.f32 %v12371_v51, %v14295_v31  ;;  %v9259_v51 = vld [vmem:[%s17809_s2 + $0x1d8] sm:$0xff] }
 0xcfd   :  { %12382 = vrcp.f32 %v2492_v50  ;;  %v2489_v59 = vpop.xlane.xlu0 %2488  ;;  %v2541_v26 = vmul.f32 %v12373_v1, %v14297_v7  ;;  %v9260_v50 = vld [vmem:[%s17809_s2 + $0x1e0] sm:$0xff] }
 0xcfe   :  { %12384 = vrcp.f32 %v2489_v59  ;;  %v9261_v59 = vld [vmem:[%s17809_s2 + $0x1e8] sm:$0xff] }
 0xcff   :  { %v12375_v36 = vpop.eup %12374  ;;  %10794 = vmatprep.mubr.msk.f32.mxu0 %vm772_vm5, %v2541_v26  ;;  %v11735_v26 = vpack.c.bf16 %v9261_v59, %v9260_v50 }
 0xd00   :  { %v12377_v34 = vpop.eup %12376  ;;  %v2498_v49 = vpop.xlane.xlu1 %2497  ;;  %10795 = vmatmul.mubr.msk.f32.gmra.mrb[48].mxu0 %vm772_vm5, %v2542_v57  ;;  %v2544_v25 = vmul.f32 %v12375_v36, %v14305_v35  ;;  %v9262_v57 = vld [vmem:[%s17809_s2 + $0x1f0] sm:$0xff]  ;;  %v9263_v36 = vld [vmem:[%s17809_s2 + $0x1f8] sm:$0xff] }
 0xd01   :  { %12386 = vrcp.f32 %v2498_v49  ;;  %v2495_v44 = vpop.xlane.xlu0 %2494  ;;  %v2543_v54 = vmul.f32 %v12377_v34, %v14307_v30  ;;  %v11738_v34 = vpack.c.bf16 %v9263_v36, %v9262_v57  ;;  %v12765_v57 = vld [vmem:[%s17811_s7 + $0x90] sm:$0xff] }
 0xd02   :  { %12388 = vrcp.f32 %v2495_v44 }
 0xd03   :  { %v12379_v39 = vpop.eup %12378  ;;  %10797 = vmatprep.mubr.msk.f32.mxu0 %vm772_vm5, %v2543_v54 }
 0xd04   :  { %v12381_v7 = vpop.eup %12380  ;;  %v2504_v10 = vpop.xlane.xlu1 %2503  ;;  %10798 = vmatmul.mubr.msk.f32.gmra.mrb[50].mxu0 %vm772_vm5, %v2544_v25  ;;  %v2546_v17 = vmul.f32 %v12379_v39, %v14315_v24  ;;  %v12759_v25 = vld [vmem:[%s17811_s7] sm:$0xff] }
 0xd05   :  { %12390 = vrcp.f32 %v2504_v10  ;;  %v2501_v31 = vpop.xlane.xlu0 %2500  ;;  %v2545_v11 = vmul.f32 %v12381_v7, %v14317_v14 }
 0xd06   :  { %12392 = vrcp.f32 %v2501_v31 }
 0xd07   :  { %v12383_v42 = vpop.eup %12382  ;;  %10800 = vmatprep.mubr.msk.f32.mxu0 %vm772_vm5, %v2545_v11 }
 0xd08   :  { %v12385_v30 = vpop.eup %12384  ;;  %v2510_v0 = vpop.xlane.xlu1 %2509  ;;  %10801 = vmatmul.mubr.msk.f32.gmra.mrb[52].mxu0 %vm772_vm5, %v2546_v17  ;;  %v2548_v16 = vmul.f32 %v12383_v42, %v14325_v62 }
 0xd09   :  { %12394 = vrcp.f32 %v2510_v0  ;;  %v2507_v35 = vpop.xlane.xlu0 %2506  ;;  %v2547_v29 = vmul.f32 %v12385_v30, %v14327_v43 }
 0xd0a   :  { %12396 = vrcp.f32 %v2507_v35 }
 0xd0b   :  { %v12387_v23 = vpop.eup %12386  ;;  %10803 = vmatprep.mubr.msk.f32.mxu0 %vm772_vm5, %v2547_v29 }
 0xd0c   :  { %v12389_v14 = vpop.eup %12388  ;;  %v2516_v40 = vpop.xlane.xlu1 %2515  ;;  %10804 = vmatmul.mubr.msk.f32.gmra.mrb[54].mxu0 %vm772_vm5, %v2548_v16  ;;  %v2550_v20 = vmul.f32 %v12387_v23, %v14335_v28 }
 0xd0d   :  { %12398 = vrcp.f32 %v2516_v40  ;;  %v2513_v24 = vpop.xlane.xlu0 %2512  ;;  %v2549_v47 = vmul.f32 %v12389_v14, %v14337_v22 }
 0xd0e   :  { %12400 = vrcp.f32 %v2513_v24 }
 0xd0f   :  { %v12391_v48 = vpop.eup %12390  ;;  %10806 = vmatprep.mubr.msk.f32.mxu0 %vm772_vm5, %v2549_v47 }
 0xd10   :  { %v12393_v43 = vpop.eup %12392  ;;  %10807 = vmatmul.mubr.msk.f32.gmra.mrb[56].mxu0 %vm772_vm5, %v2550_v20  ;;  %v2552_v27 = vmul.f32 %v12391_v48, %v14343_v33 }
 0xd11   :  { %v2551_v62 = vmul.f32 %v12393_v43, %v14345_v19  ;;  %v12761_v43 = vld [vmem:[%s17811_s7 + $0x50] sm:$0xff] }
 0xd13   :  { %v12395_v41 = vpop.eup %12394  ;;  %10809 = vmatprep.mubr.msk.f32.mxu0 %vm772_vm5, %v2551_v62 }
 0xd14   :  { %v12397_v12 = vpop.eup %12396  ;;  %10810 = vmatmul.mubr.msk.f32.gmra.mrb[58].mxu0 %vm772_vm5, %v2552_v27  ;;  %v2554_v28 = vmul.f32 %v12395_v41, %v14351_v3  ;;  %v9256_v3 = vld [vmem:[%s17809_s2 + $0x1c0] sm:$0xff] }
 0xd15   :  { %v2553_v22 = vmul.f32 %v12397_v12, %v14353_v6  ;;  %v9257_v6 = vld [vmem:[%s17809_s2 + $0x1c8] sm:$0xff] }
 0xd17   :  { %v12399_v52 = vpop.eup %12398  ;;  %10812 = vmatprep.mubr.msk.f32.mxu0 %vm772_vm5, %v2553_v22  ;;  %v12762_v22 = vld [vmem:[%s17811_s7 + $0x60] sm:$0xff] }
 0xd18   :  { %v12401_v53 = vpop.eup %12400  ;;  %10813 = vmatmul.mubr.msk.f32.gmra.mrb[60].mxu0 %vm772_vm5, %v2554_v28  ;;  %v2556_v33 = vmul.f32 %v12399_v52, %v14359_v4  ;;  %v11729_v4 = vpack.c.bf16 %v9257_v6, %v9256_v3 }
 0xd19   :  { %v2555_v19 = vmul.f32 %v12401_v53, %v14361_v15  ;;  %v9258_v15 = vld [vmem:[%s17809_s2 + $0x1d0] sm:$0xff] }
 0xd1a   :  { %11730 = vmatpush3.bf16.msra.mxu0 %v11729_v4  ;;  %v11732_v1 = vpack.c.bf16 %v9259_v51, %v9258_v15  ;;  %v12764_v51 = vld [vmem:[%s17811_s7 + $0x80] sm:$0xff] }
 0xd1b   :  { %10815 = vmatprep.mubr.msk.f32.mxu0 %vm772_vm5, %v2555_v19  ;;  %11731 = vmatprep.subr.bf16.mxu0 %v17871_v45 }
 0xd1c   :  { %10816 = vmatmul.mubr.msk.f32.gmra.mrb[62].mxu0 %vm772_vm5, %v2556_v33  ;;  %v12763_v33 = vld [vmem:[%s17811_s7 + $0x70] sm:$0xff] }
 0xd1d   :  { %10834 = vmatprep.mubr.msk.f32.mxu0 %vm12830_vm0, %v17872_v32 }
 0xd1e   :  { %11733 = vmatpush3.bf16.msra.mxu0 %v11732_v1 }
 0xd1f   :  { %11734 = vmatprep.subr.bf16.mxu0 %v17871_v45 }
 0xd22   :  { %11736 = vmatpush3.bf16.msra.mxu0 %v11735_v26 }
 0xd23   :  { %11737 = vmatprep.subr.bf16.mxu0 %v17871_v45 }
 0xd26   :  { %11739 = vmatpush3.bf16.msra.mxu0 %v11738_v34  ;;  %v12766_v34 = vld [vmem:[%s17812_s8] sm:$0xff] }
 0xdcb   :  { %v10790_v49 = vpop.f32.mrb[44].mxu0 }
 0xdcc   :  { %v2786_v44 = vmul.f32 %v14043_v55, %v10790_v49  ;;  %v2686_v54 = vpop.f32.mrb[45].mxu0  ;;  %v12768_v49 = vld [vmem:[%s17812_s8 + $0x10] sm:$0xff] }
 0xdcd   :  { %v2785_v39 = vmul.f32 %v12759_v25, %v2686_v54  ;;  %v12770_v54 = vld [vmem:[%s17812_s8 + $0x20] sm:$0xf] }
 0xdcf   :  { %v11699_v7 = vpack.c.bf16 %v2786_v44, %v2785_v39  ;;  %v10793_v10 = vpop.f32.mrb[46].mxu0  ;;  %v12769_v44 = vld [vmem:[%s17812_s8 + $0x28] sm:$0xf] }
 0xdd0   :  { %v2788_v31 = vmul.f32 %v14060_v38, %v10793_v10  ;;  %v2696_v11 = vpop.f32.mrb[47].mxu0 }
 0xdd1   :  { %v2787_v17 = vmul.f32 %v14051_v37, %v2696_v11  ;;  %11700 = vmatpush1.bf16.msra.mxu1 %v11699_v7 }
 0xdd2   :  { %11701 = vmatprep.subr.bf16.mxu1 %v17871_v45 }
 0xdd3   :  { %v11702_v42 = vpack.c.bf16 %v2788_v31, %v2787_v17  ;;  %v10796_v30 = vpop.f32.mrb[48].mxu0  ;;  %v9320_v17 = vld [vmem:[%s17813_s5 + $0x6] ss:$0 sm:$0xff] }
 0xdd4   :  { %v2790_v55 = vmul.f32 %v14076_v61, %v10796_v30  ;;  %v2706_v0 = vpop.f32.mrb[49].mxu0 }
 0xdd5   :  { %v2789_v35 = vmul.f32 %v14067_v58, %v2706_v0  ;;  %11703 = vmatpush1.bf16.msra.mxu1 %v11702_v42  ;;  %v12760_v58 = vld [vmem:[%s17811_s7 + $0x40] sm:$0xff] }
 0xdd6   :  { %11704 = vmatprep.subr.bf16.mxu1 %v17871_v45 }
 0xdd7   :  { %v11705_v29 = vpack.c.bf16 %v2790_v55, %v2789_v35  ;;  %v10799_v16 = vpop.f32.mrb[50].mxu0 }
 0xdd8   :  { %v2792_v38 = vmul.f32 %v14092_v60, %v10799_v16  ;;  %v2716_v23 = vpop.f32.mrb[51].mxu0 }
 0xdd9   :  { %v2791_v37 = vmul.f32 %v14083_v2, %v2716_v23  ;;  %11706 = vmatpush1.bf16.msra.mxu1 %v11705_v29 }
 0xdda   :  { %11707 = vmatprep.subr.bf16.mxu1 %v17871_v45 }
 0xddb   :  { %v11708_v14 = vpack.c.bf16 %v2792_v38, %v2791_v37  ;;  %v10802_v40 = vpop.f32.mrb[52].mxu0 }
 0xddc   :  { %v2794_v61 = vmul.f32 %v14103_v8, %v10802_v40  ;;  %v2726_v24 = vpop.f32.mrb[53].mxu0 }
 0xddd   :  { %v2793_v47 = vmul.f32 %v12760_v58, %v2726_v24  ;;  %11709 = vmatpush1.bf16.msra.mxu1 %v11708_v14 }
 0xdde   :  { %11710 = vmatprep.subr.bf16.mxu1 %v17871_v45 }
 0xddf   :  { %v11711_v60 = vpack.c.bf16 %v2794_v61, %v2793_v47  ;;  %v10805_v20 = vpop.f32.mrb[54].mxu0 }
 0xde0   :  { %v2796_v2 = vmul.f32 %v14114_v56, %v10805_v20  ;;  %v2736_v48 = vpop.f32.mrb[55].mxu0 }
 0xde1   :  { %v2795_v62 = vmul.f32 %v12761_v43, %v2736_v48  ;;  %11712 = vmatpush1.bf16.msra.mxu1 %v11711_v60 }
 0xde2   :  { %11713 = vmatprep.subr.bf16.mxu1 %v17871_v45 }
 0xde3   :  { %v11714_v8 = vpack.c.bf16 %v2796_v2, %v2795_v62  ;;  %v10808_v27 = vpop.f32.mrb[56].mxu0 }
 0xde4   :  { %v2798_v41 = vmul.f32 %v14125_v5, %v10808_v27  ;;  %v2746_v12 = vpop.f32.mrb[57].mxu0 }
 0xde5   :  { %v2797_v28 = vmul.f32 %v12762_v22, %v2746_v12  ;;  %11715 = vmatpush1.bf16.msra.mxu1 %v11714_v8 }
 0xde6   :  { %11716 = vmatprep.subr.bf16.mxu1 %v17871_v45 }
 0xde7   :  { %v11717_v56 = vpack.c.bf16 %v2798_v41, %v2797_v28  ;;  %v10811_v52 = vpop.f32.mrb[58].mxu0  ;;  %v9184_v28 = vld [vmem:[%s17814_s3 + $0x88] sm:$0xff] }
 0xde8   :  { %v2800_v53 = vmul.f32 %v14136_v9, %v10811_v52  ;;  %v2756_v19 = vpop.f32.mrb[59].mxu0 }
 0xde9   :  { %v2799_v3 = vmul.f32 %v12763_v33, %v2756_v19  ;;  %11718 = vmatpush1.bf16.msra.mxu1 %v11717_v56  ;;  %v9186_v56 = vld [vmem:[%s17814_s3 + $0x98] sm:$0xff]  ;;  %v9185_v19 = vld [vmem:[%s17814_s3 + $0x90] sm:$0xff] }
 0xdea   :  { %11719 = vmatprep.subr.bf16.mxu1 %v17871_v45  ;;  %v11740_v52 = vpack.c.bf16 %v9186_v56, %v9184_v28  ;;  %v9209_v56 = vld [vmem:[%s17815_s4 + $0x150] sm:$0xff] }
 0xdeb   :  { %v11720_v5 = vpack.c.bf16 %v2800_v53, %v2799_v3  ;;  %v10814_v6 = vpop.f32.mrb[60].mxu0  ;;  %v9183_v53 = vld [vmem:[%s17814_s3 + $0x80] sm:$0xff]  ;;  %v9188_v3 = vld [vmem:[%s17814_s3 + $0xa8] sm:$0xff] }
 0xdec   :  { %v2802_v15 = vmul.f32 %v14147_v13, %v10814_v6  ;;  %v2766_v4 = vpop.f32.mrb[61].mxu0  ;;  %v11742_v33 = vpack.c.bf16 %v9185_v19, %v9183_v53  ;;  %v9227_v53 = vld [vmem:[%s17815_s4 + $0x1e0] sm:$0xff]  ;;  %v9228_v19 = vld [vmem:[%s17815_s4 + $0x1e8] sm:$0xff] }
 0xded   :  { %v2801_v1 = vmul.f32 %v12764_v51, %v2766_v4  ;;  %11721 = vmatpush1.bf16.msra.mxu1 %v11720_v5  ;;  %v9190_v5 = vld [vmem:[%s17814_s3 + $0xb8] sm:$0xff]  ;;  %v9189_v4 = vld [vmem:[%s17814_s3 + $0xb0] sm:$0xff] }
 0xdee   :  { %11722 = vmatprep.subr.bf16.mxu1 %v17871_v45  ;;  %v11744_v6 = vpack.c.bf16 %v9190_v5, %v9188_v3  ;;  %v11780_v3 = vpack.c.bf16 %v9228_v19, %v9227_v53  ;;  %v9213_v19 = vld [vmem:[%s17815_s4 + $0x170] sm:$0xff] }
 0xdef   :  { %v11723_v9 = vpack.c.bf16 %v2802_v15, %v2801_v1  ;;  %v10817_v50 = vpop.f32.mrb[62].mxu0  ;;  %v9187_v15 = vld [vmem:[%s17814_s3 + $0xa0] sm:$0xff]  ;;  %v9192_v1 = vld [vmem:[%s17814_s3 + $0xc8] sm:$0xff] }
 0xdf0   :  { %v2804_v59 = vmul.f32 %v14158_v18, %v10817_v50  ;;  %v2776_v26 = vpop.f32.mrb[63].mxu0  ;;  %v12767_v18 = vld [vmem:[%s17812_s8 + $0x18] sm:$0xff]  ;;  %v11746_v51 = vpack.c.bf16 %v9189_v4, %v9187_v15 }
 0xdf1   :  { %v2803_v36 = vmul.f32 %v12765_v57, %v2776_v26  ;;  %11724 = vmatpush1.bf16.msra.mxu1 %v11723_v9  ;;  %v9194_v9 = vld [vmem:[%s17814_s3 + $0xd8] sm:$0xff]  ;;  %v9193_v26 = vld [vmem:[%s17814_s3 + $0xd0] sm:$0xff] }
 0xdf2   :  { %11725 = vmatprep.subr.bf16.mxu1 %v17871_v45  ;;  %v11748_v50 = vpack.c.bf16 %v9194_v9, %v9192_v1 }
 0xdf3   :  { %v11726_v13 = vpack.c.bf16 %v2804_v59, %v2803_v36  ;;  %v9191_v59 = vld [vmem:[%s17814_s3 + $0xc0] sm:$0xff]  ;;  %v9196_v36 = vld [vmem:[%s17814_s3 + $0xe8] sm:$0xff] }
 0xdf4   :  { %v11750_v57 = vpack.c.bf16 %v9193_v26, %v9191_v59 }
 0xdf5   :  { %11727 = vmatpush1.bf16.msra.mxu1 %v11726_v13  ;;  %v9198_v13 = vld [vmem:[%s17814_s3 + $0xf8] sm:$0xff] }
 0xdf6   :  { %11741 = vmatprep.subr.bf16.mxu1 %v11740_v52  ;;  %v9210_v52 = vld [vmem:[%s17815_s4 + $0x158] sm:$0xff] }
 0xdf8   :  { %2870 = vmatmul.mubr.f32.vlgmr.msra.gmra.mrb[76].mxu1 %v12766_v34  ;;  %v11752_v34 = vpack.c.bf16 %v9198_v13, %v9196_v36  ;;  %v9332_v13 = vld [vmem:[%s17809_s2 + $0x200] sm:$0xff] }
 0xdf9   :  { %9318 = vmatprep.mubr.msk.f32.mxu1 %vm1241_vm6, %v12767_v18  ;;  %11743 = vmatpush1.bf16.msra.mxu1 %v11742_v33  ;;  %v9195_v18 = vld [vmem:[%s17814_s3 + $0xe0] sm:$0xff]  ;;  %v11778_v33 = vpack.c.bf16 %v9210_v52, %v9209_v56  ;;  %v9229_v56 = vld [vmem:[%s17815_s4 + $0x1f0] sm:$0xff]  ;;  %v9230_v52 = vld [vmem:[%s17815_s4 + $0x1f8] sm:$0xff] }
 0xdfa   :  { %11745 = vmatprep.subr.bf16.mxu1 %v11744_v6  ;;  %v11784_v53 = vpack.c.bf16 %v9230_v52, %v9229_v56 }
 0xdfc   :  { %2875 = vmatmul.mubr.f32.gmra.mrb[78].mxu1 %v12768_v49  ;;  %v9197_v49 = vld [vmem:[%s17814_s3 + $0xf0] sm:$0xff] }
 0xdfd   :  { %9319 = vmatprep.mubr.msk.f32.mxu1 %vm1241_vm6, %v12769_v44  ;;  %11747 = vmatpush1.bf16.msra.mxu1 %v11746_v51  ;;  %v11754_v44 = vpack.c.bf16 %v9197_v49, %v9195_v18  ;;  %v9325_v18 = vld [vmem:[%s17813_s5 + $0x8] ss:$0 sm:$0xff] }
 0xdfe   :  { %11749 = vmatprep.subr.bf16.mxu1 %v11748_v50 }
 0xe00   :  { %2880 = vmatmul.mubr.f32.gmra.mrb[80].mxu1 %v12770_v54  ;;  %v9215_v54 = vld [vmem:[%s17815_s4 + $0x180] sm:$0xff] }
 0xe01   :  { %3115 = vmatprep.mubr.f32.mxu1 %v17872_v32  ;;  %11751 = vmatpush1.bf16.msra.mxu1 %v11750_v57  ;;  %v9324_v57 = vld [vmem:[%s17813_s5 + $0x7] ss:$0 sm:$0xff] }
 0xe02   :  { %11753 = vmatprep.subr.bf16.mxu1 %v11752_v34  ;;  %v9333_v34 = vld [vmem:[%s17809_s2 + $0x208] sm:$0xff] }
 0xe05   :  { %11755 = vmatpush1.bf16.msra.mxu1 %v11754_v44 }
 0xe06   :  { %11788 = vmatprep.subr.bf16.mxu1 %v17871_v45 }
 0xecb   :  { %v2871_v25 = vpop.f32.mrb[76].mxu1 }
 0xecc   :  { %v2873_v39 = vpop.f32.mrb[77].mxu1  ;;  %10835 = vmatmul.mubr.msk.f32.vlgmr.msra.gmra.mrb[64].mxu0 %vm172_vm1, %v2871_v25  ;;  %v9216_v25 = vld [vmem:[%s17815_s4 + $0x188] sm:$0xff] }
 0xecd   :  { %10837 = vmatprep.mubr.msk.f32.mxu0 %vm12830_vm0, %v17872_v32  ;;  %v9199_v39 = vld [vmem:[%s17815_s4 + $0x100] sm:$0xff] }
 0xecf   :  { %v2876_v7 = vpop.f32.mrb[78].mxu1 }
 0xed0   :  { %10838 = vmatmul.mubr.msk.f32.gmra.mrb[66].mxu0 %vm172_vm1, %v2876_v7  ;;  %v2878_v10 = vpop.f32.mrb[79].mxu1  ;;  %v11756_v7 = vpack.c.bf16 %v9216_v25, %v9215_v54  ;;  %v11789_v54 = vpack.c.bf16 %v9333_v34, %v9332_v13 }
 0xed1   :  { %10840 = vmatprep.mubr.msk.f32.mxu0 %vm12830_vm0, %v17872_v32  ;;  %v9200_v10 = vld [vmem:[%s17815_s4 + $0x108] sm:$0xff] }
 0xed2   :  { %11757 = vmatprep.subr.bf16.mxu0 %v11756_v7  ;;  %v9335_v7 = vld [vmem:[%s17809_s2 + $0x218] sm:$0xff] }
 0xed3   :  { %v2881_v31 = vpop.f32.mrb[80].mxu1 }
 0xed4   :  { %10841 = vmatmul.mubr.msk.f32.gmra.mrb[68].mxu0 %vm172_vm1, %v2881_v31  ;;  %v2883_v11 = vpop.f32.mrb[81].mxu1  ;;  %v9217_v31 = vld [vmem:[%s17815_s4 + $0x190] sm:$0xff] }
 0xed5   :  { %v9218_v11 = vld [vmem:[%s17815_s4 + $0x198] sm:$0xff] }
 0xf9f   :  { %v2964_v42 = vpop.f32.mrb[64].mxu0 }
 0xfa0   :  { %v2965_v30 = vadd.f32 %v9320_v17, %v2964_v42  ;;  %v10836_v55 = vpop.f32.mrb[65].mxu0  ;;  %v11760_v42 = vpack.c.bf16 %v9218_v11, %v9217_v31 }
 0xfa1   :  { %v9202_v55 = vld [vmem:[%s17815_s4 + $0x118] sm:$0xff] }
 0xfa2   :  { %v2978_v0 = vsel %vm172_vm1, %v2965_v30, 0.0 }
 0xfa3   :  { %2979 = vadd.xlane.f32.xlu0 %v2978_v0  ;;  %v2969_v35 = vpop.f32.mrb[66].mxu0  ;;  %v9219_v0 = vld [vmem:[%s17815_s4 + $0x1a0] sm:$0xff] }
 0xfa4   :  { %v2970_v29 = vadd.f32 %v9320_v17, %v2969_v35  ;;  %v10839_v16 = vpop.f32.mrb[67].mxu0  ;;  %v9220_v35 = vld [vmem:[%s17815_s4 + $0x1a8] sm:$0xff] }
 0xfa5   :  { %v11764_v16 = vpack.c.bf16 %v9220_v35, %v9219_v0 }
 0xfa6   :  { %v2981_v38 = vsel %vm172_vm1, %v2970_v29, 0.0 }
 0xfa7   :  { %2982 = vadd.xlane.f32.xlu1 %v2981_v38  ;;  %v2974_v23 = vpop.f32.mrb[68].mxu0  ;;  %v9203_v38 = vld [vmem:[%s17815_s4 + $0x120] sm:$0xff] }
 0xfa8   :  { %v2975_v37 = vadd.f32 %v9320_v17, %v2974_v23  ;;  %v10842_v14 = vpop.f32.mrb[69].mxu0  ;;  %v11758_v17 = vpack.c.bf16 %v9200_v10, %v9199_v39  ;;  %v9204_v23 = vld [vmem:[%s17815_s4 + $0x128] sm:$0xff] }
 0xfa9   :  { %v9222_v14 = vld [vmem:[%s17815_s4 + $0x1b8] sm:$0xff] }
 0xfaa   :  { %v2984_v40 = vsel %vm1430_vm7, %v2975_v37, 0.0  ;;  %11759 = vmatpush3.bf16.msra.mxu0 %v11758_v17 }
 0xfab   :  { %2985 = vadd.xlane.f32.xlu0 %v2984_v40  ;;  %11761 = vmatprep.subr.bf16.mxu0 %v11760_v42  ;;  %v11766_v40 = vpack.c.bf16 %v9204_v23, %v9203_v38  ;;  %v9336_v42 = vld [vmem:[%s17809_s2 + $0x220] sm:$0xff]  ;;  %v9341_v23 = vld [vmem:[%s17809_s2 + $0x248] sm:$0xff] }
 0xfac   :  { %v9340_v38 = vld [vmem:[%s17809_s2 + $0x240] sm:$0xff] }
0x1030   :  { %v2980_v61 = vpop.xlane.xlu0 %2979 }
0x1031   :  { %v2987_v24 = vmul.f32 0.015625, %v2980_v61 }
0x1033   :  { %v14510_v58 = vsub.f32 %v2965_v30, %v2987_v24  ;;  %v9201_v30 = vld [vmem:[%s17815_s4 + $0x110] sm:$0xff] }
0x1034   :  { %v2983_v47 = vpop.xlane.xlu1 %2982  ;;  %v9205_v24 = vld [vmem:[%s17815_s4 + $0x130] sm:$0xff] }
0x1035   :  { %v2988_v60 = vmul.f32 0.015625, %v2983_v47  ;;  %v2993_v20 = vmul.f32 %v14510_v58, %v14510_v58  ;;  %v9206_v47 = vld [vmem:[%s17815_s4 + $0x138] sm:$0xff] }
0x1037   :  { %v14514_v2 = vsub.f32 %v2970_v29, %v2988_v60  ;;  %v2996_v48 = vsel %vm172_vm1, %v2993_v20, 0.0  ;;  %v11762_v29 = vpack.c.bf16 %v9202_v55, %v9201_v30  ;;  %v9223_v60 = vld [vmem:[%s17815_s4 + $0x1c0] sm:$0xff]  ;;  %v9224_v20 = vld [vmem:[%s17815_s4 + $0x1c8] sm:$0xff] }
0x1038   :  { %2997 = vadd.xlane.f32.xlu1 %v2996_v48  ;;  %v2986_v43 = vpop.xlane.xlu0 %2985  ;;  %v11770_v48 = vpack.c.bf16 %v9206_v47, %v9205_v24  ;;  %v9337_v30 = vld [vmem:[%s17809_s2 + $0x228] sm:$0xff] }
0x1039   :  { %v2989_v62 = vmul.f32 0.015625, %v2986_v43  ;;  %v2994_v8 = vmul.f32 %v14514_v2, %v14514_v2  ;;  %11763 = vmatpush3.bf16.msra.mxu0 %v11762_v29  ;;  %v11772_v43 = vpack.c.bf16 %v9224_v20, %v9223_v60  ;;  %v11795_v0 = vpack.c.bf16 %v9337_v30, %v9336_v42  ;;  %v9339_v29 = vld [vmem:[%s17809_s2 + $0x238] sm:$0xff]  ;;  %v14729_v24 = vld [vmem:[%s17817_s1 + $0x8] sm:$0xff]  ;;  %v9344_v60 = vld [vmem:[%s17809_s2 + $0x260] sm:$0xff] }
0x103a   :  { %11765 = vmatprep.subr.bf16.mxu0 %v11764_v16  ;;  %v9345_v20 = vld [vmem:[%s17809_s2 + $0x268] sm:$0xff] }
0x103b   :  { %v14519_v27 = vsub.f32 %v2975_v37, %v2989_v62  ;;  %v2999_v41 = vsel %vm172_vm1, %v2994_v8, 0.0  ;;  %v9221_v37 = vld [vmem:[%s17815_s4 + $0x1b0] sm:$0xff]  ;;  %v9207_v62 = vld [vmem:[%s17815_s4 + $0x140] sm:$0xff]  ;;  %v9208_v8 = vld [vmem:[%s17815_s4 + $0x148] sm:$0xff] }
0x103c   :  { %3000 = vadd.xlane.f32.xlu0 %v2999_v41  ;;  %v11768_v61 = vpack.c.bf16 %v9222_v14, %v9221_v37  ;;  %v9225_v41 = vld [vmem:[%s17815_s4 + $0x1d0] sm:$0xff]  ;;  %v14713_v37 = vld [vmem:[%s17817_s1] sm:$0xff]  ;;  %v11801_v14 = vpack.c.bf16 %v9341_v23, %v9340_v38 }
0x103d   :  { %v2995_v12 = vmul.f32 %v14519_v27, %v14519_v27  ;;  %11767 = vmatpush3.bf16.msra.mxu0 %v11766_v40  ;;  %v9342_v40 = vld [vmem:[%s17809_s2 + $0x250] sm:$0xff] }
0x103e   :  { %11769 = vmatprep.subr.bf16.mxu0 %v11768_v61  ;;  %v9343_v61 = vld [vmem:[%s17809_s2 + $0x258] sm:$0xff] }
0x103f   :  { %v3002_v22 = vsel %vm1430_vm7, %v2995_v12, 0.0  ;;  %v9226_v12 = vld [vmem:[%s17815_s4 + $0x1d8] sm:$0xff]  ;;  %v11804_v47 = vpack.c.bf16 %v9343_v61, %v9342_v40 }
0x1040   :  { %3003 = vadd.xlane.f32.xlu1 %v3002_v22  ;;  %v11774_v22 = vpack.c.bf16 %v9208_v8, %v9207_v62  ;;  %v11776_v28 = vpack.c.bf16 %v9226_v12, %v9225_v41  ;;  %v9346_v62 = vld [vmem:[%s17809_s2 + $0x270] sm:$0xff]  ;;  %v9347_v8 = vld [vmem:[%s17809_s2 + $0x278] sm:$0xff]  ;;  %v9211_v12 = vld [vmem:[%s17815_s4 + $0x160] sm:$0xff] }
0x1041   :  { %11771 = vmatpush3.bf16.msra.mxu0 %v11770_v48  ;;  %v14745_v48 = vld [vmem:[%s17817_s1 + $0x10] sm:$0x3]  ;;  %v11810_v41 = vpack.c.bf16 %v9347_v8, %v9346_v62 }
0x1042   :  { %11773 = vmatprep.subr.bf16.mxu0 %v11772_v43  ;;  %v11807_v43 = vpack.c.bf16 %v9345_v20, %v9344_v60 }
0x1045   :  { %11775 = vmatpush3.bf16.msra.mxu0 %v11774_v22  ;;  %v9212_v22 = vld [vmem:[%s17815_s4 + $0x168] sm:$0xff] }
0x1046   :  { %11777 = vmatprep.subr.bf16.mxu0 %v11776_v28  ;;  %v11782_v28 = vpack.c.bf16 %v9212_v22, %v9211_v12 }
0x1049   :  { %11779 = vmatpush3.bf16.msra.mxu0 %v11778_v33  ;;  %v9214_v33 = vld [vmem:[%s17815_s4 + $0x178] sm:$0xff] }
0x104a   :  { %11781 = vmatprep.subr.bf16.mxu0 %v11780_v3  ;;  %v11786_v3 = vpack.c.bf16 %v9214_v33, %v9213_v19 }
0x104d   :  { %11783 = vmatpush3.bf16.msra.mxu0 %v11782_v28 }
0x104e   :  { %11785 = vmatprep.subr.bf16.mxu0 %v11784_v53 }
0x1051   :  { %11787 = vmatpush3.bf16.msra.mxu0 %v11786_v3 }
0x1052   :  { %11812 = vmatprep.subr.bf16.mxu0 %v17871_v45 }
0x10c5   :  { %v2998_v5 = vpop.xlane.xlu1 %2997 }
0x10c6   :  { %v3005_v6 = vmul.f32 0.015625, %v2998_v5  ;;  %v9231_v5 = vld [vmem:[%s17816_s6 + $0x1] ss:$4 sm:$0x3] }
0x10c8   :  { %v3008_v15 = vadd.f32 1e-05, %v3005_v6  ;;  %v3035_v6 = vrot.slane %v9231_v5, %v13864_v21 }
0x10c9   :  { %v3001_v4 = vpop.xlane.xlu0 %3000 }
0x10ca   :  { %12402 = vrsqrt.f32 %v3008_v15  ;;  %v3006_v51 = vmul.f32 0.015625, %v3001_v4  ;;  %v3039_v15 = vrot.slane %v9231_v5, %v13869_v63 }
0x10cc   :  { %v3009_v1 = vadd.f32 1e-05, %v3006_v51 }
0x10cd   :  { %v3004_v9 = vpop.xlane.xlu1 %3003 }
0x10ce   :  { %12404 = vrsqrt.f32 %v3009_v1  ;;  %v3007_v50 = vmul.f32 0.015625, %v3004_v9 }
0x10d0   :  { %v3010_v59 = vadd.f32 1e-05, %v3007_v50 }
0x10d2   :  { %12406 = vrsqrt.f32 %v3010_v59 }
0x10d4   :  { %v12403_v26 = vpop.eup %12402 }
0x10d5   :  { %v3014_v36 = vmul.f32 %v12403_v26, %v14510_v58  ;;  %v9334_v58 = vld [vmem:[%s17809_s2 + $0x210] sm:$0xff] }
0x10d6   :  { %v11792_v11 = vpack.c.bf16 %v9335_v7, %v9334_v58 }
0x10d7   :  { %v3021_v49 = vmul.f32 %v9324_v57, %v3014_v36 }
0x10d8   :  { %v12405_v44 = vpop.eup %12404 }
0x10d9   :  { %v14665_v25 = vadd.f32 %v9325_v18, %v3021_v49  ;;  %v3015_v39 = vmul.f32 %v12405_v44, %v14514_v2 }
0x10db   :  { %9326 = vmatmul.mubr.msk.f32.vlgmr.msra.gmra.mrb[82].mxu1 %vm172_vm1, %v14665_v25  ;;  %v3022_v10 = vmul.f32 %v9324_v57, %v3015_v39 }
0x10dc   :  { %v12407_v31 = vpop.eup %12406  ;;  %11790 = vmatpush3.bf16.msra.mxu1 %v11789_v54  ;;  %3121 = vmatprep.mubr.f32.mxu1 %v17872_v32 }
0x10dd   :  { %11791 = vmatprep.subr.bf16.mxu1 %v17871_v45  ;;  %v14678_v2 = vadd.f32 %v9325_v18, %v3022_v10  ;;  %v3016_v17 = vmul.f32 %v12407_v31, %v14519_v27  ;;  %v9338_v27 = vld [vmem:[%s17809_s2 + $0x230] sm:$0xff]  ;;  %v3322_v10 = vld [vmem:[%s17811_s7 + $0xa0] sm:$0xff] }
0x10de   :  { %v11798_v16 = vpack.c.bf16 %v9339_v29, %v9338_v27 }
0x10df   :  { %9327 = vmatmul.mubr.msk.f32.gmra.mrb[84].mxu1 %vm172_vm1, %v14678_v2  ;;  %v3023_v55 = vmul.f32 %v9324_v57, %v3016_v17 }
0x10e0   :  { %11793 = vmatpush3.bf16.msra.mxu1 %v11792_v11  ;;  %3127 = vmatprep.mubr.f32.mxu1 %v17872_v32 }
0x10e1   :  { %11794 = vmatprep.subr.bf16.mxu1 %v17871_v45  ;;  %v14691_v35 = vadd.f32 %v9325_v18, %v3023_v55 }
0x10e3   :  { %9328 = vmatmul.mubr.msk.f32.gmra.mrb[86].mxu1 %vm172_vm1, %v14691_v35 }
0x10e4   :  { %11796 = vmatpush3.bf16.msra.mxu1 %v11795_v0  ;;  %10859 = vmatprep.mubr.msk.f32.mxu1 %vm12830_vm0, %v17872_v32 }
0x10e5   :  { %11797 = vmatprep.subr.bf16.mxu1 %v17871_v45 }
0x10e8   :  { %11799 = vmatpush3.bf16.msra.mxu1 %v11798_v16 }
0x10e9   :  { %11800 = vmatprep.subr.bf16.mxu1 %v17871_v45 }
0x10eb   :  { %10860 = vmatmul.mubr.msk.f32.vlgmr.msra.gmra.mrb[88].mxu1 %vm172_vm1, %v14713_v37 }
0x10ec   :  { %11802 = vmatpush3.bf16.msra.mxu1 %v11801_v14  ;;  %10862 = vmatprep.mubr.msk.f32.mxu1 %vm12830_vm0, %v17872_v32 }
0x10ed   :  { %11803 = vmatprep.subr.bf16.mxu1 %v17871_v45 }
0x10ef   :  { %10863 = vmatmul.mubr.msk.f32.gmra.mrb[90].mxu1 %vm172_vm1, %v14729_v24 }
0x10f0   :  { %11805 = vmatpush3.bf16.msra.mxu1 %v11804_v47  ;;  %10865 = vmatprep.mubr.msk.f32.mxu1 %vm12830_vm0, %v17872_v32 }
0x10f1   :  { %11806 = vmatprep.subr.bf16.mxu1 %v17871_v45 }
0x10f3   :  { %10866 = vmatmul.mubr.msk.f32.gmra.mrb[92].mxu1 %vm172_vm1, %v14745_v48 }
0x10f4   :  { %11808 = vmatpush3.bf16.msra.mxu1 %v11807_v43  ;;  %10884 = vmatprep.mubr.msk.f32.mxu1 %vm12830_vm0, %v17872_v32 }
0x10f5   :  { %11809 = vmatprep.subr.bf16.mxu1 %v17871_v45 }
0x10f8   :  { %11811 = vmatpush3.bf16.msra.mxu1 %v11810_v41 }
0x10fb   :  { %10885 = vmatmul.mubr.msk.f32.vlgmr.msra.gmra.mrb[94].mxu1 %vm172_vm1, %v14713_v37 }
0x10fc   :  { %10887 = vmatprep.mubr.msk.f32.mxu1 %vm12830_vm0, %v17872_v32 }
0x10ff   :  { %10888 = vmatmul.mubr.msk.f32.gmra.mrb[96].mxu1 %vm172_vm1, %v14729_v24 }
0x1100   :  { %10890 = vmatprep.mubr.msk.f32.mxu1 %vm12830_vm0, %v17872_v32 }
0x1103   :  { %10891 = vmatmul.mubr.msk.f32.gmra.mrb[98].mxu1 %vm172_vm1, %v14745_v48 }
0x11ae   :  { %v3117_v4 = vpop.f32.mrb[82].mxu1 }
0x11af   :  { %v3118_v51 = vadd.f32 %v3117_v4, %v3035_v6  ;;  %v3119_v1 = vpop.f32.mrb[83].mxu1 }
0x11b0   :  { %v3120_v9 = vadd.f32 %v3119_v1, %v3039_v15  ;;  %v14842_v1 = vld [vmem:[%s17811_s7 + $0xb8] sm:$0xff] }
0x11b1   :  { %v3134_v26 = vmax.f32 %v3118_v51, 0.0 }
0x11b2   :  { %v3135_v50 = vmax.f32 %v3120_v9, 0.0  ;;  %v3123_v59 = vpop.f32.mrb[84].mxu1  ;;  %v14848_v9 = vld [vmem:[%s17811_s7 + $0xc0] sm:$0xff] }
0x11b3   :  { %v3124_v57 = vadd.f32 %v3123_v59, %v3035_v6  ;;  %v3125_v36 = vpop.f32.mrb[85].mxu1 }
0x11b4   :  { %v3126_v13 = vadd.f32 %v3125_v36, %v3039_v15  ;;  %3208 = vmatprep.mubr.f32.mxu0 %v3135_v50 }
0x11b5   :  { %3209 = vmatmul.mubr.f32.vlgmr.msra.gmra.mrb[70].mxu0 %v3134_v26  ;;  %v3136_v49 = vmax.f32 %v3124_v57, 0.0  ;;  %v14856_v26 = vld [vmem:[%s17811_s7 + $0xc8] sm:$0xff]  ;;  %v14862_v57 = vld [vmem:[%s17811_s7 + $0xd0] sm:$0xff] }
0x11b6   :  { %v3137_v34 = vmax.f32 %v3126_v13, 0.0  ;;  %v3129_v18 = vpop.f32.mrb[86].mxu1 }
0x11b7   :  { %v3130_v44 = vadd.f32 %v3129_v18, %v3035_v6  ;;  %v3131_v54 = vpop.f32.mrb[87].mxu1  ;;  %v14828_v6 = vld [vmem:[%s17811_s7 + $0xa8] sm:$0xff]  ;;  %v14877_v18 = vld [vmem:[%s17811_s7 + $0xe0] sm:$0xff] }
0x11b8   :  { %v3132_v39 = vadd.f32 %v3131_v54, %v3039_v15  ;;  %3213 = vmatprep.mubr.f32.mxu0 %v3137_v34  ;;  %v14833_v15 = vld [vmem:[%s17811_s7 + $0xb0] sm:$0xff]  ;;  %v14871_v34 = vld [vmem:[%s17811_s7 + $0xd8] sm:$0xff]  ;;  %v14887_v54 = vld [vmem:[%s17811_s7 + $0xe8] sm:$0xff] }
0x11b9   :  { %3214 = vmatmul.mubr.f32.gmra.mrb[72].mxu0 %v3136_v49  ;;  %v3138_v7 = vmax.f32 %v3130_v44, 0.0 }
0x11ba   :  { %v3139_v58 = vmax.f32 %v3132_v39, 0.0  ;;  %v14893_v39 = vld [vmem:[%s17811_s7 + $0xf0] sm:$0xff] }
0x11bc   :  { %3218 = vmatprep.mubr.f32.mxu0 %v3139_v58 }
0x11bd   :  { %3219 = vmatmul.mubr.f32.gmra.mrb[74].mxu0 %v3138_v7  ;;  %v14901_v7 = vld [vmem:[%s17811_s7 + $0xf8] sm:$0xff] }
0x11be   :  { %v14796_v31 = vpop.f32.mrb[88].mxu1  ;;  %10909 = vmatprep.mubr.msk.f32.mxu0 %vm12830_vm0, %v17872_v32 }
0x11bf   :  { %v10861_v11 = vpop.f32.mrb[89].mxu1  ;;  %v3645_v17 = vmul.f32 %v14796_v31, %v3322_v10  ;;  %v3617_v42 = vrot.slane %v14796_v31, 6  ;;  %v3625_v30 = vrot.slane %v14796_v31, 4  ;;  %v3634_v0 = vrot.slane %v14796_v31, 2 }
0x11c0   :  { %v3654_v58 = vmul.f32 %v14796_v31, %v14887_v54  ;;  %v14908_v11 = vld [vmem:[%s17811_s7 + $0x100] sm:$0xff] }
0x11c1   :  { %10924 = vmatprep.mubr.msk.f32.mxu1 %vm172_vm1, %v3645_v17 }
0x11c2   :  { %v3445_v55 = vpop.f32.mrb[90].mxu1 }
0x11c3   :  { %v3618_v27 = vrot.slane %v3445_v55, 6  ;;  %v3626_v29 = vrot.slane %v3445_v55, 4  ;;  %v3635_v16 = vrot.slane %v3445_v55, 2  ;;  %v10864_v38 = vpop.f32.mrb[91].mxu1  ;;  %v3646_v4 = vmul.f32 %v3445_v55, %v14828_v6 }
0x11c4   :  { %v3655_v10 = vmul.f32 %v3445_v55, %v14893_v39 }
0x11c5   :  { %v3619_v23 = vsel %vm476_vm4, %v3617_v42, %v3618_v27  ;;  %v14807_v14 = vsel %vm425_vm2, %v3625_v30, %v3626_v29  ;;  %v14810_v40 = vsel %vm3633_vm8, %v3634_v0, %v3635_v16 }
0x11c6   :  { %v3450_v61 = vpop.f32.mrb[92].mxu1  ;;  %v3648_v50 = vmul.f32 %v3619_v23, %v14842_v1  ;;  %v3650_v36 = vmul.f32 %v14807_v14, %v14856_v26  ;;  %v3652_v49 = vmul.f32 %v14810_v40, %v14871_v34  ;;  %v3657_v31 = vmul.f32 %v3619_v23, %v14908_v11  ;;  %v14946_v23 = vld [vmem:[%s17811_s7 + $0x128] sm:$0xff] }
0x11c7   :  { %v3620_v47 = vrot.slane %v3450_v61, 6  ;;  %v3628_v60 = vrot.slane %v3450_v61, 4  ;;  %v3637_v20 = vrot.slane %v3450_v61, 2  ;;  %v3642_v43 = vsel %vm476_vm4, %v3450_v61, %v3617_v42  ;;  %v10867_v62 = vpop.f32.mrb[93].mxu1  ;;  %v14916_v42 = vld [vmem:[%s17811_s7 + $0x108] sm:$0xff]  ;;  %v9348_v61 = vld [vmem:[%s17809_s2 + $0x280] sm:$0xff] }
0x11c8   :  { %v3647_v51 = vmul.f32 %v3642_v43, %v14833_v15  ;;  %v3656_v17 = vmul.f32 %v3642_v43, %v14901_v7  ;;  %v9352_v62 = vld [vmem:[%s17809_s2 + $0x2a0] sm:$0xff] }
0x11c9   :  { %v3621_v8 = vsel %vm476_vm4, %v3618_v27, %v3620_v47  ;;  %v3629_v41 = vsel %vm425_vm2, %v3626_v29, %v3628_v60  ;;  %v14816_v12 = vsel %vm3633_vm8, %v3635_v16, %v3637_v20  ;;  %v14931_v27 = vld [vmem:[%s17811_s7 + $0x118] sm:$0xff]  ;;  %v14937_v29 = vld [vmem:[%s17811_s7 + $0x120] sm:$0xff]  ;;  %v9350_v47 = vld [vmem:[%s17809_s2 + $0x290] sm:$0xff] }
0x11ca   :  { %v3643_v22 = vsel %vm425_vm2, %v3621_v8, %v3625_v30  ;;  %v3644_v28 = vsel %vm3633_vm8, %v3629_v41, %v3634_v0  ;;  %v3653_v44 = vmul.f32 %v14816_v12, %v14877_v18  ;;  %v14922_v30 = vld [vmem:[%s17811_s7 + $0x110] sm:$0xff]  ;;  %v3661_v38 = vmul.f32 %v14810_v40, %v14937_v29  ;;  %v9349_v40 = vld [vmem:[%s17809_s2 + $0x288] sm:$0xff]  ;;  %v9351_v20 = vld [vmem:[%s17809_s2 + $0x298] sm:$0xff] }
0x11cb   :  { %v3649_v59 = vmul.f32 %v3643_v22, %v14848_v9  ;;  %v3651_v13 = vmul.f32 %v3644_v28, %v14862_v57  ;;  %v3658_v55 = vmul.f32 %v3643_v22, %v14916_v42  ;;  %v3659_v0 = vmul.f32 %v14807_v14, %v14922_v30  ;;  %v9353_v8 = vld [vmem:[%s17809_s2 + $0x2a8] sm:$0xff]  ;;  %v9355_v22 = vld [vmem:[%s17809_s2 + $0x2b8] sm:$0xff] }
0x11cc   :  { %v3660_v16 = vmul.f32 %v3644_v28, %v14931_v27  ;;  %v3662_v14 = vmul.f32 %v14816_v12, %v14946_v23  ;;  %v11813_v60 = vpack.c.bf16 %v9349_v40, %v9348_v61  ;;  %v11816_v43 = vpack.c.bf16 %v9351_v20, %v9350_v47  ;;  %v9354_v12 = vld [vmem:[%s17809_s2 + $0x2b0] sm:$0xff] }
0x11cd   :  { %v11819_v41 = vpack.c.bf16 %v9353_v8, %v9352_v62  ;;  %v11822_v28 = vpack.c.bf16 %v9355_v22, %v9354_v12  ;;  %v3348_v62 = vld [vmem:[%s17812_s8 + $0x200] sm:$0xff] }
0x11ce   :  { %v3520_v56 = vpop.f32.mrb[94].mxu1  ;;  %11814 = vmatpush3.bf16.msra.mxu0 %v11813_v60 }
0x11cf   :  { %v10886_v52 = vpop.f32.mrb[95].mxu1  ;;  %11815 = vmatprep.subr.bf16.mxu0 %v17871_v45 }
0x11d2   :  { %v3525_v53 = vpop.f32.mrb[96].mxu1  ;;  %11817 = vmatpush3.bf16.msra.mxu0 %v11816_v43  ;;  %v3347_v43 = vld [vmem:[%s17812_s8 + $0x1f0] sm:$0xff] }
0x11d3   :  { %v11824_v19 = vpack.c.bf16 %v3525_v53, %v3520_v56  ;;  %v10889_v33 = vpop.f32.mrb[97].mxu1  ;;  %11818 = vmatprep.subr.bf16.mxu0 %v17871_v45 }
0x11d5   :  { %11826 = vmatprep.subr.msk.bf16.mxu1 %vm13002_vm3, %v11824_v19 }
0x11d6   :  { %11829 = vmatpush3.bf16.xpose.msk.msra.mxu1 %vm13002_vm3, %v11824_v19  ;;  %v3530_v3 = vpop.f32.mrb[98].mxu1  ;;  %11820 = vmatpush3.bf16.msra.mxu0 %v11819_v41 }
0x11d7   :  { %v10892_v5 = vpop.f32.mrb[99].mxu1  ;;  %10922 = vmatprep.subr.msk.mxu1 %vm172_vm1, %v3530_v3  ;;  %11821 = vmatprep.subr.bf16.mxu0 %v17871_v45 }
0x11da   :  { %11823 = vmatpush3.bf16.msra.mxu0 %v11822_v28 }
0x11dd   :  { %10910 = vmatmul.mubr.msk.f32.vlgmr.msra.gmra.mrb[76].mxu0 %vm172_vm1, %v14713_v37 }
0x11de   :  { %10923 = vmatpush3.xpose.msk.msra.mxu1 %vm172_vm1, %v3530_v3  ;;  %10912 = vmatprep.mubr.msk.f32.mxu0 %vm12830_vm0, %v17872_v32 }
0x11df   :  { %11834 = vmatprep.subr.bf16.mxu1 %v17871_v45 }
0x11e1   :  { %10925 = vmatmul.mubr.msk.f32.vlgmr.msra.gmra.mrb[100].mxu1 %vm172_vm1, %v3646_v4  ;;  %10913 = vmatmul.mubr.msk.f32.gmra.mrb[78].mxu0 %vm172_vm1, %v14729_v24  ;;  %v3341_v24 = vld [vmem:[%s17812_s8 + $0x190] sm:$0xff] }
0x11e2   :  { %10927 = vmatprep.mubr.msk.f32.mxu1 %vm172_vm1, %v3647_v51  ;;  %10915 = vmatprep.mubr.msk.f32.mxu0 %vm12830_vm0, %v17872_v32  ;;  %v3340_v51 = vld [vmem:[%s17812_s8 + $0x180] sm:$0xc0] }
0x11e5   :  { %10928 = vmatmul.mubr.msk.f32.gmra.mrb[102].mxu1 %vm172_vm1, %v3648_v50  ;;  %10916 = vmatmul.mubr.msk.f32.gmra.mrb[80].mxu0 %vm172_vm1, %v14745_v48  ;;  %v3342_v48 = vld [vmem:[%s17812_s8 + $0x1a0] sm:$0xff]  ;;  %v3683_v50 = vrot.slane %v3341_v24, 6 }
0x11e6   :  { %10930 = vmatprep.mubr.msk.f32.mxu1 %vm172_vm1, %v3649_v59  ;;  %v3685_v59 = vrot.slane %v3342_v48, 6  ;;  %v3350_v24 = vld [vmem:[%s17812_s8 + $0x220] sm:$0xff] }
0x11e9   :  { %10931 = vmatmul.mubr.msk.f32.gmra.mrb[104].mxu1 %vm172_vm1, %v3650_v36  ;;  %v3682_v36 = vrot.slane %v3340_v51, 6 }
0x11ea   :  { %10933 = vmatprep.mubr.msk.f32.mxu1 %vm172_vm1, %v3651_v13  ;;  %v3343_v13 = vld [vmem:[%s17812_s8 + $0x1b0] sm:$0xff] }
0x11ed   :  { %10934 = vmatmul.mubr.msk.f32.gmra.mrb[106].mxu1 %vm172_vm1, %v3652_v49  ;;  %v3344_v49 = vld [vmem:[%s17812_s8 + $0x1c0] sm:$0xff] }
0x11ee   :  { %10936 = vmatprep.mubr.msk.f32.mxu1 %vm172_vm1, %v3653_v44  ;;  %v15012_v44 = vsel %vm476_vm4, %v3683_v50, %v3685_v59 }
0x11f1   :  { %10937 = vmatmul.mubr.msk.f32.gmra.mrb[108].mxu1 %vm172_vm1, %v3654_v58  ;;  %v3687_v58 = vrot.slane %v3343_v13, 6 }
0x11f2   :  { %10939 = vmatprep.mubr.msk.f32.mxu1 %vm172_vm1, %v3655_v10  ;;  %v3689_v10 = vrot.slane %v3344_v49, 6 }
0x11f3   :  { %v15035_v20 = vsel %vm476_vm4, %v3685_v59, %v3687_v58 }
0x11f4   :  { %v15030_v61 = vsel %vm476_vm4, %v3687_v58, %v3689_v10  ;;  %v3701_v58 = vrot.slane %v3350_v24, 6 }
0x11f5   :  { %10940 = vmatmul.mubr.msk.f32.gmra.mrb[110].mxu1 %vm172_vm1, %v3656_v17  ;;  %v15015_v17 = vsel %vm476_vm4, %v3682_v36, %v3683_v50 }
0x11f6   :  { %10942 = vmatprep.mubr.msk.f32.mxu1 %vm172_vm1, %v3657_v31  ;;  %v3345_v31 = vld [vmem:[%s17812_s8 + $0x1d0] sm:$0xff] }
0x11f7   :  { %v3691_v40 = vrot.slane %v3345_v31, 6 }
0x11f9   :  { %10943 = vmatmul.mubr.msk.f32.gmra.mrb[112].mxu1 %vm172_vm1, %v3658_v55  ;;  %v3346_v55 = vld [vmem:[%s17812_s8 + $0x1e0] sm:$0xff] }
0x11fa   :  { %10945 = vmatprep.mubr.msk.f32.mxu1 %vm172_vm1, %v3659_v0  ;;  %v3693_v47 = vrot.slane %v3346_v55, 6  ;;  %v3351_v55 = vld [vmem:[%s17812_s8 + $0x230] sm:$0xff] }
0x11fd   :  { %10946 = vmatmul.mubr.msk.f32.gmra.mrb[114].mxu1 %vm172_vm1, %v3660_v16 }
0x11fe   :  { %10948 = vmatprep.mubr.msk.f32.mxu1 %vm172_vm1, %v3661_v38 }
0x1201   :  { %10949 = vmatmul.mubr.msk.f32.gmra.mrb[116].mxu1 %vm172_vm1, %v3662_v14 }
0x1288   :  { %v10060_v56 = vpop.f32.mrb[70].mxu0 }
0x1289   :  { %v10061_v52 = vpop.f32.mrb[71].mxu0 }
0x128a   :  { %v14990_v53 = vadd.f32 %v10061_v52, %v10060_v56  ;;  %v15052_v56 = vsel %vm476_vm4, %v3691_v40, %v3693_v47  ;;  %v3695_v52 = vrot.slane %v3347_v43, 6 }
0x128b   :  { %17877 = vst [vmem:[#allocation3_spill] sm:$0xff] %v15052_v56 }
0x128c   :  { %v10063_v19 = vpop.f32.mrb[72].mxu0  ;;  %v15079_v31 = vsel %vm476_vm4, %v3693_v47, %v3695_v52 }
0x128d   :  { %v10064_v33 = vpop.f32.mrb[73].mxu0  ;;  %17880 = vst [vmem:[#allocation4_spill] sm:$0xff] %v15079_v31 }
0x128e   :  { %v14992_v3 = vadd.f32 %v10064_v33, %v10063_v19  ;;  %v3697_v19 = vrot.slane %v3348_v62, 6 }
0x1290   :  { %v10066_v37 = vpop.f32.mrb[74].mxu0  ;;  %v15074_v13 = vsel %vm476_vm4, %v3695_v52, %v3697_v19 }
0x1291   :  { %v10067_v5 = vpop.f32.mrb[75].mxu0  ;;  %17879 = vst [vmem:[#allocation5_spill] sm:$0xff] %v15074_v13 }
0x1292   :  { %v14994_v4 = vadd.f32 %v10067_v5, %v10066_v37  ;;  %v15057_v37 = vsel %vm476_vm4, %v3689_v10, %v3691_v40  ;;  %v3349_v5 = vld [vmem:[%s17812_s8 + $0x210] sm:$0xff] }
0x1293   :  { %17878 = vst [vmem:[#allocation2_spill] sm:$0xff] %v15057_v37  ;;  %v3699_v49 = vrot.slane %v3349_v5, 6  ;;  %v3354_v5 = vld [vmem:[%s17812_s8 + $0x260] sm:$0xff] }
0x1295   :  { %v15096_v62 = vsel %vm476_vm4, %v3699_v49, %v3701_v58  ;;  %v15101_v52 = vsel %vm476_vm4, %v3697_v19, %v3699_v49 }
0x1296   :  { %17881 = vst [vmem:[#allocation6_spill] sm:$0xff] %v15096_v62  ;;  %17882 = vst [vmem:[#allocation7_spill] sm:$0xff] %v15101_v52 }
0x12b4   :  { %v10926_v0 = vpop.f32.mrb[100].mxu1 }
0x12b5   :  { %v15024_v16 = vadd.f32 %v10926_v0, %v15012_v44  ;;  %v3866_v38 = vpop.f32.mrb[101].mxu1  ;;  %v3352_v0 = vld [vmem:[%s17812_s8 + $0x240] sm:$0xff] }
0x12b6   :  { %v15027_v14 = vadd.f32 %v3866_v38, %v15015_v17 }
0x12b7   :  { %v3959_v60 = vsel %vm3955_vm9, %v15024_v16, -inf }
0x12b8   :  { %3960 = vmax.xlane.f32.xlu1 %v3959_v60  ;;  %v10929_v8 = vpop.f32.mrb[102].mxu1  ;;  %v3956_v41 = vsel %vm3955_vm9, %v15027_v14, -inf }
0x12b9   :  { %v15046_v12 = vadd.f32 %v10929_v8, %v15030_v61  ;;  %v3876_v22 = vpop.f32.mrb[103].mxu1  ;;  %3957 = vmax.xlane.f32.xlu0 %v3956_v41  ;;  %v3703_v8 = vrot.slane %v3351_v55, 6  ;;  %v3705_v41 = vrot.slane %v3352_v0, 6  ;;  %v3709_v55 = vrot.slane %v3354_v5, 6 }
0x12ba   :  { %v15049_v28 = vadd.f32 %v3876_v22, %v15035_v20 }
0x12bb   :  { %v3965_v33 = vsel %vm3955_vm9, %v15046_v12, -inf  ;;  %v15118_v49 = vsel %vm476_vm4, %v3703_v8, %v3705_v41 }
0x12bc   :  { %3966 = vmax.xlane.f32.xlu1 %v3965_v33  ;;  %v10932_v48 = vpop.f32.mrb[104].mxu1  ;;  %v3962_v51 = vsel %vm3955_vm9, %v15049_v28, -inf  ;;  %v3353_v33 = vld [vmem:[%s17812_s8 + $0x250] sm:$0xff]  ;;  %17883 = vst [vmem:[#allocation8_spill] sm:$0xff] %v15118_v49 }
0x12bd   :  { %v15068_v50 = vadd.f32 %v10932_v48, %v15052_v56  ;;  %v3886_v59 = vpop.f32.mrb[105].mxu1  ;;  %3963 = vmax.xlane.f32.xlu0 %v3962_v51 }
0x12be   :  { %v15071_v36 = vadd.f32 %v3886_v59, %v15057_v37 }
0x12bf   :  { %v3971_v10 = vsel %vm3955_vm9, %v15068_v50, -inf }
0x12c0   :  { %3972 = vmax.xlane.f32.xlu1 %v3971_v10  ;;  %v10935_v38 = vpop.f32.mrb[106].mxu1  ;;  %v3968_v40 = vsel %vm3955_vm9, %v15071_v36, -inf  ;;  %v3707_v10 = vrot.slane %v3353_v33, 6 }
0x12c1   :  { %v15090_v60 = vadd.f32 %v10935_v38, %v15074_v13  ;;  %v3896_v43 = vpop.f32.mrb[107].mxu1  ;;  %3969 = vmax.xlane.f32.xlu0 %v3968_v40  ;;  %v15123_v38 = vsel %vm476_vm4, %v3701_v58, %v3703_v8  ;;  %v3355_v40 = vld [vmem:[%s17812_s8 + $0x270] sm:$0xff] }
0x12c2   :  { %v15093_v47 = vadd.f32 %v3896_v43, %v15079_v31  ;;  %17884 = vst [vmem:[#allocation9_spill] sm:$0xff] %v15123_v38  ;;  %v3356_v43 = vld [vmem:[%s17812_s8 + $0x280] sm:$0xff]  ;;  %v15140_v8 = vsel %vm476_vm4, %v3707_v10, %v3709_v55 }
0x12c3   :  { %v3977_v22 = vsel %vm3955_vm9, %v15090_v60, -inf  ;;  %17885 = vst [vmem:[#allocation10_spill] sm:$0xff] %v15140_v8 }
0x12c4   :  { %3978 = vmax.xlane.f32.xlu1 %v3977_v22  ;;  %v10938_v24 = vpop.f32.mrb[108].mxu1  ;;  %v3974_v48 = vsel %vm3955_vm9, %v15093_v47, -inf }
0x12c5   :  { %v15112_v51 = vadd.f32 %v10938_v24, %v15096_v62  ;;  %v3906_v59 = vpop.f32.mrb[109].mxu1  ;;  %3975 = vmax.xlane.f32.xlu0 %v3974_v48  ;;  %v3711_v48 = vrot.slane %v3355_v40, 6 }
0x12c6   :  { %v15115_v19 = vadd.f32 %v3906_v59, %v15101_v52  ;;  %v3713_v59 = vrot.slane %v3356_v43, 6  ;;  %v15145_v52 = vsel %vm476_vm4, %v3705_v41, %v3707_v10 }
0x12c7   :  { %v3983_v0 = vsel %vm3955_vm9, %v15112_v51, -inf  ;;  %17886 = vst [vmem:[#allocation11_spill] sm:$0xff] %v15145_v52  ;;  %v15167_v31 = vsel %vm476_vm4, %v3709_v55, %v3711_v48 }
0x12c8   :  { %3984 = vmax.xlane.f32.xlu1 %v3983_v0  ;;  %v10941_v22 = vpop.f32.mrb[110].mxu1  ;;  %v3980_v33 = vsel %vm3955_vm9, %v15115_v19, -inf  ;;  %v15162_v10 = vsel %vm476_vm4, %v3711_v48, %v3713_v59  ;;  %17888 = vst [vmem:[#allocation13_spill] sm:$0xff] %v15167_v31 }
0x12c9   :  { %v15134_v5 = vadd.f32 %v10941_v22, %v15118_v49  ;;  %v3916_v24 = vpop.f32.mrb[111].mxu1  ;;  %3981 = vmax.xlane.f32.xlu0 %v3980_v33  ;;  %v3357_v22 = vld [vmem:[%s17812_s8 + $0x290] sm:$0xff]  ;;  %v3358_v33 = vld [vmem:[%s17812_s8 + $0x2a0] sm:$0x3f]  ;;  %17887 = vst [vmem:[#allocation12_spill] sm:$0xff] %v15162_v10 }
0x12ca   :  { %v15137_v58 = vadd.f32 %v3916_v24, %v15123_v38  ;;  %v3715_v49 = vrot.slane %v3357_v22, 6  ;;  %v3717_v62 = vrot.slane %v3358_v33, 6 }
0x12cb   :  { %v3989_v0 = vsel %vm3955_vm9, %v15134_v5, -inf }
0x12cc   :  { %3990 = vmax.xlane.f32.xlu1 %v3989_v0  ;;  %v10944_v24 = vpop.f32.mrb[112].mxu1  ;;  %v3986_v40 = vsel %vm3955_vm9, %v15137_v58, -inf  ;;  %v15178_v22 = vsel %vm476_vm4, %v3715_v49, %v3717_v62  ;;  %v15183_v48 = vsel %vm476_vm4, %v3713_v59, %v3715_v49 }
0x12cd   :  { %v15156_v43 = vadd.f32 %v10944_v24, %v15140_v8  ;;  %v3926_v38 = vpop.f32.mrb[113].mxu1  ;;  %3987 = vmax.xlane.f32.xlu0 %v3986_v40  ;;  %17889 = vst [vmem:[#allocation14_spill] sm:$0xff] %v15178_v22  ;;  %17890 = vst [vmem:[#allocation15_spill] sm:$0xff] %v15183_v48 }
0x12ce   :  { %v15159_v41 = vadd.f32 %v3926_v38, %v15145_v52 }
0x12cf   :  { %v3995_v0 = vsel %vm3955_vm9, %v15156_v43, -inf }
0x12d0   :  { %3996 = vmax.xlane.f32.xlu1 %v3995_v0  ;;  %v10947_v13 = vpop.f32.mrb[114].mxu1  ;;  %v3992_v24 = vsel %vm3955_vm9, %v15159_v41, -inf }
0x12d1   :  { %v15172_v40 = vadd.f32 %v10947_v13, %v15162_v10  ;;  %v3936_v38 = vpop.f32.mrb[115].mxu1  ;;  %3993 = vmax.xlane.f32.xlu0 %v3992_v24 }
0x12d2   :  { %v15175_v52 = vadd.f32 %v3936_v38, %v15167_v31 }
0x12d3   :  { %v4001_v55 = vsel %vm3955_vm9, %v15172_v40, -inf }
0x12d4   :  { %4002 = vmax.xlane.f32.xlu1 %v4001_v55  ;;  %v10950_v33 = vpop.f32.mrb[116].mxu1  ;;  %v3998_v13 = vsel %vm3955_vm9, %v15175_v52, -inf }
0x12d5   :  { %v15188_v0 = vadd.f32 %v10950_v33, %v15178_v22  ;;  %v3946_v24 = vpop.f32.mrb[117].mxu1  ;;  %3999 = vmax.xlane.f32.xlu0 %v3998_v13 }
0x12d6   :  { %v15191_v38 = vadd.f32 %v3946_v24, %v15183_v48 }
0x12d7   :  { %v4007_v62 = vsel %vm3955_vm9, %v15188_v0, -inf }
0x12d8   :  { %4008 = vmax.xlane.f32.xlu1 %v4007_v62  ;;  %v4004_v49 = vsel %vm3955_vm9, %v15191_v38, -inf }
0x12d9   :  { %4005 = vmax.xlane.f32.xlu0 %v4004_v49 }
0x1345   :  { %v3961_v59 = vpop.xlane.xlu1 %3960 }
0x1346   :  { %v4011_v55 = vsub.f32 %v15024_v16, %v3961_v59  ;;  %v3958_v31 = vpop.xlane.xlu0 %3957 }
0x1347   :  { %v4010_v33 = vsub.f32 %v15027_v14, %v3958_v31 }
0x1348   :  { %v4030_v22 = vmul.f32 1.442695, %v4011_v55 }
0x1349   :  { %v4028_v10 = vmul.f32 1.442695, %v4010_v33  ;;  %v3967_v13 = vpop.xlane.xlu1 %3966 }
0x134a   :  { %12408 = vpow2.f32 %v4030_v22  ;;  %v4013_v24 = vsub.f32 %v15046_v12, %v3967_v13  ;;  %v3964_v48 = vpop.xlane.xlu0 %3963 }
0x134b   :  { %12410 = vpow2.f32 %v4028_v10  ;;  %v4012_v62 = vsub.f32 %v15049_v28, %v3964_v48 }
0x134c   :  { %v4034_v8 = vmul.f32 1.442695, %v4013_v24 }
0x134d   :  { %v4032_v37 = vmul.f32 1.442695, %v4012_v62  ;;  %v3973_v56 = vpop.xlane.xlu1 %3972 }
0x134e   :  { %12412 = vpow2.f32 %v4034_v8  ;;  %v4015_v49 = vsub.f32 %v15068_v50, %v3973_v56  ;;  %v3970_v16 = vpop.xlane.xlu0 %3969 }
0x134f   :  { %12414 = vpow2.f32 %v4032_v37  ;;  %v4014_v14 = vsub.f32 %v15071_v36, %v3970_v16 }
0x1350   :  { %v4038_v31 = vmul.f32 1.442695, %v4015_v49 }
0x1351   :  { %v4036_v59 = vmul.f32 1.442695, %v4014_v14  ;;  %v3979_v55 = vpop.xlane.xlu1 %3978 }
0x1352   :  { %12416 = vpow2.f32 %v4038_v31  ;;  %v4017_v12 = vsub.f32 %v15090_v60, %v3979_v55  ;;  %v3976_v22 = vpop.xlane.xlu0 %3975 }
0x1353   :  { %12418 = vpow2.f32 %v4036_v59  ;;  %v4016_v28 = vsub.f32 %v15093_v47, %v3976_v22 }
0x1354   :  { %v15205_v10 = vpop.eup %12408  ;;  %v4042_v48 = vmul.f32 1.442695, %v4017_v12 }
0x1355   :  { %v15207_v8 = vpop.eup %12410  ;;  %v4040_v56 = vmul.f32 1.442695, %v4016_v28  ;;  %v3985_v50 = vpop.xlane.xlu1 %3984  ;;  %v4067_v37 = vsel %vm3955_vm9, %v15205_v10, 0.0 }
0x1356   :  { %12420 = vpow2.f32 %v4042_v48  ;;  %v4019_v36 = vsub.f32 %v15112_v51, %v3985_v50  ;;  %4068 = vadd.xlane.f32.xlu1 %v4067_v37  ;;  %v3982_v33 = vpop.xlane.xlu0 %3981  ;;  %v4064_v60 = vsel %vm3955_vm9, %v15207_v8, 0.0 }
0x1357   :  { %12422 = vpow2.f32 %v4040_v56  ;;  %v4018_v47 = vsub.f32 %v15115_v19, %v3982_v33  ;;  %4065 = vadd.xlane.f32.xlu0 %v4064_v60 }
0x1358   :  { %v15215_v13 = vpop.eup %12412  ;;  %v4046_v24 = vmul.f32 1.442695, %v4019_v36 }
0x1359   :  { %v15217_v62 = vpop.eup %12414  ;;  %v4044_v49 = vmul.f32 1.442695, %v4018_v47  ;;  %v3991_v16 = vpop.xlane.xlu1 %3990  ;;  %v4073_v14 = vsel %vm3955_vm9, %v15215_v13, 0.0 }
0x135a   :  { %12424 = vpow2.f32 %v4046_v24  ;;  %v4021_v51 = vsub.f32 %v15134_v5, %v3991_v16  ;;  %4074 = vadd.xlane.f32.xlu1 %v4073_v14  ;;  %v3988_v31 = vpop.xlane.xlu0 %3987  ;;  %v4070_v59 = vsel %vm3955_vm9, %v15217_v62, 0.0 }
0x135b   :  { %12426 = vpow2.f32 %v4044_v49  ;;  %v4020_v19 = vsub.f32 %v15137_v58, %v3988_v31  ;;  %4071 = vadd.xlane.f32.xlu0 %v4070_v59 }
0x135c   :  { %v15225_v55 = vpop.eup %12416  ;;  %v4050_v12 = vmul.f32 1.442695, %v4021_v51 }
0x135d   :  { %v15227_v22 = vpop.eup %12418  ;;  %v4048_v28 = vmul.f32 1.442695, %v4020_v19  ;;  %v3997_v48 = vpop.xlane.xlu1 %3996  ;;  %v4079_v56 = vsel %vm3955_vm9, %v15225_v55, 0.0 }
0x135e   :  { %12428 = vpow2.f32 %v4050_v12  ;;  %v4023_v5 = vsub.f32 %v15156_v43, %v3997_v48  ;;  %4080 = vadd.xlane.f32.xlu1 %v4079_v56  ;;  %v3994_v50 = vpop.xlane.xlu0 %3993  ;;  %v4076_v37 = vsel %vm3955_vm9, %v15227_v22, 0.0 }
0x135f   :  { %12430 = vpow2.f32 %v4048_v28  ;;  %v4022_v58 = vsub.f32 %v15159_v41, %v3994_v50  ;;  %4077 = vadd.xlane.f32.xlu0 %v4076_v37 }
0x1360   :  { %v15235_v36 = vpop.eup %12420  ;;  %v4054_v33 = vmul.f32 1.442695, %v4023_v5 }
0x1361   :  { %v15237_v60 = vpop.eup %12422  ;;  %v4052_v47 = vmul.f32 1.442695, %v4022_v58  ;;  %v4003_v24 = vpop.xlane.xlu1 %4002  ;;  %v4085_v49 = vsel %vm3955_vm9, %v15235_v36, 0.0 }
0x1362   :  { %12432 = vpow2.f32 %v4054_v33  ;;  %v4025_v43 = vsub.f32 %v15172_v40, %v4003_v24  ;;  %4086 = vadd.xlane.f32.xlu1 %v4085_v49  ;;  %v4000_v16 = vpop.xlane.xlu0 %3999  ;;  %v4082_v14 = vsel %vm3955_vm9, %v15237_v60, 0.0  ;;  %v3600_v40 = vpop.f32.mrb[76].mxu0 }
0x1363   :  { %12434 = vpow2.f32 %v4052_v47  ;;  %v4024_v41 = vsub.f32 %v15175_v52, %v4000_v16  ;;  %4083 = vadd.xlane.f32.xlu0 %v4082_v14  ;;  %v10911_v5 = vpop.f32.mrb[77].mxu0 }
0x1364   :  { %v15245_v51 = vpop.eup %12424  ;;  %v4058_v31 = vmul.f32 1.442695, %v4025_v43  ;;  %v3605_v37 = vpop.f32.mrb[78].mxu0 }
0x1365   :  { %v15247_v59 = vpop.eup %12426  ;;  %v4056_v19 = vmul.f32 1.442695, %v4024_v41  ;;  %v4009_v12 = vpop.xlane.xlu1 %4008  ;;  %v4091_v28 = vsel %vm3955_vm9, %v15245_v51, 0.0  ;;  %v11830_v47 = vpack.c.bf16 %v3605_v37, %v3600_v40 }
0x1366   :  { %12436 = vpow2.f32 %v4058_v31  ;;  %v4027_v48 = vsub.f32 %v15188_v0, %v4009_v12  ;;  %4092 = vadd.xlane.f32.xlu1 %v4091_v28  ;;  %v4006_v56 = vpop.xlane.xlu0 %4005  ;;  %v4088_v52 = vsel %vm3955_vm9, %v15247_v59, 0.0  ;;  %v10914_v24 = vpop.f32.mrb[79].mxu0 }
0x1367   :  { %12438 = vpow2.f32 %v4056_v19  ;;  %v4026_v50 = vsub.f32 %v15191_v38, %v4006_v56  ;;  %4089 = vadd.xlane.f32.xlu0 %v4088_v52  ;;  %11831 = vmatprep.subr.bf16.mxu0 %v11830_v47  ;;  %v9329_v19 = vld [vmem:[%s17813_s5 + $0x9] ss:$0 sm:$0xff]  ;;  %v3610_v28 = vpop.f32.mrb[80].mxu0 }
0x1368   :  { %v15255_v58 = vpop.eup %12428  ;;  %v4062_v33 = vmul.f32 1.442695, %v4027_v48  ;;  %11833 = vmatpush3.bf16.msra.mxu0 %v11830_v47  ;;  %v3216_v48 = vadd.f32 %v14992_v3, %v9329_v19  ;;  %v10917_v52 = vpop.f32.mrb[81].mxu0  ;;  %v3211_v5 = vadd.f32 %v14990_v53, %v9329_v19 }
0x1369   :  { %v15257_v49 = vpop.eup %12430  ;;  %v4060_v43 = vmul.f32 1.442695, %v4026_v50  ;;  %v4097_v0 = vsel %vm3955_vm9, %v15255_v58, 0.0  ;;  %10955 = vmatprep.subr.msk.mxu0 %vm476_vm4, %v3610_v28 }
0x136a   :  { %12440 = vpow2.f32 %v4062_v33  ;;  %4098 = vadd.xlane.f32.xlu1 %v4097_v0  ;;  %v4094_v16 = vsel %vm3955_vm9, %v15257_v49, 0.0  ;;  %v3221_v33 = vadd.f32 %v14994_v4, %v9329_v19  ;;  %v15295_v53 = vadd.f32 %v3216_v48, %v14678_v2 }
0x136b   :  { %12442 = vpow2.f32 %v4060_v43  ;;  %4095 = vadd.xlane.f32.xlu0 %v4094_v16  ;;  %v15300_v43 = vadd.f32 %v3211_v5, %v14665_v25 }
0x136c   :  { %v15263_v38 = vpop.eup %12432  ;;  %10956 = vmatpush3.msk.msra.mxu0 %vm476_vm4, %v3610_v28  ;;  %v3230_v0 = vsel %vm172_vm1, %v15295_v53, 0.0  ;;  %v15305_v16 = vadd.f32 %v3221_v33, %v14691_v35 }
0x136d   :  { %v15265_v14 = vpop.eup %12434  ;;  %v4103_v41 = vsel %vm3955_vm9, %v15263_v38, 0.0  ;;  %11861 = vmatprep.subr.bf16.mxu0 %v17871_v45  ;;  %v3227_v4 = vsel %vm172_vm1, %v15300_v43, 0.0 }
0x136e   :  { %4104 = vadd.xlane.f32.xlu1 %v4103_v41  ;;  %v4100_v31 = vsel %vm3955_vm9, %v15265_v14, 0.0  ;;  %v3233_v2 = vsel %vm1430_vm7, %v15305_v16, 0.0 }
0x136f   :  { %4101 = vadd.xlane.f32.xlu0 %v4100_v31 }
0x1370   :  { %v15274_v12 = vpop.eup %12436 }
0x1371   :  { %v15276_v40 = vpop.eup %12438  ;;  %v4109_v56 = vsel %vm3955_vm9, %v15274_v12, 0.0 }
0x1372   :  { %4110 = vadd.xlane.f32.xlu1 %v4109_v56  ;;  %v4106_v50 = vsel %vm3955_vm9, %v15276_v40, 0.0 }
0x1373   :  { %4107 = vadd.xlane.f32.xlu0 %v4106_v50 }
0x1374   :  { %v15287_v37 = vpop.eup %12440 }
0x1375   :  { %v15289_v3 = vpop.eup %12442  ;;  %v4115_v47 = vsel %vm3955_vm9, %v15287_v37, 0.0 }
0x1376   :  { %4116 = vadd.xlane.f32.xlu1 %v4115_v47  ;;  %v4112_v24 = vsel %vm3955_vm9, %v15289_v3, 0.0 }
0x1377   :  { %4113 = vadd.xlane.f32.xlu0 %v4112_v24 }
0x137a   :  { %3231 = vadd.xlane.f32.xlu1 %v3230_v0 }
0x137b   :  { %3228 = vadd.xlane.f32.xlu0 %v3227_v4 }
0x137e   :  { %3234 = vadd.xlane.f32.xlu1 %v3233_v2 }
0x13e3   :  { %v4069_v41 = vpop.xlane.xlu1 %4068 }
0x13e4   :  { %12444 = vrcp.f32 %v4069_v41  ;;  %v4066_v25 = vpop.xlane.xlu0 %4065 }
0x13e5   :  { %12446 = vrcp.f32 %v4066_v25 }
0x13e7   :  { %v4075_v31 = vpop.xlane.xlu1 %4074 }
0x13e8   :  { %12448 = vrcp.f32 %v4075_v31  ;;  %v4072_v19 = vpop.xlane.xlu0 %4071 }
0x13e9   :  { %12450 = vrcp.f32 %v4072_v19 }
0x13eb   :  { %v4081_v28 = vpop.xlane.xlu1 %4080 }
0x13ec   :  { %12452 = vrcp.f32 %v4081_v28  ;;  %v4078_v35 = vpop.xlane.xlu0 %4077 }
0x13ed   :  { %12454 = vrcp.f32 %v4078_v35 }
0x13ee   :  { %v12445_v48 = vpop.eup %12444 }
0x13ef   :  { %v12447_v56 = vpop.eup %12446  ;;  %v4087_v52 = vpop.xlane.xlu1 %4086  ;;  %v4137_v33 = vmul.f32 %v12445_v48, %v15205_v10 }
0x13f0   :  { %12456 = vrcp.f32 %v4087_v52  ;;  %v4084_v5 = vpop.xlane.xlu0 %4083  ;;  %v4136_v50 = vmul.f32 %v12447_v56, %v15207_v8 }
0x13f1   :  { %12458 = vrcp.f32 %v4084_v5 }
0x13f2   :  { %v12449_v47 = vpop.eup %12448  ;;  %10957 = vmatprep.mubr.msk.f32.mxu0 %vm3955_vm9, %v4136_v50 }
0x13f3   :  { %v12451_v24 = vpop.eup %12450  ;;  %v4093_v0 = vpop.xlane.xlu1 %4092  ;;  %10958 = vmatmul.mubr.msk.f32.vlgmr.msra.gmra.mrb[82].mxu0 %vm3955_vm9, %v4137_v33  ;;  %v4139_v41 = vmul.f32 %v12449_v47, %v15215_v13 }
0x13f4   :  { %12460 = vrcp.f32 %v4093_v0  ;;  %v4090_v4 = vpop.xlane.xlu0 %4089  ;;  %v4138_v2 = vmul.f32 %v12451_v24, %v15217_v62 }
0x13f5   :  { %12462 = vrcp.f32 %v4090_v4 }
0x13f6   :  { %v12453_v25 = vpop.eup %12452  ;;  %10960 = vmatprep.mubr.msk.f32.mxu0 %vm3955_vm9, %v4138_v2 }
0x13f7   :  { %v12455_v8 = vpop.eup %12454  ;;  %v4099_v10 = vpop.xlane.xlu1 %4098  ;;  %10961 = vmatmul.mubr.msk.f32.gmra.mrb[84].mxu0 %vm3955_vm9, %v4139_v41  ;;  %v4141_v28 = vmul.f32 %v12453_v25, %v15225_v55 }
0x13f8   :  { %12464 = vrcp.f32 %v4099_v10  ;;  %v4096_v31 = vpop.xlane.xlu0 %4095  ;;  %v4140_v19 = vmul.f32 %v12455_v8, %v15227_v22 }
0x13f9   :  { %12466 = vrcp.f32 %v4096_v31 }
0x13fa   :  { %v12457_v35 = vpop.eup %12456  ;;  %10963 = vmatprep.mubr.msk.f32.mxu0 %vm3955_vm9, %v4140_v19 }
0x13fb   :  { %v12459_v62 = vpop.eup %12458  ;;  %v4105_v48 = vpop.xlane.xlu1 %4104  ;;  %10964 = vmatmul.mubr.msk.f32.gmra.mrb[86].mxu0 %vm3955_vm9, %v4141_v28  ;;  %v4143_v52 = vmul.f32 %v12457_v35, %v15235_v36  ;;  %v9356_v35 = vld [vmem:[%s17809_s2 + $0x2c0] sm:$0xff] }
0x13fc   :  { %12468 = vrcp.f32 %v4105_v48  ;;  %v4102_v13 = vpop.xlane.xlu0 %4101  ;;  %v4142_v56 = vmul.f32 %v12459_v62, %v15237_v60  ;;  %v9357_v62 = vld [vmem:[%s17809_s2 + $0x2c8] sm:$0xff]  ;;  %v9358_v48 = vld [vmem:[%s17809_s2 + $0x2d0] sm:$0xff] }
0x13fd   :  { %12470 = vrcp.f32 %v4102_v13  ;;  %v11862_v13 = vpack.c.bf16 %v9357_v62, %v9356_v35 }
0x13fe   :  { %v12461_v5 = vpop.eup %12460  ;;  %10966 = vmatprep.mubr.msk.f32.mxu0 %vm3955_vm9, %v4142_v56  ;;  %v9359_v56 = vld [vmem:[%s17809_s2 + $0x2d8] sm:$0xff] }
0x13ff   :  { %v12463_v22 = vpop.eup %12462  ;;  %v4111_v50 = vpop.xlane.xlu1 %4110  ;;  %10967 = vmatmul.mubr.msk.f32.gmra.mrb[88].mxu0 %vm3955_vm9, %v4143_v52  ;;  %v4145_v47 = vmul.f32 %v12461_v5, %v15245_v51  ;;  %v11865_v52 = vpack.c.bf16 %v9359_v56, %v9358_v48  ;;  %v9360_v5 = vld [vmem:[%s17809_s2 + $0x2e0] sm:$0xff] }
0x1400   :  { %12472 = vrcp.f32 %v4111_v50  ;;  %v4108_v55 = vpop.xlane.xlu0 %4107  ;;  %v4144_v33 = vmul.f32 %v12463_v22, %v15247_v59  ;;  %11863 = vmatpush3.bf16.msra.mxu0 %v11862_v13  ;;  %v9361_v22 = vld [vmem:[%s17809_s2 + $0x2e8] sm:$0xff] }
0x1401   :  { %12474 = vrcp.f32 %v4108_v55  ;;  %11864 = vmatprep.subr.bf16.mxu0 %v17871_v45  ;;  %v11868_v50 = vpack.c.bf16 %v9361_v22, %v9360_v5  ;;  %v9362_v55 = vld [vmem:[%s17809_s2 + $0x2f0] sm:$0xff] }
0x1402   :  { %v12465_v24 = vpop.eup %12464  ;;  %10969 = vmatprep.mubr.msk.f32.mxu0 %vm3955_vm9, %v4144_v33  ;;  %v9363_v33 = vld [vmem:[%s17809_s2 + $0x2f8] sm:$0xff] }
0x1403   :  { %v12467_v60 = vpop.eup %12466  ;;  %v4117_v0 = vpop.xlane.xlu1 %4116  ;;  %10970 = vmatmul.mubr.msk.f32.gmra.mrb[90].mxu0 %vm3955_vm9, %v4145_v47  ;;  %v4147_v2 = vmul.f32 %v12465_v24, %v15255_v58  ;;  %v11871_v47 = vpack.c.bf16 %v9363_v33, %v9362_v55 }
0x1404   :  { %12476 = vrcp.f32 %v4117_v0  ;;  %v4114_v36 = vpop.xlane.xlu0 %4113  ;;  %v4146_v4 = vmul.f32 %v12467_v60, %v15257_v49  ;;  %11866 = vmatpush3.bf16.msra.mxu0 %v11865_v52 }
0x1405   :  { %12478 = vrcp.f32 %v4114_v36  ;;  %11867 = vmatprep.subr.bf16.mxu0 %v17871_v45  ;;  %v15397_v36 = vld [vmem:[%s17811_s7 + $0xa0] sm:$0xff] }
0x1406   :  { %v12469_v41 = vpop.eup %12468  ;;  %10972 = vmatprep.mubr.msk.f32.mxu0 %vm3955_vm9, %v4146_v4 }
0x1407   :  { %v12471_v59 = vpop.eup %12470  ;;  %10973 = vmatmul.mubr.msk.f32.gmra.mrb[92].mxu0 %vm3955_vm9, %v4147_v2  ;;  %v4149_v25 = vmul.f32 %v12469_v41, %v15263_v38 }
0x1408   :  { %v4148_v51 = vmul.f32 %v12471_v59, %v15265_v14  ;;  %11869 = vmatpush3.bf16.msra.mxu0 %v11868_v50 }
0x1409   :  { %11870 = vmatprep.subr.bf16.mxu0 %v17871_v45 }
0x140a   :  { %v12473_v8 = vpop.eup %12472  ;;  %10975 = vmatprep.mubr.msk.f32.mxu0 %vm3955_vm9, %v4148_v51 }
0x140b   :  { %v12475_v10 = vpop.eup %12474  ;;  %10976 = vmatmul.mubr.msk.f32.gmra.mrb[94].mxu0 %vm3955_vm9, %v4149_v25  ;;  %v4151_v58 = vmul.f32 %v12473_v8, %v15274_v12  ;;  %v3360_v12 = vld [vmem:[%s17812_s8 + $0x28] sm:$0xf0] }
0x140c   :  { %v4150_v49 = vmul.f32 %v12475_v10, %v15276_v40  ;;  %v15355_v40 = vld [vmem:[%s17812_s8 + $0x38] sm:$0xff]  ;;  %v4393_v28 = vrot.slane %v3360_v12, 4  ;;  %11872 = vmatpush3.bf16.msra.mxu0 %v11871_v47 }
0x140d   :  { %11885 = vmatprep.subr.bf16.mxu0 %v17871_v45 }
0x140e   :  { %v12477_v31 = vpop.eup %12476  ;;  %10978 = vmatprep.mubr.msk.f32.mxu0 %vm3955_vm9, %v4150_v49 }
0x140f   :  { %v12479_v19 = vpop.eup %12478  ;;  %10979 = vmatmul.mubr.msk.f32.gmra.mrb[96].mxu0 %vm3955_vm9, %v4151_v58  ;;  %v4153_v38 = vmul.f32 %v12477_v31, %v15287_v37 }
0x1410   :  { %v4152_v14 = vmul.f32 %v12479_v19, %v15289_v3  ;;  %v4394_v3 = vrot.slane %v15355_v40, 4 }
0x1412   :  { %10981 = vmatprep.mubr.msk.f32.mxu0 %vm3955_vm9, %v4152_v14  ;;  %v15361_v37 = vsel %vm425_vm2, %v4393_v28, %v4394_v3 }
0x1413   :  { %10982 = vmatmul.mubr.msk.f32.gmra.mrb[98].mxu0 %vm3955_vm9, %v4153_v38  ;;  %9413 = vmatprep.mubr.msk.f32.mxu1 %vm4403_vm10, %v15361_v37 }
0x1414   :  { %11000 = vmatprep.mubr.msk.f32.mxu0 %vm12830_vm0, %v17872_v32 }
0x14c6   :  { %v10959_v24 = vpop.f32.mrb[82].mxu0 }
0x14c7   :  { %v4367_v60 = vmul.f32 %v10959_v24, %v14828_v6  ;;  %v4277_v0 = vpop.f32.mrb[83].mxu0 }
0x14c8   :  { %v4366_v4 = vmul.f32 %v15397_v36, %v4277_v0 }
0x14ca   :  { %v11835_v2 = vpack.c.bf16 %v4367_v60, %v4366_v4  ;;  %v10962_v41 = vpop.f32.mrb[84].mxu0 }
0x14cb   :  { %v4369_v59 = vmul.f32 %v10962_v41, %v14842_v1  ;;  %v4287_v51 = vpop.f32.mrb[85].mxu0 }
0x14cc   :  { %v4368_v25 = vmul.f32 %v4287_v51, %v14833_v15  ;;  %11836 = vmatpush1.bf16.msra.mxu1 %v11835_v2  ;;  %v3363_v2 = vld [vmem:[%s17812_s8 + $0x40] sm:$0x3f] }
0x14cd   :  { %11837 = vmatprep.subr.bf16.mxu1 %v17871_v45 }
0x14ce   :  { %v11838_v8 = vpack.c.bf16 %v4369_v59, %v4368_v25  ;;  %v10965_v6 = vpop.f32.mrb[86].mxu0 }
0x14cf   :  { %v4371_v10 = vmul.f32 %v10965_v6, %v14856_v26  ;;  %v4297_v49 = vpop.f32.mrb[87].mxu0 }
0x14d0   :  { %v4370_v58 = vmul.f32 %v4297_v49, %v14848_v9  ;;  %11839 = vmatpush1.bf16.msra.mxu1 %v11838_v8  ;;  %v3229_v49 = vpop.xlane.xlu0 %3228 }
0x14d1   :  { %11840 = vmatprep.subr.bf16.mxu1 %v17871_v45 }
0x14d2   :  { %v11841_v31 = vpack.c.bf16 %v4371_v10, %v4370_v58  ;;  %v10968_v19 = vpop.f32.mrb[88].mxu0  ;;  %v9416_v58 = vld [vmem:[%s17813_s5 + $0xc] ss:$0 sm:$0xff] }
0x14d3   :  { %v4373_v1 = vmul.f32 %v10968_v19, %v14871_v34  ;;  %v4307_v14 = vpop.f32.mrb[89].mxu0 }
0x14d4   :  { %v4372_v15 = vmul.f32 %v4307_v14, %v14862_v57  ;;  %11842 = vmatpush1.bf16.msra.mxu1 %v11841_v31  ;;  %v3232_v31 = vpop.xlane.xlu1 %3231 }
0x14d5   :  { %11843 = vmatprep.subr.bf16.mxu1 %v17871_v45 }
0x14d6   :  { %v11844_v38 = vpack.c.bf16 %v4373_v1, %v4372_v15  ;;  %v10971_v12 = vpop.f32.mrb[90].mxu0  ;;  %v3236_v1 = vmul.f32 0.015625, %v3229_v49 }
0x14d7   :  { %v4375_v26 = vmul.f32 %v10971_v12, %v14887_v54  ;;  %v4317_v28 = vpop.f32.mrb[91].mxu0 }
0x14d8   :  { %v4374_v9 = vmul.f32 %v4317_v28, %v14877_v18  ;;  %11845 = vmatpush1.bf16.msra.mxu1 %v11844_v38  ;;  %v12772_v38 = vld [vmem:[%s17817_s1] sm:$0xff] }
0x14d9   :  { %11846 = vmatprep.subr.bf16.mxu1 %v17871_v45 }
0x14da   :  { %v11847_v35 = vpack.c.bf16 %v4375_v26, %v4374_v9  ;;  %v10974_v62 = vpop.f32.mrb[92].mxu0  ;;  %v3237_v26 = vmul.f32 0.015625, %v3232_v31  ;;  %v15479_v9 = vsub.f32 %v15300_v43, %v3236_v1 }
0x14db   :  { %v4377_v34 = vmul.f32 %v10974_v62, %v14901_v7  ;;  %v4327_v48 = vpop.f32.mrb[93].mxu0 }
0x14dc   :  { %v4376_v57 = vmul.f32 %v4327_v48, %v14893_v39  ;;  %11848 = vmatpush1.bf16.msra.mxu1 %v11847_v35  ;;  %v3235_v48 = vpop.xlane.xlu1 %3234 }
0x14dd   :  { %11849 = vmatprep.subr.bf16.mxu1 %v17871_v45 }
0x14de   :  { %v11850_v13 = vpack.c.bf16 %v4377_v34, %v4376_v57  ;;  %v10977_v56 = vpop.f32.mrb[94].mxu0  ;;  %v12773_v57 = vld [vmem:[%s17817_s1 + $0x8] sm:$0xff] }
0x14df   :  { %v4379_v54 = vmul.f32 %v10977_v56, %v14916_v42  ;;  %v4337_v52 = vpop.f32.mrb[95].mxu0  ;;  %v3359_v42 = vld [vmem:[%s17812_s8 + $0x20] sm:$0xf0]  ;;  %v15486_v56 = vsub.f32 %v15295_v53, %v3237_v26 }
0x14e0   :  { %v4378_v18 = vmul.f32 %v4337_v52, %v14908_v11  ;;  %11851 = vmatpush1.bf16.msra.mxu1 %v11850_v13  ;;  %v3361_v11 = vld [vmem:[%s17812_s8 + $0x30] sm:$0xff]  ;;  %v4390_v60 = vrot.slane %v3359_v42, 4  ;;  %v3238_v52 = vmul.f32 0.015625, %v3235_v48 }
0x14e1   :  { %11852 = vmatprep.subr.bf16.mxu1 %v17871_v45  ;;  %v4391_v0 = vrot.slane %v3361_v11, 4  ;;  %v3243_v11 = vmul.f32 %v15486_v56, %v15486_v56 }
0x14e2   :  { %v11853_v5 = vpack.c.bf16 %v4379_v54, %v4378_v18  ;;  %v10980_v22 = vpop.f32.mrb[96].mxu0 }
0x14e3   :  { %v4381_v7 = vmul.f32 %v10980_v22, %v14931_v27  ;;  %v4347_v50 = vpop.f32.mrb[97].mxu0  ;;  %v3364_v27 = vld [vmem:[%s17812_s8 + $0x48] sm:$0x3f]  ;;  %v15439_v59 = vsel %vm425_vm2, %v4390_v60, %v4391_v0  ;;  %v3242_v22 = vmul.f32 %v15479_v9, %v15479_v9  ;;  %v9482_v60 = vld [vmem:[%s17809_s2 + $0x458] sm:$0xff] }
0x14e4   :  { %v4380_v39 = vmul.f32 %v4347_v50, %v14922_v30  ;;  %11854 = vmatpush1.bf16.msra.mxu1 %v11853_v5  ;;  %v15433_v4 = vrot.slane %v3364_v27, 4 }
0x14e5   :  { %11855 = vmatprep.subr.bf16.mxu1 %v17871_v45  ;;  %v3245_v42 = vsel %vm172_vm1, %v3242_v22, 0.0 }
0x14e6   :  { %v11856_v55 = vpack.c.bf16 %v4381_v7, %v4380_v39  ;;  %v10983_v33 = vpop.f32.mrb[98].mxu0  ;;  %v12774_v7 = vld [vmem:[%s17817_s1 + $0x10] sm:$0x3]  ;;  %v15495_v39 = vsub.f32 %v15305_v16, %v3238_v52  ;;  %v9479_v16 = vld [vmem:[%s17809_s2 + $0x440] sm:$0xff] }
0x14e7   :  { %v4383_v47 = vmul.f32 %v10983_v33, %v14946_v23  ;;  %v4357_v30 = vpop.f32.mrb[99].mxu0  ;;  %v15441_v23 = vrot.slane %v3363_v2, 4  ;;  %v9483_v2 = vld [vmem:[%s17809_s2 + $0x460] sm:$0xff] }
0x14e8   :  { %v4382_v24 = vmul.f32 %v4357_v30, %v14937_v29  ;;  %11857 = vmatpush1.bf16.msra.mxu1 %v11856_v55  ;;  %v15447_v29 = vsel %vm425_vm2, %v4394_v3, %v15433_v4  ;;  %v3248_v55 = vsel %vm172_vm1, %v3243_v11, 0.0  ;;  %v3244_v33 = vmul.f32 %v15495_v39, %v15495_v39  ;;  %v9471_v11 = vld [vmem:[%s17809_s2 + $0x400] sm:$0xff] }
0x14e9   :  { %11858 = vmatprep.subr.bf16.mxu1 %v17871_v45  ;;  %v15455_v51 = vsel %vm425_vm2, %v4391_v0, %v15441_v23 }
0x14ea   :  { %v11859_v41 = vpack.c.bf16 %v4383_v47, %v4382_v24  ;;  %v3251_v27 = vsel %vm1430_vm7, %v3244_v33, 0.0  ;;  %v9480_v47 = vld [vmem:[%s17809_s2 + $0x448] sm:$0xff]  ;;  %v9481_v24 = vld [vmem:[%s17809_s2 + $0x450] sm:$0xff] }
0x14eb   :  { %v11886_v30 = vpack.c.bf16 %v9480_v47, %v9479_v16  ;;  %v11889_v0 = vpack.c.bf16 %v9482_v60, %v9481_v24  ;;  %v9474_v24 = vld [vmem:[%s17809_s2 + $0x418] sm:$0xff] }
0x14ec   :  { %11860 = vmatpush1.bf16.msra.mxu1 %v11859_v41  ;;  %v9484_v41 = vld [vmem:[%s17809_s2 + $0x468] sm:$0xff] }
0x14ed   :  { %11873 = vmatprep.subr.bf16.mxu1 %v17871_v45 }
0x14ef   :  { %4475 = vmatmul.mubr.f32.vlgmr.msra.gmra.mrb[118].mxu1 %v15439_v59 }
0x14f0   :  { %9414 = vmatprep.mubr.msk.f32.mxu1 %vm4403_vm10, %v15447_v29 }
0x14f3   :  { %4480 = vmatmul.mubr.f32.gmra.mrb[120].mxu1 %v15455_v51 }
0x14f4   :  { %9415 = vmatprep.mubr.msk.f32.mxu1 %vm4403_vm10, %v15433_v4 }
0x14f7   :  { %4485 = vmatmul.mubr.f32.gmra.mrb[122].mxu1 %v15441_v23 }
0x14f8   :  { %11025 = vmatprep.mubr.msk.f32.mxu1 %vm12830_vm0, %v17872_v32 }
0x15c2   :  { %v4476_v40 = vpop.f32.mrb[118].mxu1 }
0x15c3   :  { %v4478_v3 = vpop.f32.mrb[119].mxu1  ;;  %11001 = vmatmul.mubr.msk.f32.vlgmr.msra.gmra.mrb[100].mxu0 %vm172_vm1, %v4476_v40  ;;  %v11892_v40 = vpack.c.bf16 %v9484_v41, %v9483_v2 }
0x15c4   :  { %11003 = vmatprep.mubr.msk.f32.mxu0 %vm12830_vm0, %v17872_v32  ;;  %11887 = vmatpush3.bf16.msra.mxu0 %v11886_v30  ;;  %v9485_v3 = vld [vmem:[%s17809_s2 + $0x470] sm:$0xff] }
0x15c5   :  { %11888 = vmatprep.subr.bf16.mxu0 %v17871_v45  ;;  %v9473_v30 = vld [vmem:[%s17809_s2 + $0x410] sm:$0xff] }
0x15c6   :  { %v4481_v25 = vpop.f32.mrb[120].mxu1 }
0x15c7   :  { %v4483_v8 = vpop.f32.mrb[121].mxu1  ;;  %11004 = vmatmul.mubr.msk.f32.gmra.mrb[102].mxu0 %vm172_vm1, %v4481_v25  ;;  %v9486_v25 = vld [vmem:[%s17809_s2 + $0x478] sm:$0xff] }
0x15c8   :  { %11006 = vmatprep.mubr.msk.f32.mxu0 %vm12830_vm0, %v17872_v32  ;;  %11890 = vmatpush3.bf16.msra.mxu0 %v11889_v0  ;;  %v11895_v8 = vpack.c.bf16 %v9486_v25, %v9485_v3  ;;  %v9476_v3 = vld [vmem:[%s17809_s2 + $0x428] sm:$0xff] }
0x15c9   :  { %11891 = vmatprep.subr.bf16.mxu0 %v17871_v45 }
0x15ca   :  { %v4486_v6 = vpop.f32.mrb[122].mxu1 }
0x15cb   :  { %v4488_v10 = vpop.f32.mrb[123].mxu1  ;;  %11007 = vmatmul.mubr.msk.f32.gmra.mrb[104].mxu0 %vm172_vm1, %v4486_v6 }
0x15cc   :  { %11050 = vmatprep.mubr.msk.f32.mxu0 %vm12830_vm0, %v17872_v32  ;;  %11893 = vmatpush3.bf16.msra.mxu0 %v11892_v40  ;;  %v9475_v40 = vld [vmem:[%s17809_s2 + $0x420] sm:$0xff] }
0x15cd   :  { %11894 = vmatprep.subr.bf16.mxu0 %v17871_v45  ;;  %v11880_v25 = vpack.c.bf16 %v9476_v3, %v9475_v40 }
0x15d0   :  { %11896 = vmatpush3.bf16.msra.mxu0 %v11895_v8  ;;  %v9477_v8 = vld [vmem:[%s17809_s2 + $0x430] sm:$0xff] }
0x1696   :  { %v4569_v19 = vpop.f32.mrb[100].mxu0 }
0x1697   :  { %v4570_v14 = vadd.f32 %v9416_v58, %v4569_v19  ;;  %v11002_v15 = vpop.f32.mrb[101].mxu0 }
0x1699   :  { %v4583_v12 = vadd.f32 %v12772_v38, %v4570_v14 }
0x169a   :  { %v4574_v28 = vpop.f32.mrb[102].mxu0 }
0x169b   :  { %v4575_v35 = vadd.f32 %v9416_v58, %v4574_v28  ;;  %v11005_v62 = vpop.f32.mrb[103].mxu0  ;;  %v4586_v34 = vsel %vm172_vm1, %v4583_v12, 0.0 }
0x169c   :  { %4587 = vadd.xlane.f32.xlu0 %v4586_v34 }
0x169d   :  { %v4584_v13 = vadd.f32 %v12773_v57, %v4575_v35 }
0x169e   :  { %v4579_v54 = vpop.f32.mrb[104].mxu0 }
0x169f   :  { %v4580_v18 = vadd.f32 %v9416_v58, %v4579_v54  ;;  %v11008_v5 = vpop.f32.mrb[105].mxu0  ;;  %v4589_v43 = vsel %vm172_vm1, %v4584_v13, 0.0 }
0x16a0   :  { %4590 = vadd.xlane.f32.xlu0 %v4589_v43 }
0x16a1   :  { %v4585_v50 = vadd.f32 %v12774_v7, %v4580_v18  ;;  %v9330_v7 = vld [vmem:[%s17813_s5 + $0xa] ss:$0 sm:$0xff] }
0x16a3   :  { %v4593_v53 = vsel %vm4592_vm11, %v4585_v50, 0.0 }
0x16a4   :  { %4594 = vadd.xlane.f32.xlu1 %v4593_v53  ;;  %3246 = vadd.xlane.f32.xlu0 %v3245_v42  ;;  %v9331_v53 = vld [vmem:[%s17813_s5 + $0xb] ss:$0 sm:$0xff] }
0x16a8   :  { %3249 = vadd.xlane.f32.xlu1 %v3248_v55  ;;  %v9472_v55 = vld [vmem:[%s17809_s2 + $0x408] sm:$0xff] }
0x16ac   :  { %3252 = vadd.xlane.f32.xlu1 %v3251_v27  ;;  %v11874_v27 = vpack.c.bf16 %v9472_v55, %v9471_v11  ;;  %v9491_v55 = vld [vmem:[%s17809_s2 + $0x4a0] sm:$0xff] }
0x16ae   :  { %11875 = vmatpush3.bf16.msra.mxu1 %v11874_v27 }
0x16af   :  { %11876 = vmatprep.subr.bf16.mxu1 %v17871_v45 }
0x1729   :  { %v4588_v6 = vpop.xlane.xlu0 %4587 }
0x172a   :  { %v4596_v10 = vmul.f32 0.015625, %v4588_v6  ;;  %v9478_v6 = vld [vmem:[%s17809_s2 + $0x438] sm:$0xff] }
0x172c   :  { %v15532_v49 = vsub.f32 %v4583_v12, %v4596_v10  ;;  %v11883_v10 = vpack.c.bf16 %v9478_v6, %v9477_v8 }
0x172d   :  { %v4591_v58 = vpop.xlane.xlu0 %4590 }
0x172e   :  { %v4597_v31 = vmul.f32 0.015625, %v4591_v58  ;;  %v4602_v19 = vmul.f32 %v15532_v49, %v15532_v49 }
0x1730   :  { %v15536_v1 = vsub.f32 %v4584_v13, %v4597_v31  ;;  %v4605_v14 = vsel %vm172_vm1, %v4602_v19, 0.0 }
0x1731   :  { %v4595_v15 = vpop.xlane.xlu1 %4594  ;;  %4606 = vadd.xlane.f32.xlu0 %v4605_v14  ;;  %v3247_v38 = vpop.xlane.xlu0 %3246 }
0x1732   :  { %v4598_v26 = vmul.f32 0.015625, %v4595_v15  ;;  %v3254_v28 = vmul.f32 0.015625, %v3247_v38  ;;  %v4603_v35 = vmul.f32 %v15536_v1, %v15536_v1 }
0x1734   :  { %v15541_v62 = vsub.f32 %v4585_v50, %v4598_v26  ;;  %v3257_v12 = vadd.f32 1e-05, %v3254_v28  ;;  %v4608_v34 = vsel %vm172_vm1, %v4603_v35, 0.0 }
0x1735   :  { %v3250_v48 = vpop.xlane.xlu1 %3249  ;;  %4609 = vadd.xlane.f32.xlu0 %v4608_v34  ;;  %v9420_v34 = vld [vmem:[%s17813_s5 + $0xd] ss:$0 sm:$0xff] }
0x1736   :  { %12480 = vrsqrt.f32 %v3257_v12  ;;  %v3255_v57 = vmul.f32 0.015625, %v3250_v48  ;;  %v4604_v13 = vmul.f32 %v15541_v62, %v15541_v62 }
0x1738   :  { %v3258_v54 = vadd.f32 1e-05, %v3255_v57  ;;  %v4611_v52 = vsel %vm4592_vm11, %v4604_v13, 0.0  ;;  %v9487_v57 = vld [vmem:[%s17809_s2 + $0x480] sm:$0xff]  ;;  %v9488_v13 = vld [vmem:[%s17809_s2 + $0x488] sm:$0xff] }
0x1739   :  { %4612 = vadd.xlane.f32.xlu1 %v4611_v52  ;;  %v3253_v18 = vpop.xlane.xlu1 %3252 }
0x173a   :  { %12482 = vrsqrt.f32 %v3258_v54  ;;  %v3256_v5 = vmul.f32 0.015625, %v3253_v18  ;;  %v9421_v54 = vld [vmem:[%s17813_s5 + $0xe] ss:$0 sm:$0xff] }
0x173c   :  { %v3259_v43 = vadd.f32 1e-05, %v3256_v5  ;;  %v11898_v5 = vpack.c.bf16 %v9488_v13, %v9487_v57 }
0x173e   :  { %12484 = vrsqrt.f32 %v3259_v43 }
0x1740   :  { %v12481_v22 = vpop.eup %12480 }
0x1741   :  { %v3263_v50 = vmul.f32 %v12481_v22, %v15479_v9 }
0x1743   :  { %v3270_v42 = vmul.f32 %v9330_v7, %v3263_v50 }
0x1744   :  { %v12483_v33 = vpop.eup %12482 }
0x1745   :  { %v15560_v16 = vadd.f32 %v9331_v53, %v3270_v42  ;;  %v3264_v47 = vmul.f32 %v12483_v33, %v15486_v56  ;;  %v11877_v56 = vpack.c.bf16 %v9474_v24, %v9473_v30  ;;  %v9492_v33 = vld [vmem:[%s17809_s2 + $0x4a8] sm:$0xff]  ;;  %v9494_v30 = vld [vmem:[%s17809_s2 + $0x4b8] sm:$0xff] }
0x1747   :  { %17891 = vst [vmem:[#allocation16_spill] sm:$0xff] %v15560_v16  ;;  %11051 = vmatmul.mubr.msk.f32.vlgmr.msra.gmra.mrb[106].mxu0 %vm172_vm1, %v15560_v16  ;;  %v3271_v9 = vmul.f32 %v9330_v7, %v3264_v47  ;;  %11878 = vmatpush3.bf16.msra.mxu1 %v11877_v56  ;;  %v11904_v47 = vpack.c.bf16 %v9492_v33, %v9491_v55  ;;  %v15699_v55 = vld [vmem:[%s17811_s7 + $0xc0] sm:$0xff] }
0x1748   :  { %v12485_v60 = vpop.eup %12484  ;;  %11053 = vmatprep.mubr.msk.f32.mxu0 %vm12830_vm0, %v17872_v32  ;;  %11879 = vmatprep.subr.bf16.mxu1 %v17871_v45 }
0x1749   :  { %v15574_v0 = vadd.f32 %v9331_v53, %v3271_v9  ;;  %v3265_v2 = vmul.f32 %v12485_v60, %v15495_v39 }
0x174b   :  { %17892 = vst [vmem:[#allocation17_spill] sm:$0xff] %v15574_v0  ;;  %11054 = vmatmul.mubr.msk.f32.gmra.mrb[108].mxu0 %vm172_vm1, %v15574_v0  ;;  %v3272_v41 = vmul.f32 %v9330_v7, %v3265_v2  ;;  %11881 = vmatpush3.bf16.msra.mxu1 %v11880_v25  ;;  %v9490_v7 = vld [vmem:[%s17809_s2 + $0x498] sm:$0xff] }
0x174c   :  { %11056 = vmatprep.mubr.msk.f32.mxu0 %vm12830_vm0, %v17872_v32  ;;  %11882 = vmatprep.subr.bf16.mxu1 %v17871_v45 }
0x174d   :  { %v15588_v39 = vadd.f32 %v9331_v53, %v3272_v41 }
0x174f   :  { %17893 = vst [vmem:[#allocation18_spill] sm:$0xff] %v15588_v39  ;;  %11057 = vmatmul.mubr.msk.f32.gmra.mrb[110].mxu0 %vm172_vm1, %v15588_v39  ;;  %11884 = vmatpush3.bf16.msra.mxu1 %v11883_v10 }
0x1750   :  { %11897 = vmatprep.subr.bf16.mxu1 %v17871_v45 }
0x17be   :  { %v4607_v58 = vpop.xlane.xlu0 %4606 }
0x17bf   :  { %v4614_v31 = vmul.f32 0.015625, %v4607_v58 }
0x17c1   :  { %v4617_v19 = vadd.f32 1e-05, %v4614_v31 }
0x17c2   :  { %v4610_v14 = vpop.xlane.xlu0 %4609 }
0x17c3   :  { %12486 = vrsqrt.f32 %v4617_v19  ;;  %v4615_v15 = vmul.f32 0.015625, %v4610_v14 }
0x17c5   :  { %v4618_v38 = vadd.f32 1e-05, %v4615_v15 }
0x17c6   :  { %v4613_v26 = vpop.xlane.xlu1 %4612 }
0x17c7   :  { %12488 = vrsqrt.f32 %v4618_v38  ;;  %v4616_v28 = vmul.f32 0.015625, %v4613_v26 }
0x17c9   :  { %v4619_v35 = vadd.f32 1e-05, %v4616_v28  ;;  %v15667_v28 = vld [vmem:[%s17811_s7 + $0xa8] sm:$0xff] }
0x17cb   :  { %12490 = vrsqrt.f32 %v4619_v35 }
0x17cd   :  { %v12487_v12 = vpop.eup %12486 }
0x17ce   :  { %v4623_v48 = vmul.f32 %v12487_v12, %v15532_v49  ;;  %v9489_v49 = vld [vmem:[%s17809_s2 + $0x490] sm:$0xff] }
0x17cf   :  { %v11901_v42 = vpack.c.bf16 %v9490_v7, %v9489_v49 }
0x17d0   :  { %v4630_v52 = vmul.f32 %v9420_v34, %v4623_v48 }
0x17d1   :  { %v12489_v18 = vpop.eup %12488 }
0x17d2   :  { %v4637_v43 = vadd.f32 %v9421_v54, %v4630_v52  ;;  %v4624_v22 = vmul.f32 %v12489_v18, %v15536_v1 }
0x17d4   :  { %11026 = vmatmul.mubr.msk.f32.vlgmr.msra.gmra.mrb[124].mxu1 %vm172_vm1, %v4637_v43  ;;  %v4631_v50 = vmul.f32 %v9420_v34, %v4624_v22  ;;  %v15680_v43 = vld [vmem:[%s17811_s7 + $0xb0] sm:$0xff] }
0x17d5   :  { %v12491_v53 = vpop.eup %12490  ;;  %11899 = vmatpush3.bf16.msra.mxu1 %v11898_v5  ;;  %11028 = vmatprep.mubr.msk.f32.mxu1 %vm12830_vm0, %v17872_v32 }
0x17d6   :  { %11900 = vmatprep.subr.bf16.mxu1 %v17871_v45  ;;  %v4638_v1 = vadd.f32 %v9421_v54, %v4631_v50  ;;  %v4625_v11 = vmul.f32 %v12491_v53, %v15541_v62  ;;  %v9493_v62 = vld [vmem:[%s17809_s2 + $0x4b0] sm:$0xff]  ;;  %v15688_v50 = vld [vmem:[%s17811_s7 + $0xb8] sm:$0xff] }
0x17d7   :  { %v11907_v24 = vpack.c.bf16 %v9494_v30, %v9493_v62  ;;  %v15712_v62 = vld [vmem:[%s17811_s7 + $0xd0] sm:$0xff] }
0x17d8   :  { %11029 = vmatmul.mubr.msk.f32.gmra.mrb[126].mxu1 %vm172_vm1, %v4638_v1  ;;  %v4632_v27 = vmul.f32 %v9420_v34, %v4625_v11 }
0x17d9   :  { %11902 = vmatpush3.bf16.msra.mxu1 %v11901_v42  ;;  %11031 = vmatprep.mubr.msk.f32.mxu1 %vm12830_vm0, %v17872_v32 }
0x17da   :  { %11903 = vmatprep.subr.bf16.mxu1 %v17871_v45  ;;  %v4639_v9 = vadd.f32 %v9421_v54, %v4632_v27  ;;  %v15706_v27 = vld [vmem:[%s17811_s7 + $0xc8] sm:$0xff] }
0x17dc   :  { %11032 = vmatmul.mubr.msk.f32.gmra.mrb[128].mxu1 %vm172_vm1, %v4639_v9 }
0x17dd   :  { %11905 = vmatpush3.bf16.msra.mxu1 %v11904_v47  ;;  %11075 = vmatprep.mubr.msk.f32.mxu1 %vm12830_vm0, %v17872_v32 }
0x17de   :  { %11906 = vmatprep.subr.bf16.mxu1 %v17871_v45 }
0x17e1   :  { %11908 = vmatpush3.bf16.msra.mxu1 %v11907_v24 }
0x17e4   :  { %11076 = vmatmul.mubr.msk.f32.vlgmr.msra.gmra.mrb[130].mxu1 %vm172_vm1, %v15560_v16 }
0x17e5   :  { %11078 = vmatprep.mubr.msk.f32.mxu1 %vm12830_vm0, %v17872_v32 }
0x17e8   :  { %11079 = vmatmul.mubr.msk.f32.gmra.mrb[132].mxu1 %vm172_vm1, %v15574_v0 }
0x17e9   :  { %11081 = vmatprep.mubr.msk.f32.mxu1 %vm12830_vm0, %v17872_v32 }
0x17ec   :  { %11082 = vmatmul.mubr.msk.f32.gmra.mrb[134].mxu1 %vm172_vm1, %v15588_v39 }
0x181a   :  { %v4917_v60 = vpop.f32.mrb[106].mxu0 }
0x181b   :  { %v11052_v56 = vpop.f32.mrb[107].mxu0 }
0x181e   :  { %v4922_v2 = vpop.f32.mrb[108].mxu0 }
0x181f   :  { %v11909_v41 = vpack.c.bf16 %v4922_v2, %v4917_v60  ;;  %v11055_v40 = vpop.f32.mrb[109].mxu0  ;;  %v15720_v60 = vld [vmem:[%s17811_s7 + $0xd8] sm:$0xff] }
0x1821   :  { %11911 = vmatprep.subr.msk.bf16.mxu0 %vm13002_vm3, %v11909_v41 }
0x1822   :  { %v4927_v3 = vpop.f32.mrb[110].mxu0  ;;  %11914 = vmatpush3.bf16.xpose.msk.msra.mxu0 %vm13002_vm3, %v11909_v41  ;;  %v15727_v41 = vld [vmem:[%s17811_s7 + $0xe0] sm:$0xff] }
0x1823   :  { %v11058_v25 = vpop.f32.mrb[111].mxu0  ;;  %11088 = vmatprep.subr.msk.mxu0 %vm172_vm1, %v4927_v3 }
0x182a   :  { %11089 = vmatpush3.xpose.msk.msra.mxu0 %vm172_vm1, %v4927_v3 }
0x182b   :  { %11919 = vmatprep.subr.bf16.mxu0 %v17871_v45 }
0x18a7   :  { %v4828_v8 = vpop.f32.mrb[124].mxu1 }
0x18a8   :  { %v11027_v6 = vpop.f32.mrb[125].mxu1  ;;  %v5041_v10 = vmul.f32 %v15397_v36, %v4828_v8  ;;  %v5014_v58 = vrot.slane %v4828_v8, 6  ;;  %v5022_v31 = vrot.slane %v4828_v8, 4  ;;  %v5030_v19 = vrot.slane %v4828_v8, 2 }
0x18a9   :  { %v15735_v6 = vld [vmem:[%s17811_s7 + $0xe8] sm:$0xff] }
0x18aa   :  { %11090 = vmatprep.mubr.msk.f32.mxu0 %vm172_vm1, %v5041_v10  ;;  %v5050_v10 = vmul.f32 %v15735_v6, %v4828_v8  ;;  %v15750_v8 = vld [vmem:[%s17811_s7 + $0xf8] sm:$0xff] }
0x18ab   :  { %v4833_v14 = vpop.f32.mrb[126].mxu1 }
0x18ac   :  { %v5015_v15 = vrot.slane %v4833_v14, 6  ;;  %v5023_v38 = vrot.slane %v4833_v14, 4  ;;  %v5031_v26 = vrot.slane %v4833_v14, 2  ;;  %v5042_v35 = vmul.f32 %v15667_v28, %v4833_v14  ;;  %v11030_v12 = vpop.f32.mrb[127].mxu1 }
0x18ae   :  { %11091 = vmatmul.mubr.msk.f32.vlgmr.msra.gmra.mrb[112].mxu0 %vm172_vm1, %v5042_v35  ;;  %v5016_v36 = vsel %vm476_vm4, %v5014_v58, %v5015_v15  ;;  %v5024_v34 = vsel %vm425_vm2, %v5022_v31, %v5023_v38  ;;  %v15674_v48 = vsel %vm3633_vm8, %v5030_v19, %v5031_v26  ;;  %v15766_v35 = vld [vmem:[%s17811_s7 + $0x108] sm:$0xff] }
0x18af   :  { %v4838_v57 = vpop.f32.mrb[128].mxu1  ;;  %v5044_v53 = vmul.f32 %v15688_v50, %v5016_v36  ;;  %v5046_v47 = vmul.f32 %v15706_v27, %v5024_v34  ;;  %v5048_v56 = vmul.f32 %v15720_v60, %v15674_v48 }
0x18b0   :  { %v5017_v13 = vrot.slane %v4838_v57, 6  ;;  %v5025_v54 = vrot.slane %v4838_v57, 4  ;;  %v5033_v52 = vrot.slane %v4838_v57, 2  ;;  %v5038_v18 = vsel %vm476_vm4, %v4838_v57, %v5014_v58  ;;  %v11033_v5 = vpop.f32.mrb[129].mxu1  ;;  %v15772_v57 = vld [vmem:[%s17811_s7 + $0x110] sm:$0xff] }
0x18b1   :  { %v5043_v22 = vmul.f32 %v15680_v43, %v5038_v18 }
0x18b2   :  { %v5018_v49 = vsel %vm476_vm4, %v5015_v15, %v5017_v13  ;;  %v5026_v7 = vsel %vm425_vm2, %v5023_v38, %v5025_v54  ;;  %v5034_v42 = vsel %vm3633_vm8, %v5031_v26, %v5033_v52  ;;  %v5052_v38 = vmul.f32 %v15750_v8, %v5038_v18  ;;  %v15780_v13 = vld [vmem:[%s17811_s7 + $0x118] sm:$0xff]  ;;  %v15786_v52 = vld [vmem:[%s17811_s7 + $0x120] sm:$0xff] }
0x18b3   :  { %11093 = vmatprep.mubr.msk.f32.mxu0 %vm172_vm1, %v5043_v22  ;;  %v5039_v1 = vsel %vm425_vm2, %v5018_v49, %v5022_v31  ;;  %v5040_v11 = vsel %vm3633_vm8, %v5026_v7, %v5030_v19  ;;  %v5049_v40 = vmul.f32 %v15727_v41, %v5034_v42  ;;  %v15741_v31 = vld [vmem:[%s17811_s7 + $0xf0] sm:$0xff]  ;;  %v5057_v18 = vmul.f32 %v15786_v52, %v15674_v48  ;;  %v4736_v22 = vld [vmem:[%s17812_s8 + $0x2c0] sm:$0xff] }
0x18b4   :  { %11094 = vmatmul.mubr.msk.f32.gmra.mrb[114].mxu0 %vm172_vm1, %v5044_v53  ;;  %v5045_v33 = vmul.f32 %v15699_v55, %v5039_v1  ;;  %v5047_v30 = vmul.f32 %v15712_v62, %v5040_v11  ;;  %v5051_v19 = vmul.f32 %v15741_v31, %v4833_v14  ;;  %v15757_v14 = vld [vmem:[%s17811_s7 + $0x100] sm:$0xff]  ;;  %v5054_v12 = vmul.f32 %v15766_v35, %v5039_v1  ;;  %v4735_v48 = vld [vmem:[%s17812_s8 + $0x2b0] sm:$0xff] }
0x18b5   :  { %v5053_v26 = vmul.f32 %v15757_v14, %v5016_v36  ;;  %v5055_v36 = vmul.f32 %v15772_v57, %v5024_v34  ;;  %v5056_v54 = vmul.f32 %v15780_v13, %v5040_v11  ;;  %v15795_v34 = vld [vmem:[%s17811_s7 + $0x128] sm:$0xff]  ;;  %v4734_v49 = vld [vmem:[%s17812_s8 + $0x2a0] sm:$0xc0]  ;;  %v5079_v7 = vrot.slane %v4735_v48, 6  ;;  %v4737_v1 = vld [vmem:[%s17812_s8 + $0x2d0] sm:$0xff] }
0x18b6   :  { %11096 = vmatprep.mubr.msk.f32.mxu0 %vm172_vm1, %v5045_v33  ;;  %v5058_v5 = vmul.f32 %v15795_v34, %v5034_v42  ;;  %v5081_v53 = vrot.slane %v4736_v22, 6  ;;  %v5078_v42 = vrot.slane %v4734_v49, 6  ;;  %v4738_v11 = vld [vmem:[%s17812_s8 + $0x2e0] sm:$0xff] }
0x18b7   :  { %v4997_v9 = vpop.f32.mrb[130].mxu1 }
0x18b8   :  { %v11077_v24 = vpop.f32.mrb[131].mxu1  ;;  %11097 = vmatmul.mubr.msk.f32.gmra.mrb[116].mxu0 %vm172_vm1, %v5046_v47  ;;  %v15817_v33 = vsel %vm476_vm4, %v5079_v7, %v5081_v53  ;;  %v15820_v47 = vsel %vm476_vm4, %v5078_v42, %v5079_v7 }
0x18b9   :  { %11099 = vmatprep.mubr.msk.f32.mxu0 %vm172_vm1, %v5047_v30  ;;  %17894 = vst [vmem:[#allocation19_spill] sm:$0xff] %v15817_v33  ;;  %17895 = vst [vmem:[#allocation20_spill] sm:$0xff] %v15820_v47  ;;  %v5083_v30 = vrot.slane %v4737_v1, 6  ;;  %v5085_v24 = vrot.slane %v4738_v11, 6  ;;  %v4743_v1 = vld [vmem:[%s17812_s8 + $0x330] sm:$0xff]  ;;  %v4744_v11 = vld [vmem:[%s17812_s8 + $0x340] sm:$0xff] }
0x18bb   :  { %v5002_v2 = vpop.f32.mrb[132].mxu1 }
0x18bc   :  { %v11915_v3 = vpack.c.bf16 %v5002_v2, %v4997_v9  ;;  %v11080_v25 = vpop.f32.mrb[133].mxu1  ;;  %11100 = vmatmul.mubr.msk.f32.gmra.mrb[118].mxu0 %vm172_vm1, %v5048_v56 }
0x18bd   :  { %11102 = vmatprep.mubr.msk.f32.mxu0 %vm172_vm1, %v5049_v40  ;;  %v4739_v40 = vld [vmem:[%s17812_s8 + $0x2f0] sm:$0xff] }
0x18be   :  { %11916 = vmatprep.subr.bf16.mxu1 %v11915_v3 }
0x18bf   :  { %v5007_v58 = vpop.f32.mrb[134].mxu1  ;;  %11918 = vmatpush3.bf16.msra.mxu1 %v11915_v3  ;;  %v4740_v3 = vld [vmem:[%s17812_s8 + $0x300] sm:$0xff] }
0x18c0   :  { %v11083_v15 = vpop.f32.mrb[135].mxu1  ;;  %11121 = vmatprep.subr.msk.mxu1 %vm425_vm2, %v5007_v58  ;;  %11103 = vmatmul.mubr.msk.f32.gmra.mrb[120].mxu0 %vm172_vm1, %v5050_v10 }
0x18c1   :  { %11105 = vmatprep.mubr.msk.f32.mxu0 %vm172_vm1, %v5051_v19  ;;  %v15839_v19 = vsel %vm476_vm4, %v5083_v30, %v5085_v24  ;;  %v5087_v15 = vrot.slane %v4739_v40, 6 }
0x18c2   :  { %17896 = vst [vmem:[#allocation21_spill] sm:$0xff] %v15839_v19 }
0x18c3   :  { %11122 = vmatpush3.msk.msra.mxu1 %vm425_vm2, %v5007_v58  ;;  %v15862_v42 = vsel %vm476_vm4, %v5085_v24, %v5087_v15 }
0x18c4   :  { %11106 = vmatmul.mubr.msk.f32.gmra.mrb[122].mxu0 %vm172_vm1, %v5052_v38  ;;  %11946 = vmatprep.subr.bf16.mxu1 %v17871_v45  ;;  %v5089_v38 = vrot.slane %v4740_v3, 6  ;;  %17899 = vst [vmem:[#allocation24_spill] sm:$0xff] %v15862_v42 }
0x18c5   :  { %11108 = vmatprep.mubr.msk.f32.mxu0 %vm172_vm1, %v5053_v26  ;;  %v15842_v26 = vsel %vm476_vm4, %v5081_v53, %v5083_v30 }
0x18c6   :  { %17897 = vst [vmem:[#allocation22_spill] sm:$0xff] %v15842_v26  ;;  %v15857_v22 = vsel %vm476_vm4, %v5087_v15, %v5089_v38 }
0x18c7   :  { %17898 = vst [vmem:[#allocation23_spill] sm:$0xff] %v15857_v22 }
0x18c8   :  { %11109 = vmatmul.mubr.msk.f32.gmra.mrb[124].mxu0 %vm172_vm1, %v5054_v12  ;;  %v4741_v12 = vld [vmem:[%s17812_s8 + $0x310] sm:$0xff] }
0x18c9   :  { %11111 = vmatprep.mubr.msk.f32.mxu0 %vm172_vm1, %v5055_v36  ;;  %v4742_v36 = vld [vmem:[%s17812_s8 + $0x320] sm:$0xff]  ;;  %v5091_v49 = vrot.slane %v4741_v12, 6 }
0x18ca   :  { %v5093_v7 = vrot.slane %v4742_v36, 6  ;;  %v4745_v36 = vld [vmem:[%s17812_s8 + $0x350] sm:$0xff] }
0x18cb   :  { %v15884_v12 = vsel %vm476_vm4, %v5089_v38, %v5091_v49 }
0x18cc   :  { %11112 = vmatmul.mubr.msk.f32.gmra.mrb[126].mxu0 %vm172_vm1, %v5056_v54  ;;  %v15879_v3 = vsel %vm476_vm4, %v5091_v49, %v5093_v7  ;;  %17901 = vst [vmem:[#allocation26_spill] sm:$0xff] %v15884_v12 }
0x18cd   :  { %11114 = vmatprep.mubr.msk.f32.mxu0 %vm172_vm1, %v5057_v18  ;;  %17900 = vst [vmem:[#allocation25_spill] sm:$0xff] %v15879_v3 }
0x18d0   :  { %11115 = vmatmul.mubr.msk.f32.gmra.mrb[128].mxu0 %vm172_vm1, %v5058_v5 }
0x18d1   :  { %9552 = vmatprep.mubr.msk.f32.mxu0 %vm4403_vm10, %v15361_v37 }
0x1981   :  { %v11092_v9 = vpop.f32.mrb[112].mxu0 }
0x1982   :  { %v15823_v56 = vadd.f32 %v11092_v9, %v15817_v33  ;;  %v5262_v2 = vpop.f32.mrb[113].mxu0 }
0x1983   :  { %v15832_v25 = vadd.f32 %v5262_v2, %v15820_v47 }
0x1984   :  { %v5354_v10 = vsel %vm772_vm5, %v15823_v56, -inf }
0x1985   :  { %5355 = vmax.xlane.f32.xlu1 %v5354_v10  ;;  %v5351_v58 = vsel %vm772_vm5, %v15832_v25, -inf  ;;  %v5095_v10 = vrot.slane %v4743_v1, 6 }
0x1986   :  { %5352 = vmax.xlane.f32.xlu0 %v5351_v58  ;;  %v5097_v58 = vrot.slane %v4744_v11, 6 }
0x1987   :  { %v11095_v54 = vpop.f32.mrb[114].mxu0 }
0x1988   :  { %v15851_v18 = vadd.f32 %v11095_v54, %v15839_v19  ;;  %v5272_v5 = vpop.f32.mrb[115].mxu0  ;;  %v4746_v54 = vld [vmem:[%s17812_s8 + $0x360] sm:$0xff]  ;;  %v15901_v49 = vsel %vm476_vm4, %v5095_v10, %v5097_v58 }
0x1989   :  { %v15854_v48 = vadd.f32 %v5272_v5, %v15842_v26  ;;  %17902 = vst [vmem:[#allocation27_spill] sm:$0xff] %v15901_v49 }
0x198a   :  { %v5360_v53 = vsel %vm772_vm5, %v15851_v18, -inf }
0x198b   :  { %5361 = vmax.xlane.f32.xlu1 %v5360_v53  ;;  %v11098_v9 = vpop.f32.mrb[116].mxu0  ;;  %v5357_v30 = vsel %vm772_vm5, %v15854_v48, -inf }
0x198c   :  { %v15873_v2 = vadd.f32 %v11098_v9, %v15857_v22  ;;  %5358 = vmax.xlane.f32.xlu0 %v5357_v30  ;;  %v5282_v40 = vpop.f32.mrb[117].mxu0  ;;  %v5099_v9 = vrot.slane %v4745_v36, 6  ;;  %v5101_v30 = vrot.slane %v4746_v54, 6 }
0x198d   :  { %v15876_v24 = vadd.f32 %v5282_v40, %v15862_v42 }
0x198e   :  { %v5366_v15 = vsel %vm772_vm5, %v15873_v2, -inf  ;;  %v15928_v22 = vsel %vm476_vm4, %v5097_v58, %v5099_v9 }
0x198f   :  { %5367 = vmax.xlane.f32.xlu1 %v5366_v15  ;;  %v11101_v5 = vpop.f32.mrb[118].mxu0  ;;  %v5363_v53 = vsel %vm772_vm5, %v15876_v24, -inf  ;;  %v15906_v15 = vsel %vm476_vm4, %v5093_v7, %v5095_v10  ;;  %v15923_v10 = vsel %vm476_vm4, %v5099_v9, %v5101_v30  ;;  %17905 = vst [vmem:[#allocation30_spill] sm:$0xff] %v15928_v22 }
0x1990   :  { %v15895_v1 = vadd.f32 %v11101_v5, %v15879_v3  ;;  %v5292_v11 = vpop.f32.mrb[119].mxu0  ;;  %5364 = vmax.xlane.f32.xlu0 %v5363_v53  ;;  %17903 = vst [vmem:[#allocation28_spill] sm:$0xff] %v15906_v15  ;;  %v4747_v5 = vld [vmem:[%s17812_s8 + $0x370] sm:$0xff]  ;;  %v4748_v53 = vld [vmem:[%s17812_s8 + $0x380] sm:$0xff]  ;;  %17904 = vst [vmem:[#allocation29_spill] sm:$0xff] %v15923_v10 }
0x1991   :  { %v15898_v38 = vadd.f32 %v5292_v11, %v15884_v12  ;;  %v5103_v3 = vrot.slane %v4747_v5, 6  ;;  %v5105_v42 = vrot.slane %v4748_v53, 6 }
0x1992   :  { %v5372_v40 = vsel %vm772_vm5, %v15895_v1, -inf }
0x1993   :  { %5373 = vmax.xlane.f32.xlu1 %v5372_v40  ;;  %v11104_v11 = vpop.f32.mrb[120].mxu0  ;;  %v5369_v36 = vsel %vm772_vm5, %v15898_v38, -inf  ;;  %v15945_v9 = vsel %vm476_vm4, %v5103_v3, %v5105_v42  ;;  %v15950_v19 = vsel %vm476_vm4, %v5101_v30, %v5103_v3 }
0x1994   :  { %v15917_v54 = vadd.f32 %v11104_v11, %v15901_v49  ;;  %v5302_v12 = vpop.f32.mrb[121].mxu0  ;;  %5370 = vmax.xlane.f32.xlu0 %v5369_v36  ;;  %v4749_v11 = vld [vmem:[%s17812_s8 + $0x390] sm:$0xff]  ;;  %17906 = vst [vmem:[#allocation31_spill] sm:$0xff] %v15945_v9  ;;  %17907 = vst [vmem:[#allocation32_spill] sm:$0xff] %v15950_v19 }
0x1995   :  { %v15920_v7 = vadd.f32 %v5302_v12, %v15906_v15  ;;  %v4750_v12 = vld [vmem:[%s17812_s8 + $0x3a0] sm:$0xff]  ;;  %v5107_v49 = vrot.slane %v4749_v11, 6 }
0x1996   :  { %v5378_v40 = vsel %vm772_vm5, %v15917_v54, -inf  ;;  %v5109_v26 = vrot.slane %v4750_v12, 6 }
0x1997   :  { %5379 = vmax.xlane.f32.xlu1 %v5378_v40  ;;  %v11107_v36 = vpop.f32.mrb[122].mxu0  ;;  %v5375_v5 = vsel %vm772_vm5, %v15920_v7, -inf  ;;  %v15972_v33 = vsel %vm476_vm4, %v5105_v42, %v5107_v49 }
0x1998   :  { %v15939_v53 = vadd.f32 %v11107_v36, %v15923_v10  ;;  %v5312_v15 = vpop.f32.mrb[123].mxu0  ;;  %5376 = vmax.xlane.f32.xlu0 %v5375_v5  ;;  %v4751_v36 = vld [vmem:[%s17812_s8 + $0x3b0] sm:$0xff]  ;;  %v15967_v30 = vsel %vm476_vm4, %v5107_v49, %v5109_v26  ;;  %17909 = vst [vmem:[#allocation34_spill] sm:$0xff] %v15972_v33 }
0x1999   :  { %v15942_v58 = vadd.f32 %v5312_v15, %v15928_v22  ;;  %v4752_v15 = vld [vmem:[%s17812_s8 + $0x3c0] sm:$0x3f]  ;;  %17908 = vst [vmem:[#allocation33_spill] sm:$0xff] %v15967_v30  ;;  %v5111_v10 = vrot.slane %v4751_v36, 6 }
0x199a   :  { %v5384_v40 = vsel %vm772_vm5, %v15939_v53, -inf  ;;  %v5113_v47 = vrot.slane %v4752_v15, 6 }
0x199b   :  { %5385 = vmax.xlane.f32.xlu1 %v5384_v40  ;;  %v11110_v5 = vpop.f32.mrb[124].mxu0  ;;  %v5381_v11 = vsel %vm772_vm5, %v15942_v58, -inf  ;;  %v15988_v49 = vsel %vm476_vm4, %v5109_v26, %v5111_v10 }
0x199c   :  { %v15961_v12 = vadd.f32 %v11110_v5, %v15945_v9  ;;  %v5322_v22 = vpop.f32.mrb[125].mxu0  ;;  %5382 = vmax.xlane.f32.xlu0 %v5381_v11  ;;  %v15983_v36 = vsel %vm476_vm4, %v5111_v10, %v5113_v47  ;;  %17911 = vst [vmem:[#allocation36_spill] sm:$0xff] %v15988_v49 }
0x199d   :  { %v15964_v3 = vadd.f32 %v5322_v22, %v15950_v19  ;;  %17910 = vst [vmem:[#allocation35_spill] sm:$0xff] %v15983_v36 }
0x199e   :  { %v5390_v40 = vsel %vm772_vm5, %v15961_v12, -inf }
0x199f   :  { %5391 = vmax.xlane.f32.xlu1 %v5390_v40  ;;  %v11113_v39 = vpop.f32.mrb[126].mxu0  ;;  %v5387_v5 = vsel %vm772_vm5, %v15964_v3, -inf }
0x19a0   :  { %v15977_v11 = vadd.f32 %v11113_v39, %v15967_v30  ;;  %v5332_v22 = vpop.f32.mrb[127].mxu0  ;;  %5388 = vmax.xlane.f32.xlu0 %v5387_v5 }
0x19a1   :  { %v15980_v19 = vadd.f32 %v5332_v22, %v15972_v33 }
0x19a2   :  { %v5396_v42 = vsel %vm772_vm5, %v15977_v11, -inf }
0x19a3   :  { %5397 = vmax.xlane.f32.xlu1 %v5396_v42  ;;  %v11116_v15 = vpop.f32.mrb[128].mxu0  ;;  %v5393_v39 = vsel %vm772_vm5, %v15980_v19, -inf }
0x19a4   :  { %v15993_v40 = vadd.f32 %v11116_v15, %v15983_v36  ;;  %v5342_v5 = vpop.f32.mrb[129].mxu0  ;;  %5394 = vmax.xlane.f32.xlu0 %v5393_v39 }
0x19a5   :  { %v15996_v22 = vadd.f32 %v5342_v5, %v15988_v49 }
0x19a6   :  { %v5402_v47 = vsel %vm772_vm5, %v15993_v40, -inf }
0x19a7   :  { %5403 = vmax.xlane.f32.xlu1 %v5402_v47  ;;  %v5399_v26 = vsel %vm772_vm5, %v15996_v22, -inf }
0x19a8   :  { %5400 = vmax.xlane.f32.xlu0 %v5399_v26 }
0x1a12   :  { %v5356_v10 = vpop.xlane.xlu1 %5355 }
0x1a13   :  { %v5406_v42 = vsub.f32 %v15823_v56, %v5356_v10  ;;  %v5353_v33 = vpop.xlane.xlu0 %5352 }
0x1a14   :  { %v5405_v15 = vsub.f32 %v15832_v25, %v5353_v33 }
0x1a15   :  { %v5425_v36 = vmul.f32 1.442695, %v5406_v42 }
0x1a16   :  { %v5423_v30 = vmul.f32 1.442695, %v5405_v15 }
0x1a17   :  { %12492 = vpow2.f32 %v5425_v36 }
0x1a18   :  { %12494 = vpow2.f32 %v5423_v30  ;;  %v5362_v39 = vpop.xlane.xlu1 %5361 }
0x1a19   :  { %v5408_v5 = vsub.f32 %v15851_v18, %v5362_v39  ;;  %v5359_v49 = vpop.xlane.xlu0 %5358 }
0x1a1a   :  { %v5407_v47 = vsub.f32 %v15854_v48, %v5359_v49 }
0x1a1b   :  { %v5429_v9 = vmul.f32 1.442695, %v5408_v5 }
0x1a1c   :  { %v5427_v0 = vmul.f32 1.442695, %v5407_v47  ;;  %v5368_v16 = vpop.xlane.xlu1 %5367 }
0x1a1d   :  { %12496 = vpow2.f32 %v5429_v9  ;;  %v5410_v26 = vsub.f32 %v15873_v2, %v5368_v16  ;;  %v5365_v56 = vpop.xlane.xlu0 %5364 }
0x1a1e   :  { %12498 = vpow2.f32 %v5427_v0  ;;  %v5409_v33 = vsub.f32 %v15876_v24, %v5365_v56 }
0x1a1f   :  { %v5433_v25 = vmul.f32 1.442695, %v5410_v26 }
0x1a20   :  { %v5431_v10 = vmul.f32 1.442695, %v5409_v33  ;;  %v5374_v36 = vpop.xlane.xlu1 %5373 }
0x1a21   :  { %v16008_v30 = vpop.eup %12492  ;;  %12500 = vpow2.f32 %v5433_v25  ;;  %v5412_v18 = vsub.f32 %v15895_v1, %v5374_v36  ;;  %v5371_v42 = vpop.xlane.xlu0 %5370 }
0x1a22   :  { %v16011_v48 = vpop.eup %12494  ;;  %12502 = vpow2.f32 %v5431_v10  ;;  %v5411_v9 = vsub.f32 %v15898_v38, %v5371_v42  ;;  %v5462_v16 = vsel %vm772_vm5, %v16008_v30, 0.0 }
0x1a23   :  { %v5437_v0 = vmul.f32 1.442695, %v5412_v18  ;;  %5463 = vadd.xlane.f32.xlu1 %v5462_v16  ;;  %v5459_v2 = vsel %vm772_vm5, %v16011_v48, 0.0 }
0x1a24   :  { %v5435_v24 = vmul.f32 1.442695, %v5411_v9  ;;  %v5380_v49 = vpop.xlane.xlu1 %5379  ;;  %5460 = vadd.xlane.f32.xlu0 %v5459_v2 }
0x1a25   :  { %12504 = vpow2.f32 %v5437_v0  ;;  %v5414_v1 = vsub.f32 %v15917_v54, %v5380_v49  ;;  %v5377_v15 = vpop.xlane.xlu0 %5376 }
0x1a26   :  { %12506 = vpow2.f32 %v5435_v24  ;;  %v5413_v39 = vsub.f32 %v15920_v7, %v5377_v15 }
0x1a27   :  { %v16020_v5 = vpop.eup %12496  ;;  %v5441_v38 = vmul.f32 1.442695, %v5414_v1 }
0x1a28   :  { %v16022_v47 = vpop.eup %12498  ;;  %v5439_v26 = vmul.f32 1.442695, %v5413_v39  ;;  %v5386_v56 = vpop.xlane.xlu1 %5385  ;;  %v5468_v33 = vsel %vm772_vm5, %v16020_v5, 0.0 }
0x1a29   :  { %12508 = vpow2.f32 %v5441_v38  ;;  %v5416_v25 = vsub.f32 %v15939_v53, %v5386_v56  ;;  %5469 = vadd.xlane.f32.xlu1 %v5468_v33  ;;  %v5383_v10 = vpop.xlane.xlu0 %5382  ;;  %v5465_v54 = vsel %vm772_vm5, %v16022_v47, 0.0 }
0x1a2a   :  { %12510 = vpow2.f32 %v5439_v26  ;;  %v5415_v7 = vsub.f32 %v15942_v58, %v5383_v10  ;;  %5466 = vadd.xlane.f32.xlu0 %v5465_v54 }
0x1a2b   :  { %v16030_v36 = vpop.eup %12500  ;;  %v5445_v18 = vmul.f32 1.442695, %v5416_v25 }
0x1a2c   :  { %v16032_v42 = vpop.eup %12502  ;;  %v5443_v9 = vmul.f32 1.442695, %v5415_v7  ;;  %v5392_v16 = vpop.xlane.xlu1 %5391  ;;  %v5474_v0 = vsel %vm772_vm5, %v16030_v36, 0.0 }
0x1a2d   :  { %12512 = vpow2.f32 %v5445_v18  ;;  %v5418_v53 = vsub.f32 %v15961_v12, %v5392_v16  ;;  %5475 = vadd.xlane.f32.xlu1 %v5474_v0  ;;  %v5389_v2 = vpop.xlane.xlu0 %5388  ;;  %v5471_v24 = vsel %vm772_vm5, %v16032_v42, 0.0 }
0x1a2e   :  { %12514 = vpow2.f32 %v5443_v9  ;;  %v5417_v58 = vsub.f32 %v15964_v3, %v5389_v2  ;;  %5472 = vadd.xlane.f32.xlu0 %v5471_v24 }
0x1a2f   :  { %v16040_v49 = vpop.eup %12504  ;;  %v5449_v1 = vmul.f32 1.442695, %v5418_v53 }
0x1a30   :  { %v16042_v15 = vpop.eup %12506  ;;  %v5447_v39 = vmul.f32 1.442695, %v5417_v58  ;;  %v5398_v38 = vpop.xlane.xlu1 %5397  ;;  %v5480_v26 = vsel %vm772_vm5, %v16040_v49, 0.0 }
0x1a31   :  { %12516 = vpow2.f32 %v5449_v1  ;;  %v5420_v12 = vsub.f32 %v15977_v11, %v5398_v38  ;;  %5481 = vadd.xlane.f32.xlu1 %v5480_v26  ;;  %v5395_v56 = vpop.xlane.xlu0 %5394  ;;  %v5477_v33 = vsel %vm772_vm5, %v16042_v15, 0.0 }
0x1a32   :  { %12518 = vpow2.f32 %v5447_v39  ;;  %v5419_v3 = vsub.f32 %v15980_v19, %v5395_v56  ;;  %5478 = vadd.xlane.f32.xlu0 %v5477_v33 }
0x1a33   :  { %v16050_v25 = vpop.eup %12508  ;;  %v5453_v10 = vmul.f32 1.442695, %v5420_v12 }
0x1a34   :  { %v16052_v54 = vpop.eup %12510  ;;  %v5451_v7 = vmul.f32 1.442695, %v5419_v3  ;;  %v5404_v18 = vpop.xlane.xlu1 %5403  ;;  %v5486_v9 = vsel %vm772_vm5, %v16050_v25, 0.0 }
0x1a35   :  { %12520 = vpow2.f32 %v5453_v10  ;;  %v5422_v11 = vsub.f32 %v15993_v40, %v5404_v18  ;;  %5487 = vadd.xlane.f32.xlu1 %v5486_v9  ;;  %v5401_v16 = vpop.xlane.xlu0 %5400  ;;  %v5483_v0 = vsel %vm772_vm5, %v16052_v54, 0.0 }
0x1a36   :  { %12522 = vpow2.f32 %v5451_v7  ;;  %v5421_v19 = vsub.f32 %v15996_v22, %v5401_v16  ;;  %5484 = vadd.xlane.f32.xlu0 %v5483_v0 }
0x1a37   :  { %v16060_v53 = vpop.eup %12512  ;;  %v5457_v2 = vmul.f32 1.442695, %v5422_v11 }
0x1a38   :  { %v16062_v24 = vpop.eup %12514  ;;  %v5455_v58 = vmul.f32 1.442695, %v5421_v19  ;;  %v5492_v1 = vsel %vm772_vm5, %v16060_v53, 0.0 }
0x1a39   :  { %12524 = vpow2.f32 %v5457_v2  ;;  %5493 = vadd.xlane.f32.xlu1 %v5492_v1  ;;  %v5489_v40 = vsel %vm772_vm5, %v16062_v24, 0.0 }
0x1a3a   :  { %12526 = vpow2.f32 %v5455_v58  ;;  %5490 = vadd.xlane.f32.xlu0 %v5489_v40 }
0x1a3b   :  { %v16068_v39 = vpop.eup %12516 }
0x1a3c   :  { %v16070_v22 = vpop.eup %12518  ;;  %v5498_v38 = vsel %vm772_vm5, %v16068_v39, 0.0 }
0x1a3d   :  { %5499 = vadd.xlane.f32.xlu1 %v5498_v38  ;;  %v5495_v26 = vsel %vm772_vm5, %v16070_v22, 0.0 }
0x1a3e   :  { %5496 = vadd.xlane.f32.xlu0 %v5495_v26 }
0x1a3f   :  { %v16076_v12 = vpop.eup %12520 }
0x1a40   :  { %v16078_v56 = vpop.eup %12522  ;;  %v5504_v33 = vsel %vm772_vm5, %v16076_v12, 0.0 }
0x1a41   :  { %5505 = vadd.xlane.f32.xlu1 %v5504_v33  ;;  %v5501_v3 = vsel %vm772_vm5, %v16078_v56, 0.0 }
0x1a42   :  { %5502 = vadd.xlane.f32.xlu0 %v5501_v3 }
0x1a43   :  { %v16084_v10 = vpop.eup %12524 }
0x1a44   :  { %v16086_v7 = vpop.eup %12526  ;;  %v5510_v18 = vsel %vm772_vm5, %v16084_v10, 0.0 }
0x1a45   :  { %5511 = vadd.xlane.f32.xlu1 %v5510_v18  ;;  %v5507_v9 = vsel %vm772_vm5, %v16086_v7, 0.0 }
0x1a46   :  { %5508 = vadd.xlane.f32.xlu0 %v5507_v9 }
0x1ab0   :  { %v5464_v11 = vpop.xlane.xlu1 %5463 }
0x1ab1   :  { %12528 = vrcp.f32 %v5464_v11  ;;  %v5461_v16 = vpop.xlane.xlu0 %5460 }
0x1ab2   :  { %12530 = vrcp.f32 %v5461_v16 }
0x1ab6   :  { %v5470_v0 = vpop.xlane.xlu1 %5469 }
0x1ab7   :  { %12532 = vrcp.f32 %v5470_v0  ;;  %v5467_v19 = vpop.xlane.xlu0 %5466 }
0x1ab8   :  { %12534 = vrcp.f32 %v5467_v19 }
0x1aba   :  { %v5476_v2 = vpop.xlane.xlu1 %5475 }
0x1abb   :  { %v12529_v58 = vpop.eup %12528  ;;  %12536 = vrcp.f32 %v5476_v2  ;;  %v5473_v1 = vpop.xlane.xlu0 %5472 }
0x1abc   :  { %v12531_v40 = vpop.eup %12530  ;;  %12538 = vrcp.f32 %v5473_v1  ;;  %v5532_v26 = vmul.f32 %v12529_v58, %v16008_v30 }
0x1abd   :  { %v5531_v38 = vmul.f32 %v12531_v40, %v16011_v48 }
0x1abe   :  { %v5482_v33 = vpop.xlane.xlu1 %5481 }
0x1abf   :  { %12540 = vrcp.f32 %v5482_v33  ;;  %11123 = vmatprep.mubr.msk.f32.mxu1 %vm772_vm5, %v5531_v38  ;;  %v5479_v3 = vpop.xlane.xlu0 %5478 }
0x1ac0   :  { %12542 = vrcp.f32 %v5479_v3  ;;  %11124 = vmatmul.mubr.msk.f32.vlgmr.msra.gmra.mrb[136].mxu1 %vm772_vm5, %v5532_v26 }
0x1ac1   :  { %v12533_v18 = vpop.eup %12532 }
0x1ac2   :  { %v12535_v9 = vpop.eup %12534  ;;  %v5488_v11 = vpop.xlane.xlu1 %5487  ;;  %v5534_v48 = vmul.f32 %v12533_v18, %v16020_v5 }
0x1ac3   :  { %12544 = vrcp.f32 %v5488_v11  ;;  %v5485_v16 = vpop.xlane.xlu0 %5484  ;;  %v5533_v0 = vmul.f32 %v12535_v9, %v16022_v47 }
0x1ac4   :  { %12546 = vrcp.f32 %v5485_v16 }
0x1ac5   :  { %v12537_v19 = vpop.eup %12536  ;;  %11126 = vmatprep.mubr.msk.f32.mxu1 %vm772_vm5, %v5533_v0 }
0x1ac6   :  { %v12539_v30 = vpop.eup %12538  ;;  %v5494_v2 = vpop.xlane.xlu1 %5493  ;;  %11127 = vmatmul.mubr.msk.f32.gmra.mrb[138].mxu1 %vm772_vm5, %v5534_v48  ;;  %v5536_v40 = vmul.f32 %v12537_v19, %v16030_v36 }
0x1ac7   :  { %12548 = vrcp.f32 %v5494_v2  ;;  %v5491_v58 = vpop.xlane.xlu0 %5490  ;;  %v5535_v1 = vmul.f32 %v12539_v30, %v16032_v42 }
0x1ac8   :  { %12550 = vrcp.f32 %v5491_v58 }
0x1ac9   :  { %v12541_v38 = vpop.eup %12540  ;;  %11129 = vmatprep.mubr.msk.f32.mxu1 %vm772_vm5, %v5535_v1 }
0x1aca   :  { %v12543_v47 = vpop.eup %12542  ;;  %v5500_v26 = vpop.xlane.xlu1 %5499  ;;  %11130 = vmatmul.mubr.msk.f32.gmra.mrb[140].mxu1 %vm772_vm5, %v5536_v40  ;;  %v5538_v3 = vmul.f32 %v12541_v38, %v16040_v49 }
0x1acb   :  { %12552 = vrcp.f32 %v5500_v26  ;;  %v5497_v5 = vpop.xlane.xlu0 %5496  ;;  %v5537_v33 = vmul.f32 %v12543_v47, %v16042_v15  ;;  %v9498_v26 = vld [vmem:[%s17809_s2 + $0x4d8] sm:$0xff] }
0x1acc   :  { %12554 = vrcp.f32 %v5497_v5 }
0x1acd   :  { %v12545_v18 = vpop.eup %12544  ;;  %11132 = vmatprep.mubr.msk.f32.mxu1 %vm772_vm5, %v5537_v33  ;;  %v9499_v33 = vld [vmem:[%s17809_s2 + $0x4e0] sm:$0xff] }
0x1ace   :  { %v12547_v42 = vpop.eup %12546  ;;  %v5506_v9 = vpop.xlane.xlu1 %5505  ;;  %11133 = vmatmul.mubr.msk.f32.gmra.mrb[142].mxu1 %vm772_vm5, %v5538_v3  ;;  %v5540_v16 = vmul.f32 %v12545_v18, %v16050_v25  ;;  %v9500_v3 = vld [vmem:[%s17809_s2 + $0x4e8] sm:$0xff] }
0x1acf   :  { %12556 = vrcp.f32 %v5506_v9  ;;  %v5503_v36 = vpop.xlane.xlu0 %5502  ;;  %v5539_v11 = vmul.f32 %v12547_v42, %v16052_v54  ;;  %v11953_v18 = vpack.c.bf16 %v9500_v3, %v9499_v33  ;;  %v9501_v42 = vld [vmem:[%s17809_s2 + $0x4f0] sm:$0xff]  ;;  %v9502_v9 = vld [vmem:[%s17809_s2 + $0x4f8] sm:$0xff] }
0x1ad0   :  { %12558 = vrcp.f32 %v5503_v36  ;;  %v11956_v36 = vpack.c.bf16 %v9502_v9, %v9501_v42 }
0x1ad1   :  { %v12549_v0 = vpop.eup %12548  ;;  %11135 = vmatprep.mubr.msk.f32.mxu1 %vm772_vm5, %v5539_v11 }
0x1ad2   :  { %v12551_v15 = vpop.eup %12550  ;;  %v5512_v48 = vpop.xlane.xlu1 %5511  ;;  %11136 = vmatmul.mubr.msk.f32.gmra.mrb[144].mxu1 %vm772_vm5, %v5540_v16  ;;  %v5542_v30 = vmul.f32 %v12549_v0, %v16060_v53 }
0x1ad3   :  { %12560 = vrcp.f32 %v5512_v48  ;;  %v5509_v49 = vpop.xlane.xlu0 %5508  ;;  %v5541_v19 = vmul.f32 %v12551_v15, %v16062_v24  ;;  %v16161_v15 = vld [vmem:[%s17811_s7 + $0xa0] sm:$0xff] }
0x1ad4   :  { %12562 = vrcp.f32 %v5509_v49 }
0x1ad5   :  { %v12553_v2 = vpop.eup %12552  ;;  %11138 = vmatprep.mubr.msk.f32.mxu1 %vm772_vm5, %v5541_v19 }
0x1ad6   :  { %v12555_v54 = vpop.eup %12554  ;;  %11139 = vmatmul.mubr.msk.f32.gmra.mrb[146].mxu1 %vm772_vm5, %v5542_v30  ;;  %v5544_v58 = vmul.f32 %v12553_v2, %v16068_v39 }
0x1ad7   :  { %v5543_v25 = vmul.f32 %v12555_v54, %v16070_v22 }
0x1ad9   :  { %v12557_v1 = vpop.eup %12556  ;;  %11141 = vmatprep.mubr.msk.f32.mxu1 %vm772_vm5, %v5543_v25 }
0x1ada   :  { %v12559_v40 = vpop.eup %12558  ;;  %11142 = vmatmul.mubr.msk.f32.gmra.mrb[148].mxu1 %vm772_vm5, %v5544_v58  ;;  %v5546_v53 = vmul.f32 %v12557_v1, %v16076_v12  ;;  %v9495_v12 = vld [vmem:[%s17809_s2 + $0x4c0] sm:$0xff] }
0x1adb   :  { %v5545_v24 = vmul.f32 %v12559_v40, %v16078_v56  ;;  %v9496_v56 = vld [vmem:[%s17809_s2 + $0x4c8] sm:$0xff] }
0x1add   :  { %v12561_v38 = vpop.eup %12560  ;;  %11144 = vmatprep.mubr.msk.f32.mxu1 %vm772_vm5, %v5545_v24 }
0x1ade   :  { %v12563_v47 = vpop.eup %12562  ;;  %11145 = vmatmul.mubr.msk.f32.gmra.mrb[150].mxu1 %vm772_vm5, %v5546_v53  ;;  %v5548_v39 = vmul.f32 %v12561_v38, %v16084_v10  ;;  %v11947_v10 = vpack.c.bf16 %v9496_v56, %v9495_v12 }
0x1adf   :  { %v5547_v22 = vmul.f32 %v12563_v47, %v16086_v7  ;;  %v9497_v7 = vld [vmem:[%s17809_s2 + $0x4d0] sm:$0xff] }
0x1ae0   :  { %11948 = vmatpush3.bf16.msra.mxu1 %v11947_v10  ;;  %v11950_v5 = vpack.c.bf16 %v9498_v26, %v9497_v7 }
0x1ae1   :  { %11147 = vmatprep.mubr.msk.f32.mxu1 %vm772_vm5, %v5547_v22  ;;  %11949 = vmatprep.subr.bf16.mxu1 %v17871_v45 }
0x1ae2   :  { %11148 = vmatmul.mubr.msk.f32.gmra.mrb[152].mxu1 %vm772_vm5, %v5548_v39 }
0x1ae3   :  { %11166 = vmatprep.mubr.msk.f32.mxu1 %vm12830_vm0, %v17872_v32 }
0x1ae4   :  { %11951 = vmatpush3.bf16.msra.mxu1 %v11950_v5 }
0x1ae5   :  { %11952 = vmatprep.subr.bf16.mxu1 %v17871_v45 }
0x1ae8   :  { %11954 = vmatpush3.bf16.msra.mxu1 %v11953_v18 }
0x1ae9   :  { %11955 = vmatprep.subr.bf16.mxu1 %v17871_v45 }
0x1aec   :  { %11957 = vmatpush3.bf16.msra.mxu1 %v11956_v36 }
0x1b93   :  { %v11125_v11 = vpop.f32.mrb[136].mxu1 }
0x1b94   :  { %v5762_v16 = vmul.f32 %v15667_v28, %v11125_v11  ;;  %v5672_v0 = vpop.f32.mrb[137].mxu1 }
0x1b95   :  { %v5761_v48 = vmul.f32 %v16161_v15, %v5672_v0 }
0x1b97   :  { %v11920_v49 = vpack.c.bf16 %v5762_v16, %v5761_v48  ;;  %v9555_v48 = vld [vmem:[%s17813_s5 + $0x12] ss:$0 sm:$0xff] }
0x1b99   :  { %v11128_v19 = vpop.f32.mrb[138].mxu1  ;;  %11921 = vmatpush1.bf16.msra.mxu0 %v11920_v49 }
0x1b9a   :  { %v5764_v30 = vmul.f32 %v15688_v50, %v11128_v19  ;;  %v5682_v2 = vpop.f32.mrb[139].mxu1  ;;  %11922 = vmatprep.subr.bf16.mxu0 %v17871_v45 }
0x1b9b   :  { %v5763_v54 = vmul.f32 %v15680_v43, %v5682_v2 }
0x1b9d   :  { %v11923_v25 = vpack.c.bf16 %v5764_v30, %v5763_v54  ;;  %v11131_v28 = vpop.f32.mrb[140].mxu1 }
0x1b9e   :  { %v5766_v58 = vmul.f32 %v15706_v27, %v11131_v28  ;;  %v5692_v1 = vpop.f32.mrb[141].mxu1 }
0x1b9f   :  { %v5765_v40 = vmul.f32 %v15699_v55, %v5692_v1  ;;  %11924 = vmatpush1.bf16.msra.mxu0 %v11923_v25 }
0x1ba0   :  { %11925 = vmatprep.subr.bf16.mxu0 %v17871_v45 }
0x1ba1   :  { %v11926_v24 = vpack.c.bf16 %v5766_v58, %v5765_v40  ;;  %v11134_v53 = vpop.f32.mrb[142].mxu1 }
0x1ba2   :  { %v5768_v38 = vmul.f32 %v15720_v60, %v11134_v53  ;;  %v5702_v50 = vpop.f32.mrb[143].mxu1 }
0x1ba3   :  { %v5767_v47 = vmul.f32 %v15712_v62, %v5702_v50  ;;  %11927 = vmatpush1.bf16.msra.mxu0 %v11926_v24 }
0x1ba4   :  { %11928 = vmatprep.subr.bf16.mxu0 %v17871_v45 }
0x1ba5   :  { %v11929_v43 = vpack.c.bf16 %v5768_v38, %v5767_v47  ;;  %v11137_v22 = vpop.f32.mrb[144].mxu1 }
0x1ba6   :  { %v5770_v27 = vmul.f32 %v15735_v6, %v11137_v22  ;;  %v5712_v39 = vpop.f32.mrb[145].mxu1 }
0x1ba7   :  { %v5769_v55 = vmul.f32 %v15727_v41, %v5712_v39  ;;  %11930 = vmatpush1.bf16.msra.mxu0 %v11929_v43 }
0x1ba8   :  { %11931 = vmatprep.subr.bf16.mxu0 %v17871_v45 }
0x1ba9   :  { %v11932_v12 = vpack.c.bf16 %v5770_v27, %v5769_v55  ;;  %v11140_v56 = vpop.f32.mrb[146].mxu1 }
0x1baa   :  { %v5772_v60 = vmul.f32 %v15750_v8, %v11140_v56  ;;  %v5722_v7 = vpop.f32.mrb[147].mxu1 }
0x1bab   :  { %v5771_v62 = vmul.f32 %v15741_v31, %v5722_v7  ;;  %11933 = vmatpush1.bf16.msra.mxu0 %v11932_v12 }
0x1bac   :  { %11934 = vmatprep.subr.bf16.mxu0 %v17871_v45 }
0x1bad   :  { %v11935_v10 = vpack.c.bf16 %v5772_v60, %v5771_v62  ;;  %v11143_v26 = vpop.f32.mrb[148].mxu1 }
0x1bae   :  { %v5774_v6 = vmul.f32 %v15766_v35, %v11143_v26  ;;  %v5732_v5 = vpop.f32.mrb[149].mxu1 }
0x1baf   :  { %v5773_v41 = vmul.f32 %v15757_v14, %v5732_v5  ;;  %11936 = vmatpush1.bf16.msra.mxu0 %v11935_v10  ;;  %v9425_v5 = vld [vmem:[%s17814_s3 + $0x118] sm:$0xff] }
0x1bb0   :  { %11937 = vmatprep.subr.bf16.mxu0 %v17871_v45 }
0x1bb1   :  { %v11938_v33 = vpack.c.bf16 %v5774_v6, %v5773_v41  ;;  %v11146_v3 = vpop.f32.mrb[150].mxu1  ;;  %v9423_v6 = vld [vmem:[%s17814_s3 + $0x108] sm:$0xff] }
0x1bb2   :  { %v5776_v8 = vmul.f32 %v15780_v13, %v11146_v3  ;;  %v5742_v18 = vpop.f32.mrb[151].mxu1  ;;  %v11958_v41 = vpack.c.bf16 %v9425_v5, %v9423_v6  ;;  %v9424_v3 = vld [vmem:[%s17814_s3 + $0x110] sm:$0xff]  ;;  %v9445_v5 = vld [vmem:[%s17815_s4 + $0x238] sm:$0xff] }
0x1bb3   :  { %v5775_v31 = vmul.f32 %v15772_v57, %v5742_v18  ;;  %11939 = vmatpush1.bf16.msra.mxu0 %v11938_v33  ;;  %v9422_v33 = vld [vmem:[%s17814_s3 + $0x100] sm:$0xff]  ;;  %v9427_v18 = vld [vmem:[%s17814_s3 + $0x128] sm:$0xff]  ;;  %v9444_v6 = vld [vmem:[%s17815_s4 + $0x230] sm:$0xff] }
0x1bb4   :  { %11940 = vmatprep.subr.bf16.mxu0 %v17871_v45 }
0x1bb5   :  { %v11941_v42 = vpack.c.bf16 %v5776_v8, %v5775_v31  ;;  %v11149_v9 = vpop.f32.mrb[152].mxu1  ;;  %v11960_v8 = vpack.c.bf16 %v9424_v3, %v9422_v33  ;;  %v9429_v31 = vld [vmem:[%s17814_s3 + $0x138] sm:$0xff]  ;;  %v9463_v33 = vld [vmem:[%s17815_s4 + $0x2c8] sm:$0xff]  ;;  %v11988_v3 = vpack.c.bf16 %v9445_v5, %v9444_v6 }
0x1bb6   :  { %v5778_v35 = vmul.f32 %v15795_v34, %v11149_v9  ;;  %v5752_v36 = vpop.f32.mrb[153].mxu1  ;;  %v9426_v9 = vld [vmem:[%s17814_s3 + $0x120] sm:$0xff]  ;;  %v9453_v6 = vld [vmem:[%s17815_s4 + $0x278] sm:$0xff] }
0x1bb7   :  { %v5777_v14 = vmul.f32 %v15786_v52, %v5752_v36  ;;  %11942 = vmatpush1.bf16.msra.mxu0 %v11941_v42  ;;  %v11962_v42 = vpack.c.bf16 %v9429_v31, %v9427_v18  ;;  %v9446_v18 = vld [vmem:[%s17815_s4 + $0x240] sm:$0xff]  ;;  %v9447_v31 = vld [vmem:[%s17815_s4 + $0x248] sm:$0xff] }
0x1bb8   :  { %11943 = vmatprep.subr.bf16.mxu0 %v17871_v45 }
0x1bb9   :  { %v11944_v11 = vpack.c.bf16 %v5778_v35, %v5777_v14  ;;  %v9428_v35 = vld [vmem:[%s17814_s3 + $0x130] sm:$0xff]  ;;  %v9431_v14 = vld [vmem:[%s17814_s3 + $0x148] sm:$0xff] }
0x1bba   :  { %v11964_v36 = vpack.c.bf16 %v9428_v35, %v9426_v9  ;;  %v9465_v9 = vld [vmem:[%s17815_s4 + $0x2d8] sm:$0xff]  ;;  %v11992_v35 = vpack.c.bf16 %v9447_v31, %v9446_v18 }
0x1bbb   :  { %11945 = vmatpush1.bf16.msra.mxu0 %v11944_v11  ;;  %v9433_v11 = vld [vmem:[%s17814_s3 + $0x158] sm:$0xff] }
0x1bbc   :  { %11959 = vmatprep.subr.bf16.mxu0 %v11958_v41  ;;  %v9462_v41 = vld [vmem:[%s17815_s4 + $0x2c0] sm:$0xff] }
0x1bbe   :  { %5844 = vmatmul.mubr.f32.vlgmr.msra.gmra.mrb[130].mxu0 %v15439_v59 }
0x1bbf   :  { %9553 = vmatprep.mubr.msk.f32.mxu0 %vm4403_vm10, %v15447_v29  ;;  %11961 = vmatpush1.bf16.msra.mxu0 %v11960_v8  ;;  %v11990_v8 = vpack.c.bf16 %v9463_v33, %v9462_v41  ;;  %v9470_v41 = vld [vmem:[%s17816_s6 + $0x2] ss:$4 sm:$0x3] }
0x1bc0   :  { %11963 = vmatprep.subr.bf16.mxu0 %v11962_v42  ;;  %v9464_v42 = vld [vmem:[%s17815_s4 + $0x2d0] sm:$0xff]  ;;  %v6009_v33 = vrot.slane %v9470_v41, %v13864_v21 }
0x1bc2   :  { %5849 = vmatmul.mubr.f32.gmra.mrb[132].mxu0 %v15455_v51 }
0x1bc3   :  { %9554 = vmatprep.mubr.msk.f32.mxu0 %vm4403_vm10, %v15433_v4  ;;  %11965 = vmatpush1.bf16.msra.mxu0 %v11964_v36  ;;  %v11994_v36 = vpack.c.bf16 %v9465_v9, %v9464_v42 }
0x1bc6   :  { %5854 = vmatmul.mubr.f32.gmra.mrb[134].mxu0 %v15441_v23 }
0x1bc7   :  { %6089 = vmatprep.mubr.f32.mxu0 %v17872_v32 }
0x1c91   :  { %v5845_v57 = vpop.f32.mrb[130].mxu0 }
0x1c92   :  { %v5847_v13 = vpop.f32.mrb[131].mxu0  ;;  %11167 = vmatmul.mubr.msk.f32.vlgmr.msra.gmra.mrb[154].mxu1 %vm172_vm1, %v5845_v57  ;;  %v11966_v57 = vpack.c.bf16 %v9433_v11, %v9431_v14  ;;  %v9448_v14 = vld [vmem:[%s17815_s4 + $0x250] sm:$0xff]  ;;  %v9449_v11 = vld [vmem:[%s17815_s4 + $0x258] sm:$0xff] }
0x1c93   :  { %11169 = vmatprep.mubr.msk.f32.mxu1 %vm12830_vm0, %v17872_v32  ;;  %v9430_v13 = vld [vmem:[%s17814_s3 + $0x140] sm:$0xff] }
0x1c94   :  { %11967 = vmatprep.subr.bf16.mxu0 %v11966_v57  ;;  %v9466_v57 = vld [vmem:[%s17815_s4 + $0x2e0] sm:$0xff] }
0x1c95   :  { %v5850_v52 = vpop.f32.mrb[132].mxu0 }
0x1c96   :  { %11170 = vmatmul.mubr.msk.f32.gmra.mrb[156].mxu1 %vm172_vm1, %v5850_v52  ;;  %v5852_v34 = vpop.f32.mrb[133].mxu0  ;;  %v9432_v52 = vld [vmem:[%s17814_s3 + $0x150] sm:$0xff] }
0x1c97   :  { %11172 = vmatprep.mubr.msk.f32.mxu1 %vm12830_vm0, %v17872_v32  ;;  %v11968_v34 = vpack.c.bf16 %v9432_v52, %v9430_v13  ;;  %v9467_v13 = vld [vmem:[%s17815_s4 + $0x2e8] sm:$0xff]  ;;  %v11996_v52 = vpack.c.bf16 %v9449_v11, %v9448_v14 }
0x1c99   :  { %v5855_v16 = vpop.f32.mrb[134].mxu0  ;;  %11969 = vmatpush1.bf16.msra.mxu0 %v11968_v34  ;;  %v11998_v34 = vpack.c.bf16 %v9467_v13, %v9466_v57 }
0x1c9a   :  { %11173 = vmatmul.mubr.msk.f32.gmra.mrb[158].mxu1 %vm172_vm1, %v5855_v16  ;;  %v5857_v0 = vpop.f32.mrb[135].mxu0  ;;  %v9435_v16 = vld [vmem:[%s17814_s3 + $0x168] sm:$0xff] }
0x1c9b   :  { %v9437_v0 = vld [vmem:[%s17814_s3 + $0x178] sm:$0xff] }
0x1d65   :  { %v5938_v49 = vpop.f32.mrb[154].mxu1 }
0x1d66   :  { %v5939_v19 = vadd.f32 %v9555_v48, %v5938_v49  ;;  %v11168_v30 = vpop.f32.mrb[155].mxu1  ;;  %v9434_v49 = vld [vmem:[%s17814_s3 + $0x160] sm:$0xff] }
0x1d68   :  { %v5952_v2 = vsel %vm172_vm1, %v5939_v19, 0.0 }
0x1d69   :  { %5953 = vadd.xlane.f32.xlu0 %v5952_v2  ;;  %v5943_v54 = vpop.f32.mrb[156].mxu1  ;;  %v9454_v2 = vld [vmem:[%s17815_s4 + $0x280] sm:$0xff] }
0x1d6a   :  { %v5944_v25 = vadd.f32 %v9555_v48, %v5943_v54  ;;  %v11171_v28 = vpop.f32.mrb[157].mxu1  ;;  %v9455_v54 = vld [vmem:[%s17815_s4 + $0x288] sm:$0xff] }
0x1d6b   :  { %v11974_v28 = vpack.c.bf16 %v9455_v54, %v9454_v2 }
0x1d6c   :  { %v5955_v58 = vsel %vm172_vm1, %v5944_v25, 0.0 }
0x1d6d   :  { %5956 = vadd.xlane.f32.xlu1 %v5955_v58  ;;  %v5948_v1 = vpop.f32.mrb[158].mxu1  ;;  %v9439_v58 = vld [vmem:[%s17815_s4 + $0x208] sm:$0xff]  ;;  %11975 = vmatprep.subr.bf16.mxu1 %v11974_v28 }
0x1d6e   :  { %v5949_v40 = vadd.f32 %v9555_v48, %v5948_v1  ;;  %v11174_v24 = vpop.f32.mrb[159].mxu1  ;;  %v11970_v48 = vpack.c.bf16 %v9437_v0, %v9435_v16  ;;  %v9456_v1 = vld [vmem:[%s17815_s4 + $0x290] sm:$0xff] }
0x1d70   :  { %v5958_v53 = vsel %vm4592_vm11, %v5949_v40, 0.0  ;;  %11971 = vmatprep.subr.bf16.mxu0 %v11970_v48 }
0x1d71   :  { %5959 = vadd.xlane.f32.xlu0 %v5958_v53 }
0x1df6   :  { %v5954_v38 = vpop.xlane.xlu0 %5953 }
0x1df7   :  { %v5961_v50 = vmul.f32 0.015625, %v5954_v38  ;;  %v9440_v38 = vld [vmem:[%s17815_s4 + $0x210] sm:$0xff] }
0x1df9   :  { %v16209_v47 = vsub.f32 %v5939_v19, %v5961_v50  ;;  %v9436_v19 = vld [vmem:[%s17814_s3 + $0x170] sm:$0xff]  ;;  %v9441_v50 = vld [vmem:[%s17815_s4 + $0x218] sm:$0xff] }
0x1dfa   :  { %v5957_v43 = vpop.xlane.xlu1 %5956  ;;  %v11972_v30 = vpack.c.bf16 %v9436_v19, %v9434_v49 }
0x1dfb   :  { %v5962_v22 = vmul.f32 0.015625, %v5957_v43  ;;  %v5967_v27 = vmul.f32 %v16209_v47, %v16209_v47  ;;  %v9458_v43 = vld [vmem:[%s17815_s4 + $0x2a0] sm:$0xff] }
0x1dfc   :  { %11973 = vmatpush1.bf16.msra.mxu0 %v11972_v30 }
0x1dfd   :  { %v16213_v39 = vsub.f32 %v5944_v25, %v5962_v22  ;;  %v5970_v55 = vsel %vm172_vm1, %v5967_v27, 0.0  ;;  %12006 = vmatprep.subr.bf16.mxu0 %v17871_v45  ;;  %v9438_v25 = vld [vmem:[%s17815_s4 + $0x200] sm:$0xff]  ;;  %v9459_v22 = vld [vmem:[%s17815_s4 + $0x2a8] sm:$0xff]  ;;  %v11980_v27 = vpack.c.bf16 %v9441_v50, %v9440_v38 }
0x1dfe   :  { %5971 = vadd.xlane.f32.xlu1 %v5970_v55  ;;  %v5960_v12 = vpop.xlane.xlu0 %5959  ;;  %v11976_v24 = vpack.c.bf16 %v9439_v58, %v9438_v25  ;;  %v11982_v55 = vpack.c.bf16 %v9459_v22, %v9458_v43  ;;  %v9559_v58 = vld [vmem:[%s17813_s5 + $0x13] ss:$0 sm:$0xff] }
0x1dff   :  { %v5963_v56 = vmul.f32 0.015625, %v5960_v12  ;;  %v5968_v60 = vmul.f32 %v16213_v39, %v16213_v39  ;;  %v9442_v12 = vld [vmem:[%s17815_s4 + $0x220] sm:$0xff] }
0x1e00   :  { %11977 = vmatpush3.bf16.msra.mxu1 %v11976_v24 }
0x1e01   :  { %v16218_v7 = vsub.f32 %v5949_v40, %v5963_v56  ;;  %v5973_v62 = vsel %vm172_vm1, %v5968_v60, 0.0  ;;  %v9457_v40 = vld [vmem:[%s17815_s4 + $0x298] sm:$0xff]  ;;  %v9443_v56 = vld [vmem:[%s17815_s4 + $0x228] sm:$0xff]  ;;  %v9460_v60 = vld [vmem:[%s17815_s4 + $0x2b0] sm:$0xff] }
0x1e02   :  { %5974 = vadd.xlane.f32.xlu0 %v5973_v62  ;;  %v11978_v53 = vpack.c.bf16 %v9457_v40, %v9456_v1  ;;  %v9461_v62 = vld [vmem:[%s17815_s4 + $0x2b8] sm:$0xff]  ;;  %v9560_v40 = vld [vmem:[%s17813_s5 + $0x14] ss:$0 sm:$0xff] }
0x1e03   :  { %v5969_v10 = vmul.f32 %v16218_v7, %v16218_v7 }
0x1e04   :  { %11979 = vmatprep.subr.bf16.mxu1 %v11978_v53 }
0x1e05   :  { %v5976_v26 = vsel %vm4592_vm11, %v5969_v10, 0.0  ;;  %11981 = vmatpush3.bf16.msra.mxu1 %v11980_v27  ;;  %v11984_v10 = vpack.c.bf16 %v9443_v56, %v9442_v12 }
0x1e06   :  { %5977 = vadd.xlane.f32.xlu1 %v5976_v26  ;;  %11983 = vmatprep.subr.bf16.mxu1 %v11982_v55  ;;  %v11986_v26 = vpack.c.bf16 %v9461_v62, %v9460_v60  ;;  %v9468_v60 = vld [vmem:[%s17815_s4 + $0x2f0] sm:$0xff]  ;;  %v9469_v62 = vld [vmem:[%s17815_s4 + $0x2f8] sm:$0xff] }
0x1e09   :  { %11985 = vmatpush3.bf16.msra.mxu1 %v11984_v10  ;;  %v12002_v10 = vpack.c.bf16 %v9469_v62, %v9468_v60 }
0x1e0a   :  { %11987 = vmatprep.subr.bf16.mxu1 %v11986_v26  ;;  %v9452_v26 = vld [vmem:[%s17815_s4 + $0x270] sm:$0xff] }
0x1e0b   :  { %v12004_v5 = vpack.c.bf16 %v9453_v6, %v9452_v26 }
0x1e0d   :  { %11989 = vmatpush3.bf16.msra.mxu1 %v11988_v3  ;;  %v6013_v3 = vrot.slane %v9470_v41, %v13869_v63 }
0x1e0e   :  { %11991 = vmatprep.subr.bf16.mxu1 %v11990_v8 }
0x1e11   :  { %11993 = vmatpush3.bf16.msra.mxu1 %v11992_v35 }
0x1e12   :  { %11995 = vmatprep.subr.bf16.mxu1 %v11994_v36 }
0x1e15   :  { %11997 = vmatpush3.bf16.msra.mxu1 %v11996_v52 }
0x1e16   :  { %11999 = vmatprep.subr.bf16.mxu1 %v11998_v34 }
0x1e8b   :  { %v5972_v16 = vpop.xlane.xlu1 %5971 }
0x1e8c   :  { %v5979_v0 = vmul.f32 0.015625, %v5972_v16 }
0x1e8e   :  { %v5982_v48 = vadd.f32 1e-05, %v5979_v0 }
0x1e8f   :  { %v5975_v49 = vpop.xlane.xlu0 %5974 }
0x1e90   :  { %12564 = vrsqrt.f32 %v5982_v48  ;;  %v5980_v19 = vmul.f32 0.015625, %v5975_v49 }
0x1e92   :  { %v5983_v30 = vadd.f32 1e-05, %v5980_v19 }
0x1e93   :  { %v5978_v2 = vpop.xlane.xlu1 %5977 }
0x1e94   :  { %12566 = vrsqrt.f32 %v5983_v30  ;;  %v5981_v54 = vmul.f32 0.015625, %v5978_v2  ;;  %v9564_v2 = vld [vmem:[%s17813_s5 + $0x15] ss:$0 sm:$0xff] }
0x1e96   :  { %v5984_v25 = vadd.f32 1e-05, %v5981_v54 }
0x1e98   :  { %12568 = vrsqrt.f32 %v5984_v25 }
0x1e9a   :  { %v12565_v28 = vpop.eup %12564 }
0x1e9b   :  { %v5988_v1 = vmul.f32 %v12565_v28, %v16209_v47 }
0x1e9d   :  { %v5995_v24 = vmul.f32 %v9559_v58, %v5988_v1 }
0x1e9e   :  { %v12567_v53 = vpop.eup %12566 }
0x1e9f   :  { %v16358_v38 = vadd.f32 %v9560_v40, %v5995_v24  ;;  %v5989_v50 = vmul.f32 %v12567_v53, %v16213_v39  ;;  %v9450_v39 = vld [vmem:[%s17815_s4 + $0x260] sm:$0xff] }
0x1ea1   :  { %9561 = vmatmul.mubr.msk.f32.vlgmr.msra.gmra.mrb[136].mxu0 %vm172_vm1, %v16358_v38  ;;  %v5996_v43 = vmul.f32 %v9559_v58, %v5989_v50 }
0x1ea2   :  { %v12569_v22 = vpop.eup %12568  ;;  %6095 = vmatprep.mubr.f32.mxu0 %v17872_v32 }
0x1ea3   :  { %v16364_v27 = vadd.f32 %v9560_v40, %v5996_v43  ;;  %v5990_v47 = vmul.f32 %v12569_v22, %v16218_v7  ;;  %v9451_v7 = vld [vmem:[%s17815_s4 + $0x268] sm:$0xff] }
0x1ea4   :  { %v12000_v56 = vpack.c.bf16 %v9451_v7, %v9450_v39 }
0x1ea5   :  { %9562 = vmatmul.mubr.msk.f32.gmra.mrb[138].mxu0 %vm172_vm1, %v16364_v27  ;;  %v5997_v55 = vmul.f32 %v9559_v58, %v5990_v47 }
0x1ea6   :  { %6101 = vmatprep.mubr.f32.mxu0 %v17872_v32  ;;  %12001 = vmatpush3.bf16.msra.mxu1 %v12000_v56 }
0x1ea7   :  { %v16370_v12 = vadd.f32 %v9560_v40, %v5997_v55  ;;  %12003 = vmatprep.subr.bf16.mxu1 %v12002_v10 }
0x1ea9   :  { %9563 = vmatmul.mubr.msk.f32.gmra.mrb[140].mxu0 %vm172_vm1, %v16370_v12 }
0x1eaa   :  { %11191 = vmatprep.mubr.msk.f32.mxu0 %vm12830_vm0, %v17872_v32  ;;  %12005 = vmatpush3.bf16.msra.mxu1 %v12004_v5 }
0x1eab   :  { %12030 = vmatprep.subr.bf16.mxu1 %v17871_v45 }
0x1f74   :  { %v6091_v8 = vpop.f32.mrb[136].mxu0 }
0x1f75   :  { %v6092_v18 = vadd.f32 %v6091_v8, %v6009_v33  ;;  %v6093_v31 = vpop.f32.mrb[137].mxu0 }
0x1f76   :  { %v6094_v42 = vadd.f32 %v6093_v31, %v6013_v3 }
0x1f77   :  { %v6108_v36 = vmax.f32 %v6092_v18, 0.0 }
0x1f78   :  { %v6109_v9 = vmax.f32 %v6094_v42, 0.0  ;;  %v6097_v35 = vpop.f32.mrb[138].mxu0 }
0x1f79   :  { %v6098_v14 = vadd.f32 %v6097_v35, %v6009_v33  ;;  %v6099_v11 = vpop.f32.mrb[139].mxu0  ;;  %v9568_v35 = vld [vmem:[%s17809_s2 + $0x308] sm:$0xff] }
0x1f7a   :  { %v6100_v57 = vadd.f32 %v6099_v11, %v6013_v3  ;;  %6182 = vmatprep.mubr.f32.mxu1 %v6109_v9  ;;  %v9567_v9 = vld [vmem:[%s17809_s2 + $0x300] sm:$0xff]  ;;  %v9584_v11 = vld [vmem:[%s17809_s2 + $0x388] sm:$0xff] }
0x1f7b   :  { %6183 = vmatmul.mubr.f32.vlgmr.msra.gmra.mrb[160].mxu1 %v6108_v36  ;;  %v6110_v34 = vmax.f32 %v6098_v14, 0.0  ;;  %v12007_v36 = vpack.c.bf16 %v9568_v35, %v9567_v9  ;;  %v9583_v14 = vld [vmem:[%s17809_s2 + $0x380] sm:$0xff] }
0x1f7c   :  { %v6111_v13 = vmax.f32 %v6100_v57, 0.0  ;;  %v6103_v52 = vpop.f32.mrb[140].mxu0  ;;  %v12031_v57 = vpack.c.bf16 %v9584_v11, %v9583_v14  ;;  %v9579_v11 = vld [vmem:[%s17809_s2 + $0x360] sm:$0xff] }
0x1f7d   :  { %v6104_v16 = vadd.f32 %v6103_v52, %v6009_v33  ;;  %v6105_v0 = vpop.f32.mrb[141].mxu0  ;;  %12008 = vmatpush3.bf16.msra.mxu0 %v12007_v36  ;;  %v9570_v52 = vld [vmem:[%s17809_s2 + $0x318] sm:$0xff] }
0x1f7e   :  { %v6106_v48 = vadd.f32 %v6105_v0, %v6013_v3  ;;  %6187 = vmatprep.mubr.f32.mxu1 %v6111_v13  ;;  %12032 = vmatpush3.bf16.msra.mxu1 %v12031_v57  ;;  %v9569_v13 = vld [vmem:[%s17809_s2 + $0x310] sm:$0xff]  ;;  %v9586_v0 = vld [vmem:[%s17809_s2 + $0x398] sm:$0xff]  ;;  %v9580_v57 = vld [vmem:[%s17809_s2 + $0x368] sm:$0xff] }
0x1f7f   :  { %6188 = vmatmul.mubr.f32.gmra.mrb[162].mxu1 %v6110_v34  ;;  %v6112_v19 = vmax.f32 %v6104_v16, 0.0  ;;  %12009 = vmatprep.subr.bf16.mxu0 %v17871_v45  ;;  %v12010_v34 = vpack.c.bf16 %v9570_v52, %v9569_v13  ;;  %v9585_v16 = vld [vmem:[%s17809_s2 + $0x390] sm:$0xff] }
0x1f80   :  { %v6113_v49 = vmax.f32 %v6106_v48, 0.0  ;;  %12033 = vmatprep.subr.bf16.mxu1 %v17871_v45  ;;  %v12034_v48 = vpack.c.bf16 %v9586_v0, %v9585_v16  ;;  %v9582_v16 = vld [vmem:[%s17809_s2 + $0x378] sm:$0xff] }
0x1f81   :  { %12011 = vmatpush3.bf16.msra.mxu0 %v12010_v34  ;;  %v9581_v34 = vld [vmem:[%s17809_s2 + $0x370] sm:$0xff] }
0x1f82   :  { %6192 = vmatprep.mubr.f32.mxu1 %v6113_v49  ;;  %12035 = vmatpush3.bf16.msra.mxu1 %v12034_v48  ;;  %v9571_v49 = vld [vmem:[%s17809_s2 + $0x320] sm:$0xff]  ;;  %v12028_v0 = vpack.c.bf16 %v9582_v16, %v9581_v34  ;;  %v16613_v34 = vld [vmem:[%s17811_s7 + $0xb8] sm:$0xff] }
0x1f83   :  { %6193 = vmatmul.mubr.f32.gmra.mrb[164].mxu1 %v6112_v19  ;;  %12012 = vmatprep.subr.bf16.mxu0 %v17871_v45  ;;  %v9572_v19 = vld [vmem:[%s17809_s2 + $0x328] sm:$0xff] }
0x1f84   :  { %11241 = vmatprep.mubr.msk.f32.mxu1 %vm12830_vm0, %v17872_v32  ;;  %12036 = vmatprep.subr.bf16.mxu1 %v17871_v45 }
0x204e   :  { %v10273_v30 = vpop.f32.mrb[160].mxu1 }
0x204f   :  { %v10274_v54 = vpop.f32.mrb[161].mxu1 }
0x2050   :  { %v10275_v25 = vadd.f32 %v10274_v54, %v10273_v30  ;;  %v12013_v30 = vpack.c.bf16 %v9572_v19, %v9571_v49  ;;  %v9588_v54 = vld [vmem:[%s17809_s2 + $0x3a8] sm:$0xff] }
0x2052   :  { %v6185_v28 = vadd.f32 %v10275_v25, %v9564_v2  ;;  %v10276_v58 = vpop.f32.mrb[162].mxu1  ;;  %12014 = vmatpush3.bf16.msra.mxu0 %v12013_v30 }
0x2053   :  { %v10277_v1 = vpop.f32.mrb[163].mxu1  ;;  %12015 = vmatprep.subr.bf16.mxu0 %v17871_v45 }
0x2054   :  { %v10278_v40 = vadd.f32 %v10277_v1, %v10276_v58  ;;  %v6198_v24 = vadd.f32 %v6185_v28, %v16358_v38  ;;  %v9573_v28 = vld [vmem:[%s17809_s2 + $0x330] sm:$0xff]  ;;  %v9574_v58 = vld [vmem:[%s17809_s2 + $0x338] sm:$0xff] }
0x2055   :  { %v12016_v1 = vpack.c.bf16 %v9574_v58, %v9573_v28 }
0x2056   :  { %v6190_v53 = vadd.f32 %v10278_v40, %v9564_v2  ;;  %v10279_v50 = vpop.f32.mrb[164].mxu1  ;;  %v6201_v43 = vsel %vm172_vm1, %v6198_v24, 0.0  ;;  %v9589_v40 = vld [vmem:[%s17809_s2 + $0x3b0] sm:$0xff] }
0x2057   :  { %v10280_v22 = vpop.f32.mrb[165].mxu1  ;;  %6202 = vadd.xlane.f32.xlu0 %v6201_v43  ;;  %12017 = vmatpush3.bf16.msra.mxu0 %v12016_v1 }
0x2058   :  { %v10281_v47 = vadd.f32 %v10280_v22, %v10279_v50  ;;  %v6199_v55 = vadd.f32 %v6190_v53, %v16364_v27  ;;  %12018 = vmatprep.subr.bf16.mxu0 %v17871_v45 }
0x205a   :  { %v6195_v39 = vadd.f32 %v10281_v47, %v9564_v2  ;;  %v6204_v7 = vsel %vm172_vm1, %v6199_v55, 0.0  ;;  %v9587_v2 = vld [vmem:[%s17809_s2 + $0x3a0] sm:$0xff] }
0x205b   :  { %6205 = vadd.xlane.f32.xlu1 %v6204_v7  ;;  %v12037_v25 = vpack.c.bf16 %v9588_v54, %v9587_v2 }
0x205c   :  { %v6200_v56 = vadd.f32 %v6195_v39, %v16370_v12 }
0x205d   :  { %12038 = vmatpush3.bf16.msra.mxu1 %v12037_v25 }
0x205e   :  { %v6207_v60 = vsel %vm4592_vm11, %v6200_v56, 0.0  ;;  %12039 = vmatprep.subr.bf16.mxu1 %v17871_v45 }
0x205f   :  { %6208 = vadd.xlane.f32.xlu0 %v6207_v60 }
0x20e4   :  { %v6203_v62 = vpop.xlane.xlu0 %6202 }
0x20e5   :  { %v6210_v38 = vmul.f32 0.015625, %v6203_v62 }
0x20e7   :  { %v16411_v10 = vsub.f32 %v6198_v24, %v6210_v38  ;;  %v9590_v24 = vld [vmem:[%s17809_s2 + $0x3b8] sm:$0xff]  ;;  %v9565_v38 = vld [vmem:[%s17813_s5 + $0x16] ss:$0 sm:$0xff] }
0x20e8   :  { %v6206_v26 = vpop.xlane.xlu1 %6205  ;;  %v12040_v53 = vpack.c.bf16 %v9590_v24, %v9589_v40 }
0x20e9   :  { %v6211_v6 = vmul.f32 0.015625, %v6206_v26  ;;  %v6216_v5 = vmul.f32 %v16411_v10, %v16411_v10 }
0x20ea   :  { %12041 = vmatpush3.bf16.msra.mxu1 %v12040_v53 }
0x20eb   :  { %v16415_v41 = vsub.f32 %v6199_v55, %v6211_v6  ;;  %v6219_v27 = vsel %vm172_vm1, %v6216_v5, 0.0  ;;  %v9575_v6 = vld [vmem:[%s17809_s2 + $0x340] sm:$0xff]  ;;  %v9576_v5 = vld [vmem:[%s17809_s2 + $0x348] sm:$0xff] }
0x20ec   :  { %6220 = vadd.xlane.f32.xlu1 %v6219_v27  ;;  %v6209_v33 = vpop.xlane.xlu0 %6208  ;;  %v9566_v27 = vld [vmem:[%s17813_s5 + $0x17] ss:$0 sm:$0xff] }
0x20ed   :  { %v6212_v3 = vmul.f32 0.015625, %v6209_v33  ;;  %v6217_v12 = vmul.f32 %v16415_v41, %v16415_v41 }
0x20ef   :  { %v16420_v8 = vsub.f32 %v6200_v56, %v6212_v3  ;;  %v6222_v18 = vsel %vm172_vm1, %v6217_v12, 0.0  ;;  %v12019_v12 = vpack.c.bf16 %v9576_v5, %v9575_v6 }
0x20f0   :  { %6223 = vadd.xlane.f32.xlu0 %v6222_v18 }
0x20f1   :  { %v6218_v31 = vmul.f32 %v16420_v8, %v16420_v8 }
0x20f3   :  { %v6225_v42 = vsel %vm4592_vm11, %v6218_v31, 0.0 }
0x20f4   :  { %6226 = vadd.xlane.f32.xlu1 %v6225_v42  ;;  %v9578_v42 = vld [vmem:[%s17809_s2 + $0x358] sm:$0xff] }
0x2179   :  { %v6221_v50 = vpop.xlane.xlu1 %6220 }
0x217a   :  { %v6228_v43 = vmul.f32 0.015625, %v6221_v50 }
0x217c   :  { %v6231_v22 = vadd.f32 1e-05, %v6228_v43 }
0x217d   :  { %v6224_v47 = vpop.xlane.xlu0 %6223 }
0x217e   :  { %12570 = vrsqrt.f32 %v6231_v22  ;;  %v6229_v55 = vmul.f32 0.015625, %v6224_v47 }
0x2180   :  { %v6232_v39 = vadd.f32 1e-05, %v6229_v55 }
0x2181   :  { %v6227_v7 = vpop.xlane.xlu1 %6226 }
0x2182   :  { %12572 = vrsqrt.f32 %v6232_v39  ;;  %v6230_v56 = vmul.f32 0.015625, %v6227_v7 }
0x2184   :  { %v6233_v60 = vadd.f32 1e-05, %v6230_v56 }
0x2186   :  { %12574 = vrsqrt.f32 %v6233_v60 }
0x2188   :  { %v12571_v62 = vpop.eup %12570 }
0x2189   :  { %v6237_v26 = vmul.f32 %v12571_v62, %v16411_v10  ;;  %v9577_v10 = vld [vmem:[%s17809_s2 + $0x350] sm:$0xff] }
0x218b   :  { %v6244_v33 = vmul.f32 %v9565_v38, %v6237_v26 }
0x218c   :  { %v12573_v3 = vpop.eup %12572 }
0x218d   :  { %v16494_v18 = vadd.f32 %v9566_v27, %v6244_v33  ;;  %v6238_v31 = vmul.f32 %v12573_v3, %v16415_v41  ;;  %v12022_v41 = vpack.c.bf16 %v9578_v42, %v9577_v10 }
0x218f   :  { %11192 = vmatmul.mubr.msk.f32.vlgmr.msra.gmra.mrb[142].mxu0 %vm172_vm1, %v16494_v18  ;;  %11242 = vmatmul.mubr.msk.f32.vlgmr.msra.gmra.mrb[166].mxu1 %vm172_vm1, %v16494_v18  ;;  %v6245_v9 = vmul.f32 %v9565_v38, %v6238_v31 }
0x2190   :  { %v12575_v35 = vpop.eup %12574  ;;  %12020 = vmatpush3.bf16.msra.mxu0 %v12019_v12  ;;  %11194 = vmatprep.mubr.msk.f32.mxu0 %vm12830_vm0, %v17872_v32 }
0x2191   :  { %12021 = vmatprep.subr.bf16.mxu0 %v17871_v45  ;;  %11244 = vmatprep.mubr.msk.f32.mxu1 %vm12830_vm0, %v17872_v32  ;;  %v16512_v36 = vadd.f32 %v9566_v27, %v6245_v9  ;;  %v6239_v14 = vmul.f32 %v12575_v35, %v16420_v8  ;;  %v12025_v8 = vpack.c.bf16 %v9580_v57, %v9579_v11  ;;  %v16597_v11 = vld [vmem:[%s17811_s7 + $0xa8] sm:$0xff] }
0x2193   :  { %11195 = vmatmul.mubr.msk.f32.gmra.mrb[144].mxu0 %vm172_vm1, %v16512_v36  ;;  %11245 = vmatmul.mubr.msk.f32.gmra.mrb[168].mxu1 %vm172_vm1, %v16512_v36  ;;  %v6246_v13 = vmul.f32 %v9565_v38, %v6239_v14 }
0x2194   :  { %12023 = vmatpush3.bf16.msra.mxu0 %v12022_v41  ;;  %11197 = vmatprep.mubr.msk.f32.mxu0 %vm12830_vm0, %v17872_v32 }
0x2195   :  { %12024 = vmatprep.subr.bf16.mxu0 %v17871_v45  ;;  %11247 = vmatprep.mubr.msk.f32.mxu1 %vm12830_vm0, %v17872_v32  ;;  %v16530_v52 = vadd.f32 %v9566_v27, %v6246_v13  ;;  %v16605_v13 = vld [vmem:[%s17811_s7 + $0xb0] sm:$0xff] }
0x2197   :  { %11198 = vmatmul.mubr.msk.f32.gmra.mrb[146].mxu0 %vm172_vm1, %v16530_v52  ;;  %11248 = vmatmul.mubr.msk.f32.gmra.mrb[170].mxu1 %vm172_vm1, %v16530_v52 }
0x2198   :  { %12026 = vmatpush3.bf16.msra.mxu0 %v12025_v8  ;;  %11216 = vmatprep.mubr.msk.f32.mxu0 %vm12830_vm0, %v17872_v32 }
0x2199   :  { %12027 = vmatprep.subr.bf16.mxu0 %v17871_v45 }
0x219c   :  { %12029 = vmatpush3.bf16.msra.mxu0 %v12028_v0  ;;  %v16620_v0 = vld [vmem:[%s17811_s7 + $0xc0] sm:$0xff] }
0x219f   :  { %11217 = vmatmul.mubr.msk.f32.vlgmr.msra.gmra.mrb[148].mxu0 %vm172_vm1, %v16494_v18 }
0x21a0   :  { %11219 = vmatprep.mubr.msk.f32.mxu0 %vm12830_vm0, %v17872_v32 }
0x21a3   :  { %11220 = vmatmul.mubr.msk.f32.gmra.mrb[150].mxu0 %vm172_vm1, %v16512_v36 }
0x21a4   :  { %11222 = vmatprep.mubr.msk.f32.mxu0 %vm12830_vm0, %v17872_v32 }
0x21a7   :  { %11223 = vmatmul.mubr.msk.f32.gmra.mrb[152].mxu0 %vm172_vm1, %v16530_v52 }
0x2262   :  { %v16555_v48 = vpop.f32.mrb[142].mxu0  ;;  %v6528_v49 = vpop.f32.mrb[166].mxu1 }
0x2263   :  { %v11193_v19 = vpop.f32.mrb[143].mxu0  ;;  %v11243_v30 = vpop.f32.mrb[167].mxu1  ;;  %v6572_v2 = vmul.f32 %v16161_v15, %v16555_v48  ;;  %v6545_v54 = vrot.slane %v16555_v48, 6  ;;  %v6553_v25 = vrot.slane %v16555_v48, 4  ;;  %v6561_v1 = vrot.slane %v16555_v48, 2 }
0x2264   :  { %v16628_v19 = vld [vmem:[%s17811_s7 + $0xc8] sm:$0xff] }
0x2265   :  { %11256 = vmatprep.mubr.msk.f32.mxu0 %vm172_vm1, %v6572_v2  ;;  %v16635_v2 = vld [vmem:[%s17811_s7 + $0xd0] sm:$0xff] }
0x2266   :  { %v16562_v28 = vpop.f32.mrb[144].mxu0  ;;  %v6533_v58 = vpop.f32.mrb[168].mxu1 }
0x2267   :  { %v6546_v40 = vrot.slane %v16562_v28, 6  ;;  %v6554_v24 = vrot.slane %v16562_v28, 4  ;;  %v6562_v53 = vrot.slane %v16562_v28, 2  ;;  %v11196_v50 = vpop.f32.mrb[145].mxu0  ;;  %v11246_v43 = vpop.f32.mrb[169].mxu1  ;;  %v12048_v15 = vpack.c.bf16 %v6533_v58, %v6528_v49 }
0x2268   :  { %v6573_v57 = vmul.f32 %v16597_v11, %v16562_v28  ;;  %v16666_v50 = vld [vmem:[%s17811_s7 + $0xf0] sm:$0xff] }
0x2269   :  { %v16569_v22 = vsel %vm476_vm4, %v6545_v54, %v6546_v40  ;;  %v16572_v47 = vsel %vm425_vm2, %v6553_v25, %v6554_v24  ;;  %v16575_v55 = vsel %vm3633_vm8, %v6561_v1, %v6562_v53  ;;  %12049 = vmatprep.subr.bf16.mxu1 %v12048_v15  ;;  %v6582_v43 = vmul.f32 %v16666_v50, %v16562_v28  ;;  %v16690_v28 = vld [vmem:[%s17811_s7 + $0x108] sm:$0xff] }
0x226a   :  { %v6378_v39 = vpop.f32.mrb[146].mxu0  ;;  %v6538_v7 = vpop.f32.mrb[170].mxu1  ;;  %12051 = vmatpush3.bf16.msra.mxu1 %v12048_v15  ;;  %v6575_v16 = vmul.f32 %v16613_v34, %v16569_v22  ;;  %v6577_v30 = vmul.f32 %v16628_v19, %v16572_v47  ;;  %v16675_v15 = vld [vmem:[%s17811_s7 + $0xf8] sm:$0xff] }
0x226b   :  { %v6548_v56 = vrot.slane %v6378_v39, 6  ;;  %v6556_v60 = vrot.slane %v6378_v39, 4  ;;  %v6564_v62 = vrot.slane %v6378_v39, 2  ;;  %v6569_v38 = vsel %vm476_vm4, %v6378_v39, %v6545_v54  ;;  %v11199_v26 = vpop.f32.mrb[147].mxu0  ;;  %v11249_v6 = vpop.f32.mrb[171].mxu1  ;;  %11287 = vmatprep.subr.msk.mxu1 %vm476_vm4, %v6538_v7 }
0x226c   :  { %v6574_v8 = vmul.f32 %v16605_v13, %v6569_v38  ;;  %v6583_v39 = vmul.f32 %v16675_v15, %v6569_v38  ;;  %v16711_v26 = vld [vmem:[%s17811_s7 + $0x120] sm:$0xff] }
0x226d   :  { %v6549_v5 = vsel %vm476_vm4, %v6546_v40, %v6548_v56  ;;  %v6557_v27 = vsel %vm425_vm2, %v6554_v24, %v6556_v60  ;;  %v16582_v33 = vsel %vm3633_vm8, %v6562_v53, %v6564_v62  ;;  %v16659_v24 = vld [vmem:[%s17811_s7 + $0xe8] sm:$0xff]  ;;  %v16696_v60 = vld [vmem:[%s17811_s7 + $0x110] sm:$0xff]  ;;  %v6588_v6 = vmul.f32 %v16711_v26, %v16575_v55 }
0x226e   :  { %v6570_v3 = vsel %vm425_vm2, %v6549_v5, %v6553_v25  ;;  %v6571_v12 = vsel %vm3633_vm8, %v6557_v27, %v6561_v1  ;;  %11288 = vmatpush3.msk.msra.mxu1 %vm476_vm4, %v6538_v7  ;;  %v16643_v25 = vld [vmem:[%s17811_s7 + $0xd8] sm:$0xff]  ;;  %v16650_v1 = vld [vmem:[%s17811_s7 + $0xe0] sm:$0xff]  ;;  %v6581_v53 = vmul.f32 %v16659_v24, %v16555_v48  ;;  %v6586_v62 = vmul.f32 %v16696_v60, %v16572_v47  ;;  %v16720_v47 = vld [vmem:[%s17811_s7 + $0x128] sm:$0xff] }
0x226f   :  { %12079 = vmatprep.subr.bf16.mxu1 %v17871_v45  ;;  %v6576_v49 = vmul.f32 %v16620_v0, %v6570_v3  ;;  %v6578_v54 = vmul.f32 %v16635_v2, %v6571_v12  ;;  %v6579_v58 = vmul.f32 %v16643_v25, %v16575_v55  ;;  %v6580_v40 = vmul.f32 %v16650_v1, %v16582_v33  ;;  %v16681_v48 = vld [vmem:[%s17811_s7 + $0x100] sm:$0xff] }
0x2270   :  { %v6584_v7 = vmul.f32 %v16681_v48, %v16569_v22  ;;  %v6585_v56 = vmul.f32 %v16690_v28, %v6570_v3  ;;  %v16705_v22 = vld [vmem:[%s17811_s7 + $0x118] sm:$0xff]  ;;  %v6589_v5 = vmul.f32 %v16720_v47, %v16582_v33 }
0x2271   :  { %v6587_v38 = vmul.f32 %v16705_v22, %v6571_v12 }
0x2272   :  { %v6448_v31 = vpop.f32.mrb[148].mxu0 }
0x2273   :  { %v11218_v10 = vpop.f32.mrb[149].mxu0 }
0x2276   :  { %v6453_v42 = vpop.f32.mrb[150].mxu0 }
0x2277   :  { %v12042_v9 = vpack.c.bf16 %v6453_v42, %v6448_v31  ;;  %v11221_v35 = vpop.f32.mrb[151].mxu0 }
0x2279   :  { %12044 = vmatprep.subr.msk.bf16.mxu0 %vm13002_vm3, %v12042_v9 }
0x227a   :  { %v6458_v41 = vpop.f32.mrb[152].mxu0  ;;  %12047 = vmatpush3.bf16.xpose.msk.msra.mxu0 %vm13002_vm3, %v12042_v9 }
0x227b   :  { %v11224_v14 = vpop.f32.mrb[153].mxu0  ;;  %11254 = vmatprep.subr.msk.mxu0 %vm172_vm1, %v6458_v41 }
0x227c   :  { %v17912_v14 = vld [vmem:[#allocation3_spill] sm:$0xff] }
0x2282   :  { %11255 = vmatpush3.xpose.msk.msra.mxu0 %vm172_vm1, %v6458_v41 }
0x2283   :  { %12052 = vmatprep.subr.bf16.mxu0 %v17871_v45 }
0x2285   :  { %11257 = vmatmul.mubr.msk.f32.vlgmr.msra.gmra.mrb[154].mxu0 %vm172_vm1, %v6573_v57 }
0x2286   :  { %11259 = vmatprep.mubr.msk.f32.mxu0 %vm172_vm1, %v6574_v8 }
0x2289   :  { %11260 = vmatmul.mubr.msk.f32.gmra.mrb[156].mxu0 %vm172_vm1, %v6575_v16 }
0x228a   :  { %11262 = vmatprep.mubr.msk.f32.mxu0 %vm172_vm1, %v6576_v49 }
0x228d   :  { %11263 = vmatmul.mubr.msk.f32.gmra.mrb[158].mxu0 %vm172_vm1, %v6577_v30 }
0x228e   :  { %11265 = vmatprep.mubr.msk.f32.mxu0 %vm172_vm1, %v6578_v54  ;;  %v17914_v54 = vld [vmem:[#allocation5_spill] sm:$0xff] }
0x2291   :  { %11266 = vmatmul.mubr.msk.f32.gmra.mrb[160].mxu0 %vm172_vm1, %v6579_v58 }
0x2292   :  { %11268 = vmatprep.mubr.msk.f32.mxu0 %vm172_vm1, %v6580_v40 }
0x2295   :  { %11269 = vmatmul.mubr.msk.f32.gmra.mrb[162].mxu0 %vm172_vm1, %v6581_v53  ;;  %v17915_v53 = vld [vmem:[#allocation4_spill] sm:$0xff] }
0x2296   :  { %11271 = vmatprep.mubr.msk.f32.mxu0 %vm172_vm1, %v6582_v43 }
0x2299   :  { %11272 = vmatmul.mubr.msk.f32.gmra.mrb[164].mxu0 %vm172_vm1, %v6583_v39 }
0x229a   :  { %11274 = vmatprep.mubr.msk.f32.mxu0 %vm172_vm1, %v6584_v7 }
0x229d   :  { %11275 = vmatmul.mubr.msk.f32.gmra.mrb[166].mxu0 %vm172_vm1, %v6585_v56 }
0x229e   :  { %11277 = vmatprep.mubr.msk.f32.mxu0 %vm172_vm1, %v6586_v62  ;;  %v17916_v62 = vld [vmem:[#allocation6_spill] sm:$0xff] }
0x22a1   :  { %11278 = vmatmul.mubr.msk.f32.gmra.mrb[168].mxu0 %vm172_vm1, %v6587_v38 }
0x22a2   :  { %11280 = vmatprep.mubr.msk.f32.mxu0 %vm172_vm1, %v6588_v6 }
0x22a5   :  { %11281 = vmatmul.mubr.msk.f32.gmra.mrb[170].mxu0 %vm172_vm1, %v6589_v5  ;;  %v17917_v5 = vld [vmem:[#allocation7_spill] sm:$0xff] }
0x22a6   :  { %9648 = vmatprep.mubr.msk.f32.mxu0 %vm4403_vm10, %v15361_v37 }
0x2358   :  { %v11258_v27 = vpop.f32.mrb[154].mxu0 }
0x2359   :  { %v16728_v55 = vadd.f32 %v11258_v27, %v15012_v44  ;;  %v6719_v3 = vpop.f32.mrb[155].mxu0 }
0x235a   :  { %v16731_v12 = vadd.f32 %v6719_v3, %v15015_v17 }
0x235b   :  { %v6811_v31 = vsel %vm3955_vm9, %v16728_v55, -inf }
0x235c   :  { %6812 = vmax.xlane.f32.xlu1 %v6811_v31  ;;  %v11261_v10 = vpop.f32.mrb[156].mxu0  ;;  %v6808_v33 = vsel %vm3955_vm9, %v16731_v12, -inf }
0x235d   :  { %v16738_v42 = vadd.f32 %v11261_v10, %v15030_v61  ;;  %v6729_v9 = vpop.f32.mrb[157].mxu0  ;;  %6809 = vmax.xlane.f32.xlu0 %v6808_v33  ;;  %v17913_v61 = vld [vmem:[#allocation2_spill] sm:$0xff]  ;;  %v17918_v33 = vld [vmem:[#allocation8_spill] sm:$0xff] }
0x235e   :  { %v16741_v44 = vadd.f32 %v6729_v9, %v15035_v20 }
0x235f   :  { %v6817_v17 = vsel %vm3955_vm9, %v16738_v42, -inf }
0x2360   :  { %6818 = vmax.xlane.f32.xlu1 %v6817_v17  ;;  %v11264_v35 = vpop.f32.mrb[158].mxu0  ;;  %v6814_v41 = vsel %vm3955_vm9, %v16741_v44, -inf }
0x2361   :  { %v16748_v57 = vadd.f32 %v11264_v35, %v17912_v14  ;;  %v6739_v8 = vpop.f32.mrb[159].mxu0  ;;  %6815 = vmax.xlane.f32.xlu0 %v6814_v41  ;;  %v17919_v35 = vld [vmem:[#allocation9_spill] sm:$0xff] }
0x2362   :  { %v16751_v16 = vadd.f32 %v6739_v8, %v17913_v61 }
0x2363   :  { %v6823_v20 = vsel %vm3955_vm9, %v16748_v57, -inf }
0x2364   :  { %6824 = vmax.xlane.f32.xlu1 %v6823_v20  ;;  %v11267_v49 = vpop.f32.mrb[160].mxu0  ;;  %v6820_v30 = vsel %vm3955_vm9, %v16751_v16, -inf  ;;  %v17920_v20 = vld [vmem:[#allocation10_spill] sm:$0xff] }
0x2365   :  { %v16758_v58 = vadd.f32 %v11267_v49, %v17914_v54  ;;  %v6749_v40 = vpop.f32.mrb[161].mxu0  ;;  %6821 = vmax.xlane.f32.xlu0 %v6820_v30  ;;  %v17921_v54 = vld [vmem:[#allocation11_spill] sm:$0xff] }
0x2366   :  { %v16761_v43 = vadd.f32 %v6749_v40, %v17915_v53 }
0x2367   :  { %v6829_v39 = vsel %vm3955_vm9, %v16758_v58, -inf }
0x2368   :  { %6830 = vmax.xlane.f32.xlu1 %v6829_v39  ;;  %v11270_v7 = vpop.f32.mrb[162].mxu0  ;;  %v6826_v56 = vsel %vm3955_vm9, %v16761_v43, -inf }
0x2369   :  { %v16768_v38 = vadd.f32 %v11270_v7, %v17916_v62  ;;  %v6759_v6 = vpop.f32.mrb[163].mxu0  ;;  %6827 = vmax.xlane.f32.xlu0 %v6826_v56  ;;  %v17922_v56 = vld [vmem:[#allocation12_spill] sm:$0xff] }
0x236a   :  { %v16771_v27 = vadd.f32 %v6759_v6, %v17917_v5  ;;  %v17923_v5 = vld [vmem:[#allocation13_spill] sm:$0xff] }
0x236b   :  { %v6835_v3 = vsel %vm3955_vm9, %v16768_v38, -inf }
0x236c   :  { %6836 = vmax.xlane.f32.xlu1 %v6835_v3  ;;  %v11273_v31 = vpop.f32.mrb[164].mxu0  ;;  %v6832_v10 = vsel %vm3955_vm9, %v16771_v27, -inf }
0x236d   :  { %v16778_v9 = vadd.f32 %v11273_v31, %v17918_v33  ;;  %v6769_v17 = vpop.f32.mrb[165].mxu0  ;;  %6833 = vmax.xlane.f32.xlu0 %v6832_v10 }
0x236e   :  { %v16781_v41 = vadd.f32 %v6769_v17, %v17919_v35  ;;  %v17924_v17 = vld [vmem:[#allocation14_spill] sm:$0xff] }
0x236f   :  { %v6841_v14 = vsel %vm3955_vm9, %v16778_v9, -inf }
0x2370   :  { %6842 = vmax.xlane.f32.xlu1 %v6841_v14  ;;  %v11276_v8 = vpop.f32.mrb[166].mxu0  ;;  %v6838_v61 = vsel %vm3955_vm9, %v16781_v41, -inf }
0x2371   :  { %v16788_v49 = vadd.f32 %v11276_v8, %v17920_v20  ;;  %v6779_v30 = vpop.f32.mrb[167].mxu0  ;;  %6839 = vmax.xlane.f32.xlu0 %v6838_v61  ;;  %v17925_v8 = vld [vmem:[#allocation15_spill] sm:$0xff] }
0x2372   :  { %v16791_v40 = vadd.f32 %v6779_v30, %v17921_v54 }
0x2373   :  { %v6847_v53 = vsel %vm3955_vm9, %v16788_v49, -inf }
0x2374   :  { %6848 = vmax.xlane.f32.xlu1 %v6847_v53  ;;  %v11279_v39 = vpop.f32.mrb[168].mxu0  ;;  %v6844_v7 = vsel %vm3955_vm9, %v16791_v40, -inf }
0x2375   :  { %v16798_v62 = vadd.f32 %v11279_v39, %v17922_v56  ;;  %v6789_v6 = vpop.f32.mrb[169].mxu0  ;;  %6845 = vmax.xlane.f32.xlu0 %v6844_v7 }
0x2376   :  { %v16801_v3 = vadd.f32 %v6789_v6, %v17923_v5 }
0x2377   :  { %v6853_v31 = vsel %vm3955_vm9, %v16798_v62, -inf }
0x2378   :  { %6854 = vmax.xlane.f32.xlu1 %v6853_v31  ;;  %v11282_v10 = vpop.f32.mrb[170].mxu0  ;;  %v6850_v33 = vsel %vm3955_vm9, %v16801_v3, -inf }
0x2379   :  { %v16808_v35 = vadd.f32 %v11282_v10, %v17924_v17  ;;  %v6799_v14 = vpop.f32.mrb[171].mxu0  ;;  %6851 = vmax.xlane.f32.xlu0 %v6850_v33 }
0x237a   :  { %v16811_v61 = vadd.f32 %v6799_v14, %v17925_v8 }
0x237b   :  { %v6859_v20 = vsel %vm3955_vm9, %v16808_v35, -inf }
0x237c   :  { %6860 = vmax.xlane.f32.xlu1 %v6859_v20  ;;  %v6856_v30 = vsel %vm3955_vm9, %v16811_v61, -inf }
0x237d   :  { %6857 = vmax.xlane.f32.xlu0 %v6856_v30 }
0x23e9   :  { %v6813_v54 = vpop.xlane.xlu1 %6812 }
0x23ea   :  { %v6863_v53 = vsub.f32 %v16728_v55, %v6813_v54  ;;  %v6810_v39 = vpop.xlane.xlu0 %6809 }
0x23eb   :  { %v6862_v7 = vsub.f32 %v16731_v12, %v6810_v39 }
0x23ec   :  { %v6882_v56 = vmul.f32 1.442695, %v6863_v53 }
0x23ed   :  { %v6880_v6 = vmul.f32 1.442695, %v6862_v7  ;;  %v6819_v5 = vpop.xlane.xlu1 %6818 }
0x23ee   :  { %12576 = vpow2.f32 %v6882_v56  ;;  %v6865_v31 = vsub.f32 %v16738_v42, %v6819_v5  ;;  %v6816_v10 = vpop.xlane.xlu0 %6815 }
0x23ef   :  { %12578 = vpow2.f32 %v6880_v6  ;;  %v6864_v33 = vsub.f32 %v16741_v44, %v6816_v10 }
0x23f0   :  { %v6886_v17 = vmul.f32 1.442695, %v6865_v31 }
0x23f1   :  { %v6884_v14 = vmul.f32 1.442695, %v6864_v33  ;;  %v6825_v8 = vpop.xlane.xlu1 %6824 }
0x23f2   :  { %12580 = vpow2.f32 %v6886_v17  ;;  %v6867_v20 = vsub.f32 %v16748_v57, %v6825_v8  ;;  %v6822_v55 = vpop.xlane.xlu0 %6821 }
0x23f3   :  { %12582 = vpow2.f32 %v6884_v14  ;;  %v6866_v12 = vsub.f32 %v16751_v16, %v6822_v55 }
0x23f4   :  { %v6890_v30 = vmul.f32 1.442695, %v6867_v20 }
0x23f5   :  { %v6888_v54 = vmul.f32 1.442695, %v6866_v12  ;;  %v6831_v53 = vpop.xlane.xlu1 %6830 }
0x23f6   :  { %12584 = vpow2.f32 %v6890_v30  ;;  %v6869_v42 = vsub.f32 %v16758_v58, %v6831_v53  ;;  %v6828_v39 = vpop.xlane.xlu0 %6827 }
0x23f7   :  { %12586 = vpow2.f32 %v6888_v54  ;;  %v6868_v44 = vsub.f32 %v16761_v43, %v6828_v39 }
0x23f8   :  { %v16825_v7 = vpop.eup %12576  ;;  %v6894_v56 = vmul.f32 1.442695, %v6869_v42 }
0x23f9   :  { %v16827_v6 = vpop.eup %12578  ;;  %v6892_v57 = vmul.f32 1.442695, %v6868_v44  ;;  %v6837_v5 = vpop.xlane.xlu1 %6836  ;;  %v6919_v16 = vsel %vm3955_vm9, %v16825_v7, 0.0 }
0x23fa   :  { %12588 = vpow2.f32 %v6894_v56  ;;  %v6871_v31 = vsub.f32 %v16768_v38, %v6837_v5  ;;  %6920 = vadd.xlane.f32.xlu1 %v6919_v16  ;;  %v6834_v10 = vpop.xlane.xlu0 %6833  ;;  %v6916_v58 = vsel %vm3955_vm9, %v16827_v6, 0.0 }
0x23fb   :  { %12590 = vpow2.f32 %v6892_v57  ;;  %v6870_v43 = vsub.f32 %v16771_v27, %v6834_v10  ;;  %6917 = vadd.xlane.f32.xlu0 %v6916_v58 }
0x23fc   :  { %v16835_v33 = vpop.eup %12580  ;;  %v6898_v17 = vmul.f32 1.442695, %v6871_v31 }
0x23fd   :  { %v16837_v14 = vpop.eup %12582  ;;  %v6896_v8 = vmul.f32 1.442695, %v6870_v43  ;;  %v6843_v20 = vpop.xlane.xlu1 %6842  ;;  %v6925_v55 = vsel %vm3955_vm9, %v16835_v33, 0.0 }
0x23fe   :  { %12592 = vpow2.f32 %v6898_v17  ;;  %v6873_v38 = vsub.f32 %v16778_v9, %v6843_v20  ;;  %6926 = vadd.xlane.f32.xlu1 %v6925_v55  ;;  %v6840_v12 = vpop.xlane.xlu0 %6839  ;;  %v6922_v30 = vsel %vm3955_vm9, %v16837_v14, 0.0 }
0x23ff   :  { %12594 = vpow2.f32 %v6896_v8  ;;  %v6872_v27 = vsub.f32 %v16781_v41, %v6840_v12  ;;  %6923 = vadd.xlane.f32.xlu0 %v6922_v30 }
0x2400   :  { %v16845_v54 = vpop.eup %12584  ;;  %v6902_v53 = vmul.f32 1.442695, %v6873_v38 }
0x2401   :  { %v16847_v42 = vpop.eup %12586  ;;  %v6900_v39 = vmul.f32 1.442695, %v6872_v27  ;;  %v6849_v44 = vpop.xlane.xlu1 %6848  ;;  %v6931_v56 = vsel %vm3955_vm9, %v16845_v54, 0.0 }
0x2402   :  { %12596 = vpow2.f32 %v6902_v53  ;;  %v6875_v9 = vsub.f32 %v16788_v49, %v6849_v44  ;;  %6932 = vadd.xlane.f32.xlu1 %v6931_v56  ;;  %v6846_v57 = vpop.xlane.xlu0 %6845  ;;  %v6928_v5 = vsel %vm3955_vm9, %v16847_v42, 0.0 }
0x2403   :  { %12598 = vpow2.f32 %v6900_v39  ;;  %v6874_v41 = vsub.f32 %v16791_v40, %v6846_v57  ;;  %6929 = vadd.xlane.f32.xlu0 %v6928_v5 }
0x2404   :  { %v16855_v16 = vpop.eup %12588  ;;  %v6906_v31 = vmul.f32 1.442695, %v6875_v9 }
0x2405   :  { %v16857_v10 = vpop.eup %12590  ;;  %v6904_v58 = vmul.f32 1.442695, %v6874_v41  ;;  %v6855_v43 = vpop.xlane.xlu1 %6854  ;;  %v6937_v17 = vsel %vm3955_vm9, %v16855_v16, 0.0 }
0x2406   :  { %12600 = vpow2.f32 %v6906_v31  ;;  %v6877_v49 = vsub.f32 %v16798_v62, %v6855_v43  ;;  %6938 = vadd.xlane.f32.xlu1 %v6937_v17  ;;  %v6852_v8 = vpop.xlane.xlu0 %6851  ;;  %v6934_v20 = vsel %vm3955_vm9, %v16857_v10, 0.0 }
0x2407   :  { %12602 = vpow2.f32 %v6904_v58  ;;  %v6876_v40 = vsub.f32 %v16801_v3, %v6852_v8  ;;  %6935 = vadd.xlane.f32.xlu0 %v6934_v20 }
0x2408   :  { %v16865_v55 = vpop.eup %12592  ;;  %v6910_v38 = vmul.f32 1.442695, %v6877_v49 }
0x2409   :  { %v16867_v12 = vpop.eup %12594  ;;  %v6908_v30 = vmul.f32 1.442695, %v6876_v40  ;;  %v6861_v27 = vpop.xlane.xlu1 %6860  ;;  %v6943_v53 = vsel %vm3955_vm9, %v16865_v55, 0.0 }
0x240a   :  { %12604 = vpow2.f32 %v6910_v38  ;;  %v6879_v62 = vsub.f32 %v16808_v35, %v6861_v27  ;;  %6944 = vadd.xlane.f32.xlu1 %v6943_v53  ;;  %v6858_v39 = vpop.xlane.xlu0 %6857  ;;  %v6940_v44 = vsel %vm3955_vm9, %v16867_v12, 0.0 }
0x240b   :  { %12606 = vpow2.f32 %v6908_v30  ;;  %v6878_v3 = vsub.f32 %v16811_v61, %v6858_v39  ;;  %6941 = vadd.xlane.f32.xlu0 %v6940_v44 }
0x240c   :  { %v16875_v56 = vpop.eup %12596  ;;  %v6914_v9 = vmul.f32 1.442695, %v6879_v62 }
0x240d   :  { %v16877_v57 = vpop.eup %12598  ;;  %v6912_v5 = vmul.f32 1.442695, %v6878_v3  ;;  %v6949_v41 = vsel %vm3955_vm9, %v16875_v56, 0.0 }
0x240e   :  { %12608 = vpow2.f32 %v6914_v9  ;;  %6950 = vadd.xlane.f32.xlu1 %v6949_v41  ;;  %v6946_v35 = vsel %vm3955_vm9, %v16877_v57, 0.0 }
0x240f   :  { %12610 = vpow2.f32 %v6912_v5  ;;  %6947 = vadd.xlane.f32.xlu0 %v6946_v35 }
0x2410   :  { %v16883_v31 = vpop.eup %12600 }
0x2411   :  { %v16885_v61 = vpop.eup %12602  ;;  %v6955_v58 = vsel %vm3955_vm9, %v16883_v31, 0.0 }
0x2412   :  { %6956 = vadd.xlane.f32.xlu1 %v6955_v58  ;;  %v6952_v43 = vsel %vm3955_vm9, %v16885_v61, 0.0 }
0x2413   :  { %6953 = vadd.xlane.f32.xlu0 %v6952_v43 }
0x2414   :  { %v16891_v17 = vpop.eup %12604 }
0x2415   :  { %v16893_v49 = vpop.eup %12606  ;;  %v6961_v8 = vsel %vm3955_vm9, %v16891_v17, 0.0 }
0x2416   :  { %6962 = vadd.xlane.f32.xlu1 %v6961_v8  ;;  %v6958_v20 = vsel %vm3955_vm9, %v16893_v49, 0.0 }
0x2417   :  { %6959 = vadd.xlane.f32.xlu0 %v6958_v20 }
0x2418   :  { %v16899_v40 = vpop.eup %12608 }
0x2419   :  { %v16901_v38 = vpop.eup %12610  ;;  %v6967_v30 = vsel %vm3955_vm9, %v16899_v40, 0.0 }
0x241a   :  { %6968 = vadd.xlane.f32.xlu1 %v6967_v30  ;;  %v6964_v27 = vsel %vm3955_vm9, %v16901_v38, 0.0 }
0x241b   :  { %6965 = vadd.xlane.f32.xlu0 %v6964_v27 }
0x2487   :  { %v6921_v53 = vpop.xlane.xlu1 %6920 }
0x2488   :  { %12612 = vrcp.f32 %v6921_v53  ;;  %v6918_v62 = vpop.xlane.xlu0 %6917 }
0x2489   :  { %12614 = vrcp.f32 %v6918_v62 }
0x248b   :  { %v6927_v39 = vpop.xlane.xlu1 %6926 }
0x248c   :  { %12616 = vrcp.f32 %v6927_v39  ;;  %v6924_v44 = vpop.xlane.xlu0 %6923 }
0x248d   :  { %12618 = vrcp.f32 %v6924_v44 }
0x248f   :  { %v6933_v3 = vpop.xlane.xlu1 %6932 }
0x2490   :  { %12620 = vrcp.f32 %v6933_v3  ;;  %v6930_v9 = vpop.xlane.xlu0 %6929 }
0x2491   :  { %12622 = vrcp.f32 %v6930_v9 }
0x2492   :  { %v12613_v5 = vpop.eup %12612 }
0x2493   :  { %v12615_v41 = vpop.eup %12614  ;;  %v6939_v35 = vpop.xlane.xlu1 %6938  ;;  %v6989_v8 = vmul.f32 %v12613_v5, %v16825_v7 }
0x2494   :  { %12624 = vrcp.f32 %v6939_v35  ;;  %v6936_v58 = vpop.xlane.xlu0 %6935  ;;  %v6988_v43 = vmul.f32 %v12615_v41, %v16827_v6 }
0x2495   :  { %12626 = vrcp.f32 %v6936_v58 }
0x2496   :  { %v12617_v20 = vpop.eup %12616  ;;  %11289 = vmatprep.mubr.msk.f32.mxu1 %vm3955_vm9, %v6988_v43 }
0x2497   :  { %v12619_v30 = vpop.eup %12618  ;;  %v6945_v27 = vpop.xlane.xlu1 %6944  ;;  %11290 = vmatmul.mubr.msk.f32.vlgmr.msra.gmra.mrb[172].mxu1 %vm3955_vm9, %v6989_v8  ;;  %v6991_v39 = vmul.f32 %v12617_v20, %v16835_v33 }
0x2498   :  { %12628 = vrcp.f32 %v6945_v27  ;;  %v6942_v53 = vpop.xlane.xlu0 %6941  ;;  %v6990_v62 = vmul.f32 %v12619_v30, %v16837_v14 }
0x2499   :  { %12630 = vrcp.f32 %v6942_v53 }
0x249a   :  { %v12621_v44 = vpop.eup %12620  ;;  %11292 = vmatprep.mubr.msk.f32.mxu1 %vm3955_vm9, %v6990_v62 }
0x249b   :  { %v12623_v6 = vpop.eup %12622  ;;  %v6951_v7 = vpop.xlane.xlu1 %6950  ;;  %11293 = vmatmul.mubr.msk.f32.gmra.mrb[174].mxu1 %vm3955_vm9, %v6991_v39  ;;  %v6993_v5 = vmul.f32 %v12621_v44, %v16845_v54 }
0x249c   :  { %12632 = vrcp.f32 %v6951_v7  ;;  %v6948_v3 = vpop.xlane.xlu0 %6947  ;;  %v6992_v9 = vmul.f32 %v12623_v6, %v16847_v42 }
0x249d   :  { %12634 = vrcp.f32 %v6948_v3 }
0x249e   :  { %v12625_v41 = vpop.eup %12624  ;;  %11295 = vmatprep.mubr.msk.f32.mxu1 %vm3955_vm9, %v6992_v9 }
0x249f   :  { %v12627_v14 = vpop.eup %12626  ;;  %v6957_v35 = vpop.xlane.xlu1 %6956  ;;  %11296 = vmatmul.mubr.msk.f32.gmra.mrb[176].mxu1 %vm3955_vm9, %v6993_v5  ;;  %v6995_v43 = vmul.f32 %v12625_v41, %v16855_v16 }
0x24a0   :  { %12636 = vrcp.f32 %v6957_v35  ;;  %v6954_v33 = vpop.xlane.xlu0 %6953  ;;  %v6994_v58 = vmul.f32 %v12627_v14, %v16857_v10  ;;  %v9594_v14 = vld [vmem:[%s17809_s2 + $0x3d8] sm:$0xff] }
0x24a1   :  { %12638 = vrcp.f32 %v6954_v33  ;;  %v9595_v33 = vld [vmem:[%s17809_s2 + $0x3e0] sm:$0xff] }
0x24a2   :  { %v12629_v8 = vpop.eup %12628  ;;  %11298 = vmatprep.mubr.msk.f32.mxu1 %vm3955_vm9, %v6994_v58  ;;  %v9596_v58 = vld [vmem:[%s17809_s2 + $0x3e8] sm:$0xff] }
0x24a3   :  { %v12631_v42 = vpop.eup %12630  ;;  %v6963_v20 = vpop.xlane.xlu1 %6962  ;;  %11299 = vmatmul.mubr.msk.f32.gmra.mrb[178].mxu1 %vm3955_vm9, %v6995_v43  ;;  %v6997_v27 = vmul.f32 %v12629_v8, %v16865_v55  ;;  %v12086_v43 = vpack.c.bf16 %v9596_v58, %v9595_v33  ;;  %v9597_v8 = vld [vmem:[%s17809_s2 + $0x3f0] sm:$0xff] }
0x24a4   :  { %12640 = vrcp.f32 %v6963_v20  ;;  %v6960_v54 = vpop.xlane.xlu0 %6959  ;;  %v6996_v30 = vmul.f32 %v12631_v42, %v16867_v12  ;;  %v9598_v42 = vld [vmem:[%s17809_s2 + $0x3f8] sm:$0xff] }
0x24a5   :  { %12642 = vrcp.f32 %v6960_v54  ;;  %v12089_v20 = vpack.c.bf16 %v9598_v42, %v9597_v8 }
0x24a6   :  { %v12633_v53 = vpop.eup %12632  ;;  %11301 = vmatprep.mubr.msk.f32.mxu1 %vm3955_vm9, %v6996_v30 }
0x24a7   :  { %v12635_v10 = vpop.eup %12634  ;;  %v6969_v62 = vpop.xlane.xlu1 %6968  ;;  %11302 = vmatmul.mubr.msk.f32.gmra.mrb[180].mxu1 %vm3955_vm9, %v6997_v27  ;;  %v6999_v44 = vmul.f32 %v12633_v53, %v16875_v56  ;;  %v16977_v53 = vld [vmem:[%s17811_s7 + $0xa0] sm:$0xff] }
0x24a8   :  { %12644 = vrcp.f32 %v6969_v62  ;;  %v6966_v16 = vpop.xlane.xlu0 %6965  ;;  %v6998_v39 = vmul.f32 %v12635_v10, %v16877_v57 }
0x24a9   :  { %12646 = vrcp.f32 %v6966_v16 }
0x24aa   :  { %v12637_v6 = vpop.eup %12636  ;;  %11304 = vmatprep.mubr.msk.f32.mxu1 %vm3955_vm9, %v6998_v39 }
0x24ab   :  { %v12639_v12 = vpop.eup %12638  ;;  %11305 = vmatmul.mubr.msk.f32.gmra.mrb[182].mxu1 %vm3955_vm9, %v6999_v44  ;;  %v7001_v7 = vmul.f32 %v12637_v6, %v16883_v31 }
0x24ac   :  { %v7000_v55 = vmul.f32 %v12639_v12, %v16885_v61 }
0x24ae   :  { %v12641_v3 = vpop.eup %12640  ;;  %11307 = vmatprep.mubr.msk.f32.mxu1 %vm3955_vm9, %v7000_v55 }
0x24af   :  { %v12643_v9 = vpop.eup %12642  ;;  %11308 = vmatmul.mubr.msk.f32.gmra.mrb[184].mxu1 %vm3955_vm9, %v7001_v7  ;;  %v7003_v56 = vmul.f32 %v12641_v3, %v16891_v17  ;;  %v9591_v17 = vld [vmem:[%s17809_s2 + $0x3c0] sm:$0xff] }
0x24b0   :  { %v7002_v57 = vmul.f32 %v12643_v9, %v16893_v49  ;;  %v9592_v49 = vld [vmem:[%s17809_s2 + $0x3c8] sm:$0xff] }
0x24b2   :  { %v12645_v5 = vpop.eup %12644  ;;  %11310 = vmatprep.mubr.msk.f32.mxu1 %vm3955_vm9, %v7002_v57 }
0x24b3   :  { %v12647_v41 = vpop.eup %12646  ;;  %11311 = vmatmul.mubr.msk.f32.gmra.mrb[186].mxu1 %vm3955_vm9, %v7003_v56  ;;  %v7005_v31 = vmul.f32 %v12645_v5, %v16899_v40  ;;  %v12080_v40 = vpack.c.bf16 %v9592_v49, %v9591_v17 }
0x24b4   :  { %v7004_v61 = vmul.f32 %v12647_v41, %v16901_v38  ;;  %v9593_v38 = vld [vmem:[%s17809_s2 + $0x3d0] sm:$0xff] }
0x24b5   :  { %12081 = vmatpush3.bf16.msra.mxu1 %v12080_v40  ;;  %v12083_v35 = vpack.c.bf16 %v9594_v14, %v9593_v38 }
0x24b6   :  { %11313 = vmatprep.mubr.msk.f32.mxu1 %vm3955_vm9, %v7004_v61  ;;  %12082 = vmatprep.subr.bf16.mxu1 %v17871_v45 }
0x24b7   :  { %11314 = vmatmul.mubr.msk.f32.gmra.mrb[188].mxu1 %vm3955_vm9, %v7005_v31 }
0x24b8   :  { %11332 = vmatprep.mubr.msk.f32.mxu1 %vm12830_vm0, %v17872_v32 }
0x24b9   :  { %12084 = vmatpush3.bf16.msra.mxu1 %v12083_v35 }
0x24ba   :  { %12085 = vmatprep.subr.bf16.mxu1 %v17871_v45 }
0x24bd   :  { %12087 = vmatpush3.bf16.msra.mxu1 %v12086_v43 }
0x24be   :  { %12088 = vmatprep.subr.bf16.mxu1 %v17871_v45 }
0x24c1   :  { %12090 = vmatpush3.bf16.msra.mxu1 %v12089_v20 }
0x24c2   :  { %12103 = vmatprep.subr.bf16.mxu1 %v17871_v45 }
0x256a   :  { %v11291_v54 = vpop.f32.mrb[172].mxu1 }
0x256b   :  { %v7219_v30 = vmul.f32 %v16597_v11, %v11291_v54  ;;  %v7129_v27 = vpop.f32.mrb[173].mxu1  ;;  %v9717_v54 = vld [vmem:[%s17809_s2 + $0x558] sm:$0xff] }
0x256c   :  { %v7218_v10 = vmul.f32 %v16977_v53, %v7129_v27 }
0x256e   :  { %v12053_v62 = vpack.c.bf16 %v7219_v30, %v7218_v10  ;;  %v11294_v16 = vpop.f32.mrb[174].mxu1 }
0x256f   :  { %v7221_v39 = vmul.f32 %v16613_v34, %v11294_v16  ;;  %v7139_v44 = vpop.f32.mrb[175].mxu1  ;;  %v9719_v16 = vld [vmem:[%s17809_s2 + $0x568] sm:$0xff] }
0x2570   :  { %v7220_v6 = vmul.f32 %v16605_v13, %v7139_v44  ;;  %12054 = vmatpush1.bf16.msra.mxu0 %v12053_v62  ;;  %v9718_v62 = vld [vmem:[%s17809_s2 + $0x560] sm:$0xff] }
0x2571   :  { %12055 = vmatprep.subr.bf16.mxu0 %v17871_v45 }
0x2572   :  { %v12056_v12 = vpack.c.bf16 %v7221_v39, %v7220_v6  ;;  %v11297_v11 = vpop.f32.mrb[176].mxu1  ;;  %v12110_v6 = vpack.c.bf16 %v9719_v16, %v9718_v62  ;;  %v9708_v16 = vld [vmem:[%s17809_s2 + $0x510] sm:$0xff] }
0x2573   :  { %v7223_v55 = vmul.f32 %v16628_v19, %v11297_v11  ;;  %v7149_v7 = vpop.f32.mrb[177].mxu1  ;;  %v9721_v11 = vld [vmem:[%s17809_s2 + $0x578] sm:$0xff] }
0x2574   :  { %v7222_v3 = vmul.f32 %v16620_v0, %v7149_v7  ;;  %12057 = vmatpush1.bf16.msra.mxu0 %v12056_v12  ;;  %v9720_v12 = vld [vmem:[%s17809_s2 + $0x570] sm:$0xff] }
0x2575   :  { %12058 = vmatprep.subr.bf16.mxu0 %v17871_v45 }
0x2576   :  { %v12059_v9 = vpack.c.bf16 %v7223_v55, %v7222_v3  ;;  %v11300_v57 = vpop.f32.mrb[178].mxu1  ;;  %v12113_v3 = vpack.c.bf16 %v9721_v11, %v9720_v12  ;;  %v9711_v12 = vld [vmem:[%s17809_s2 + $0x528] sm:$0xff] }
0x2577   :  { %v7225_v34 = vmul.f32 %v16643_v25, %v11300_v57  ;;  %v7159_v56 = vpop.f32.mrb[179].mxu1  ;;  %v17927_v57 = vld [vmem:[#allocation17_spill] sm:$0xff] }
0x2578   :  { %v7224_v13 = vmul.f32 %v16635_v2, %v7159_v56  ;;  %12060 = vmatpush1.bf16.msra.mxu0 %v12059_v9  ;;  %v17926_v9 = vld [vmem:[#allocation16_spill] sm:$0xff]  ;;  %v9651_v56 = vld [vmem:[%s17813_s5 + $0xf] ss:$0 sm:$0xff] }
0x2579   :  { %12061 = vmatprep.subr.bf16.mxu0 %v17871_v45 }
0x257a   :  { %v12062_v5 = vpack.c.bf16 %v7225_v34, %v7224_v13  ;;  %v11303_v41 = vpop.f32.mrb[180].mxu1  ;;  %v17928_v34 = vld [vmem:[#allocation18_spill] sm:$0xff] }
0x257b   :  { %v7227_v19 = vmul.f32 %v16659_v24, %v11303_v41  ;;  %v7169_v61 = vpop.f32.mrb[181].mxu1 }
0x257c   :  { %v7226_v0 = vmul.f32 %v16650_v1, %v7169_v61  ;;  %12063 = vmatpush1.bf16.msra.mxu0 %v12062_v5 }
0x257d   :  { %12064 = vmatprep.subr.bf16.mxu0 %v17871_v45 }
0x257e   :  { %v12065_v31 = vpack.c.bf16 %v7227_v19, %v7226_v0  ;;  %v11306_v17 = vpop.f32.mrb[182].mxu1 }
0x257f   :  { %v7229_v25 = vmul.f32 %v16675_v15, %v11306_v17  ;;  %v7179_v49 = vpop.f32.mrb[183].mxu1 }
0x2580   :  { %v7228_v2 = vmul.f32 %v16666_v50, %v7179_v49  ;;  %12066 = vmatpush1.bf16.msra.mxu0 %v12065_v31 }
0x2581   :  { %12067 = vmatprep.subr.bf16.mxu0 %v17871_v45 }
0x2582   :  { %v12068_v38 = vpack.c.bf16 %v7229_v25, %v7228_v2  ;;  %v11309_v40 = vpop.f32.mrb[184].mxu1 }
0x2583   :  { %v7231_v24 = vmul.f32 %v16690_v28, %v11309_v40  ;;  %v7189_v14 = vpop.f32.mrb[185].mxu1 }
0x2584   :  { %v7230_v1 = vmul.f32 %v16681_v48, %v7189_v14  ;;  %12069 = vmatpush1.bf16.msra.mxu0 %v12068_v38 }
0x2585   :  { %12070 = vmatprep.subr.bf16.mxu0 %v17871_v45 }
0x2586   :  { %v12071_v35 = vpack.c.bf16 %v7231_v24, %v7230_v1  ;;  %v11312_v33 = vpop.f32.mrb[186].mxu1 }
0x2587   :  { %v7233_v15 = vmul.f32 %v16705_v22, %v11312_v33  ;;  %v7199_v58 = vpop.f32.mrb[187].mxu1  ;;  %v9715_v22 = vld [vmem:[%s17809_s2 + $0x548] sm:$0xff] }
0x2588   :  { %v7232_v50 = vmul.f32 %v16696_v60, %v7199_v58  ;;  %12072 = vmatpush1.bf16.msra.mxu0 %v12071_v35  ;;  %v9714_v60 = vld [vmem:[%s17809_s2 + $0x540] sm:$0xff] }
0x2589   :  { %12073 = vmatprep.subr.bf16.mxu0 %v17871_v45 }
0x258a   :  { %v12074_v43 = vpack.c.bf16 %v7233_v15, %v7232_v50  ;;  %v11315_v8 = vpop.f32.mrb[188].mxu1 }
0x258b   :  { %v7235_v28 = vmul.f32 %v16720_v47, %v11315_v8  ;;  %v7209_v42 = vpop.f32.mrb[189].mxu1  ;;  %v9716_v47 = vld [vmem:[%s17809_s2 + $0x550] sm:$0xff] }
0x258c   :  { %v7234_v48 = vmul.f32 %v16711_v26, %v7209_v42  ;;  %12075 = vmatpush1.bf16.msra.mxu0 %v12074_v43  ;;  %v12104_v26 = vpack.c.bf16 %v9715_v22, %v9714_v60  ;;  %v12107_v10 = vpack.c.bf16 %v9717_v54, %v9716_v47 }
0x258d   :  { %12076 = vmatprep.subr.bf16.mxu0 %v17871_v45 }
0x258e   :  { %v12077_v20 = vpack.c.bf16 %v7235_v28, %v7234_v48 }
0x2590   :  { %12078 = vmatpush1.bf16.msra.mxu0 %v12077_v20 }
0x2591   :  { %12091 = vmatprep.subr.bf16.mxu0 %v17871_v45 }
0x2593   :  { %7301 = vmatmul.mubr.f32.vlgmr.msra.gmra.mrb[172].mxu0 %v15439_v59 }
0x2594   :  { %9649 = vmatprep.mubr.msk.f32.mxu0 %vm4403_vm10, %v15447_v29 }
0x2597   :  { %7306 = vmatmul.mubr.f32.gmra.mrb[174].mxu0 %v15455_v51 }
0x2598   :  { %9650 = vmatprep.mubr.msk.f32.mxu0 %vm4403_vm10, %v15433_v4 }
0x259b   :  { %7311 = vmatmul.mubr.f32.gmra.mrb[176].mxu0 %v15441_v23 }
0x259c   :  { %11357 = vmatprep.mubr.msk.f32.mxu0 %vm12830_vm0, %v17872_v32 }
0x2666   :  { %v7302_v30 = vpop.f32.mrb[172].mxu0 }
0x2667   :  { %v7304_v27 = vpop.f32.mrb[173].mxu0  ;;  %11333 = vmatmul.mubr.msk.f32.vlgmr.msra.gmra.mrb[190].mxu1 %vm172_vm1, %v7302_v30 }
0x2668   :  { %12105 = vmatpush3.bf16.msra.mxu1 %v12104_v26  ;;  %11335 = vmatprep.mubr.msk.f32.mxu1 %vm12830_vm0, %v17872_v32  ;;  %v9706_v27 = vld [vmem:[%s17809_s2 + $0x500] sm:$0xff] }
0x2669   :  { %12106 = vmatprep.subr.bf16.mxu1 %v17871_v45 }
0x266a   :  { %v7307_v39 = vpop.f32.mrb[174].mxu0 }
0x266b   :  { %v7309_v44 = vpop.f32.mrb[175].mxu0  ;;  %11336 = vmatmul.mubr.msk.f32.gmra.mrb[192].mxu1 %vm172_vm1, %v7307_v39  ;;  %v9709_v39 = vld [vmem:[%s17809_s2 + $0x518] sm:$0xff] }
0x266c   :  { %12108 = vmatpush3.bf16.msra.mxu1 %v12107_v10  ;;  %11338 = vmatprep.mubr.msk.f32.mxu1 %vm12830_vm0, %v17872_v32  ;;  %v9707_v10 = vld [vmem:[%s17809_s2 + $0x508] sm:$0xff]  ;;  %v12095_v44 = vpack.c.bf16 %v9709_v39, %v9708_v16 }
0x266d   :  { %12109 = vmatprep.subr.bf16.mxu1 %v17871_v45  ;;  %v12092_v62 = vpack.c.bf16 %v9707_v10, %v9706_v27 }
0x266e   :  { %v7312_v55 = vpop.f32.mrb[176].mxu0 }
0x266f   :  { %v7314_v7 = vpop.f32.mrb[177].mxu0  ;;  %11339 = vmatmul.mubr.msk.f32.gmra.mrb[194].mxu1 %vm172_vm1, %v7312_v55  ;;  %12093 = vmatpush3.bf16.msra.mxu0 %v12092_v62  ;;  %v9712_v55 = vld [vmem:[%s17809_s2 + $0x530] sm:$0xff] }
0x2670   :  { %12111 = vmatpush3.bf16.msra.mxu1 %v12110_v6  ;;  %11382 = vmatprep.mubr.msk.f32.mxu1 %vm12830_vm0, %v17872_v32  ;;  %v9710_v6 = vld [vmem:[%s17809_s2 + $0x520] sm:$0xff]  ;;  %v9713_v7 = vld [vmem:[%s17809_s2 + $0x538] sm:$0xff] }
0x2671   :  { %12112 = vmatprep.subr.bf16.mxu1 %v17871_v45  ;;  %12094 = vmatprep.subr.bf16.mxu0 %v17871_v45  ;;  %v12098_v11 = vpack.c.bf16 %v9711_v12, %v9710_v6 }
0x2673   :  { %12096 = vmatpush3.bf16.msra.mxu0 %v12095_v44 }
0x2674   :  { %12114 = vmatpush3.bf16.msra.mxu1 %v12113_v3  ;;  %12097 = vmatprep.subr.bf16.mxu0 %v17871_v45  ;;  %v12101_v3 = vpack.c.bf16 %v9713_v7, %v9712_v55 }
0x2677   :  { %11383 = vmatmul.mubr.msk.f32.vlgmr.msra.gmra.mrb[196].mxu1 %vm172_vm1, %v17926_v9  ;;  %12099 = vmatpush3.bf16.msra.mxu0 %v12098_v11 }
0x2678   :  { %11385 = vmatprep.mubr.msk.f32.mxu1 %vm12830_vm0, %v17872_v32  ;;  %12100 = vmatprep.subr.bf16.mxu0 %v17871_v45 }
0x267b   :  { %11386 = vmatmul.mubr.msk.f32.gmra.mrb[198].mxu1 %vm172_vm1, %v17927_v57  ;;  %12102 = vmatpush3.bf16.msra.mxu0 %v12101_v3 }
0x267c   :  { %11388 = vmatprep.mubr.msk.f32.mxu1 %vm12830_vm0, %v17872_v32  ;;  %12115 = vmatprep.subr.bf16.mxu0 %v17871_v45 }
0x267f   :  { %11389 = vmatmul.mubr.msk.f32.gmra.mrb[200].mxu1 %vm172_vm1, %v17928_v34 }
0x273a   :  { %v7395_v13 = vpop.f32.mrb[190].mxu1 }
0x273b   :  { %v7396_v5 = vadd.f32 %v9651_v56, %v7395_v13  ;;  %v11334_v41 = vpop.f32.mrb[191].mxu1 }
0x273d   :  { %v7409_v19 = vadd.f32 %v7396_v5, %v16494_v18 }
0x273e   :  { %v7400_v61 = vpop.f32.mrb[192].mxu1 }
0x273f   :  { %v7401_v0 = vadd.f32 %v9651_v56, %v7400_v61  ;;  %v11337_v31 = vpop.f32.mrb[193].mxu1  ;;  %v7412_v17 = vsel %vm172_vm1, %v7409_v19, 0.0 }
0x2740   :  { %7413 = vadd.xlane.f32.xlu0 %v7412_v17 }
0x2741   :  { %v7410_v25 = vadd.f32 %v7401_v0, %v16512_v36 }
0x2742   :  { %v7405_v49 = vpop.f32.mrb[194].mxu1 }
0x2743   :  { %v7406_v2 = vadd.f32 %v9651_v56, %v7405_v49  ;;  %v11340_v38 = vpop.f32.mrb[195].mxu1  ;;  %v7415_v40 = vsel %vm172_vm1, %v7410_v25, 0.0  ;;  %v9655_v49 = vld [vmem:[%s17813_s5 + $0x10] ss:$0 sm:$0xff] }
0x2744   :  { %7416 = vadd.xlane.f32.xlu1 %v7415_v40  ;;  %v9722_v38 = vld [vmem:[%s17809_s2 + $0x580] sm:$0xff]  ;;  %v9723_v40 = vld [vmem:[%s17809_s2 + $0x588] sm:$0xff] }
0x2745   :  { %v7411_v24 = vadd.f32 %v7406_v2, %v16530_v52 }
0x2747   :  { %v7418_v14 = vsel %vm4592_vm11, %v7411_v24, 0.0 }
0x2748   :  { %7419 = vadd.xlane.f32.xlu0 %v7418_v14 }
0x274a   :  { %v7714_v18 = vpop.f32.mrb[196].mxu1 }
0x274b   :  { %v11384_v1 = vpop.f32.mrb[197].mxu1 }
0x274c   :  { %v12116_v1 = vpack.c.bf16 %v9723_v40, %v9722_v38  ;;  %v17196_v38 = vld [vmem:[%s17811_s7 + $0xc0] sm:$0xff] }
0x274e   :  { %v7719_v35 = vpop.f32.mrb[198].mxu1 }
0x274f   :  { %v12127_v33 = vpack.c.bf16 %v7719_v35, %v7714_v18  ;;  %v11387_v15 = vpop.f32.mrb[199].mxu1 }
0x2750   :  { %v9724_v15 = vld [vmem:[%s17809_s2 + $0x590] sm:$0xff] }
0x2751   :  { %12129 = vmatprep.subr.msk.bf16.mxu1 %vm13002_vm3, %v12127_v33 }
0x2752   :  { %v7724_v36 = vpop.f32.mrb[200].mxu1  ;;  %12132 = vmatpush3.bf16.xpose.msk.msra.mxu1 %vm13002_vm3, %v12127_v33 }
0x2753   :  { %v11390_v58 = vpop.f32.mrb[201].mxu1  ;;  %11420 = vmatprep.subr.msk.mxu1 %vm172_vm1, %v7724_v36 }
0x275a   :  { %11421 = vmatpush3.xpose.msk.msra.mxu1 %vm172_vm1, %v7724_v36  ;;  %v9725_v36 = vld [vmem:[%s17809_s2 + $0x598] sm:$0xff] }
0x275b   :  { %12137 = vmatprep.subr.bf16.mxu1 %v17871_v45 }
0x27cd   :  { %v7414_v52 = vpop.xlane.xlu0 %7413 }
0x27ce   :  { %v7421_v50 = vmul.f32 0.015625, %v7414_v52 }
0x27d0   :  { %v7424_v43 = vsub.f32 %v7409_v19, %v7421_v50  ;;  %v12119_v50 = vpack.c.bf16 %v9725_v36, %v9724_v15  ;;  %v17217_v15 = vld [vmem:[%s17811_s7 + $0xd8] sm:$0xff] }
0x27d1   :  { %v7417_v8 = vpop.xlane.xlu1 %7416 }
0x27d2   :  { %v7422_v28 = vmul.f32 0.015625, %v7417_v8  ;;  %v7427_v42 = vmul.f32 %v7424_v43, %v7424_v43 }
0x27d4   :  { %v7425_v48 = vsub.f32 %v7410_v25, %v7422_v28  ;;  %v7430_v20 = vsel %vm172_vm1, %v7427_v42, 0.0  ;;  %v9726_v28 = vld [vmem:[%s17809_s2 + $0x5a0] sm:$0xff]  ;;  %v9727_v42 = vld [vmem:[%s17809_s2 + $0x5a8] sm:$0xff] }
0x27d5   :  { %7431 = vadd.xlane.f32.xlu1 %v7430_v20  ;;  %v7420_v60 = vpop.xlane.xlu0 %7419  ;;  %v12122_v20 = vpack.c.bf16 %v9727_v42, %v9726_v28  ;;  %v17232_v28 = vld [vmem:[%s17811_s7 + $0xe8] sm:$0xff] }
0x27d6   :  { %v7423_v46 = vmul.f32 0.015625, %v7420_v60  ;;  %v7428_v22 = vmul.f32 %v7425_v48, %v7425_v48 }
0x27d8   :  { %v7426_v26 = vsub.f32 %v7411_v24, %v7423_v46  ;;  %v7433_v47 = vsel %vm172_vm1, %v7428_v22, 0.0  ;;  %v9656_v24 = vld [vmem:[%s17813_s5 + $0x11] ss:$0 sm:$0xff]  ;;  %v9729_v22 = vld [vmem:[%s17809_s2 + $0x5b8] sm:$0xff] }
0x27d9   :  { %7434 = vadd.xlane.f32.xlu0 %v7433_v47  ;;  %v9728_v46 = vld [vmem:[%s17809_s2 + $0x5b0] sm:$0xff] }
0x27da   :  { %v7429_v54 = vmul.f32 %v7426_v26, %v7426_v26 }
0x27dc   :  { %v7436_v30 = vsel %vm4592_vm11, %v7429_v54, 0.0 }
0x27dd   :  { %7437 = vadd.xlane.f32.xlu1 %v7436_v30 }
0x2862   :  { %v7432_v56 = vpop.xlane.xlu1 %7431 }
0x2863   :  { %v7439_v13 = vmul.f32 0.015625, %v7432_v56 }
0x2865   :  { %v7442_v5 = vadd.f32 1e-05, %v7439_v13 }
0x2866   :  { %v7435_v41 = vpop.xlane.xlu0 %7434 }
0x2867   :  { %12648 = vrsqrt.f32 %v7442_v5  ;;  %v7440_v19 = vmul.f32 0.015625, %v7435_v41  ;;  %v17177_v41 = vld [vmem:[%s17811_s7 + $0xb0] sm:$0xff] }
0x2869   :  { %v7443_v61 = vadd.f32 1e-05, %v7440_v19 }
0x286a   :  { %v7438_v0 = vpop.xlane.xlu1 %7437 }
0x286b   :  { %12650 = vrsqrt.f32 %v7443_v61  ;;  %v7441_v31 = vmul.f32 0.015625, %v7438_v0 }
0x286d   :  { %v7444_v17 = vadd.f32 1e-05, %v7441_v31  ;;  %v17185_v31 = vld [vmem:[%s17811_s7 + $0xb8] sm:$0xff] }
0x286f   :  { %12652 = vrsqrt.f32 %v7444_v17 }
0x2871   :  { %v12649_v25 = vpop.eup %12648 }
0x2872   :  { %v7448_v2 = vmul.f32 %v12649_v25, %v7424_v43 }
0x2874   :  { %v7455_v14 = vmul.f32 %v9655_v49, %v7448_v2 }
0x2875   :  { %v12651_v18 = vpop.eup %12650 }
0x2876   :  { %v7462_v35 = vadd.f32 %v9656_v24, %v7455_v14  ;;  %v7449_v33 = vmul.f32 %v12651_v18, %v7425_v48 }
0x2878   :  { %11358 = vmatmul.mubr.msk.f32.vlgmr.msra.gmra.mrb[178].mxu0 %vm172_vm1, %v7462_v35  ;;  %v7456_v58 = vmul.f32 %v9655_v49, %v7449_v33 }
0x2879   :  { %v12653_v52 = vpop.eup %12652  ;;  %12117 = vmatpush3.bf16.msra.mxu0 %v12116_v1  ;;  %11360 = vmatprep.mubr.msk.f32.mxu0 %vm12830_vm0, %v17872_v32  ;;  %v17209_v1 = vld [vmem:[%s17811_s7 + $0xd0] sm:$0xff] }
0x287a   :  { %12118 = vmatprep.subr.bf16.mxu0 %v17871_v45  ;;  %v7463_v43 = vadd.f32 %v9656_v24, %v7456_v58  ;;  %v7450_v8 = vmul.f32 %v12653_v52, %v7426_v26  ;;  %v12125_v26 = vpack.c.bf16 %v9729_v22, %v9728_v46  ;;  %v17224_v52 = vld [vmem:[%s17811_s7 + $0xe0] sm:$0xff]  ;;  %v17247_v22 = vld [vmem:[%s17811_s7 + $0xf8] sm:$0xff] }
0x287c   :  { %11361 = vmatmul.mubr.msk.f32.gmra.mrb[180].mxu0 %vm172_vm1, %v7463_v43  ;;  %v7457_v48 = vmul.f32 %v9655_v49, %v7450_v8 }
0x287d   :  { %12120 = vmatpush3.bf16.msra.mxu0 %v12119_v50  ;;  %11363 = vmatprep.mubr.msk.f32.mxu0 %vm12830_vm0, %v17872_v32 }
0x287e   :  { %12121 = vmatprep.subr.bf16.mxu0 %v17871_v45  ;;  %v7464_v60 = vadd.f32 %v9656_v24, %v7457_v48  ;;  %v17203_v24 = vld [vmem:[%s17811_s7 + $0xc8] sm:$0xff] }
0x2880   :  { %11364 = vmatmul.mubr.msk.f32.gmra.mrb[182].mxu0 %vm172_vm1, %v7464_v60 }
0x2881   :  { %12123 = vmatpush3.bf16.msra.mxu0 %v12122_v20  ;;  %11407 = vmatprep.mubr.msk.f32.mxu0 %vm12830_vm0, %v17872_v32  ;;  %v17238_v20 = vld [vmem:[%s17811_s7 + $0xf0] sm:$0xff] }
0x2882   :  { %12124 = vmatprep.subr.bf16.mxu0 %v17871_v45 }
0x2885   :  { %12126 = vmatpush3.bf16.msra.mxu0 %v12125_v26 }
0x2888   :  { %11408 = vmatmul.mubr.msk.f32.vlgmr.msra.gmra.mrb[184].mxu0 %vm172_vm1, %v17926_v9 }
0x2889   :  { %11410 = vmatprep.mubr.msk.f32.mxu0 %vm12830_vm0, %v17872_v32 }
0x288c   :  { %11411 = vmatmul.mubr.msk.f32.gmra.mrb[186].mxu0 %vm172_vm1, %v17927_v57  ;;  %v17164_v57 = vld [vmem:[%s17811_s7 + $0xa8] sm:$0xff] }
0x288d   :  { %11413 = vmatprep.mubr.msk.f32.mxu0 %vm12830_vm0, %v17872_v32 }
0x2890   :  { %11414 = vmatmul.mubr.msk.f32.gmra.mrb[188].mxu0 %vm172_vm1, %v17928_v34 }
0x294b   :  { %v7634_v47 = vpop.f32.mrb[178].mxu0 }
0x294c   :  { %v11359_v54 = vpop.f32.mrb[179].mxu0  ;;  %v7838_v30 = vmul.f32 %v16977_v53, %v7634_v47  ;;  %v7811_v27 = vrot.slane %v7634_v47, 6  ;;  %v7819_v9 = vrot.slane %v7634_v47, 4  ;;  %v7827_v10 = vrot.slane %v7634_v47, 2 }
0x294d   :  { %v7847_v42 = vmul.f32 %v17232_v28, %v7634_v47  ;;  %v17254_v47 = vld [vmem:[%s17811_s7 + $0x100] sm:$0xff] }
0x294e   :  { %11422 = vmatprep.mubr.msk.f32.mxu1 %vm172_vm1, %v7838_v30  ;;  %v17263_v30 = vld [vmem:[%s17811_s7 + $0x108] sm:$0xff] }
0x294f   :  { %v7639_v62 = vpop.f32.mrb[180].mxu0 }
0x2950   :  { %v7812_v16 = vrot.slane %v7639_v62, 6  ;;  %v7820_v39 = vrot.slane %v7639_v62, 4  ;;  %v7828_v44 = vrot.slane %v7639_v62, 2  ;;  %v7839_v34 = vmul.f32 %v17164_v57, %v7639_v62  ;;  %v11362_v6 = vpop.f32.mrb[181].mxu0 }
0x2951   :  { %v7848_v60 = vmul.f32 %v17238_v20, %v7639_v62  ;;  %v17277_v62 = vld [vmem:[%s17811_s7 + $0x118] sm:$0xff] }
0x2952   :  { %11423 = vmatmul.mubr.msk.f32.vlgmr.msra.gmra.mrb[202].mxu1 %vm172_vm1, %v7839_v34  ;;  %v7813_v53 = vsel %vm476_vm4, %v7811_v27, %v7812_v16  ;;  %v7821_v12 = vsel %vm425_vm2, %v7819_v9, %v7820_v39  ;;  %v17171_v11 = vsel %vm3633_vm8, %v7827_v10, %v7828_v44  ;;  %v17292_v34 = vld [vmem:[%s17811_s7 + $0x128] sm:$0xff] }
0x2953   :  { %v7644_v55 = vpop.f32.mrb[182].mxu0  ;;  %v7841_v17 = vmul.f32 %v17185_v31, %v7813_v53  ;;  %v7843_v14 = vmul.f32 %v17203_v24, %v7821_v12  ;;  %v7845_v36 = vmul.f32 %v17217_v15, %v17171_v11  ;;  %v7850_v54 = vmul.f32 %v17254_v47, %v7813_v53 }
0x2954   :  { %v7814_v7 = vrot.slane %v7644_v55, 6  ;;  %v7822_v3 = vrot.slane %v7644_v55, 4  ;;  %v7830_v56 = vrot.slane %v7644_v55, 2  ;;  %v7835_v13 = vsel %vm476_vm4, %v7644_v55, %v7811_v27  ;;  %v11365_v5 = vpop.f32.mrb[183].mxu0 }
0x2955   :  { %v7840_v19 = vmul.f32 %v17177_v41, %v7835_v13  ;;  %v7849_v26 = vmul.f32 %v17247_v22, %v7835_v13 }
0x2956   :  { %v7815_v61 = vsel %vm476_vm4, %v7812_v16, %v7814_v7  ;;  %v7823_v0 = vsel %vm425_vm2, %v7820_v39, %v7822_v3  ;;  %v7831_v25 = vsel %vm3633_vm8, %v7828_v44, %v7830_v56  ;;  %v17283_v39 = vld [vmem:[%s17811_s7 + $0x120] sm:$0xff]  ;;  %v17930_v7 = vld [vmem:[#allocation20_spill] sm:$0xff] }
0x2957   :  { %11425 = vmatprep.mubr.msk.f32.mxu1 %vm172_vm1, %v7840_v19  ;;  %v7836_v49 = vsel %vm425_vm2, %v7815_v61, %v7819_v9  ;;  %v7837_v2 = vsel %vm3633_vm8, %v7823_v0, %v7827_v10  ;;  %v7846_v50 = vmul.f32 %v17224_v52, %v7831_v25  ;;  %v17269_v9 = vld [vmem:[%s17811_s7 + $0x110] sm:$0xff]  ;;  %v7854_v44 = vmul.f32 %v17283_v39, %v17171_v11  ;;  %v17931_v19 = vld [vmem:[#allocation21_spill] sm:$0xff]  ;;  %v17932_v0 = vld [vmem:[#allocation22_spill] sm:$0xff] }
0x2958   :  { %11426 = vmatmul.mubr.msk.f32.gmra.mrb[204].mxu1 %vm172_vm1, %v7841_v17  ;;  %v7842_v40 = vmul.f32 %v17196_v38, %v7836_v49  ;;  %v7844_v35 = vmul.f32 %v17209_v1, %v7837_v2  ;;  %v7851_v27 = vmul.f32 %v17263_v30, %v7836_v49  ;;  %v7852_v10 = vmul.f32 %v17269_v9, %v7821_v12  ;;  %v17929_v12 = vld [vmem:[#allocation19_spill] sm:$0xff] }
0x2959   :  { %v7853_v16 = vmul.f32 %v17277_v62, %v7837_v2  ;;  %v7855_v6 = vmul.f32 %v17292_v34, %v7831_v25 }
0x295a   :  { %11428 = vmatprep.mubr.msk.f32.mxu1 %vm172_vm1, %v7842_v40  ;;  %v17933_v40 = vld [vmem:[#allocation23_spill] sm:$0xff] }
0x295b   :  { %v7794_v18 = vpop.f32.mrb[184].mxu0 }
0x295c   :  { %v11409_v33 = vpop.f32.mrb[185].mxu0  ;;  %11429 = vmatmul.mubr.msk.f32.gmra.mrb[206].mxu1 %vm172_vm1, %v7843_v14 }
0x295d   :  { %11431 = vmatprep.mubr.msk.f32.mxu1 %vm172_vm1, %v7844_v35  ;;  %v17934_v35 = vld [vmem:[#allocation24_spill] sm:$0xff] }
0x295f   :  { %v7799_v58 = vpop.f32.mrb[186].mxu0 }
0x2960   :  { %v12133_v43 = vpack.c.bf16 %v7799_v58, %v7794_v18  ;;  %v11412_v8 = vpop.f32.mrb[187].mxu0  ;;  %11432 = vmatmul.mubr.msk.f32.gmra.mrb[208].mxu1 %vm172_vm1, %v7845_v36 }
0x2961   :  { %11434 = vmatprep.mubr.msk.f32.mxu1 %vm172_vm1, %v7846_v50 }
0x2962   :  { %12134 = vmatprep.subr.bf16.mxu0 %v12133_v43 }
0x2963   :  { %v7804_v48 = vpop.f32.mrb[188].mxu0  ;;  %12136 = vmatpush3.bf16.msra.mxu0 %v12133_v43  ;;  %v17935_v43 = vld [vmem:[#allocation25_spill] sm:$0xff] }
0x2964   :  { %v11415_v46 = vpop.f32.mrb[189].mxu0  ;;  %11453 = vmatprep.subr.msk.mxu0 %vm425_vm2, %v7804_v48  ;;  %11435 = vmatmul.mubr.msk.f32.gmra.mrb[210].mxu1 %vm172_vm1, %v7847_v42 }
0x2965   :  { %11437 = vmatprep.mubr.msk.f32.mxu1 %vm172_vm1, %v7848_v60 }
0x2967   :  { %11454 = vmatpush3.msk.msra.mxu0 %vm425_vm2, %v7804_v48  ;;  %v17936_v48 = vld [vmem:[#allocation26_spill] sm:$0xff] }
0x2968   :  { %11438 = vmatmul.mubr.msk.f32.gmra.mrb[212].mxu1 %vm172_vm1, %v7849_v26  ;;  %12164 = vmatprep.subr.bf16.mxu0 %v17871_v45 }
0x2969   :  { %11440 = vmatprep.mubr.msk.f32.mxu1 %vm172_vm1, %v7850_v54 }
0x296c   :  { %11441 = vmatmul.mubr.msk.f32.gmra.mrb[214].mxu1 %vm172_vm1, %v7851_v27  ;;  %v17937_v27 = vld [vmem:[#allocation27_spill] sm:$0xff] }
0x296d   :  { %11443 = vmatprep.mubr.msk.f32.mxu1 %vm172_vm1, %v7852_v10 }
0x2970   :  { %11444 = vmatmul.mubr.msk.f32.gmra.mrb[216].mxu1 %vm172_vm1, %v7853_v16 }
0x2971   :  { %11446 = vmatprep.mubr.msk.f32.mxu1 %vm172_vm1, %v7854_v44  ;;  %v17938_v44 = vld [vmem:[#allocation28_spill] sm:$0xff] }
0x2974   :  { %11447 = vmatmul.mubr.msk.f32.gmra.mrb[218].mxu1 %vm172_vm1, %v7855_v6 }
0x2975   :  { %9787 = vmatprep.mubr.msk.f32.mxu1 %vm4403_vm10, %v15361_v37 }
0x2a25   :  { %v11424_v53 = vpop.f32.mrb[202].mxu1 }
0x2a26   :  { %v17299_v55 = vadd.f32 %v11424_v53, %v17929_v12  ;;  %v7985_v11 = vpop.f32.mrb[203].mxu1 }
0x2a27   :  { %v17302_v3 = vadd.f32 %v7985_v11, %v17930_v7  ;;  %v17939_v7 = vld [vmem:[#allocation29_spill] sm:$0xff] }
0x2a28   :  { %v8077_v56 = vsel %vm772_vm5, %v17299_v55, -inf }
0x2a29   :  { %8078 = vmax.xlane.f32.xlu1 %v8077_v56  ;;  %v8074_v13 = vsel %vm772_vm5, %v17302_v3, -inf }
0x2a2a   :  { %8075 = vmax.xlane.f32.xlu0 %v8074_v13 }
0x2a2b   :  { %v11427_v5 = vpop.f32.mrb[204].mxu1 }
0x2a2c   :  { %v17309_v61 = vadd.f32 %v11427_v5, %v17931_v19  ;;  %v7995_v37 = vpop.f32.mrb[205].mxu1  ;;  %v17940_v5 = vld [vmem:[#allocation30_spill] sm:$0xff] }
0x2a2d   :  { %v17312_v17 = vadd.f32 %v7995_v37, %v17932_v0 }
0x2a2e   :  { %v8083_v25 = vsel %vm772_vm5, %v17309_v61, -inf }
0x2a2f   :  { %8084 = vmax.xlane.f32.xlu1 %v8083_v25  ;;  %v11430_v49 = vpop.f32.mrb[206].mxu1  ;;  %v8080_v2 = vsel %vm772_vm5, %v17312_v17, -inf }
0x2a30   :  { %v17319_v14 = vadd.f32 %v11430_v49, %v17933_v40  ;;  %8081 = vmax.xlane.f32.xlu0 %v8080_v2  ;;  %v8005_v18 = vpop.f32.mrb[207].mxu1  ;;  %v17941_v49 = vld [vmem:[#allocation31_spill] sm:$0xff] }
0x2a31   :  { %v17322_v33 = vadd.f32 %v8005_v18, %v17934_v35  ;;  %v17942_v18 = vld [vmem:[#allocation32_spill] sm:$0xff] }
0x2a32   :  { %v8089_v36 = vsel %vm772_vm5, %v17319_v14, -inf }
0x2a33   :  { %8090 = vmax.xlane.f32.xlu1 %v8089_v36  ;;  %v11433_v58 = vpop.f32.mrb[208].mxu1  ;;  %v8086_v50 = vsel %vm772_vm5, %v17322_v33, -inf }
0x2a34   :  { %v17329_v8 = vadd.f32 %v11433_v58, %v17935_v43  ;;  %v8015_v42 = vpop.f32.mrb[209].mxu1  ;;  %8087 = vmax.xlane.f32.xlu0 %v8086_v50  ;;  %v17943_v43 = vld [vmem:[#allocation33_spill] sm:$0xff] }
0x2a35   :  { %v17332_v60 = vadd.f32 %v8015_v42, %v17936_v48 }
0x2a36   :  { %v8095_v46 = vsel %vm772_vm5, %v17329_v8, -inf }
0x2a37   :  { %8096 = vmax.xlane.f32.xlu1 %v8095_v46  ;;  %v11436_v26 = vpop.f32.mrb[210].mxu1  ;;  %v8092_v54 = vsel %vm772_vm5, %v17332_v60, -inf  ;;  %v17944_v46 = vld [vmem:[#allocation34_spill] sm:$0xff] }
0x2a38   :  { %v17339_v10 = vadd.f32 %v11436_v26, %v17937_v27  ;;  %v8025_v16 = vpop.f32.mrb[211].mxu1  ;;  %8093 = vmax.xlane.f32.xlu0 %v8092_v54 }
0x2a39   :  { %v17342_v6 = vadd.f32 %v8025_v16, %v17938_v44  ;;  %v17945_v44 = vld [vmem:[#allocation35_spill] sm:$0xff] }
0x2a3a   :  { %v8101_v53 = vsel %vm772_vm5, %v17339_v10, -inf }
0x2a3b   :  { %8102 = vmax.xlane.f32.xlu1 %v8101_v53  ;;  %v11439_v12 = vpop.f32.mrb[212].mxu1  ;;  %v8098_v11 = vsel %vm772_vm5, %v17342_v6, -inf }
0x2a3c   :  { %v17349_v56 = vadd.f32 %v11439_v12, %v17939_v7  ;;  %v8035_v13 = vpop.f32.mrb[213].mxu1  ;;  %8099 = vmax.xlane.f32.xlu0 %v8098_v11  ;;  %v17946_v11 = vld [vmem:[#allocation36_spill] sm:$0xff] }
0x2a3d   :  { %v17352_v19 = vadd.f32 %v8035_v13, %v17940_v5 }
0x2a3e   :  { %v8107_v37 = vsel %vm772_vm5, %v17349_v56, -inf }
0x2a3f   :  { %8108 = vmax.xlane.f32.xlu1 %v8107_v37  ;;  %v11442_v0 = vpop.f32.mrb[214].mxu1  ;;  %v8104_v25 = vsel %vm772_vm5, %v17352_v19, -inf }
0x2a40   :  { %v17359_v2 = vadd.f32 %v11442_v0, %v17941_v49  ;;  %v8045_v40 = vpop.f32.mrb[215].mxu1  ;;  %8105 = vmax.xlane.f32.xlu0 %v8104_v25 }
0x2a41   :  { %v17362_v35 = vadd.f32 %v8045_v40, %v17942_v18 }
0x2a42   :  { %v8113_v36 = vsel %vm772_vm5, %v17359_v2, -inf }
0x2a43   :  { %8114 = vmax.xlane.f32.xlu1 %v8113_v36  ;;  %v11445_v58 = vpop.f32.mrb[216].mxu1  ;;  %v8110_v50 = vsel %vm772_vm5, %v17362_v35, -inf }
0x2a44   :  { %v17369_v42 = vadd.f32 %v11445_v58, %v17943_v43  ;;  %v8055_v48 = vpop.f32.mrb[217].mxu1  ;;  %8111 = vmax.xlane.f32.xlu0 %v8110_v50 }
0x2a45   :  { %v17372_v26 = vadd.f32 %v8055_v48, %v17944_v46 }
0x2a46   :  { %v8119_v54 = vsel %vm772_vm5, %v17369_v42, -inf }
0x2a47   :  { %8120 = vmax.xlane.f32.xlu1 %v8119_v54  ;;  %v11448_v27 = vpop.f32.mrb[218].mxu1  ;;  %v8116_v16 = vsel %vm772_vm5, %v17372_v26, -inf }
0x2a48   :  { %v17379_v53 = vadd.f32 %v11448_v27, %v17945_v44  ;;  %v8065_v12 = vpop.f32.mrb[219].mxu1  ;;  %8117 = vmax.xlane.f32.xlu0 %v8116_v16 }
0x2a49   :  { %v17382_v7 = vadd.f32 %v8065_v12, %v17946_v11 }
0x2a4a   :  { %v8125_v13 = vsel %vm772_vm5, %v17379_v53, -inf }
0x2a4b   :  { %8126 = vmax.xlane.f32.xlu1 %v8125_v13  ;;  %v8122_v5 = vsel %vm772_vm5, %v17382_v7, -inf }
0x2a4c   :  { %8123 = vmax.xlane.f32.xlu0 %v8122_v5 }
0x2ab6   :  { %v8079_v37 = vpop.xlane.xlu1 %8078 }
0x2ab7   :  { %v8129_v0 = vsub.f32 %v17299_v55, %v8079_v37  ;;  %v8076_v25 = vpop.xlane.xlu0 %8075 }
0x2ab8   :  { %v8128_v49 = vsub.f32 %v17302_v3, %v8076_v25 }
0x2ab9   :  { %v8148_v40 = vmul.f32 1.442695, %v8129_v0 }
0x2aba   :  { %v8146_v18 = vmul.f32 1.442695, %v8128_v49 }
0x2abb   :  { %12654 = vpow2.f32 %v8148_v40 }
0x2abc   :  { %12656 = vpow2.f32 %v8146_v18  ;;  %v8085_v36 = vpop.xlane.xlu1 %8084 }
0x2abd   :  { %v8131_v58 = vsub.f32 %v17309_v61, %v8085_v36  ;;  %v8082_v50 = vpop.xlane.xlu0 %8081 }
0x2abe   :  { %v8130_v43 = vsub.f32 %v17312_v17, %v8082_v50 }
0x2abf   :  { %v8152_v48 = vmul.f32 1.442695, %v8131_v58 }
0x2ac0   :  { %v8150_v46 = vmul.f32 1.442695, %v8130_v43  ;;  %v8091_v54 = vpop.xlane.xlu1 %8090 }
0x2ac1   :  { %12658 = vpow2.f32 %v8152_v48  ;;  %v8133_v27 = vsub.f32 %v17319_v14, %v8091_v54  ;;  %v8088_v55 = vpop.xlane.xlu0 %8087 }
0x2ac2   :  { %12660 = vpow2.f32 %v8150_v46  ;;  %v8132_v3 = vsub.f32 %v17322_v33, %v8088_v55 }
0x2ac3   :  { %v8156_v16 = vmul.f32 1.442695, %v8133_v27 }
0x2ac4   :  { %v8154_v44 = vmul.f32 1.442695, %v8132_v3  ;;  %v8097_v12 = vpop.xlane.xlu1 %8096 }
0x2ac5   :  { %v17394_v11 = vpop.eup %12654  ;;  %12662 = vpow2.f32 %v8156_v16  ;;  %v8135_v61 = vsub.f32 %v17329_v8, %v8097_v12  ;;  %v8094_v13 = vpop.xlane.xlu0 %8093 }
0x2ac6   :  { %v17397_v17 = vpop.eup %12656  ;;  %12664 = vpow2.f32 %v8154_v44  ;;  %v8134_v5 = vsub.f32 %v17332_v60, %v8094_v13  ;;  %v8185_v14 = vsel %vm772_vm5, %v17394_v11, 0.0 }
0x2ac7   :  { %v8160_v37 = vmul.f32 1.442695, %v8135_v61  ;;  %8186 = vadd.xlane.f32.xlu1 %v8185_v14  ;;  %v8182_v33 = vsel %vm772_vm5, %v17397_v17, 0.0 }
0x2ac8   :  { %v8158_v0 = vmul.f32 1.442695, %v8134_v5  ;;  %v8103_v25 = vpop.xlane.xlu1 %8102  ;;  %8183 = vadd.xlane.f32.xlu0 %v8182_v33 }
0x2ac9   :  { %12666 = vpow2.f32 %v8160_v37  ;;  %v8137_v8 = vsub.f32 %v17339_v10, %v8103_v25  ;;  %v8100_v49 = vpop.xlane.xlu0 %8099 }
0x2aca   :  { %12668 = vpow2.f32 %v8158_v0  ;;  %v8136_v40 = vsub.f32 %v17342_v6, %v8100_v49 }
0x2acb   :  { %v17406_v18 = vpop.eup %12658  ;;  %v8164_v60 = vmul.f32 1.442695, %v8137_v8 }
0x2acc   :  { %v17408_v36 = vpop.eup %12660  ;;  %v8162_v58 = vmul.f32 1.442695, %v8136_v40  ;;  %v8109_v50 = vpop.xlane.xlu1 %8108  ;;  %v8191_v43 = vsel %vm772_vm5, %v17406_v18, 0.0 }
0x2acd   :  { %12670 = vpow2.f32 %v8164_v60  ;;  %v8139_v48 = vsub.f32 %v17349_v56, %v8109_v50  ;;  %8192 = vadd.xlane.f32.xlu1 %v8191_v43  ;;  %v8106_v46 = vpop.xlane.xlu0 %8105  ;;  %v8188_v10 = vsel %vm772_vm5, %v17408_v36, 0.0 }
0x2ace   :  { %12672 = vpow2.f32 %v8162_v58  ;;  %v8138_v6 = vsub.f32 %v17352_v19, %v8106_v46  ;;  %8189 = vadd.xlane.f32.xlu0 %v8188_v10 }
0x2acf   :  { %v17416_v54 = vpop.eup %12662  ;;  %v8168_v27 = vmul.f32 1.442695, %v8139_v48 }
0x2ad0   :  { %v17418_v55 = vpop.eup %12664  ;;  %v8166_v3 = vmul.f32 1.442695, %v8138_v6  ;;  %v8115_v16 = vpop.xlane.xlu1 %8114  ;;  %v8197_v44 = vsel %vm772_vm5, %v17416_v54, 0.0 }
0x2ad1   :  { %12674 = vpow2.f32 %v8168_v27  ;;  %v8141_v56 = vsub.f32 %v17359_v2, %v8115_v16  ;;  %8198 = vadd.xlane.f32.xlu1 %v8197_v44  ;;  %v8112_v12 = vpop.xlane.xlu0 %8111  ;;  %v8194_v61 = vsel %vm772_vm5, %v17418_v55, 0.0 }
0x2ad2   :  { %12676 = vpow2.f32 %v8166_v3  ;;  %v8140_v19 = vsub.f32 %v17362_v35, %v8112_v12  ;;  %8195 = vadd.xlane.f32.xlu0 %v8194_v61 }
0x2ad3   :  { %v17426_v13 = vpop.eup %12666  ;;  %v8172_v5 = vmul.f32 1.442695, %v8141_v56 }
0x2ad4   :  { %v17428_v14 = vpop.eup %12668  ;;  %v8170_v37 = vmul.f32 1.442695, %v8140_v19  ;;  %v8121_v33 = vpop.xlane.xlu1 %8120  ;;  %v8203_v0 = vsel %vm772_vm5, %v17426_v13, 0.0 }
0x2ad5   :  { %12678 = vpow2.f32 %v8172_v5  ;;  %v8143_v2 = vsub.f32 %v17369_v42, %v8121_v33  ;;  %8204 = vadd.xlane.f32.xlu1 %v8203_v0  ;;  %v8118_v25 = vpop.xlane.xlu0 %8117  ;;  %v8200_v8 = vsel %vm772_vm5, %v17428_v14, 0.0 }
0x2ad6   :  { %12680 = vpow2.f32 %v8170_v37  ;;  %v8142_v35 = vsub.f32 %v17372_v26, %v8118_v25  ;;  %8201 = vadd.xlane.f32.xlu0 %v8200_v8 }
0x2ad7   :  { %v17436_v49 = vpop.eup %12670  ;;  %v8176_v40 = vmul.f32 1.442695, %v8143_v2 }
0x2ad8   :  { %v17438_v60 = vpop.eup %12672  ;;  %v8174_v58 = vmul.f32 1.442695, %v8142_v35  ;;  %v8127_v50 = vpop.xlane.xlu1 %8126  ;;  %v8209_v43 = vsel %vm772_vm5, %v17436_v49, 0.0 }
0x2ad9   :  { %12682 = vpow2.f32 %v8176_v40  ;;  %v8145_v42 = vsub.f32 %v17379_v53, %v8127_v50  ;;  %8210 = vadd.xlane.f32.xlu1 %v8209_v43  ;;  %v8124_v48 = vpop.xlane.xlu0 %8123  ;;  %v8206_v46 = vsel %vm772_vm5, %v17438_v60, 0.0 }
0x2ada   :  { %12684 = vpow2.f32 %v8174_v58  ;;  %v8144_v26 = vsub.f32 %v17382_v7, %v8124_v48  ;;  %8207 = vadd.xlane.f32.xlu0 %v8206_v46 }
0x2adb   :  { %v17446_v10 = vpop.eup %12674  ;;  %v8180_v6 = vmul.f32 1.442695, %v8145_v42 }
0x2adc   :  { %v17448_v27 = vpop.eup %12676  ;;  %v8178_v3 = vmul.f32 1.442695, %v8144_v26  ;;  %v8215_v16 = vsel %vm772_vm5, %v17446_v10, 0.0 }
0x2add   :  { %12686 = vpow2.f32 %v8180_v6  ;;  %8216 = vadd.xlane.f32.xlu1 %v8215_v16  ;;  %v8212_v53 = vsel %vm772_vm5, %v17448_v27, 0.0 }
0x2ade   :  { %12688 = vpow2.f32 %v8178_v3  ;;  %8213 = vadd.xlane.f32.xlu0 %v8212_v53 }
0x2adf   :  { %v17454_v44 = vpop.eup %12678 }
0x2ae0   :  { %v17456_v7 = vpop.eup %12680  ;;  %v8221_v56 = vsel %vm772_vm5, %v17454_v44, 0.0 }
0x2ae1   :  { %8222 = vadd.xlane.f32.xlu1 %v8221_v56  ;;  %v8218_v12 = vsel %vm772_vm5, %v17456_v7, 0.0 }
0x2ae2   :  { %8219 = vadd.xlane.f32.xlu0 %v8218_v12 }
0x2ae3   :  { %v17462_v61 = vpop.eup %12682 }
0x2ae4   :  { %v17464_v19 = vpop.eup %12684  ;;  %v8227_v5 = vsel %vm772_vm5, %v17462_v61, 0.0 }
0x2ae5   :  { %8228 = vadd.xlane.f32.xlu1 %v8227_v5  ;;  %v8224_v37 = vsel %vm772_vm5, %v17464_v19, 0.0 }
0x2ae6   :  { %8225 = vadd.xlane.f32.xlu0 %v8224_v37 }
0x2ae7   :  { %v17470_v33 = vpop.eup %12686 }
0x2ae8   :  { %v17472_v0 = vpop.eup %12688  ;;  %v8233_v2 = vsel %vm772_vm5, %v17470_v33, 0.0 }
0x2ae9   :  { %8234 = vadd.xlane.f32.xlu1 %v8233_v2  ;;  %v8230_v25 = vsel %vm772_vm5, %v17472_v0, 0.0 }
0x2aea   :  { %8231 = vadd.xlane.f32.xlu0 %v8230_v25 }
0x2b54   :  { %v8187_v8 = vpop.xlane.xlu1 %8186 }
0x2b55   :  { %12690 = vrcp.f32 %v8187_v8  ;;  %v8184_v35 = vpop.xlane.xlu0 %8183 }
0x2b56   :  { %12692 = vrcp.f32 %v8184_v35 }
0x2b5a   :  { %v8193_v40 = vpop.xlane.xlu1 %8192 }
0x2b5b   :  { %12694 = vrcp.f32 %v8193_v40  ;;  %v8190_v58 = vpop.xlane.xlu0 %8189 }
0x2b5c   :  { %12696 = vrcp.f32 %v8190_v58 }
0x2b5e   :  { %v8199_v50 = vpop.xlane.xlu1 %8198 }
0x2b5f   :  { %v12691_v43 = vpop.eup %12690  ;;  %12698 = vrcp.f32 %v8199_v50  ;;  %v8196_v42 = vpop.xlane.xlu0 %8195 }
0x2b60   :  { %v12693_v48 = vpop.eup %12692  ;;  %12700 = vrcp.f32 %v8196_v42  ;;  %v8255_v26 = vmul.f32 %v12691_v43, %v17394_v11 }
0x2b61   :  { %v8254_v46 = vmul.f32 %v12693_v48, %v17397_v17 }
0x2b62   :  { %v8205_v6 = vpop.xlane.xlu1 %8204 }
0x2b63   :  { %12702 = vrcp.f32 %v8205_v6  ;;  %11455 = vmatprep.mubr.msk.f32.mxu0 %vm772_vm5, %v8254_v46  ;;  %v8202_v3 = vpop.xlane.xlu0 %8201 }
0x2b64   :  { %12704 = vrcp.f32 %v8202_v3  ;;  %11456 = vmatmul.mubr.msk.f32.vlgmr.msra.gmra.mrb[190].mxu0 %vm772_vm5, %v8255_v26 }
0x2b65   :  { %v12695_v16 = vpop.eup %12694 }
0x2b66   :  { %v12697_v53 = vpop.eup %12696  ;;  %v8211_v56 = vpop.xlane.xlu1 %8210  ;;  %v8257_v17 = vmul.f32 %v12695_v16, %v17406_v18 }
0x2b67   :  { %12706 = vrcp.f32 %v8211_v56  ;;  %v8208_v12 = vpop.xlane.xlu0 %8207  ;;  %v8256_v5 = vmul.f32 %v12697_v53, %v17408_v36 }
0x2b68   :  { %12708 = vrcp.f32 %v8208_v12 }
0x2b69   :  { %v12699_v37 = vpop.eup %12698  ;;  %11458 = vmatprep.mubr.msk.f32.mxu0 %vm772_vm5, %v8256_v5 }
0x2b6a   :  { %v12701_v11 = vpop.eup %12700  ;;  %v8217_v2 = vpop.xlane.xlu1 %8216  ;;  %11459 = vmatmul.mubr.msk.f32.gmra.mrb[192].mxu0 %vm772_vm5, %v8257_v17  ;;  %v8259_v35 = vmul.f32 %v12699_v37, %v17416_v54 }
0x2b6b   :  { %12710 = vrcp.f32 %v8217_v2  ;;  %v8214_v25 = vpop.xlane.xlu0 %8213  ;;  %v8258_v8 = vmul.f32 %v12701_v11, %v17418_v55  ;;  %v9733_v2 = vld [vmem:[%s17809_s2 + $0x5d8] sm:$0xff] }
0x2b6c   :  { %12712 = vrcp.f32 %v8214_v25 }
0x2b6d   :  { %v12703_v40 = vpop.eup %12702  ;;  %11461 = vmatprep.mubr.msk.f32.mxu0 %vm772_vm5, %v8258_v8  ;;  %v9734_v8 = vld [vmem:[%s17809_s2 + $0x5e0] sm:$0xff] }
0x2b6e   :  { %v12705_v36 = vpop.eup %12704  ;;  %v8223_v58 = vpop.xlane.xlu1 %8222  ;;  %11462 = vmatmul.mubr.msk.f32.gmra.mrb[194].mxu0 %vm772_vm5, %v8259_v35  ;;  %v8261_v43 = vmul.f32 %v12703_v40, %v17426_v13  ;;  %v9735_v35 = vld [vmem:[%s17809_s2 + $0x5e8] sm:$0xff] }
0x2b6f   :  { %12714 = vrcp.f32 %v8223_v58  ;;  %v8220_v18 = vpop.xlane.xlu0 %8219  ;;  %v8260_v50 = vmul.f32 %v12705_v36, %v17428_v14  ;;  %v12171_v40 = vpack.c.bf16 %v9735_v35, %v9734_v8  ;;  %v9736_v36 = vld [vmem:[%s17809_s2 + $0x5f0] sm:$0xff]  ;;  %v9737_v58 = vld [vmem:[%s17809_s2 + $0x5f8] sm:$0xff] }
0x2b70   :  { %12716 = vrcp.f32 %v8220_v18  ;;  %v12174_v18 = vpack.c.bf16 %v9737_v58, %v9736_v36 }
0x2b71   :  { %v12707_v42 = vpop.eup %12706  ;;  %11464 = vmatprep.mubr.msk.f32.mxu0 %vm772_vm5, %v8260_v50 }
0x2b72   :  { %v12709_v55 = vpop.eup %12708  ;;  %v8229_v48 = vpop.xlane.xlu1 %8228  ;;  %11465 = vmatmul.mubr.msk.f32.gmra.mrb[196].mxu0 %vm772_vm5, %v8261_v43  ;;  %v8263_v26 = vmul.f32 %v12707_v42, %v17436_v49 }
0x2b73   :  { %12718 = vrcp.f32 %v8229_v48  ;;  %v8226_v54 = vpop.xlane.xlu0 %8225  ;;  %v8262_v46 = vmul.f32 %v12709_v55, %v17438_v60  ;;  %v12828_v55 = vld [vmem:[%s17811_s7 + $0xa0] sm:$0xff] }
0x2b74   :  { %12720 = vrcp.f32 %v8226_v54 }
0x2b75   :  { %v12711_v6 = vpop.eup %12710  ;;  %11467 = vmatprep.mubr.msk.f32.mxu0 %vm772_vm5, %v8262_v46 }
0x2b76   :  { %v12713_v14 = vpop.eup %12712  ;;  %v8235_v3 = vpop.xlane.xlu1 %8234  ;;  %11468 = vmatmul.mubr.msk.f32.gmra.mrb[198].mxu0 %vm772_vm5, %v8263_v26  ;;  %v8265_v53 = vmul.f32 %v12711_v6, %v17446_v10 }
0x2b77   :  { %12722 = vrcp.f32 %v8235_v3  ;;  %v8232_v13 = vpop.xlane.xlu0 %8231  ;;  %v8264_v16 = vmul.f32 %v12713_v14, %v17448_v27 }
0x2b78   :  { %12724 = vrcp.f32 %v8232_v13 }
0x2b79   :  { %v12715_v56 = vpop.eup %12714  ;;  %11470 = vmatprep.mubr.msk.f32.mxu0 %vm772_vm5, %v8264_v16 }
0x2b7a   :  { %v12717_v60 = vpop.eup %12716  ;;  %11471 = vmatmul.mubr.msk.f32.gmra.mrb[200].mxu0 %vm772_vm5, %v8265_v53  ;;  %v8267_v12 = vmul.f32 %v12715_v56, %v17454_v44 }
0x2b7b   :  { %v8266_v49 = vmul.f32 %v12717_v60, %v17456_v7 }
0x2b7d   :  { %v12719_v5 = vpop.eup %12718  ;;  %11473 = vmatprep.mubr.msk.f32.mxu0 %vm772_vm5, %v8266_v49 }
0x2b7e   :  { %v12721_v17 = vpop.eup %12720  ;;  %11474 = vmatmul.mubr.msk.f32.gmra.mrb[202].mxu0 %vm772_vm5, %v8267_v12  ;;  %v8269_v10 = vmul.f32 %v12719_v5, %v17462_v61  ;;  %v9730_v61 = vld [vmem:[%s17809_s2 + $0x5c0] sm:$0xff] }
0x2b7f   :  { %v8268_v27 = vmul.f32 %v12721_v17, %v17464_v19  ;;  %v9731_v19 = vld [vmem:[%s17809_s2 + $0x5c8] sm:$0xff] }
0x2b81   :  { %v12723_v37 = vpop.eup %12722  ;;  %11476 = vmatprep.mubr.msk.f32.mxu0 %vm772_vm5, %v8268_v27 }
0x2b82   :  { %v12725_v11 = vpop.eup %12724  ;;  %11477 = vmatmul.mubr.msk.f32.gmra.mrb[204].mxu0 %vm772_vm5, %v8269_v10  ;;  %v8271_v44 = vmul.f32 %v12723_v37, %v17470_v33  ;;  %v12165_v33 = vpack.c.bf16 %v9731_v19, %v9730_v61 }
0x2b83   :  { %v8270_v7 = vmul.f32 %v12725_v11, %v17472_v0  ;;  %v9732_v0 = vld [vmem:[%s17809_s2 + $0x5d0] sm:$0xff] }
0x2b84   :  { %12166 = vmatpush3.bf16.msra.mxu0 %v12165_v33  ;;  %v12168_v25 = vpack.c.bf16 %v9733_v2, %v9732_v0 }
0x2b85   :  { %11479 = vmatprep.mubr.msk.f32.mxu0 %vm772_vm5, %v8270_v7  ;;  %12167 = vmatprep.subr.bf16.mxu0 %v17871_v45 }
0x2b86   :  { %11480 = vmatmul.mubr.msk.f32.gmra.mrb[206].mxu0 %vm772_vm5, %v8271_v44 }
0x2b87   :  { %11498 = vmatprep.mubr.msk.f32.mxu0 %vm12830_vm0, %v17872_v32 }
0x2b88   :  { %12169 = vmatpush3.bf16.msra.mxu0 %v12168_v25 }
0x2b89   :  { %12170 = vmatprep.subr.bf16.mxu0 %v17871_v45 }
0x2b8c   :  { %12172 = vmatpush3.bf16.msra.mxu0 %v12171_v40 }
0x2b8d   :  { %12173 = vmatprep.subr.bf16.mxu0 %v17871_v45 }
0x2b90   :  { %12175 = vmatpush3.bf16.msra.mxu0 %v12174_v18 }
0x2c37   :  { %v11457_v50 = vpop.f32.mrb[190].mxu0 }
0x2c38   :  { %v8485_v43 = vmul.f32 %v17164_v57, %v11457_v50  ;;  %v8395_v42 = vpop.f32.mrb[191].mxu0 }
0x2c39   :  { %v8484_v48 = vmul.f32 %v12828_v55, %v8395_v42 }
0x2c3b   :  { %v12138_v54 = vpack.c.bf16 %v8485_v43, %v8484_v48 }
0x2c3d   :  { %v11460_v46 = vpop.f32.mrb[192].mxu0  ;;  %12139 = vmatpush1.bf16.msra.mxu1 %v12138_v54 }
0x2c3e   :  { %v8487_v26 = vmul.f32 %v17185_v31, %v11460_v46  ;;  %v8405_v6 = vpop.f32.mrb[193].mxu0  ;;  %12140 = vmatprep.subr.bf16.mxu1 %v17871_v45 }
0x2c3f   :  { %v8486_v14 = vmul.f32 %v17177_v41, %v8405_v6 }
0x2c41   :  { %v12141_v3 = vpack.c.bf16 %v8487_v26, %v8486_v14  ;;  %v11463_v13 = vpop.f32.mrb[194].mxu0 }
0x2c42   :  { %v8489_v57 = vmul.f32 %v17203_v24, %v11463_v13  ;;  %v8415_v16 = vpop.f32.mrb[195].mxu0 }
0x2c43   :  { %v8488_v53 = vmul.f32 %v17196_v38, %v8415_v16  ;;  %12142 = vmatpush1.bf16.msra.mxu1 %v12141_v3 }
0x2c44   :  { %12143 = vmatprep.subr.bf16.mxu1 %v17871_v45 }
0x2c45   :  { %v12144_v56 = vpack.c.bf16 %v8489_v57, %v8488_v53  ;;  %v11466_v60 = vpop.f32.mrb[196].mxu0 }
0x2c46   :  { %v8491_v49 = vmul.f32 %v17217_v15, %v11466_v60  ;;  %v8425_v31 = vpop.f32.mrb[197].mxu0 }
0x2c47   :  { %v8490_v12 = vmul.f32 %v17209_v1, %v8425_v31  ;;  %12145 = vmatpush1.bf16.msra.mxu1 %v12144_v56 }
0x2c48   :  { %12146 = vmatprep.subr.bf16.mxu1 %v17871_v45 }
0x2c49   :  { %v12147_v41 = vpack.c.bf16 %v8491_v49, %v8490_v12  ;;  %v11469_v5 = vpop.f32.mrb[198].mxu0 }
0x2c4a   :  { %v8493_v24 = vmul.f32 %v17232_v28, %v11469_v5  ;;  %v8435_v17 = vpop.f32.mrb[199].mxu0  ;;  %v9660_v5 = vld [vmem:[%s17814_s3 + $0x198] sm:$0xff] }
0x2c4b   :  { %v8492_v38 = vmul.f32 %v17224_v52, %v8435_v17  ;;  %12148 = vmatpush1.bf16.msra.mxu1 %v12147_v41  ;;  %v9658_v41 = vld [vmem:[%s17814_s3 + $0x188] sm:$0xff]  ;;  %v9657_v17 = vld [vmem:[%s17814_s3 + $0x180] sm:$0xff] }
0x2c4c   :  { %12149 = vmatprep.subr.bf16.mxu1 %v17871_v45 }
0x2c4d   :  { %v12150_v27 = vpack.c.bf16 %v8493_v24, %v8492_v38  ;;  %v11472_v10 = vpop.f32.mrb[200].mxu0  ;;  %v12176_v24 = vpack.c.bf16 %v9660_v5, %v9658_v41  ;;  %v9659_v38 = vld [vmem:[%s17814_s3 + $0x190] sm:$0xff]  ;;  %v9684_v41 = vld [vmem:[%s17815_s4 + $0x358] sm:$0xff]  ;;  %v9701_v5 = vld [vmem:[%s17815_s4 + $0x3e0] sm:$0xff] }
0x2c4e   :  { %v8495_v15 = vmul.f32 %v17247_v22, %v11472_v10  ;;  %v8445_v37 = vpop.f32.mrb[201].mxu0  ;;  %v9662_v10 = vld [vmem:[%s17814_s3 + $0x1a8] sm:$0xff] }
0x2c4f   :  { %v8494_v1 = vmul.f32 %v17238_v20, %v8445_v37  ;;  %12151 = vmatpush1.bf16.msra.mxu1 %v12150_v27  ;;  %v12178_v27 = vpack.c.bf16 %v9659_v38, %v9657_v17 }
0x2c50   :  { %12152 = vmatprep.subr.bf16.mxu1 %v17871_v45 }
0x2c51   :  { %v12153_v11 = vpack.c.bf16 %v8495_v15, %v8494_v1  ;;  %v11475_v7 = vpop.f32.mrb[202].mxu0  ;;  %v9664_v15 = vld [vmem:[%s17814_s3 + $0x1b8] sm:$0xff]  ;;  %v9661_v1 = vld [vmem:[%s17814_s3 + $0x1a0] sm:$0xff] }
0x2c52   :  { %v8497_v28 = vmul.f32 %v17263_v30, %v11475_v7  ;;  %v8455_v44 = vpop.f32.mrb[203].mxu0  ;;  %v12180_v37 = vpack.c.bf16 %v9664_v15, %v9662_v10 }
0x2c53   :  { %v8496_v52 = vmul.f32 %v17254_v47, %v8455_v44  ;;  %12154 = vmatpush1.bf16.msra.mxu1 %v12153_v11  ;;  %v9663_v11 = vld [vmem:[%s17814_s3 + $0x1b0] sm:$0xff]  ;;  %v9668_v44 = vld [vmem:[%s17814_s3 + $0x1d8] sm:$0xff] }
0x2c54   :  { %12155 = vmatprep.subr.bf16.mxu1 %v17871_v45  ;;  %v12182_v7 = vpack.c.bf16 %v9663_v11, %v9661_v1 }
0x2c55   :  { %v12156_v61 = vpack.c.bf16 %v8497_v28, %v8496_v52  ;;  %v11478_v19 = vpop.f32.mrb[204].mxu0  ;;  %v9666_v28 = vld [vmem:[%s17814_s3 + $0x1c8] sm:$0xff] }
0x2c56   :  { %v8499_v22 = vmul.f32 %v17277_v62, %v11478_v19  ;;  %v8465_v0 = vpop.f32.mrb[205].mxu0  ;;  %v12184_v52 = vpack.c.bf16 %v9668_v44, %v9666_v28  ;;  %v9667_v19 = vld [vmem:[%s17814_s3 + $0x1d0] sm:$0xff] }
0x2c57   :  { %v8498_v20 = vmul.f32 %v17269_v9, %v8465_v0  ;;  %12157 = vmatpush1.bf16.msra.mxu1 %v12156_v61  ;;  %v9665_v61 = vld [vmem:[%s17814_s3 + $0x1c0] sm:$0xff]  ;;  %v9670_v0 = vld [vmem:[%s17814_s3 + $0x1e8] sm:$0xff] }
0x2c58   :  { %12158 = vmatprep.subr.bf16.mxu1 %v17871_v45 }
0x2c59   :  { %v12159_v33 = vpack.c.bf16 %v8499_v22, %v8498_v20  ;;  %v11481_v2 = vpop.f32.mrb[206].mxu0  ;;  %v12186_v22 = vpack.c.bf16 %v9667_v19, %v9665_v61  ;;  %v9672_v20 = vld [vmem:[%s17814_s3 + $0x1f8] sm:$0xff] }
0x2c5a   :  { %v8501_v30 = vmul.f32 %v17292_v34, %v11481_v2  ;;  %v8475_v25 = vpop.f32.mrb[207].mxu0  ;;  %v9669_v2 = vld [vmem:[%s17814_s3 + $0x1e0] sm:$0xff]  ;;  %v9794_v61 = vld [vmem:[%s17813_s5 + $0x19] ss:$0 sm:$0xff] }
0x2c5b   :  { %v8500_v47 = vmul.f32 %v17283_v39, %v8475_v25  ;;  %12160 = vmatpush1.bf16.msra.mxu1 %v12159_v33  ;;  %v12188_v33 = vpack.c.bf16 %v9672_v20, %v9670_v0 }
0x2c5c   :  { %12161 = vmatprep.subr.bf16.mxu1 %v17871_v45 }
0x2c5d   :  { %v12162_v8 = vpack.c.bf16 %v8501_v30, %v8500_v47  ;;  %v9671_v30 = vld [vmem:[%s17814_s3 + $0x1f0] sm:$0xff]  ;;  %v9689_v47 = vld [vmem:[%s17815_s4 + $0x380] sm:$0xff] }
0x2c5e   :  { %v12190_v25 = vpack.c.bf16 %v9671_v30, %v9669_v2 }
0x2c5f   :  { %12163 = vmatpush1.bf16.msra.mxu1 %v12162_v8  ;;  %v9690_v8 = vld [vmem:[%s17815_s4 + $0x388] sm:$0xff] }
0x2c60   :  { %12177 = vmatprep.subr.bf16.mxu1 %v12176_v24  ;;  %v9702_v24 = vld [vmem:[%s17815_s4 + $0x3e8] sm:$0xff] }
0x2c61   :  { %v12216_v38 = vpack.c.bf16 %v9702_v24, %v9701_v5 }
0x2c62   :  { %8567 = vmatmul.mubr.f32.vlgmr.msra.gmra.mrb[220].mxu1 %v15439_v59 }
0x2c63   :  { %9788 = vmatprep.mubr.msk.f32.mxu1 %vm4403_vm10, %v15447_v29  ;;  %12179 = vmatpush1.bf16.msra.mxu1 %v12178_v27 }
0x2c64   :  { %12181 = vmatprep.subr.bf16.mxu1 %v12180_v37 }
0x2c66   :  { %8572 = vmatmul.mubr.f32.gmra.mrb[222].mxu1 %v15455_v51 }
0x2c67   :  { %9789 = vmatprep.mubr.msk.f32.mxu1 %vm4403_vm10, %v15433_v4  ;;  %12183 = vmatpush1.bf16.msra.mxu1 %v12182_v7 }
0x2c68   :  { %12185 = vmatprep.subr.bf16.mxu1 %v12184_v52 }
0x2c6a   :  { %8577 = vmatmul.mubr.f32.gmra.mrb[224].mxu1 %v15441_v23  ;;  %v9790_v23 = vld [vmem:[%s17813_s5 + $0x18] ss:$0 sm:$0xff] }
0x2c6b   :  { %8812 = vmatprep.mubr.f32.mxu1 %v17872_v32  ;;  %12187 = vmatpush1.bf16.msra.mxu1 %v12186_v22  ;;  %v9795_v22 = vld [vmem:[%s17813_s5 + $0x1a] ss:$0 sm:$0xff] }
0x2c6c   :  { %12189 = vmatprep.subr.bf16.mxu1 %v12188_v33 }
0x2c6f   :  { %12191 = vmatpush1.bf16.msra.mxu1 %v12190_v25 }
0x2c70   :  { %12224 = vmatprep.subr.bf16.mxu1 %v17871_v45  ;;  %v9691_v45 = vld [vmem:[%s17815_s4 + $0x390] sm:$0xff] }
0x2d35   :  { %v8568_v9 = vpop.f32.mrb[220].mxu1 }
0x2d36   :  { %v8570_v62 = vpop.f32.mrb[221].mxu1  ;;  %11499 = vmatmul.mubr.msk.f32.vlgmr.msra.gmra.mrb[208].mxu0 %vm172_vm1, %v8568_v9  ;;  %v9673_v9 = vld [vmem:[%s17815_s4 + $0x300] sm:$0xff] }
0x2d37   :  { %11501 = vmatprep.mubr.msk.f32.mxu0 %vm12830_vm0, %v17872_v32  ;;  %v12192_v62 = vpack.c.bf16 %v9690_v8, %v9689_v47 }
0x2d39   :  { %v8573_v59 = vpop.f32.mrb[222].mxu1  ;;  %12193 = vmatprep.subr.bf16.mxu0 %v12192_v62  ;;  %v9686_v62 = vld [vmem:[%s17815_s4 + $0x368] sm:$0xff] }
0x2d3a   :  { %v8575_v39 = vpop.f32.mrb[223].mxu1  ;;  %11502 = vmatmul.mubr.msk.f32.gmra.mrb[210].mxu0 %vm172_vm1, %v8573_v59  ;;  %v9674_v59 = vld [vmem:[%s17815_s4 + $0x308] sm:$0xff] }
0x2d3b   :  { %11504 = vmatprep.mubr.msk.f32.mxu0 %vm12830_vm0, %v17872_v32  ;;  %v9692_v39 = vld [vmem:[%s17815_s4 + $0x398] sm:$0xff] }
0x2d3d   :  { %v8578_v29 = vpop.f32.mrb[224].mxu1 }
0x2d3e   :  { %11505 = vmatmul.mubr.msk.f32.gmra.mrb[212].mxu0 %vm172_vm1, %v8578_v29  ;;  %v8580_v4 = vpop.f32.mrb[225].mxu1  ;;  %v12194_v29 = vpack.c.bf16 %v9674_v59, %v9673_v9  ;;  %v9703_v59 = vld [vmem:[%s17815_s4 + $0x3f0] sm:$0xff] }
0x2d3f   :  { %v12196_v4 = vpack.c.bf16 %v9692_v39, %v9691_v45  ;;  %v9704_v45 = vld [vmem:[%s17815_s4 + $0x3f8] sm:$0xff] }
0x2d40   :  { %12195 = vmatpush3.bf16.msra.mxu0 %v12194_v29  ;;  %v12220_v39 = vpack.c.bf16 %v9704_v45, %v9703_v59  ;;  %v9687_v29 = vld [vmem:[%s17815_s4 + $0x370] sm:$0xff] }
0x2d41   :  { %12197 = vmatprep.subr.bf16.mxu0 %v12196_v4  ;;  %v9688_v4 = vld [vmem:[%s17815_s4 + $0x378] sm:$0xff] }
0x2e09   :  { %v8661_v51 = vpop.f32.mrb[208].mxu0 }
0x2e0a   :  { %v8662_v34 = vadd.f32 %v9790_v23, %v8661_v51  ;;  %v11500_v35 = vpop.f32.mrb[209].mxu0  ;;  %v9676_v51 = vld [vmem:[%s17815_s4 + $0x318] sm:$0xff] }
0x2e0b   :  { %v9694_v35 = vld [vmem:[%s17815_s4 + $0x3a8] sm:$0xff] }
0x2e0c   :  { %v8675_v40 = vsel %vm172_vm1, %v8662_v34, 0.0 }
0x2e0d   :  { %8676 = vadd.xlane.f32.xlu0 %v8675_v40  ;;  %v8666_v36 = vpop.f32.mrb[210].mxu0 }
0x2e0e   :  { %v8667_v58 = vadd.f32 %v9790_v23, %v8666_v36  ;;  %v11503_v18 = vpop.f32.mrb[211].mxu0 }
0x2e0f   :  { %v9678_v18 = vld [vmem:[%s17815_s4 + $0x328] sm:$0xff] }
0x2e10   :  { %v8678_v50 = vsel %vm172_vm1, %v8667_v58, 0.0 }
0x2e11   :  { %8679 = vadd.xlane.f32.xlu1 %v8678_v50  ;;  %v8671_v43 = vpop.f32.mrb[212].mxu0  ;;  %v9695_v50 = vld [vmem:[%s17815_s4 + $0x3b0] sm:$0xff] }
0x2e12   :  { %v8672_v42 = vadd.f32 %v9790_v23, %v8671_v43  ;;  %v11506_v55 = vpop.f32.mrb[213].mxu0  ;;  %v9675_v23 = vld [vmem:[%s17815_s4 + $0x310] sm:$0xff]  ;;  %v9696_v43 = vld [vmem:[%s17815_s4 + $0x3b8] sm:$0xff] }
0x2e13   :  { %v12198_v40 = vpack.c.bf16 %v9676_v51, %v9675_v23  ;;  %v12204_v55 = vpack.c.bf16 %v9696_v43, %v9695_v50  ;;  %v12222_v23 = vpack.c.bf16 %v9688_v4, %v9687_v29  ;;  %v9705_v51 = vld [vmem:[%s17816_s6 + $0x3] ss:$4 sm:$0x3] }
0x2e14   :  { %v8681_v48 = vsel %vm4592_vm11, %v8672_v42, 0.0 }
0x2e15   :  { %8682 = vadd.xlane.f32.xlu0 %v8681_v48  ;;  %12199 = vmatpush3.bf16.msra.mxu0 %v12198_v40  ;;  %v9679_v48 = vld [vmem:[%s17815_s4 + $0x330] sm:$0xff] }
0x2e9a   :  { %v8677_v54 = vpop.xlane.xlu0 %8676 }
0x2e9b   :  { %v8684_v46 = vmul.f32 0.015625, %v8677_v54  ;;  %v9680_v54 = vld [vmem:[%s17815_s4 + $0x338] sm:$0xff] }
0x2e9d   :  { %v17592_v26 = vsub.f32 %v8662_v34, %v8684_v46  ;;  %v9693_v34 = vld [vmem:[%s17815_s4 + $0x3a0] sm:$0xff] }
0x2e9e   :  { %v8680_v6 = vpop.xlane.xlu1 %8679  ;;  %v12200_v36 = vpack.c.bf16 %v9694_v35, %v9693_v34  ;;  %v9697_v46 = vld [vmem:[%s17815_s4 + $0x3c0] sm:$0xff]  ;;  %v8732_v34 = vrot.slane %v9705_v51, %v13864_v21  ;;  %v8736_v35 = vrot.slane %v9705_v51, %v13869_v63 }
0x2e9f   :  { %v8685_v14 = vmul.f32 0.015625, %v8680_v6  ;;  %v8690_v3 = vmul.f32 %v17592_v26, %v17592_v26  ;;  %v9698_v6 = vld [vmem:[%s17815_s4 + $0x3c8] sm:$0xff] }
0x2ea0   :  { %12201 = vmatprep.subr.bf16.mxu0 %v12200_v36 }
0x2ea1   :  { %v17596_v13 = vsub.f32 %v8667_v58, %v8685_v14  ;;  %v8693_v57 = vsel %vm172_vm1, %v8690_v3, 0.0  ;;  %v9677_v58 = vld [vmem:[%s17815_s4 + $0x320] sm:$0xff]  ;;  %v12206_v14 = vpack.c.bf16 %v9680_v54, %v9679_v48  ;;  %v12208_v3 = vpack.c.bf16 %v9698_v6, %v9697_v46 }
0x2ea2   :  { %8694 = vadd.xlane.f32.xlu1 %v8693_v57  ;;  %v8683_v16 = vpop.xlane.xlu0 %8682  ;;  %v9681_v57 = vld [vmem:[%s17815_s4 + $0x340] sm:$0xff] }
0x2ea3   :  { %v8686_v53 = vmul.f32 0.015625, %v8683_v16  ;;  %v8691_v56 = vmul.f32 %v17596_v13, %v17596_v13  ;;  %v9682_v16 = vld [vmem:[%s17815_s4 + $0x348] sm:$0xff] }
0x2ea5   :  { %v17601_v60 = vsub.f32 %v8672_v42, %v8686_v53  ;;  %v8696_v49 = vsel %vm172_vm1, %v8691_v56, 0.0  ;;  %v12202_v42 = vpack.c.bf16 %v9678_v18, %v9677_v58  ;;  %v9699_v53 = vld [vmem:[%s17815_s4 + $0x3d0] sm:$0xff]  ;;  %v9700_v56 = vld [vmem:[%s17815_s4 + $0x3d8] sm:$0xff] }
0x2ea6   :  { %8697 = vadd.xlane.f32.xlu0 %v8696_v49  ;;  %v12210_v49 = vpack.c.bf16 %v9682_v16, %v9681_v57 }
0x2ea7   :  { %v8692_v31 = vmul.f32 %v17601_v60, %v17601_v60  ;;  %12203 = vmatpush3.bf16.msra.mxu0 %v12202_v42 }
0x2ea8   :  { %12205 = vmatprep.subr.bf16.mxu0 %v12204_v55 }
0x2ea9   :  { %v8699_v12 = vsel %vm4592_vm11, %v8692_v31, 0.0  ;;  %v12212_v31 = vpack.c.bf16 %v9700_v56, %v9699_v53  ;;  %v9799_v56 = vld [vmem:[%s17813_s5 + $0x1b] ss:$0 sm:$0xff] }
0x2eaa   :  { %8700 = vadd.xlane.f32.xlu1 %v8699_v12  ;;  %v9683_v12 = vld [vmem:[%s17815_s4 + $0x350] sm:$0xff] }
0x2eab   :  { %12207 = vmatpush3.bf16.msra.mxu0 %v12206_v14  ;;  %v12214_v17 = vpack.c.bf16 %v9684_v41, %v9683_v12 }
0x2eac   :  { %12209 = vmatprep.subr.bf16.mxu0 %v12208_v3 }
0x2eaf   :  { %12211 = vmatpush3.bf16.msra.mxu0 %v12210_v49 }
0x2eb0   :  { %12213 = vmatprep.subr.bf16.mxu0 %v12212_v31 }
0x2eb3   :  { %12215 = vmatpush3.bf16.msra.mxu0 %v12214_v17 }
0x2eb4   :  { %12217 = vmatprep.subr.bf16.mxu0 %v12216_v38 }
0x2f2f   :  { %v8695_v27 = vpop.xlane.xlu1 %8694 }
0x2f30   :  { %v8702_v10 = vmul.f32 0.015625, %v8695_v27 }
0x2f32   :  { %v8705_v15 = vadd.f32 1e-05, %v8702_v10 }
0x2f33   :  { %v8698_v37 = vpop.xlane.xlu0 %8697 }
0x2f34   :  { %12726 = vrsqrt.f32 %v8705_v15  ;;  %v8703_v1 = vmul.f32 0.015625, %v8698_v37 }
0x2f36   :  { %v8706_v11 = vadd.f32 1e-05, %v8703_v1 }
0x2f37   :  { %v8701_v7 = vpop.xlane.xlu1 %8700 }
0x2f38   :  { %12728 = vrsqrt.f32 %v8706_v11  ;;  %v8704_v28 = vmul.f32 0.015625, %v8701_v7 }
0x2f3a   :  { %v8707_v44 = vadd.f32 1e-05, %v8704_v28 }
0x2f3c   :  { %12730 = vrsqrt.f32 %v8707_v44 }
0x2f3e   :  { %v12727_v52 = vpop.eup %12726 }
0x2f3f   :  { %v8711_v19 = vmul.f32 %v12727_v52, %v17592_v26 }
0x2f41   :  { %v8718_v0 = vmul.f32 %v9794_v61, %v8711_v19 }
0x2f42   :  { %v12729_v20 = vpop.eup %12728 }
0x2f43   :  { %v8725_v33 = vadd.f32 %v9795_v22, %v8718_v0  ;;  %v8712_v2 = vmul.f32 %v12729_v20, %v17596_v13  ;;  %v9685_v13 = vld [vmem:[%s17815_s4 + $0x360] sm:$0xff] }
0x2f45   :  { %9796 = vmatmul.mubr.msk.f32.vlgmr.msra.gmra.mrb[226].mxu1 %vm172_vm1, %v8725_v33  ;;  %v8719_v30 = vmul.f32 %v9794_v61, %v8712_v2 }
0x2f46   :  { %v12731_v25 = vpop.eup %12730  ;;  %8818 = vmatprep.mubr.f32.mxu1 %v17872_v32 }
0x2f47   :  { %v8726_v47 = vadd.f32 %v9795_v22, %v8719_v30  ;;  %v8713_v8 = vmul.f32 %v12731_v25, %v17601_v60  ;;  %v12218_v60 = vpack.c.bf16 %v9686_v62, %v9685_v13 }
0x2f49   :  { %9797 = vmatmul.mubr.msk.f32.gmra.mrb[228].mxu1 %vm172_vm1, %v8726_v47  ;;  %v8720_v26 = vmul.f32 %v9794_v61, %v8713_v8  ;;  %12219 = vmatpush3.bf16.msra.mxu0 %v12218_v60 }
0x2f4a   :  { %8824 = vmatprep.mubr.f32.mxu1 %v17872_v32  ;;  %12221 = vmatprep.subr.bf16.mxu0 %v12220_v39 }
0x2f4b   :  { %v8727_v9 = vadd.f32 %v9795_v22, %v8720_v26 }
0x2f4d   :  { %9798 = vmatmul.mubr.msk.f32.gmra.mrb[230].mxu1 %vm172_vm1, %v8727_v9  ;;  %12223 = vmatpush3.bf16.msra.mxu0 %v12222_v23 }
0x2f4e   :  { %11513 = vmatprep.mubr.msk.f32.mxu1 %vm12830_vm0, %v17872_v32 }
0x3018   :  { %v8814_v40 = vpop.f32.mrb[226].mxu1 }
0x3019   :  { %v8815_v36 = vadd.f32 %v8814_v40, %v8732_v34  ;;  %v8816_v58 = vpop.f32.mrb[227].mxu1 }
0x301a   :  { %v8817_v18 = vadd.f32 %v8816_v58, %v8736_v35 }
0x301b   :  { %v8831_v42 = vmax.f32 %v8815_v36, 0.0  ;;  %v9801_v36 = vld [vmem:[%s17813_s5 + $0x1d] ss:$0 sm:$0xff] }
0x301c   :  { %v8832_v50 = vmax.f32 %v8817_v18, 0.0  ;;  %v8820_v43 = vpop.f32.mrb[228].mxu1 }
0x301d   :  { %v8821_v55 = vadd.f32 %v8820_v43, %v8732_v34  ;;  %v8822_v48 = vpop.f32.mrb[229].mxu1 }
0x301e   :  { %v8823_v54 = vadd.f32 %v8822_v48, %v8736_v35  ;;  %8905 = vmatprep.mubr.f32.mxu0 %v8832_v50  ;;  %v9802_v50 = vld [vmem:[%s17811_s7 + $0x130] ss:$0 sm:$0xff] }
0x301f   :  { %8906 = vmatmul.mubr.f32.vlgmr.msra.gmra.mrb[214].mxu0 %v8831_v42  ;;  %v8833_v14 = vmax.f32 %v8821_v55, 0.0 }
0x3020   :  { %v8834_v46 = vmax.f32 %v8823_v54, 0.0  ;;  %v8826_v6 = vpop.f32.mrb[230].mxu1 }
0x3021   :  { %v8827_v3 = vadd.f32 %v8826_v6, %v8732_v34  ;;  %v8828_v57 = vpop.f32.mrb[231].mxu1 }
0x3022   :  { %v8829_v21 = vadd.f32 %v8828_v57, %v8736_v35  ;;  %8910 = vmatprep.mubr.f32.mxu0 %v8834_v46  ;;  %v9800_v35 = vld [vmem:[%s17813_s5 + $0x1c] ss:$0 sm:$0xff] }
0x3023   :  { %8911 = vmatmul.mubr.f32.gmra.mrb[216].mxu0 %v8833_v14  ;;  %v8835_v16 = vmax.f32 %v8827_v3, 0.0 }
0x3024   :  { %v8836_v63 = vmax.f32 %v8829_v21, 0.0 }
0x3026   :  { %8915 = vmatprep.mubr.f32.mxu0 %v8836_v63 }
0x3027   :  { %8916 = vmatmul.mubr.f32.gmra.mrb[218].mxu0 %v8835_v16 }
0x30f2   :  { %v10486_v53 = vpop.f32.mrb[214].mxu0 }
0x30f3   :  { %v10487_v49 = vpop.f32.mrb[215].mxu0 }
0x30f4   :  { %v10488_v31 = vadd.f32 %v10487_v49, %v10486_v53 }
0x30f6   :  { %v8908_v12 = vadd.f32 %v10488_v31, %v9799_v56  ;;  %v10489_v41 = vpop.f32.mrb[216].mxu0 }
0x30f7   :  { %v10490_v5 = vpop.f32.mrb[217].mxu0 }
0x30f8   :  { %v10491_v24 = vadd.f32 %v10490_v5, %v10489_v41  ;;  %v8921_v17 = vadd.f32 %v8908_v12, %v8725_v33 }
0x30fa   :  { %v8913_v38 = vadd.f32 %v10491_v24, %v9799_v56  ;;  %v10492_v27 = vpop.f32.mrb[218].mxu0  ;;  %v8924_v10 = vsel %vm172_vm1, %v8921_v17, 0.0  ;;  %v8980_v24 = vld [vmem:[%s17812_s8 + $0x3c0] sm:$0xc0] }
0x30fb   :  { %v10493_v15 = vpop.f32.mrb[219].mxu0  ;;  %8925 = vadd.xlane.f32.xlu0 %v8924_v10  ;;  %v9804_v10 = vld [vmem:[%s17811_s7 + $0x132] ss:$0 sm:$0xff] }
0x30fc   :  { %v10494_v37 = vadd.f32 %v10493_v15, %v10492_v27  ;;  %v8922_v1 = vadd.f32 %v8913_v38, %v8726_v47  ;;  %v9009_v38 = vrot.slane %v8980_v24, 6 }
0x30fe   :  { %v8918_v11 = vadd.f32 %v10494_v37, %v9799_v56  ;;  %v8927_v7 = vsel %vm172_vm1, %v8922_v1, 0.0  ;;  %v9803_v56 = vld [vmem:[%s17811_s7 + $0x131] ss:$0 sm:$0xff] }
0x30ff   :  { %8928 = vadd.xlane.f32.xlu1 %v8927_v7 }
0x3100   :  { %v8923_v28 = vadd.f32 %v8918_v11, %v8727_v9 }
0x3102   :  { %v8930_v44 = vsel %vm4592_vm11, %v8923_v28, 0.0 }
0x3103   :  { %8931 = vadd.xlane.f32.xlu0 %v8930_v44 }
0x3188   :  { %v8926_v52 = vpop.xlane.xlu0 %8925 }
0x3189   :  { %v8933_v61 = vmul.f32 0.015625, %v8926_v52 }
0x318b   :  { %v8936_v19 = vsub.f32 %v8921_v17, %v8933_v61 }
0x318c   :  { %v8929_v22 = vpop.xlane.xlu1 %8928 }
0x318d   :  { %v8934_v0 = vmul.f32 0.015625, %v8929_v22  ;;  %v8939_v20 = vmul.f32 %v8936_v19, %v8936_v19 }
0x318f   :  { %v8937_v33 = vsub.f32 %v8922_v1, %v8934_v0  ;;  %v8942_v2 = vsel %vm172_vm1, %v8939_v20, 0.0 }
0x3190   :  { %8943 = vadd.xlane.f32.xlu1 %v8942_v2  ;;  %v8932_v30 = vpop.xlane.xlu0 %8931 }
0x3191   :  { %v8935_v25 = vmul.f32 0.015625, %v8932_v30  ;;  %v8940_v47 = vmul.f32 %v8937_v33, %v8937_v33 }
0x3193   :  { %v8938_v8 = vsub.f32 %v8923_v28, %v8935_v25  ;;  %v8945_v26 = vsel %vm172_vm1, %v8940_v47, 0.0 }
0x3194   :  { %8946 = vadd.xlane.f32.xlu0 %v8945_v26 }
0x3195   :  { %v8941_v9 = vmul.f32 %v8938_v8, %v8938_v8 }
0x3197   :  { %v8948_v13 = vsel %vm4592_vm11, %v8941_v9, 0.0 }
0x3198   :  { %8949 = vadd.xlane.f32.xlu1 %v8948_v13 }
0x321d   :  { %v8944_v62 = vpop.xlane.xlu1 %8943 }
0x321e   :  { %v8951_v60 = vmul.f32 0.015625, %v8944_v62 }
0x3220   :  { %v8954_v59 = vadd.f32 1e-05, %v8951_v60 }
0x3221   :  { %v8947_v45 = vpop.xlane.xlu0 %8946 }
0x3222   :  { %12732 = vrsqrt.f32 %v8954_v59  ;;  %v8952_v39 = vmul.f32 0.015625, %v8947_v45 }
0x3224   :  { %v8955_v29 = vadd.f32 1e-05, %v8952_v39 }
0x3225   :  { %v8950_v4 = vpop.xlane.xlu1 %8949 }
0x3226   :  { %12734 = vrsqrt.f32 %v8955_v29  ;;  %v8953_v23 = vmul.f32 0.015625, %v8950_v4 }
0x3228   :  { %v8956_v51 = vadd.f32 1e-05, %v8953_v23 }
0x322a   :  { %12736 = vrsqrt.f32 %v8956_v51 }
0x322c   :  { %v12733_v34 = vpop.eup %12732 }
0x322d   :  { %v8960_v40 = vmul.f32 %v12733_v34, %v8936_v19 }
0x322f   :  { %v8967_v58 = vmul.f32 %v9800_v35, %v8960_v40 }
0x3230   :  { %v12735_v18 = vpop.eup %12734 }
0x3231   :  { %v8974_v43 = vadd.f32 %v9801_v36, %v8967_v58  ;;  %v8961_v42 = vmul.f32 %v12735_v18, %v8937_v33 }
0x3233   :  { %v8985_v55 = vmul.f32 %v9802_v50, %v8974_v43  ;;  %v8968_v48 = vmul.f32 %v9800_v35, %v8961_v42 }
0x3234   :  { %v12737_v54 = vpop.eup %12736 }
0x3235   :  { %v8988_v46 = vsel %vm172_vm1, %v8985_v55, 0.0  ;;  %v8975_v6 = vadd.f32 %v9801_v36, %v8968_v48  ;;  %v8962_v14 = vmul.f32 %v12737_v54, %v8938_v8 }
0x3236   :  { %8989 = vadd.xlane.f32.xlu0 %v8988_v46 }
0x3237   :  { %v8986_v3 = vmul.f32 %v9802_v50, %v8975_v6  ;;  %v8969_v57 = vmul.f32 %v9800_v35, %v8962_v14 }
0x3239   :  { %v8991_v21 = vsel %vm172_vm1, %v8986_v3, 0.0  ;;  %v8976_v63 = vadd.f32 %v9801_v36, %v8969_v57 }
0x323a   :  { %8992 = vadd.xlane.f32.xlu1 %v8991_v21 }
0x323b   :  { %v8987_v16 = vmul.f32 %v9802_v50, %v8976_v63 }
0x323d   :  { %v8994_v53 = vsel %vm4592_vm11, %v8987_v16, 0.0 }
0x323e   :  { %8995 = vadd.xlane.f32.xlu0 %v8994_v53 }
0x32c3   :  { %v8990_v49 = vpop.xlane.xlu0 %8989 }
0x32c4   :  { %v9001_v12 = vadd.f32 %v9803_v56, %v8990_v49 }
0x32c7   :  { %v8993_v31 = vpop.xlane.xlu1 %8992 }
0x32c8   :  { %v9002_v41 = vadd.f32 %v9803_v56, %v8993_v31 }
0x32ca   :  { %v12225_v5 = vpack.c.bf16 %v9002_v41, %v9001_v12 }
0x32cb   :  { %v8996_v17 = vpop.xlane.xlu0 %8995 }
0x32cc   :  { %12226 = vmatpush3.bf16.msra.mxu1 %v12225_v5  ;;  %v9003_v27 = vadd.f32 %v9803_v56, %v8996_v17 }
0x32cd   :  { %11511 = vmatprep.subr.mxu1 %v17872_v32 }
0x32d0   :  { %11512 = vmatpush3.msk.msra.mxu1 %vm476_vm4, %v9003_v27 }
0x32d1   :  { %11514 = vmatmul.mubr.msk.f32.vlgmr.msra.gmra.mrb[232].mxu1 %vm3955_vm9, %v9009_v38 }
0x33a4   :  { %v9081_v15 = vpop.f32.mrb[232].mxu1 }
0x33a5   :  { %v9082_v37 = vadd.f32 %v9804_v10, %v9081_v15  ;;  %v11515_v1 = vpop.f32.mrb[233].mxu1 }
0x33a7   :  { %9086 = vst.msk [vmem:[%s17818_s9] sm:$0x3] %vm9085_vm12, %v9082_v37 }

</bundles_post_ra>
